<compile_context>
chip_gen: v5e
topology: v5e:2x2
jax: 0.10.0
libtpu: 0.0.40
codegen_flags: <defaults>
</compile_context>

<pallas_src>
import jax
import jax.numpy as jnp
from jax.experimental import pallas as pl
from jax.experimental.pallas import tpu as pltpu

# ---------------- configuration (scaled-down stand-in for 768-dim / 12-block ViT) -------
B = 2
C = 3
H = W = 16
PATCH = 8                        # cfg.STRIDE_SIZE == patch size
NUM_PATCHES = (H // PATCH) * (W // PATCH)
T = NUM_PATCHES + 1              # +1 cls token
D = 128                          # stands in for in_planes = 768
HEADS = 4
DH = D // HEADS
MLP = 4 * D
DEPTH = 4                        # stands in for 12 blocks
BLOCK_NUM = 3                    # cfg.BLOCK_NUM ; b1/b2 copy base.blocks[BLOCK_NUM:DEPTH]
NUM_CLASSES = 16
LN_EPS = 1e-6
BN_EPS = 1e-5
CPP = C * PATCH * PATCH
DOT_DT = jnp.bfloat16            # MXU operand dtype (accumulation stays f32)

# per-block parameter layout (leading axis = block index when stacked)
_BLOCK_KEYS = ("ln1_g", "ln1_b", "wq", "bq", "wk", "bk", "wv", "bv",
               "wo", "bo", "ln2_g", "ln2_b", "fc1_w", "fc1_b", "fc2_w", "fc2_b")
_BLOCK_SHAPES = {
    "ln1_g": (1, D), "ln1_b": (1, D),
    "wq": (HEADS, D, DH), "bq": (HEADS, 1, DH),
    "wk": (HEADS, D, DH), "bk": (HEADS, 1, DH),
    "wv": (HEADS, D, DH), "bv": (HEADS, 1, DH),
    "wo": (HEADS, DH, D), "bo": (1, D),
    "ln2_g": (1, D), "ln2_b": (1, D),
    "fc1_w": (D, MLP), "fc1_b": (1, MLP),
    "fc2_w": (MLP, D), "fc2_b": (1, D),
}


# =============================== Pallas kernels ==========================================
def _layernorm(x, g, b):
    mu = jnp.mean(x, axis=-1, keepdims=True)
    var = jnp.mean((x - mu) ** 2, axis=-1, keepdims=True)
    return (x - mu) * jax.lax.rsqrt(var + LN_EPS) * g + b


def _transformer_block(x, refs):
    """One pre-LN ViT block on a (T, D) f32 tile, entirely in VMEM / registers."""
    (ln1g, ln1b, wq, bq, wk, bk, wv, bv, wo, bo,
     ln2g, ln2b, fc1w, fc1b, fc2w, fc2b) = refs

    h = _layernorm(x, ln1g[...], ln1b[...])
    hb = h.astype(DOT_DT)
    scale = 1.0 / (DH ** 0.5)

    attn = bo[...]                                               # (1, D) -> broadcasts to (T, D)
    for hh in range(HEADS):                                      # static unroll over heads
        q = jnp.dot(hb, wq[hh], preferred_element_type=jnp.float32) + bq[hh]
        k = jnp.dot(hb, wk[hh], preferred_element_type=jnp.float32) + bk[hh]
        v = jnp.dot(hb, wv[hh], preferred_element_type=jnp.float32) + bv[hh]
        s = jnp.einsum("qd,kd->qk", q.astype(DOT_DT), k.astype(DOT_DT),
                       preferred_element_type=jnp.float32) * scale
        s = s - jnp.max(s, axis=-1, keepdims=True)
        p = jnp.exp(s)
        p = p * pl.reciprocal(jnp.sum(p, axis=-1, keepdims=True), approx=True)
        o_h = jnp.dot(p.astype(DOT_DT), v.astype(DOT_DT),
                      preferred_element_type=jnp.float32)        # (T, DH)
        # fold the head directly into the output projection (lane-dense (T, D) accumulate)
        attn = attn + jnp.dot(o_h.astype(DOT_DT), wo[hh],
                              preferred_element_type=jnp.float32)
    x = x + attn                                                 # residual 1

    h2 = _layernorm(x, ln2g[...], ln2b[...])
    f = (jnp.dot(h2.astype(DOT_DT), fc1w[...], preferred_element_type=jnp.float32)
         + fc1b[...])
    # TODO(synk): torch nn.GELU defaults to exact erf; tanh approximation used here.
    f = jax.nn.gelu(f, approximate=True)
    f = (jnp.dot(f.astype(DOT_DT), fc2w[...], preferred_element_type=jnp.float32)
         + fc2b[...])
    return x + f                                                 # residual 2


def _embed_blocks_kernel(xp_ref, pw_ref, pb_ref, clspos_ref, postok_ref, *rest):
    """Fused patch-embed + stacked transformer blocks for the base backbone.
    grid = (batch, n_blocks); the output tile (constant index over the block axis) is the
    VMEM-resident carry between blocks."""
    block_refs, o_ref = rest[:-1], rest[-1]

    @pl.when(pl.program_id(1) == 0)
    def _():
        tok = (jnp.dot(xp_ref[...].astype(DOT_DT), pw_ref[...],
                       preferred_element_type=jnp.float32)
               + pb_ref[...] + postok_ref[...])                  # (NUM_PATCHES, D)
        o_ref[...] = jnp.concatenate([clspos_ref[...], tok], axis=0)

    o_ref[...] = _transformer_block(o_ref[...], block_refs)


def _blocks_kernel(x_ref, *rest):
    """Stacked transformer blocks on pre-embedded tokens (b1 / b2 branches)."""
    block_refs, o_ref = rest[:-1], rest[-1]

    @pl.when(pl.program_id(1) == 0)
    def _():
        o_ref[...] = x_ref[...]

    o_ref[...] = _transformer_block(o_ref[...], block_refs)


def _head_eval_kernel(c1_ref, c2_ref, ln1g_ref, ln1b_ref, ln21g_ref, ln21b_ref,
                      bng_ref, bnb_ref, bnm_ref, bnv_ref, o_ref):
    """Fused eval head: LN (shared layer_norm1 over the 3 stacked b1 views, layer_norm21
    over the b2 view), 4x BatchNorm1d(eval), concat with the 0.5 scaling, L2-normalize."""
    f1 = _layernorm(c1_ref[...], ln1g_ref[...], ln1b_ref[...])   # (3, B, D)
    f2 = _layernorm(c2_ref[...], ln21g_ref[...], ln21b_ref[...])  # (B, D)

    def bn_eval(x, i):
        return ((x - bnm_ref[i:i + 1, :]) * jax.lax.rsqrt(bnv_ref[i:i + 1, :] + BN_EPS)
                * bng_ref[i:i + 1, :] + bnb_ref[i:i + 1, :])

    feats = [bn_eval(f1[0], 0), bn_eval(f1[1], 1) * 0.5,
             bn_eval(f1[2], 2) * 0.5, bn_eval(f2, 3)]
    # L2 norm over the (virtual) concatenation, then lane-aligned stores of each 128-slab.
    ssum = sum(jnp.sum(f * f, axis=1, keepdims=True) for f in feats)   # (B, 1)
    # TODO(synk): original Normalize has no eps; tiny eps added to avoid /0 hazard.
    inv = jax.lax.rsqrt(ssum + 1e-24)
    for i in range(4):
        o_ref[:, i * D:(i + 1) * D] = feats[i] * inv


def _head_train_kernel(c1_ref, c2_ref, ln1g_ref, ln1b_ref, ln21g_ref, ln21b_ref,
                       bng_ref, bnb_ref, wcls_ref,
                       cls_ref, f1_ref, f2_ref, feat_adv_ref):
    """Fused training head: LNs, 4x BatchNorm1d(train, batch stats), 4x bias-free
    classifiers (stacked weights)."""
    f1 = _layernorm(c1_ref[...], ln1g_ref[...], ln1b_ref[...])   # (3, B, D)
    f2 = _layernorm(c2_ref[...], ln21g_ref[...], ln21b_ref[...])  # (B, D)
    f1_ref[...] = f1
    f2_ref[...] = f2

    def bn_train(x, i):
        m = jnp.mean(x, axis=0, keepdims=True)
        v = jnp.mean((x - m) ** 2, axis=0, keepdims=True)        # biased var (PyTorch BN)
        return (x - m) * jax.lax.rsqrt(v + BN_EPS) * bng_ref[i:i + 1, :] + bnb_ref[i:i + 1, :]

    feats = [bn_train(f1[0], 0), bn_train(f1[1], 1), bn_train(f1[2], 2), bn_train(f2, 3)]
    feat_adv_ref[...] = feats[3]
    for i in range(4):
        cls_ref[i] = jnp.dot(feats[i].astype(DOT_DT), wcls_ref[i],
                             preferred_element_type=jnp.float32)


# =============================== wrappers ================================================
def _const_spec(shape):
    n = len(shape)
    return pl.BlockSpec(shape, lambda *_: (0,) * n)


def _block_weight_specs():
    specs = []
    for k in _BLOCK_KEYS:
        shape = _BLOCK_SHAPES[k]
        n = len(shape)
        specs.append(pl.BlockSpec((None,) + shape,
                                  lambda b, l, _n=n: (l,) + (0,) * _n))
    return specs


def run_base(bp, x):
    """Patch-embed + all base blocks, one pallas_call. x: (B, C, H, W) -> (B, T, D)."""
    Bx = x.shape[0]
    xp = (x.reshape(Bx, C, H // PATCH, PATCH, W // PATCH, PATCH)
            .transpose(0, 2, 4, 1, 3, 5)
            .reshape(Bx, NUM_PATCHES, CPP))
    blk = bp["blocks"]
    nb = blk["ln1_g"].shape[0]
    row_spec = pl.BlockSpec((None, T, D), lambda b, l: (b, 0, 0))

    def cspec(shape):
        n = len(shape)
        return pl.BlockSpec(shape, lambda b, l, _n=n: (0,) * _n)

    return pl.pallas_call(
        _embed_blocks_kernel,
        out_shape=jax.ShapeDtypeStruct((Bx, T, D), jnp.float32),
        grid=(Bx, nb),
        in_specs=[pl.BlockSpec((None, NUM_PATCHES, CPP), lambda b, l: (b, 0, 0)),
                  cspec((CPP, D)), cspec((1, D)),
                  cspec((1, D)), cspec((NUM_PATCHES, D))]
                 + _block_weight_specs(),
        out_specs=row_spec,
        compiler_params=pltpu.CompilerParams(
            dimension_semantics=("parallel", "arbitrary")),
    )(xp, bp["patch_w"], bp["patch_b"], bp["cls_pos"], bp["pos_tok"],
      *[blk[k] for k in _BLOCK_KEYS])


def run_blocks(sp, x):
    """Stacked transformer blocks (b1 / b2 branches). x: (N, T, D) -> (N, T, D)."""
    Bx = x.shape[0]
    nb = sp["ln1_g"].shape[0]
    row_spec = pl.BlockSpec((None, T, D), lambda b, l: (b, 0, 0))
    return pl.pallas_call(
        _blocks_kernel,
        out_shape=jax.ShapeDtypeStruct((Bx, T, D), jnp.float32),
        grid=(Bx, nb),
        in_specs=[row_spec] + _block_weight_specs(),
        out_specs=row_spec,
        compiler_params=pltpu.CompilerParams(
            dimension_semantics=("parallel", "arbitrary")),
    )(x, *[sp[k] for k in _BLOCK_KEYS])


def head_eval(p, cls_b1, cls_b2):
    Bx = cls_b2.shape[0]
    return pl.pallas_call(
        _head_eval_kernel,
        out_shape=jax.ShapeDtypeStruct((Bx, 4 * D), jnp.float32),
        grid=(1,),
        in_specs=[_const_spec((3, Bx, D)), _const_spec((Bx, D)),
                  _const_spec((1, D)), _const_spec((1, D)),
                  _const_spec((1, D)), _const_spec((1, D)),
                  _const_spec((4, D)), _const_spec((4, D)),
                  _const_spec((4, D)), _const_spec((4, D))],
        out_specs=_const_spec((Bx, 4 * D)),
    )(cls_b1, cls_b2, p["ln1_g"], p["ln1_b"], p["ln21_g"], p["ln21_b"],
      p["bn_g"], p["bn_b"], p["bn_m"], p["bn_v"])


def head_train(p, cls_b1, cls_b2):
    Bx = cls_b2.shape[0]
    return pl.pallas_call(
        _head_train_kernel,
        out_shape=(jax.ShapeDtypeStruct((4, Bx, NUM_CLASSES), jnp.float32),
                   jax.ShapeDtypeStruct((3, Bx, D), jnp.float32),
                   jax.ShapeDtypeStruct((Bx, D), jnp.float32),
                   jax.ShapeDtypeStruct((Bx, D), jnp.float32)),
        grid=(1,),
        in_specs=[_const_spec((3, Bx, D)), _const_spec((Bx, D)),
                  _const_spec((1, D)), _const_spec((1, D)),
                  _const_spec((1, D)), _const_spec((1, D)),
                  _const_spec((4, D)), _const_spec((4, D)),
                  _const_spec((4, D, NUM_CLASSES))],
        out_specs=(_const_spec((4, Bx, NUM_CLASSES)), _const_spec((3, Bx, D)),
                   _const_spec((Bx, D)), _const_spec((Bx, D))),
    )(cls_b1, cls_b2, p["ln1_g"], p["ln1_b"], p["ln21_g"], p["ln21_b"],
      p["bn_g"], p["bn_b"], p["cls_w"])


# =============================== model forward ===========================================
def forward(params, x, training=False):
    Bx = x.shape[0]
    x10 = run_base(params["base"], x)                         # (B, T, D)

    # jigsaw-style auxiliary views: cls token fixed, patch tokens rolled.
    def shift(t, k):
        return jnp.concatenate([t[:, :1], jnp.roll(t[:, 1:], k, axis=1)], axis=1)

    x10_1, x10_2 = shift(x10, 1), shift(x10, 2)
    # (x9 / x9_1 / x9_2 from the base are unused by the original forward; not materialized)

    # batch the three b1-branch passes (x10, x10_1, x10_2) into one 3B-batch pass
    xb1 = run_blocks(params["b1"], jnp.concatenate([x10, x10_1, x10_2], axis=0))
    cls_b1 = xb1[:, 0].reshape(3, Bx, D)                      # cls tokens of the 3 views

    xb2 = run_blocks(params["b2"], x10)
    cls_b2 = xb2[:, 0]                                        # (B, D)

    if training:
        cls_all, f_b1, f_b2, feat_adv = head_train(params, cls_b1, cls_b2)
        return (cls_all[0], cls_all[1], cls_all[2],
                f_b1[0], f_b1[1], f_b1[2],
                cls_all[3], f_b2, feat_adv)
    else:
        return head_eval(params, cls_b1, cls_b2)              # (B, 4D) L2-normalized


# =============================== parameter init ==========================================
def _nrm(key, shape, std, dtype=jnp.float32):
    return (std * jax.random.normal(key, shape, jnp.float32)).astype(dtype)


def init_block_params(key):
    ks = jax.random.split(key, 6)
    return dict(
        ln1_g=jnp.ones((1, D), jnp.float32), ln1_b=jnp.zeros((1, D), jnp.float32),
        # per-head attention weights (no in-kernel head slicing needed)
        wq=_nrm(ks[0], (HEADS, D, DH), 0.02, DOT_DT),
        wk=_nrm(ks[1], (HEADS, D, DH), 0.02, DOT_DT),
        wv=_nrm(ks[2], (HEADS, D, DH), 0.02, DOT_DT),
        bq=jnp.zeros((HEADS, 1, DH), jnp.float32),
        bk=jnp.zeros((HEADS, 1, DH), jnp.float32),
        bv=jnp.zeros((HEADS, 1, DH), jnp.float32),
        wo=_nrm(ks[3], (HEADS, DH, D), 0.02, DOT_DT),
        bo=jnp.zeros((1, D), jnp.float32),
        ln2_g=jnp.ones((1, D), jnp.float32), ln2_b=jnp.zeros((1, D), jnp.float32),
        fc1_w=_nrm(ks[4], (D, MLP), 0.02, DOT_DT), fc1_b=jnp.zeros((1, MLP), jnp.float32),
        fc2_w=_nrm(ks[5], (MLP, D), 0.02, DOT_DT), fc2_b=jnp.zeros((1, D), jnp.float32),
    )


def _stack_blocks(blocks):
    return {k: jnp.stack([blk[k] for blk in blocks], axis=0) for k in _BLOCK_KEYS}


def init_params(key):
    ks = jax.random.split(key, DEPTH + 8)
    all_blocks = [init_block_params(ks[i]) for i in range(DEPTH)]

    cls_tok = _nrm(ks[DEPTH + 1], (1, D), 0.02)
    pos = _nrm(ks[DEPTH + 2], (T, D), 0.02)
    base = dict(
        patch_w=_nrm(ks[DEPTH + 0], (CPP, D), 0.02, DOT_DT),
        patch_b=jnp.zeros((1, D), jnp.float32),
        cls_pos=cls_tok + pos[:1],          # cls token + its pos embed (input independent)
        pos_tok=pos[1:],                    # pos embed of the patch tokens
        blocks=_stack_blocks(all_blocks[:BLOCK_NUM]),
    )
    tail = _stack_blocks(all_blocks[BLOCK_NUM:DEPTH])   # copy.deepcopy(blocks[BLOCK_NUM:12])

    return dict(
        base=base,
        b1=dict(tail),
        b2=dict(tail),
        # layer_norm1 / layer_norm21 = deepcopy(base.norm) (default LN init)
        ln1_g=jnp.ones((1, D), jnp.float32), ln1_b=jnp.zeros((1, D), jnp.float32),
        ln21_g=jnp.ones((1, D), jnp.float32), ln21_b=jnp.zeros((1, D), jnp.float32),
        # BatchNorm1d x4 stacked in order [bottleneck, bottleneck1, bottleneck2, bottleneck21]
        # (weights_init_kaiming -> gamma=1, beta=0; default running stats)
        bn_g=jnp.ones((4, D), jnp.float32), bn_b=jnp.zeros((4, D), jnp.float32),
        bn_m=jnp.zeros((4, D), jnp.float32), bn_v=jnp.ones((4, D), jnp.float32),
        # classifiers x4 stacked: Linear(D, num_classes, bias=False), weight ~ N(0, 0.001)
        cls_w=_nrm(ks[DEPTH + 3], (4, D, NUM_CLASSES), 0.001, DOT_DT),
    )


# =============================== main ====================================================
if __name__ == "__main__":
    key = jax.random.PRNGKey(0)
    pkey, xkey = jax.random.split(key)
    params = init_params(pkey)
    x = jax.random.normal(xkey, (B, C, H, W), jnp.float32)

    fwd_eval = jax.jit(lambda p, xx: forward(p, xx, training=False))
    fwd_train = jax.jit(lambda p, xx: forward(p, xx, training=True))

    out_eval = fwd_eval(params, x)       # inference branch (L2-normalized concat)
    out_train = fwd_train(params, x)     # training branch (9-tuple)

    jax.block_until_ready(out_eval)
    jax.block_until_ready(out_train)

    assert out_eval.shape == (B, 4 * D)
    assert out_train[0].shape == (B, NUM_CLASSES)
    assert out_train[3].shape == (B, D)
    print("KERNEL_OK")
</pallas_src>

<mosaic_0001>
module attributes {stable_mosaic.version = 11 : i64} {
  func.func @_embed_blocks_kernel(%arg0: i32, %arg1: i32, %arg2: memref<1x4x192xf32, #tpu.memory_space<vmem>>, %arg3: memref<192x128xbf16, #tpu.memory_space<vmem>>, %arg4: memref<1x128xf32, #tpu.memory_space<vmem>>, %arg5: memref<1x128xf32, #tpu.memory_space<vmem>>, %arg6: memref<4x128xf32, #tpu.memory_space<vmem>>, %arg7: memref<1x1x128xf32, #tpu.memory_space<vmem>>, %arg8: memref<1x1x128xf32, #tpu.memory_space<vmem>>, %arg9: memref<1x4x128x32xbf16, #tpu.memory_space<vmem>>, %arg10: memref<1x4x1x32xf32, #tpu.memory_space<vmem>>, %arg11: memref<1x4x128x32xbf16, #tpu.memory_space<vmem>>, %arg12: memref<1x4x1x32xf32, #tpu.memory_space<vmem>>, %arg13: memref<1x4x128x32xbf16, #tpu.memory_space<vmem>>, %arg14: memref<1x4x1x32xf32, #tpu.memory_space<vmem>>, %arg15: memref<1x4x32x128xbf16, #tpu.memory_space<vmem>>, %arg16: memref<1x1x128xf32, #tpu.memory_space<vmem>>, %arg17: memref<1x1x128xf32, #tpu.memory_space<vmem>>, %arg18: memref<1x1x128xf32, #tpu.memory_space<vmem>>, %arg19: memref<1x128x512xbf16, #tpu.memory_space<vmem>>, %arg20: memref<1x1x512xf32, #tpu.memory_space<vmem>>, %arg21: memref<1x512x128xbf16, #tpu.memory_space<vmem>>, %arg22: memref<1x1x128xf32, #tpu.memory_space<vmem>>, %arg23: memref<1x5x128xf32, #tpu.memory_space<vmem>>) attributes {dimension_semantics = [#tpu.dimension_semantics<parallel>, #tpu.dimension_semantics<arbitrary>], iteration_bounds = array<i64: 2, 3>, scalar_prefetch = 0 : i64, scratch_operands = 0 : i64, tpu.core_type = #tpu.core_type<tc>, window_params = [{transform_indices = @transform_0, window_bounds = array<i64: 1, 4, 192>}, {pipeline_mode = #tpu.pipeline_mode<synchronous>, transform_indices = @transform_1, window_bounds = array<i64: 192, 128>}, {pipeline_mode = #tpu.pipeline_mode<synchronous>, transform_indices = @transform_2, window_bounds = array<i64: 1, 128>}, {pipeline_mode = #tpu.pipeline_mode<synchronous>, transform_indices = @transform_3, window_bounds = array<i64: 1, 128>}, {pipeline_mode = #tpu.pipeline_mode<synchronous>, transform_indices = @transform_4, window_bounds = array<i64: 4, 128>}, {transform_indices = @transform_5, window_bounds = array<i64: 1, 1, 128>}, {transform_indices = @transform_6, window_bounds = array<i64: 1, 1, 128>}, {transform_indices = @transform_7, window_bounds = array<i64: 1, 4, 128, 32>}, {transform_indices = @transform_8, window_bounds = array<i64: 1, 4, 1, 32>}, {transform_indices = @transform_9, window_bounds = array<i64: 1, 4, 128, 32>}, {transform_indices = @transform_10, window_bounds = array<i64: 1, 4, 1, 32>}, {transform_indices = @transform_11, window_bounds = array<i64: 1, 4, 128, 32>}, {transform_indices = @transform_12, window_bounds = array<i64: 1, 4, 1, 32>}, {transform_indices = @transform_13, window_bounds = array<i64: 1, 4, 32, 128>}, {transform_indices = @transform_14, window_bounds = array<i64: 1, 1, 128>}, {transform_indices = @transform_15, window_bounds = array<i64: 1, 1, 128>}, {transform_indices = @transform_16, window_bounds = array<i64: 1, 1, 128>}, {transform_indices = @transform_17, window_bounds = array<i64: 1, 128, 512>}, {transform_indices = @transform_18, window_bounds = array<i64: 1, 1, 512>}, {transform_indices = @transform_19, window_bounds = array<i64: 1, 512, 128>}, {transform_indices = @transform_20, window_bounds = array<i64: 1, 1, 128>}, {transform_indices = @transform_21, window_bounds = array<i64: 1, 5, 128>}]} {
    %c0_i32 = arith.constant 0 : i32
    %0 = arith.cmpi eq, %arg1, %c0_i32 : i32
    %1 = arith.extui %0 : i1 to i32
    %c0_i32_0 = arith.constant 0 : i32
    %2 = arith.cmpi ne, %1, %c0_i32_0 : i32
    scf.if %2 {
      %c0_193 = arith.constant 0 : index
      %c0_194 = arith.constant 0 : index
      %c0_195 = arith.constant 0 : index
      %271 = vector.load %arg2[%c0_193, %c0_194, %c0_195] : memref<1x4x192xf32, #tpu.memory_space<vmem>>, vector<1x4x192xf32>
      %272 = vector.shape_cast %271 : vector<1x4x192xf32> to vector<4x192xf32>
      %273 = arith.truncf %272 : vector<4x192xf32> to vector<4x192xbf16>
      %c0_196 = arith.constant 0 : index
      %c0_197 = arith.constant 0 : index
      %274 = vector.load %arg3[%c0_196, %c0_197] : memref<192x128xbf16, #tpu.memory_space<vmem>>, vector<192x128xbf16>
      %cst_198 = arith.constant dense<0.000000e+00> : vector<4x128xf32>
      %275 = tpu.matmul %273, %274, %cst_198 {dimension_numbers = #tpu.dot_dimension_numbers<[1], [0], [0], [1], [0, 0, 1, 1], [], []>} : vector<4x192xbf16>, vector<192x128xbf16>, vector<4x128xf32> -> vector<4x128xf32>
      %c0_199 = arith.constant 0 : index
      %c0_200 = arith.constant 0 : index
      %276 = vector.load %arg4[%c0_199, %c0_200] : memref<1x128xf32, #tpu.memory_space<vmem>>, vector<1x128xf32>
      %277 = vector.broadcast %276 : vector<1x128xf32> to vector<4x128xf32>
      %278 = arith.addf %275, %277 : vector<4x128xf32>
      %c0_201 = arith.constant 0 : index
      %c0_202 = arith.constant 0 : index
      %279 = vector.load %arg6[%c0_201, %c0_202] : memref<4x128xf32, #tpu.memory_space<vmem>>, vector<4x128xf32>
      %280 = arith.addf %278, %279 : vector<4x128xf32>
      %c0_203 = arith.constant 0 : index
      %c0_204 = arith.constant 0 : index
      %281 = vector.load %arg5[%c0_203, %c0_204] : memref<1x128xf32, #tpu.memory_space<vmem>>, vector<1x128xf32>
      %282 = tpu.concatenate %281, %280 in 0 : vector<1x128xf32>, vector<4x128xf32> -> vector<5x128xf32>
      %c0_205 = arith.constant 0 : index
      %c0_206 = arith.constant 0 : index
      %c0_207 = arith.constant 0 : index
      %283 = vector.load %arg23[%c0_205, %c0_206, %c0_207] : memref<1x5x128xf32, #tpu.memory_space<vmem>>, vector<1x5x128xf32>
      %284 = vector.shape_cast %283 : vector<1x5x128xf32> to vector<5x128xf32>
      %285 = vector.shape_cast %282 : vector<5x128xf32> to vector<1x5x128xf32>
      tpu.vector_store %arg23[%c0_205, %c0_206, %c0_207], %285 {strides = array<i32>} : memref<1x5x128xf32, #tpu.memory_space<vmem>>, vector<1x5x128xf32>,
    } else {
    }
    %c0 = arith.constant 0 : index
    %c0_1 = arith.constant 0 : index
    %c0_2 = arith.constant 0 : index
    %3 = vector.load %arg23[%c0, %c0_1, %c0_2] : memref<1x5x128xf32, #tpu.memory_space<vmem>>, vector<1x5x128xf32>
    %4 = vector.shape_cast %3 : vector<1x5x128xf32> to vector<5x128xf32>
    %c0_3 = arith.constant 0 : index
    %c0_4 = arith.constant 0 : index
    %c0_5 = arith.constant 0 : index
    %5 = vector.load %arg7[%c0_3, %c0_4, %c0_5] : memref<1x1x128xf32, #tpu.memory_space<vmem>>, vector<1x1x128xf32>
    %6 = vector.shape_cast %5 : vector<1x1x128xf32> to vector<1x128xf32>
    %c0_6 = arith.constant 0 : index
    %c0_7 = arith.constant 0 : index
    %c0_8 = arith.constant 0 : index
    %7 = vector.load %arg8[%c0_6, %c0_7, %c0_8] : memref<1x1x128xf32, #tpu.memory_space<vmem>>, vector<1x1x128xf32>
    %8 = vector.shape_cast %7 : vector<1x1x128xf32> to vector<1x128xf32>
    %cst = arith.constant dense<0.000000e+00> : vector<5xf32>
    %9 = vector.multi_reduction <add>, %4, %cst [1] : vector<5x128xf32> to vector<5xf32>
    %10 = vector.shape_cast %9 : vector<5xf32> to vector<5x1xf32>
    %cst_9 = arith.constant 1.280000e+02 : f32
    %11 = vector.broadcast %cst_9 : f32 to vector<5x1xf32>
    %12 = arith.divf %10, %11 : vector<5x1xf32>
    %13 = vector.broadcast %12 : vector<5x1xf32> to vector<5x128xf32>
    %14 = arith.subf %4, %13 : vector<5x128xf32>
    %15 = arith.mulf %14, %14 : vector<5x128xf32>
    %cst_10 = arith.constant dense<0.000000e+00> : vector<5xf32>
    %16 = vector.multi_reduction <add>, %15, %cst_10 [1] : vector<5x128xf32> to vector<5xf32>
    %17 = vector.shape_cast %16 : vector<5xf32> to vector<5x1xf32>
    %cst_11 = arith.constant 1.280000e+02 : f32
    %18 = vector.broadcast %cst_11 : f32 to vector<5x1xf32>
    %19 = arith.divf %17, %18 : vector<5x1xf32>
    %20 = vector.broadcast %12 : vector<5x1xf32> to vector<5x128xf32>
    %21 = arith.subf %4, %20 : vector<5x128xf32>
    %cst_12 = arith.constant 9.99999997E-7 : f32
    %22 = vector.broadcast %cst_12 : f32 to vector<5x1xf32>
    %23 = arith.addf %19, %22 : vector<5x1xf32>
    %24 = math.rsqrt %23 : vector<5x1xf32>
    %25 = vector.broadcast %24 : vector<5x1xf32> to vector<5x128xf32>
    %26 = arith.mulf %21, %25 : vector<5x128xf32>
    %27 = vector.broadcast %6 : vector<1x128xf32> to vector<5x128xf32>
    %28 = arith.mulf %26, %27 : vector<5x128xf32>
    %29 = vector.broadcast %8 : vector<1x128xf32> to vector<5x128xf32>
    %30 = arith.addf %28, %29 : vector<5x128xf32>
    %31 = arith.truncf %30 : vector<5x128xf32> to vector<5x128xbf16>
    %c0_13 = arith.constant 0 : index
    %c0_14 = arith.constant 0 : index
    %c0_15 = arith.constant 0 : index
    %32 = vector.load %arg16[%c0_13, %c0_14, %c0_15] : memref<1x1x128xf32, #tpu.memory_space<vmem>>, vector<1x1x128xf32>
    %33 = vector.shape_cast %32 : vector<1x1x128xf32> to vector<1x128xf32>
    %c0_16 = arith.constant 0 : index
    %c0_17 = arith.constant 0 : index
    %c0_18 = arith.constant 0 : index
    %c0_19 = arith.constant 0 : index
    %34 = vector.load %arg9[%c0_16, %c0_17, %c0_18, %c0_19] : memref<1x4x128x32xbf16, #tpu.memory_space<vmem>>, vector<1x1x128x32xbf16>
    %35 = vector.shape_cast %34 : vector<1x1x128x32xbf16> to vector<128x32xbf16>
    %cst_20 = arith.constant dense<0.000000e+00> : vector<5x32xf32>
    %36 = tpu.matmul %31, %35, %cst_20 {dimension_numbers = #tpu.dot_dimension_numbers<[1], [0], [0], [1], [0, 0, 1, 1], [], []>} : vector<5x128xbf16>, vector<128x32xbf16>, vector<5x32xf32> -> vector<5x32xf32>
    %c0_21 = arith.constant 0 : index
    %c0_22 = arith.constant 0 : index
    %c0_23 = arith.constant 0 : index
    %c0_24 = arith.constant 0 : index
    %37 = vector.load %arg10[%c0_21, %c0_22, %c0_23, %c0_24] : memref<1x4x1x32xf32, #tpu.memory_space<vmem>>, vector<1x1x1x32xf32>
    %38 = vector.shape_cast %37 : vector<1x1x1x32xf32> to vector<1x32xf32>
    %39 = vector.broadcast %38 : vector<1x32xf32> to vector<5x32xf32>
    %40 = arith.addf %36, %39 : vector<5x32xf32>
    %c0_25 = arith.constant 0 : index
    %c0_26 = arith.constant 0 : index
    %c0_27 = arith.constant 0 : index
    %c0_28 = arith.constant 0 : index
    %41 = vector.load %arg11[%c0_25, %c0_26, %c0_27, %c0_28] : memref<1x4x128x32xbf16, #tpu.memory_space<vmem>>, vector<1x1x128x32xbf16>
    %42 = vector.shape_cast %41 : vector<1x1x128x32xbf16> to vector<128x32xbf16>
    %cst_29 = arith.constant dense<0.000000e+00> : vector<5x32xf32>
    %43 = tpu.matmul %31, %42, %cst_29 {dimension_numbers = #tpu.dot_dimension_numbers<[1], [0], [0], [1], [0, 0, 1, 1], [], []>} : vector<5x128xbf16>, vector<128x32xbf16>, vector<5x32xf32> -> vector<5x32xf32>
    %c0_30 = arith.constant 0 : index
    %c0_31 = arith.constant 0 : index
    %c0_32 = arith.constant 0 : index
    %c0_33 = arith.constant 0 : index
    %44 = vector.load %arg12[%c0_30, %c0_31, %c0_32, %c0_33] : memref<1x4x1x32xf32, #tpu.memory_space<vmem>>, vector<1x1x1x32xf32>
    %45 = vector.shape_cast %44 : vector<1x1x1x32xf32> to vector<1x32xf32>
    %46 = vector.broadcast %45 : vector<1x32xf32> to vector<5x32xf32>
    %47 = arith.addf %43, %46 : vector<5x32xf32>
    %c0_34 = arith.constant 0 : index
    %c0_35 = arith.constant 0 : index
    %c0_36 = arith.constant 0 : index
    %c0_37 = arith.constant 0 : index
    %48 = vector.load %arg13[%c0_34, %c0_35, %c0_36, %c0_37] : memref<1x4x128x32xbf16, #tpu.memory_space<vmem>>, vector<1x1x128x32xbf16>
    %49 = vector.shape_cast %48 : vector<1x1x128x32xbf16> to vector<128x32xbf16>
    %cst_38 = arith.constant dense<0.000000e+00> : vector<5x32xf32>
    %50 = tpu.matmul %31, %49, %cst_38 {dimension_numbers = #tpu.dot_dimension_numbers<[1], [0], [0], [1], [0, 0, 1, 1], [], []>} : vector<5x128xbf16>, vector<128x32xbf16>, vector<5x32xf32> -> vector<5x32xf32>
    %c0_39 = arith.constant 0 : index
    %c0_40 = arith.constant 0 : index
    %c0_41 = arith.constant 0 : index
    %c0_42 = arith.constant 0 : index
    %51 = vector.load %arg14[%c0_39, %c0_40, %c0_41, %c0_42] : memref<1x4x1x32xf32, #tpu.memory_space<vmem>>, vector<1x1x1x32xf32>
    %52 = vector.shape_cast %51 : vector<1x1x1x32xf32> to vector<1x32xf32>
    %53 = vector.broadcast %52 : vector<1x32xf32> to vector<5x32xf32>
    %54 = arith.addf %50, %53 : vector<5x32xf32>
    %55 = arith.truncf %40 : vector<5x32xf32> to vector<5x32xbf16>
    %56 = arith.truncf %47 : vector<5x32xf32> to vector<5x32xbf16>
    "tpu.trace_start"() <{level = 10 : i32, message = "qd,kd->qk"}> : () -> ()
    %cst_43 = arith.constant dense<0.000000e+00> : vector<5x5xf32>
    %57 = tpu.matmul %55, %56, %cst_43 {dimension_numbers = #tpu.dot_dimension_numbers<[1], [1], [0], [0], [0, 0, 1, 0], [], []>} : vector<5x32xbf16>, vector<5x32xbf16>, vector<5x5xf32> -> vector<5x5xf32>
    "tpu.trace_stop"() : () -> ()
    %cst_44 = arith.constant 0.176776692 : f32
    %58 = vector.broadcast %cst_44 : f32 to vector<5x5xf32>
    %59 = arith.mulf %57, %58 : vector<5x5xf32>
    %cst_45 = arith.constant dense<0xFF800000> : vector<5xf32>
    %60 = vector.multi_reduction <maximumf>, %59, %cst_45 [1] : vector<5x5xf32> to vector<5xf32>
    %61 = vector.shape_cast %60 : vector<5xf32> to vector<5x1xf32>
    %62 = vector.broadcast %61 : vector<5x1xf32> to vector<5x5xf32>
    %63 = arith.subf %59, %62 : vector<5x5xf32>
    %64 = math.exp %63 : vector<5x5xf32>
    %cst_46 = arith.constant dense<0.000000e+00> : vector<5xf32>
    %65 = vector.multi_reduction <add>, %64, %cst_46 [1] : vector<5x5xf32> to vector<5xf32>
    %66 = vector.shape_cast %65 : vector<5xf32> to vector<5x1xf32>
    %67 = tpu.reciprocal %66 {approx = true} : vector<5x1xf32> -> vector<5x1xf32>
    %68 = vector.broadcast %67 : vector<5x1xf32> to vector<5x5xf32>
    %69 = arith.mulf %64, %68 : vector<5x5xf32>
    %70 = arith.truncf %69 : vector<5x5xf32> to vector<5x5xbf16>
    %71 = arith.truncf %54 : vector<5x32xf32> to vector<5x32xbf16>
    %cst_47 = arith.constant dense<0.000000e+00> : vector<5x32xf32>
    %72 = tpu.matmul %70, %71, %cst_47 {dimension_numbers = #tpu.dot_dimension_numbers<[1], [0], [0], [1], [0, 0, 1, 1], [], []>} : vector<5x5xbf16>, vector<5x32xbf16>, vector<5x32xf32> -> vector<5x32xf32>
    %73 = arith.truncf %72 : vector<5x32xf32> to vector<5x32xbf16>
    %c0_48 = arith.constant 0 : index
    %c0_49 = arith.constant 0 : index
    %c0_50 = arith.constant 0 : index
    %c0_51 = arith.constant 0 : index
    %74 = vector.load %arg15[%c0_48, %c0_49, %c0_50, %c0_51] : memref<1x4x32x128xbf16, #tpu.memory_space<vmem>>, vector<1x1x32x128xbf16>
    %75 = vector.shape_cast %74 : vector<1x1x32x128xbf16> to vector<32x128xbf16>
    %cst_52 = arith.constant dense<0.000000e+00> : vector<5x128xf32>
    %76 = tpu.matmul %73, %75, %cst_52 {dimension_numbers = #tpu.dot_dimension_numbers<[1], [0], [0], [1], [0, 0, 1, 1], [], []>} : vector<5x32xbf16>, vector<32x128xbf16>, vector<5x128xf32> -> vector<5x128xf32>
    %77 = vector.broadcast %33 : vector<1x128xf32> to vector<5x128xf32>
    %78 = arith.addf %77, %76 : vector<5x128xf32>
    %c0_53 = arith.constant 0 : index
    %c1 = arith.constant 1 : index
    %c0_54 = arith.constant 0 : index
    %c0_55 = arith.constant 0 : index
    %79 = vector.load %arg9[%c0_53, %c1, %c0_54, %c0_55] : memref<1x4x128x32xbf16, #tpu.memory_space<vmem>>, vector<1x1x128x32xbf16>
    %80 = vector.shape_cast %79 : vector<1x1x128x32xbf16> to vector<128x32xbf16>
    %cst_56 = arith.constant dense<0.000000e+00> : vector<5x32xf32>
    %81 = tpu.matmul %31, %80, %cst_56 {dimension_numbers = #tpu.dot_dimension_numbers<[1], [0], [0], [1], [0, 0, 1, 1], [], []>} : vector<5x128xbf16>, vector<128x32xbf16>, vector<5x32xf32> -> vector<5x32xf32>
    %c0_57 = arith.constant 0 : index
    %c1_58 = arith.constant 1 : index
    %c0_59 = arith.constant 0 : index
    %c0_60 = arith.constant 0 : index
    %82 = vector.load %arg10[%c0_57, %c1_58, %c0_59, %c0_60] : memref<1x4x1x32xf32, #tpu.memory_space<vmem>>, vector<1x1x1x32xf32>
    %83 = vector.shape_cast %82 : vector<1x1x1x32xf32> to vector<1x32xf32>
    %84 = vector.broadcast %83 : vector<1x32xf32> to vector<5x32xf32>
    %85 = arith.addf %81, %84 : vector<5x32xf32>
    %c0_61 = arith.constant 0 : index
    %c1_62 = arith.constant 1 : index
    %c0_63 = arith.constant 0 : index
    %c0_64 = arith.constant 0 : index
    %86 = vector.load %arg11[%c0_61, %c1_62, %c0_63, %c0_64] : memref<1x4x128x32xbf16, #tpu.memory_space<vmem>>, vector<1x1x128x32xbf16>
    %87 = vector.shape_cast %86 : vector<1x1x128x32xbf16> to vector<128x32xbf16>
    %cst_65 = arith.constant dense<0.000000e+00> : vector<5x32xf32>
    %88 = tpu.matmul %31, %87, %cst_65 {dimension_numbers = #tpu.dot_dimension_numbers<[1], [0], [0], [1], [0, 0, 1, 1], [], []>} : vector<5x128xbf16>, vector<128x32xbf16>, vector<5x32xf32> -> vector<5x32xf32>
    %c0_66 = arith.constant 0 : index
    %c1_67 = arith.constant 1 : index
    %c0_68 = arith.constant 0 : index
    %c0_69 = arith.constant 0 : index
    %89 = vector.load %arg12[%c0_66, %c1_67, %c0_68, %c0_69] : memref<1x4x1x32xf32, #tpu.memory_space<vmem>>, vector<1x1x1x32xf32>
    %90 = vector.shape_cast %89 : vector<1x1x1x32xf32> to vector<1x32xf32>
    %91 = vector.broadcast %90 : vector<1x32xf32> to vector<5x32xf32>
    %92 = arith.addf %88, %91 : vector<5x32xf32>
    %c0_70 = arith.constant 0 : index
    %c1_71 = arith.constant 1 : index
    %c0_72 = arith.constant 0 : index
    %c0_73 = arith.constant 0 : index
    %93 = vector.load %arg13[%c0_70, %c1_71, %c0_72, %c0_73] : memref<1x4x128x32xbf16, #tpu.memory_space<vmem>>, vector<1x1x128x32xbf16>
    %94 = vector.shape_cast %93 : vector<1x1x128x32xbf16> to vector<128x32xbf16>
    %cst_74 = arith.constant dense<0.000000e+00> : vector<5x32xf32>
    %95 = tpu.matmul %31, %94, %cst_74 {dimension_numbers = #tpu.dot_dimension_numbers<[1], [0], [0], [1], [0, 0, 1, 1], [], []>} : vector<5x128xbf16>, vector<128x32xbf16>, vector<5x32xf32> -> vector<5x32xf32>
    %c0_75 = arith.constant 0 : index
    %c1_76 = arith.constant 1 : index
    %c0_77 = arith.constant 0 : index
    %c0_78 = arith.constant 0 : index
    %96 = vector.load %arg14[%c0_75, %c1_76, %c0_77, %c0_78] : memref<1x4x1x32xf32, #tpu.memory_space<vmem>>, vector<1x1x1x32xf32>
    %97 = vector.shape_cast %96 : vector<1x1x1x32xf32> to vector<1x32xf32>
    %98 = vector.broadcast %97 : vector<1x32xf32> to vector<5x32xf32>
    %99 = arith.addf %95, %98 : vector<5x32xf32>
    %100 = arith.truncf %85 : vector<5x32xf32> to vector<5x32xbf16>
    %101 = arith.truncf %92 : vector<5x32xf32> to vector<5x32xbf16>
    "tpu.trace_start"() <{level = 10 : i32, message = "qd,kd->qk"}> : () -> ()
    %cst_79 = arith.constant dense<0.000000e+00> : vector<5x5xf32>
    %102 = tpu.matmul %100, %101, %cst_79 {dimension_numbers = #tpu.dot_dimension_numbers<[1], [1], [0], [0], [0, 0, 1, 0], [], []>} : vector<5x32xbf16>, vector<5x32xbf16>, vector<5x5xf32> -> vector<5x5xf32>
    "tpu.trace_stop"() : () -> ()
    %cst_80 = arith.constant 0.176776692 : f32
    %103 = vector.broadcast %cst_80 : f32 to vector<5x5xf32>
    %104 = arith.mulf %102, %103 : vector<5x5xf32>
    %cst_81 = arith.constant dense<0xFF800000> : vector<5xf32>
    %105 = vector.multi_reduction <maximumf>, %104, %cst_81 [1] : vector<5x5xf32> to vector<5xf32>
    %106 = vector.shape_cast %105 : vector<5xf32> to vector<5x1xf32>
    %107 = vector.broadcast %106 : vector<5x1xf32> to vector<5x5xf32>
    %108 = arith.subf %104, %107 : vector<5x5xf32>
    %109 = math.exp %108 : vector<5x5xf32>
    %cst_82 = arith.constant dense<0.000000e+00> : vector<5xf32>
    %110 = vector.multi_reduction <add>, %109, %cst_82 [1] : vector<5x5xf32> to vector<5xf32>
    %111 = vector.shape_cast %110 : vector<5xf32> to vector<5x1xf32>
    %112 = tpu.reciprocal %111 {approx = true} : vector<5x1xf32> -> vector<5x1xf32>
    %113 = vector.broadcast %112 : vector<5x1xf32> to vector<5x5xf32>
    %114 = arith.mulf %109, %113 : vector<5x5xf32>
    %115 = arith.truncf %114 : vector<5x5xf32> to vector<5x5xbf16>
    %116 = arith.truncf %99 : vector<5x32xf32> to vector<5x32xbf16>
    %cst_83 = arith.constant dense<0.000000e+00> : vector<5x32xf32>
    %117 = tpu.matmul %115, %116, %cst_83 {dimension_numbers = #tpu.dot_dimension_numbers<[1], [0], [0], [1], [0, 0, 1, 1], [], []>} : vector<5x5xbf16>, vector<5x32xbf16>, vector<5x32xf32> -> vector<5x32xf32>
    %118 = arith.truncf %117 : vector<5x32xf32> to vector<5x32xbf16>
    %c0_84 = arith.constant 0 : index
    %c1_85 = arith.constant 1 : index
    %c0_86 = arith.constant 0 : index
    %c0_87 = arith.constant 0 : index
    %119 = vector.load %arg15[%c0_84, %c1_85, %c0_86, %c0_87] : memref<1x4x32x128xbf16, #tpu.memory_space<vmem>>, vector<1x1x32x128xbf16>
    %120 = vector.shape_cast %119 : vector<1x1x32x128xbf16> to vector<32x128xbf16>
    %cst_88 = arith.constant dense<0.000000e+00> : vector<5x128xf32>
    %121 = tpu.matmul %118, %120, %cst_88 {dimension_numbers = #tpu.dot_dimension_numbers<[1], [0], [0], [1], [0, 0, 1, 1], [], []>} : vector<5x32xbf16>, vector<32x128xbf16>, vector<5x128xf32> -> vector<5x128xf32>
    %122 = arith.addf %78, %121 : vector<5x128xf32>
    %c0_89 = arith.constant 0 : index
    %c2 = arith.constant 2 : index
    %c0_90 = arith.constant 0 : index
    %c0_91 = arith.constant 0 : index
    %123 = vector.load %arg9[%c0_89, %c2, %c0_90, %c0_91] : memref<1x4x128x32xbf16, #tpu.memory_space<vmem>>, vector<1x1x128x32xbf16>
    %124 = vector.shape_cast %123 : vector<1x1x128x32xbf16> to vector<128x32xbf16>
    %cst_92 = arith.constant dense<0.000000e+00> : vector<5x32xf32>
    %125 = tpu.matmul %31, %124, %cst_92 {dimension_numbers = #tpu.dot_dimension_numbers<[1], [0], [0], [1], [0, 0, 1, 1], [], []>} : vector<5x128xbf16>, vector<128x32xbf16>, vector<5x32xf32> -> vector<5x32xf32>
    %c0_93 = arith.constant 0 : index
    %c2_94 = arith.constant 2 : index
    %c0_95 = arith.constant 0 : index
    %c0_96 = arith.constant 0 : index
    %126 = vector.load %arg10[%c0_93, %c2_94, %c0_95, %c0_96] : memref<1x4x1x32xf32, #tpu.memory_space<vmem>>, vector<1x1x1x32xf32>
    %127 = vector.shape_cast %126 : vector<1x1x1x32xf32> to vector<1x32xf32>
    %128 = vector.broadcast %127 : vector<1x32xf32> to vector<5x32xf32>
    %129 = arith.addf %125, %128 : vector<5x32xf32>
    %c0_97 = arith.constant 0 : index
    %c2_98 = arith.constant 2 : index
    %c0_99 = arith.constant 0 : index
    %c0_100 = arith.constant 0 : index
    %130 = vector.load %arg11[%c0_97, %c2_98, %c0_99, %c0_100] : memref<1x4x128x32xbf16, #tpu.memory_space<vmem>>, vector<1x1x128x32xbf16>
    %131 = vector.shape_cast %130 : vector<1x1x128x32xbf16> to vector<128x32xbf16>
    %cst_101 = arith.constant dense<0.000000e+00> : vector<5x32xf32>
    %132 = tpu.matmul %31, %131, %cst_101 {dimension_numbers = #tpu.dot_dimension_numbers<[1], [0], [0], [1], [0, 0, 1, 1], [], []>} : vector<5x128xbf16>, vector<128x32xbf16>, vector<5x32xf32> -> vector<5x32xf32>
    %c0_102 = arith.constant 0 : index
    %c2_103 = arith.constant 2 : index
    %c0_104 = arith.constant 0 : index
    %c0_105 = arith.constant 0 : index
    %133 = vector.load %arg12[%c0_102, %c2_103, %c0_104, %c0_105] : memref<1x4x1x32xf32, #tpu.memory_space<vmem>>, vector<1x1x1x32xf32>
    %134 = vector.shape_cast %133 : vector<1x1x1x32xf32> to vector<1x32xf32>
    %135 = vector.broadcast %134 : vector<1x32xf32> to vector<5x32xf32>
    %136 = arith.addf %132, %135 : vector<5x32xf32>
    %c0_106 = arith.constant 0 : index
    %c2_107 = arith.constant 2 : index
    %c0_108 = arith.constant 0 : index
    %c0_109 = arith.constant 0 : index
    %137 = vector.load %arg13[%c0_106, %c2_107, %c0_108, %c0_109] : memref<1x4x128x32xbf16, #tpu.memory_space<vmem>>, vector<1x1x128x32xbf16>
    %138 = vector.shape_cast %137 : vector<1x1x128x32xbf16> to vector<128x32xbf16>
    %cst_110 = arith.constant dense<0.000000e+00> : vector<5x32xf32>
    %139 = tpu.matmul %31, %138, %cst_110 {dimension_numbers = #tpu.dot_dimension_numbers<[1], [0], [0], [1], [0, 0, 1, 1], [], []>} : vector<5x128xbf16>, vector<128x32xbf16>, vector<5x32xf32> -> vector<5x32xf32>
    %c0_111 = arith.constant 0 : index
    %c2_112 = arith.constant 2 : index
    %c0_113 = arith.constant 0 : index
    %c0_114 = arith.constant 0 : index
    %140 = vector.load %arg14[%c0_111, %c2_112, %c0_113, %c0_114] : memref<1x4x1x32xf32, #tpu.memory_space<vmem>>, vector<1x1x1x32xf32>
    %141 = vector.shape_cast %140 : vector<1x1x1x32xf32> to vector<1x32xf32>
    %142 = vector.broadcast %141 : vector<1x32xf32> to vector<5x32xf32>
    %143 = arith.addf %139, %142 : vector<5x32xf32>
    %144 = arith.truncf %129 : vector<5x32xf32> to vector<5x32xbf16>
    %145 = arith.truncf %136 : vector<5x32xf32> to vector<5x32xbf16>
    "tpu.trace_start"() <{level = 10 : i32, message = "qd,kd->qk"}> : () -> ()
    %cst_115 = arith.constant dense<0.000000e+00> : vector<5x5xf32>
    %146 = tpu.matmul %144, %145, %cst_115 {dimension_numbers = #tpu.dot_dimension_numbers<[1], [1], [0], [0], [0, 0, 1, 0], [], []>} : vector<5x32xbf16>, vector<5x32xbf16>, vector<5x5xf32> -> vector<5x5xf32>
    "tpu.trace_stop"() : () -> ()
    %cst_116 = arith.constant 0.176776692 : f32
    %147 = vector.broadcast %cst_116 : f32 to vector<5x5xf32>
    %148 = arith.mulf %146, %147 : vector<5x5xf32>
    %cst_117 = arith.constant dense<0xFF800000> : vector<5xf32>
    %149 = vector.multi_reduction <maximumf>, %148, %cst_117 [1] : vector<5x5xf32> to vector<5xf32>
    %150 = vector.shape_cast %149 : vector<5xf32> to vector<5x1xf32>
    %151 = vector.broadcast %150 : vector<5x1xf32> to vector<5x5xf32>
    %152 = arith.subf %148, %151 : vector<5x5xf32>
    %153 = math.exp %152 : vector<5x5xf32>
    %cst_118 = arith.constant dense<0.000000e+00> : vector<5xf32>
    %154 = vector.multi_reduction <add>, %153, %cst_118 [1] : vector<5x5xf32> to vector<5xf32>
    %155 = vector.shape_cast %154 : vector<5xf32> to vector<5x1xf32>
    %156 = tpu.reciprocal %155 {approx = true} : vector<5x1xf32> -> vector<5x1xf32>
    %157 = vector.broadcast %156 : vector<5x1xf32> to vector<5x5xf32>
    %158 = arith.mulf %153, %157 : vector<5x5xf32>
    %159 = arith.truncf %158 : vector<5x5xf32> to vector<5x5xbf16>
    %160 = arith.truncf %143 : vector<5x32xf32> to vector<5x32xbf16>
    %cst_119 = arith.constant dense<0.000000e+00> : vector<5x32xf32>
    %161 = tpu.matmul %159, %160, %cst_119 {dimension_numbers = #tpu.dot_dimension_numbers<[1], [0], [0], [1], [0, 0, 1, 1], [], []>} : vector<5x5xbf16>, vector<5x32xbf16>, vector<5x32xf32> -> vector<5x32xf32>
    %162 = arith.truncf %161 : vector<5x32xf32> to vector<5x32xbf16>
    %c0_120 = arith.constant 0 : index
    %c2_121 = arith.constant 2 : index
    %c0_122 = arith.constant 0 : index
    %c0_123 = arith.constant 0 : index
    %163 = vector.load %arg15[%c0_120, %c2_121, %c0_122, %c0_123] : memref<1x4x32x128xbf16, #tpu.memory_space<vmem>>, vector<1x1x32x128xbf16>
    %164 = vector.shape_cast %163 : vector<1x1x32x128xbf16> to vector<32x128xbf16>
    %cst_124 = arith.constant dense<0.000000e+00> : vector<5x128xf32>
    %165 = tpu.matmul %162, %164, %cst_124 {dimension_numbers = #tpu.dot_dimension_numbers<[1], [0], [0], [1], [0, 0, 1, 1], [], []>} : vector<5x32xbf16>, vector<32x128xbf16>, vector<5x128xf32> -> vector<5x128xf32>
    %166 = arith.addf %122, %165 : vector<5x128xf32>
    %c0_125 = arith.constant 0 : index
    %c3 = arith.constant 3 : index
    %c0_126 = arith.constant 0 : index
    %c0_127 = arith.constant 0 : index
    %167 = vector.load %arg9[%c0_125, %c3, %c0_126, %c0_127] : memref<1x4x128x32xbf16, #tpu.memory_space<vmem>>, vector<1x1x128x32xbf16>
    %168 = vector.shape_cast %167 : vector<1x1x128x32xbf16> to vector<128x32xbf16>
    %cst_128 = arith.constant dense<0.000000e+00> : vector<5x32xf32>
    %169 = tpu.matmul %31, %168, %cst_128 {dimension_numbers = #tpu.dot_dimension_numbers<[1], [0], [0], [1], [0, 0, 1, 1], [], []>} : vector<5x128xbf16>, vector<128x32xbf16>, vector<5x32xf32> -> vector<5x32xf32>
    %c0_129 = arith.constant 0 : index
    %c3_130 = arith.constant 3 : index
    %c0_131 = arith.constant 0 : index
    %c0_132 = arith.constant 0 : index
    %170 = vector.load %arg10[%c0_129, %c3_130, %c0_131, %c0_132] : memref<1x4x1x32xf32, #tpu.memory_space<vmem>>, vector<1x1x1x32xf32>
    %171 = vector.shape_cast %170 : vector<1x1x1x32xf32> to vector<1x32xf32>
    %172 = vector.broadcast %171 : vector<1x32xf32> to vector<5x32xf32>
    %173 = arith.addf %169, %172 : vector<5x32xf32>
    %c0_133 = arith.constant 0 : index
    %c3_134 = arith.constant 3 : index
    %c0_135 = arith.constant 0 : index
    %c0_136 = arith.constant 0 : index
    %174 = vector.load %arg11[%c0_133, %c3_134, %c0_135, %c0_136] : memref<1x4x128x32xbf16, #tpu.memory_space<vmem>>, vector<1x1x128x32xbf16>
    %175 = vector.shape_cast %174 : vector<1x1x128x32xbf16> to vector<128x32xbf16>
    %cst_137 = arith.constant dense<0.000000e+00> : vector<5x32xf32>
    %176 = tpu.matmul %31, %175, %cst_137 {dimension_numbers = #tpu.dot_dimension_numbers<[1], [0], [0], [1], [0, 0, 1, 1], [], []>} : vector<5x128xbf16>, vector<128x32xbf16>, vector<5x32xf32> -> vector<5x32xf32>
    %c0_138 = arith.constant 0 : index
    %c3_139 = arith.constant 3 : index
    %c0_140 = arith.constant 0 : index
    %c0_141 = arith.constant 0 : index
    %177 = vector.load %arg12[%c0_138, %c3_139, %c0_140, %c0_141] : memref<1x4x1x32xf32, #tpu.memory_space<vmem>>, vector<1x1x1x32xf32>
    %178 = vector.shape_cast %177 : vector<1x1x1x32xf32> to vector<1x32xf32>
    %179 = vector.broadcast %178 : vector<1x32xf32> to vector<5x32xf32>
    %180 = arith.addf %176, %179 : vector<5x32xf32>
    %c0_142 = arith.constant 0 : index
    %c3_143 = arith.constant 3 : index
    %c0_144 = arith.constant 0 : index
    %c0_145 = arith.constant 0 : index
    %181 = vector.load %arg13[%c0_142, %c3_143, %c0_144, %c0_145] : memref<1x4x128x32xbf16, #tpu.memory_space<vmem>>, vector<1x1x128x32xbf16>
    %182 = vector.shape_cast %181 : vector<1x1x128x32xbf16> to vector<128x32xbf16>
    %cst_146 = arith.constant dense<0.000000e+00> : vector<5x32xf32>
    %183 = tpu.matmul %31, %182, %cst_146 {dimension_numbers = #tpu.dot_dimension_numbers<[1], [0], [0], [1], [0, 0, 1, 1], [], []>} : vector<5x128xbf16>, vector<128x32xbf16>, vector<5x32xf32> -> vector<5x32xf32>
    %c0_147 = arith.constant 0 : index
    %c3_148 = arith.constant 3 : index
    %c0_149 = arith.constant 0 : index
    %c0_150 = arith.constant 0 : index
    %184 = vector.load %arg14[%c0_147, %c3_148, %c0_149, %c0_150] : memref<1x4x1x32xf32, #tpu.memory_space<vmem>>, vector<1x1x1x32xf32>
    %185 = vector.shape_cast %184 : vector<1x1x1x32xf32> to vector<1x32xf32>
    %186 = vector.broadcast %185 : vector<1x32xf32> to vector<5x32xf32>
    %187 = arith.addf %183, %186 : vector<5x32xf32>
    %188 = arith.truncf %173 : vector<5x32xf32> to vector<5x32xbf16>
    %189 = arith.truncf %180 : vector<5x32xf32> to vector<5x32xbf16>
    "tpu.trace_start"() <{level = 10 : i32, message = "qd,kd->qk"}> : () -> ()
    %cst_151 = arith.constant dense<0.000000e+00> : vector<5x5xf32>
    %190 = tpu.matmul %188, %189, %cst_151 {dimension_numbers = #tpu.dot_dimension_numbers<[1], [1], [0], [0], [0, 0, 1, 0], [], []>} : vector<5x32xbf16>, vector<5x32xbf16>, vector<5x5xf32> -> vector<5x5xf32>
    "tpu.trace_stop"() : () -> ()
    %cst_152 = arith.constant 0.176776692 : f32
    %191 = vector.broadcast %cst_152 : f32 to vector<5x5xf32>
    %192 = arith.mulf %190, %191 : vector<5x5xf32>
    %cst_153 = arith.constant dense<0xFF800000> : vector<5xf32>
    %193 = vector.multi_reduction <maximumf>, %192, %cst_153 [1] : vector<5x5xf32> to vector<5xf32>
    %194 = vector.shape_cast %193 : vector<5xf32> to vector<5x1xf32>
    %195 = vector.broadcast %194 : vector<5x1xf32> to vector<5x5xf32>
    %196 = arith.subf %192, %195 : vector<5x5xf32>
    %197 = math.exp %196 : vector<5x5xf32>
    %cst_154 = arith.constant dense<0.000000e+00> : vector<5xf32>
    %198 = vector.multi_reduction <add>, %197, %cst_154 [1] : vector<5x5xf32> to vector<5xf32>
    %199 = vector.shape_cast %198 : vector<5xf32> to vector<5x1xf32>
    %200 = tpu.reciprocal %199 {approx = true} : vector<5x1xf32> -> vector<5x1xf32>
    %201 = vector.broadcast %200 : vector<5x1xf32> to vector<5x5xf32>
    %202 = arith.mulf %197, %201 : vector<5x5xf32>
    %203 = arith.truncf %202 : vector<5x5xf32> to vector<5x5xbf16>
    %204 = arith.truncf %187 : vector<5x32xf32> to vector<5x32xbf16>
    %cst_155 = arith.constant dense<0.000000e+00> : vector<5x32xf32>
    %205 = tpu.matmul %203, %204, %cst_155 {dimension_numbers = #tpu.dot_dimension_numbers<[1], [0], [0], [1], [0, 0, 1, 1], [], []>} : vector<5x5xbf16>, vector<5x32xbf16>, vector<5x32xf32> -> vector<5x32xf32>
    %206 = arith.truncf %205 : vector<5x32xf32> to vector<5x32xbf16>
    %c0_156 = arith.constant 0 : index
    %c3_157 = arith.constant 3 : index
    %c0_158 = arith.constant 0 : index
    %c0_159 = arith.constant 0 : index
    %207 = vector.load %arg15[%c0_156, %c3_157, %c0_158, %c0_159] : memref<1x4x32x128xbf16, #tpu.memory_space<vmem>>, vector<1x1x32x128xbf16>
    %208 = vector.shape_cast %207 : vector<1x1x32x128xbf16> to vector<32x128xbf16>
    %cst_160 = arith.constant dense<0.000000e+00> : vector<5x128xf32>
    %209 = tpu.matmul %206, %208, %cst_160 {dimension_numbers = #tpu.dot_dimension_numbers<[1], [0], [0], [1], [0, 0, 1, 1], [], []>} : vector<5x32xbf16>, vector<32x128xbf16>, vector<5x128xf32> -> vector<5x128xf32>
    %210 = arith.addf %166, %209 : vector<5x128xf32>
    %211 = arith.addf %4, %210 : vector<5x128xf32>
    %c0_161 = arith.constant 0 : index
    %c0_162 = arith.constant 0 : index
    %c0_163 = arith.constant 0 : index
    %212 = vector.load %arg17[%c0_161, %c0_162, %c0_163] : memref<1x1x128xf32, #tpu.memory_space<vmem>>, vector<1x1x128xf32>
    %213 = vector.shape_cast %212 : vector<1x1x128xf32> to vector<1x128xf32>
    %c0_164 = arith.constant 0 : index
    %c0_165 = arith.constant 0 : index
    %c0_166 = arith.constant 0 : index
    %214 = vector.load %arg18[%c0_164, %c0_165, %c0_166] : memref<1x1x128xf32, #tpu.memory_space<vmem>>, vector<1x1x128xf32>
    %215 = vector.shape_cast %214 : vector<1x1x128xf32> to vector<1x128xf32>
    %cst_167 = arith.constant dense<0.000000e+00> : vector<5xf32>
    %216 = vector.multi_reduction <add>, %211, %cst_167 [1] : vector<5x128xf32> to vector<5xf32>
    %217 = vector.shape_cast %216 : vector<5xf32> to vector<5x1xf32>
    %cst_168 = arith.constant 1.280000e+02 : f32
    %218 = vector.broadcast %cst_168 : f32 to vector<5x1xf32>
    %219 = arith.divf %217, %218 : vector<5x1xf32>
    %220 = vector.broadcast %219 : vector<5x1xf32> to vector<5x128xf32>
    %221 = arith.subf %211, %220 : vector<5x128xf32>
    %222 = arith.mulf %221, %221 : vector<5x128xf32>
    %cst_169 = arith.constant dense<0.000000e+00> : vector<5xf32>
    %223 = vector.multi_reduction <add>, %222, %cst_169 [1] : vector<5x128xf32> to vector<5xf32>
    %224 = vector.shape_cast %223 : vector<5xf32> to vector<5x1xf32>
    %cst_170 = arith.constant 1.280000e+02 : f32
    %225 = vector.broadcast %cst_170 : f32 to vector<5x1xf32>
    %226 = arith.divf %224, %225 : vector<5x1xf32>
    %227 = vector.broadcast %219 : vector<5x1xf32> to vector<5x128xf32>
    %228 = arith.subf %211, %227 : vector<5x128xf32>
    %cst_171 = arith.constant 9.99999997E-7 : f32
    %229 = vector.broadcast %cst_171 : f32 to vector<5x1xf32>
    %230 = arith.addf %226, %229 : vector<5x1xf32>
    %231 = math.rsqrt %230 : vector<5x1xf32>
    %232 = vector.broadcast %231 : vector<5x1xf32> to vector<5x128xf32>
    %233 = arith.mulf %228, %232 : vector<5x128xf32>
    %234 = vector.broadcast %213 : vector<1x128xf32> to vector<5x128xf32>
    %235 = arith.mulf %233, %234 : vector<5x128xf32>
    %236 = vector.broadcast %215 : vector<1x128xf32> to vector<5x128xf32>
    %237 = arith.addf %235, %236 : vector<5x128xf32>
    %238 = arith.truncf %237 : vector<5x128xf32> to vector<5x128xbf16>
    %c0_172 = arith.constant 0 : index
    %c0_173 = arith.constant 0 : index
    %c0_174 = arith.constant 0 : index
    %239 = vector.load %arg19[%c0_172, %c0_173, %c0_174] : memref<1x128x512xbf16, #tpu.memory_space<vmem>>, vector<1x128x512xbf16>
    %240 = vector.shape_cast %239 : vector<1x128x512xbf16> to vector<128x512xbf16>
    %cst_175 = arith.constant dense<0.000000e+00> : vector<5x512xf32>
    %241 = tpu.matmul %238, %240, %cst_175 {dimension_numbers = #tpu.dot_dimension_numbers<[1], [0], [0], [1], [0, 0, 1, 1], [], []>} : vector<5x128xbf16>, vector<128x512xbf16>, vector<5x512xf32> -> vector<5x512xf32>
    %c0_176 = arith.constant 0 : index
    %c0_177 = arith.constant 0 : index
    %c0_178 = arith.constant 0 : index
    %242 = vector.load %arg20[%c0_176, %c0_177, %c0_178] : memref<1x1x512xf32, #tpu.memory_space<vmem>>, vector<1x1x512xf32>
    %243 = vector.shape_cast %242 : vector<1x1x512xf32> to vector<1x512xf32>
    %244 = vector.broadcast %243 : vector<1x512xf32> to vector<5x512xf32>
    %245 = arith.addf %241, %244 : vector<5x512xf32>
    %246 = arith.mulf %245, %245 : vector<5x512xf32>
    %247 = arith.mulf %245, %246 : vector<5x512xf32>
    %cst_179 = arith.constant 4.471500e-02 : f32
    %248 = vector.broadcast %cst_179 : f32 to vector<5x512xf32>
    %249 = arith.mulf %248, %247 : vector<5x512xf32>
    %250 = arith.addf %245, %249 : vector<5x512xf32>
    %cst_180 = arith.constant 0.797884583 : f32
    %251 = vector.broadcast %cst_180 : f32 to vector<5x512xf32>
    %252 = arith.mulf %251, %250 : vector<5x512xf32>
    %253 = math.tanh %252 : vector<5x512xf32>
    %cst_181 = arith.constant 1.000000e+00 : f32
    %254 = vector.broadcast %cst_181 : f32 to vector<5x512xf32>
    %255 = arith.addf %254, %253 : vector<5x512xf32>
    %cst_182 = arith.constant 5.000000e-01 : f32
    %256 = vector.broadcast %cst_182 : f32 to vector<5x512xf32>
    %257 = arith.mulf %256, %255 : vector<5x512xf32>
    %258 = arith.mulf %245, %257 : vector<5x512xf32>
    %259 = arith.truncf %258 : vector<5x512xf32> to vector<5x512xbf16>
    %c0_183 = arith.constant 0 : index
    %c0_184 = arith.constant 0 : index
    %c0_185 = arith.constant 0 : index
    %260 = vector.load %arg21[%c0_183, %c0_184, %c0_185] : memref<1x512x128xbf16, #tpu.memory_space<vmem>>, vector<1x512x128xbf16>
    %261 = vector.shape_cast %260 : vector<1x512x128xbf16> to vector<512x128xbf16>
    %cst_186 = arith.constant dense<0.000000e+00> : vector<5x128xf32>
    %262 = tpu.matmul %259, %261, %cst_186 {dimension_numbers = #tpu.dot_dimension_numbers<[1], [0], [0], [1], [0, 0, 1, 1], [], []>} : vector<5x512xbf16>, vector<512x128xbf16>, vector<5x128xf32> -> vector<5x128xf32>
    %c0_187 = arith.constant 0 : index
    %c0_188 = arith.constant 0 : index
    %c0_189 = arith.constant 0 : index
    %263 = vector.load %arg22[%c0_187, %c0_188, %c0_189] : memref<1x1x128xf32, #tpu.memory_space<vmem>>, vector<1x1x128xf32>
    %264 = vector.shape_cast %263 : vector<1x1x128xf32> to vector<1x128xf32>
    %265 = vector.broadcast %264 : vector<1x128xf32> to vector<5x128xf32>
    %266 = arith.addf %262, %265 : vector<5x128xf32>
    %267 = arith.addf %211, %266 : vector<5x128xf32>
    %c0_190 = arith.constant 0 : index
    %c0_191 = arith.constant 0 : index
    %c0_192 = arith.constant 0 : index
    %268 = vector.load %arg23[%c0_190, %c0_191, %c0_192] : memref<1x5x128xf32, #tpu.memory_space<vmem>>, vector<1x5x128xf32>
    %269 = vector.shape_cast %268 : vector<1x5x128xf32> to vector<5x128xf32>
    %270 = vector.shape_cast %267 : vector<5x128xf32> to vector<1x5x128xf32>
    tpu.vector_store %arg23[%c0_190, %c0_191, %c0_192], %270 {strides = array<i32>} : memref<1x5x128xf32, #tpu.memory_space<vmem>>, vector<1x5x128xf32>,
    return
  }
  func.func @transform_0(%arg0: i32, %arg1: i32) -> (i32, i32, i32) {
    %c0_i32 = arith.constant 0 : i32
    %c0_i32_0 = arith.constant 0 : i32
    %c0_i32_1 = arith.constant 0 : i32
    return %arg0, %c0_i32, %c0_i32_0 : i32, i32, i32
  }
  func.func @transform_1(%arg0: i32, %arg1: i32) -> (i32, i32) {
    %c0_i32 = arith.constant 0 : i32
    %c0_i32_0 = arith.constant 0 : i32
    %c0_i32_1 = arith.constant 0 : i32
    return %c0_i32, %c0_i32_0 : i32, i32
  }
  func.func @transform_2(%arg0: i32, %arg1: i32) -> (i32, i32) {
    %c0_i32 = arith.constant 0 : i32
    %c0_i32_0 = arith.constant 0 : i32
    %c0_i32_1 = arith.constant 0 : i32
    return %c0_i32, %c0_i32_0 : i32, i32
  }
  func.func @transform_3(%arg0: i32, %arg1: i32) -> (i32, i32) {
    %c0_i32 = arith.constant 0 : i32
    %c0_i32_0 = arith.constant 0 : i32
    %c0_i32_1 = arith.constant 0 : i32
    return %c0_i32, %c0_i32_0 : i32, i32
  }
  func.func @transform_4(%arg0: i32, %arg1: i32) -> (i32, i32) {
    %c0_i32 = arith.constant 0 : i32
    %c0_i32_0 = arith.constant 0 : i32
    %c0_i32_1 = arith.constant 0 : i32
    return %c0_i32, %c0_i32_0 : i32, i32
  }
  func.func @transform_5(%arg0: i32, %arg1: i32) -> (i32, i32, i32) {
    %c0_i32 = arith.constant 0 : i32
    %c0_i32_0 = arith.constant 0 : i32
    %c0_i32_1 = arith.constant 0 : i32
    return %arg1, %c0_i32, %c0_i32_0 : i32, i32, i32
  }
  func.func @transform_6(%arg0: i32, %arg1: i32) -> (i32, i32, i32) {
    %c0_i32 = arith.constant 0 : i32
    %c0_i32_0 = arith.constant 0 : i32
    %c0_i32_1 = arith.constant 0 : i32
    return %arg1, %c0_i32, %c0_i32_0 : i32, i32, i32
  }
  func.func @transform_7(%arg0: i32, %arg1: i32) -> (i32, i32, i32, i32) {
    %c0_i32 = arith.constant 0 : i32
    %c0_i32_0 = arith.constant 0 : i32
    %c0_i32_1 = arith.constant 0 : i32
    %c0_i32_2 = arith.constant 0 : i32
    return %arg1, %c0_i32, %c0_i32_0, %c0_i32_1 : i32, i32, i32, i32
  }
  func.func @transform_8(%arg0: i32, %arg1: i32) -> (i32, i32, i32, i32) {
    %c0_i32 = arith.constant 0 : i32
    %c0_i32_0 = arith.constant 0 : i32
    %c0_i32_1 = arith.constant 0 : i32
    %c0_i32_2 = arith.constant 0 : i32
    return %arg1, %c0_i32, %c0_i32_0, %c0_i32_1 : i32, i32, i32, i32
  }
  func.func @transform_9(%arg0: i32, %arg1: i32) -> (i32, i32, i32, i32) {
    %c0_i32 = arith.constant 0 : i32
    %c0_i32_0 = arith.constant 0 : i32
    %c0_i32_1 = arith.constant 0 : i32
    %c0_i32_2 = arith.constant 0 : i32
    return %arg1, %c0_i32, %c0_i32_0, %c0_i32_1 : i32, i32, i32, i32
  }
  func.func @transform_10(%arg0: i32, %arg1: i32) -> (i32, i32, i32, i32) {
    %c0_i32 = arith.constant 0 : i32
    %c0_i32_0 = arith.constant 0 : i32
    %c0_i32_1 = arith.constant 0 : i32
    %c0_i32_2 = arith.constant 0 : i32
    return %arg1, %c0_i32, %c0_i32_0, %c0_i32_1 : i32, i32, i32, i32
  }
  func.func @transform_11(%arg0: i32, %arg1: i32) -> (i32, i32, i32, i32) {
    %c0_i32 = arith.constant 0 : i32
    %c0_i32_0 = arith.constant 0 : i32
    %c0_i32_1 = arith.constant 0 : i32
    %c0_i32_2 = arith.constant 0 : i32
    return %arg1, %c0_i32, %c0_i32_0, %c0_i32_1 : i32, i32, i32, i32
  }
  func.func @transform_12(%arg0: i32, %arg1: i32) -> (i32, i32, i32, i32) {
    %c0_i32 = arith.constant 0 : i32
    %c0_i32_0 = arith.constant 0 : i32
    %c0_i32_1 = arith.constant 0 : i32
    %c0_i32_2 = arith.constant 0 : i32
    return %arg1, %c0_i32, %c0_i32_0, %c0_i32_1 : i32, i32, i32, i32
  }
  func.func @transform_13(%arg0: i32, %arg1: i32) -> (i32, i32, i32, i32) {
    %c0_i32 = arith.constant 0 : i32
    %c0_i32_0 = arith.constant 0 : i32
    %c0_i32_1 = arith.constant 0 : i32
    %c0_i32_2 = arith.constant 0 : i32
    return %arg1, %c0_i32, %c0_i32_0, %c0_i32_1 : i32, i32, i32, i32
  }
  func.func @transform_14(%arg0: i32, %arg1: i32) -> (i32, i32, i32) {
    %c0_i32 = arith.constant 0 : i32
    %c0_i32_0 = arith.constant 0 : i32
    %c0_i32_1 = arith.constant 0 : i32
    return %arg1, %c0_i32, %c0_i32_0 : i32, i32, i32
  }
  func.func @transform_15(%arg0: i32, %arg1: i32) -> (i32, i32, i32) {
    %c0_i32 = arith.constant 0 : i32
    %c0_i32_0 = arith.constant 0 : i32
    %c0_i32_1 = arith.constant 0 : i32
    return %arg1, %c0_i32, %c0_i32_0 : i32, i32, i32
  }
  func.func @transform_16(%arg0: i32, %arg1: i32) -> (i32, i32, i32) {
    %c0_i32 = arith.constant 0 : i32
    %c0_i32_0 = arith.constant 0 : i32
    %c0_i32_1 = arith.constant 0 : i32
    return %arg1, %c0_i32, %c0_i32_0 : i32, i32, i32
  }
  func.func @transform_17(%arg0: i32, %arg1: i32) -> (i32, i32, i32) {
    %c0_i32 = arith.constant 0 : i32
    %c0_i32_0 = arith.constant 0 : i32
    %c0_i32_1 = arith.constant 0 : i32
    return %arg1, %c0_i32, %c0_i32_0 : i32, i32, i32
  }
  func.func @transform_18(%arg0: i32, %arg1: i32) -> (i32, i32, i32) {
    %c0_i32 = arith.constant 0 : i32
    %c0_i32_0 = arith.constant 0 : i32
    %c0_i32_1 = arith.constant 0 : i32
    return %arg1, %c0_i32, %c0_i32_0 : i32, i32, i32
  }
  func.func @transform_19(%arg0: i32, %arg1: i32) -> (i32, i32, i32) {
    %c0_i32 = arith.constant 0 : i32
    %c0_i32_0 = arith.constant 0 : i32
    %c0_i32_1 = arith.constant 0 : i32
    return %arg1, %c0_i32, %c0_i32_0 : i32, i32, i32
  }
  func.func @transform_20(%arg0: i32, %arg1: i32) -> (i32, i32, i32) {
    %c0_i32 = arith.constant 0 : i32
    %c0_i32_0 = arith.constant 0 : i32
    %c0_i32_1 = arith.constant 0 : i32
    return %arg1, %c0_i32, %c0_i32_0 : i32, i32, i32
  }
  func.func @transform_21(%arg0: i32, %arg1: i32) -> (i32, i32, i32) {
    %c0_i32 = arith.constant 0 : i32
    %c0_i32_0 = arith.constant 0 : i32
    %c0_i32_1 = arith.constant 0 : i32
    return %arg0, %c0_i32, %c0_i32_0 : i32, i32, i32
  }
}

module attributes {stable_mosaic.version = 11 : i64} {
  func.func @_blocks_kernel(%arg0: i32, %arg1: i32, %arg2: memref<1x5x128xf32, #tpu.memory_space<vmem>>, %arg3: memref<1x1x128xf32, #tpu.memory_space<vmem>>, %arg4: memref<1x1x128xf32, #tpu.memory_space<vmem>>, %arg5: memref<1x4x128x32xbf16, #tpu.memory_space<vmem>>, %arg6: memref<1x4x1x32xf32, #tpu.memory_space<vmem>>, %arg7: memref<1x4x128x32xbf16, #tpu.memory_space<vmem>>, %arg8: memref<1x4x1x32xf32, #tpu.memory_space<vmem>>, %arg9: memref<1x4x128x32xbf16, #tpu.memory_space<vmem>>, %arg10: memref<1x4x1x32xf32, #tpu.memory_space<vmem>>, %arg11: memref<1x4x32x128xbf16, #tpu.memory_space<vmem>>, %arg12: memref<1x1x128xf32, #tpu.memory_space<vmem>>, %arg13: memref<1x1x128xf32, #tpu.memory_space<vmem>>, %arg14: memref<1x1x128xf32, #tpu.memory_space<vmem>>, %arg15: memref<1x128x512xbf16, #tpu.memory_space<vmem>>, %arg16: memref<1x1x512xf32, #tpu.memory_space<vmem>>, %arg17: memref<1x512x128xbf16, #tpu.memory_space<vmem>>, %arg18: memref<1x1x128xf32, #tpu.memory_space<vmem>>, %arg19: memref<1x5x128xf32, #tpu.memory_space<vmem>>) attributes {dimension_semantics = [#tpu.dimension_semantics<parallel>, #tpu.dimension_semantics<arbitrary>], iteration_bounds = array<i64: 6, 1>, scalar_prefetch = 0 : i64, scratch_operands = 0 : i64, tpu.core_type = #tpu.core_type<tc>, window_params = [{transform_indices = @transform_0, window_bounds = array<i64: 1, 5, 128>}, {transform_indices = @transform_1, window_bounds = array<i64: 1, 1, 128>}, {transform_indices = @transform_2, window_bounds = array<i64: 1, 1, 128>}, {transform_indices = @transform_3, window_bounds = array<i64: 1, 4, 128, 32>}, {transform_indices = @transform_4, window_bounds = array<i64: 1, 4, 1, 32>}, {transform_indices = @transform_5, window_bounds = array<i64: 1, 4, 128, 32>}, {transform_indices = @transform_6, window_bounds = array<i64: 1, 4, 1, 32>}, {transform_indices = @transform_7, window_bounds = array<i64: 1, 4, 128, 32>}, {transform_indices = @transform_8, window_bounds = array<i64: 1, 4, 1, 32>}, {transform_indices = @transform_9, window_bounds = array<i64: 1, 4, 32, 128>}, {transform_indices = @transform_10, window_bounds = array<i64: 1, 1, 128>}, {transform_indices = @transform_11, window_bounds = array<i64: 1, 1, 128>}, {transform_indices = @transform_12, window_bounds = array<i64: 1, 1, 128>}, {transform_indices = @transform_13, window_bounds = array<i64: 1, 128, 512>}, {transform_indices = @transform_14, window_bounds = array<i64: 1, 1, 512>}, {transform_indices = @transform_15, window_bounds = array<i64: 1, 512, 128>}, {transform_indices = @transform_16, window_bounds = array<i64: 1, 1, 128>}, {transform_indices = @transform_17, window_bounds = array<i64: 1, 5, 128>}]} {
    %c0_i32 = arith.constant 0 : i32
    %0 = arith.cmpi eq, %arg1, %c0_i32 : i32
    %1 = arith.extui %0 : i1 to i32
    %c0_i32_0 = arith.constant 0 : i32
    %2 = arith.cmpi ne, %1, %c0_i32_0 : i32
    scf.if %2 {
      %c0_193 = arith.constant 0 : index
      %c0_194 = arith.constant 0 : index
      %c0_195 = arith.constant 0 : index
      %271 = vector.load %arg2[%c0_193, %c0_194, %c0_195] : memref<1x5x128xf32, #tpu.memory_space<vmem>>, vector<1x5x128xf32>
      %272 = vector.shape_cast %271 : vector<1x5x128xf32> to vector<5x128xf32>
      %c0_196 = arith.constant 0 : index
      %c0_197 = arith.constant 0 : index
      %c0_198 = arith.constant 0 : index
      %273 = vector.load %arg19[%c0_196, %c0_197, %c0_198] : memref<1x5x128xf32, #tpu.memory_space<vmem>>, vector<1x5x128xf32>
      %274 = vector.shape_cast %273 : vector<1x5x128xf32> to vector<5x128xf32>
      %275 = vector.shape_cast %272 : vector<5x128xf32> to vector<1x5x128xf32>
      tpu.vector_store %arg19[%c0_196, %c0_197, %c0_198], %275 {strides = array<i32>} : memref<1x5x128xf32, #tpu.memory_space<vmem>>, vector<1x5x128xf32>,
    } else {
    }
    %c0 = arith.constant 0 : index
    %c0_1 = arith.constant 0 : index
    %c0_2 = arith.constant 0 : index
    %3 = vector.load %arg19[%c0, %c0_1, %c0_2] : memref<1x5x128xf32, #tpu.memory_space<vmem>>, vector<1x5x128xf32>
    %4 = vector.shape_cast %3 : vector<1x5x128xf32> to vector<5x128xf32>
    %c0_3 = arith.constant 0 : index
    %c0_4 = arith.constant 0 : index
    %c0_5 = arith.constant 0 : index
    %5 = vector.load %arg3[%c0_3, %c0_4, %c0_5] : memref<1x1x128xf32, #tpu.memory_space<vmem>>, vector<1x1x128xf32>
    %6 = vector.shape_cast %5 : vector<1x1x128xf32> to vector<1x128xf32>
    %c0_6 = arith.constant 0 : index
    %c0_7 = arith.constant 0 : index
    %c0_8 = arith.constant 0 : index
    %7 = vector.load %arg4[%c0_6, %c0_7, %c0_8] : memref<1x1x128xf32, #tpu.memory_space<vmem>>, vector<1x1x128xf32>
    %8 = vector.shape_cast %7 : vector<1x1x128xf32> to vector<1x128xf32>
    %cst = arith.constant dense<0.000000e+00> : vector<5xf32>
    %9 = vector.multi_reduction <add>, %4, %cst [1] : vector<5x128xf32> to vector<5xf32>
    %10 = vector.shape_cast %9 : vector<5xf32> to vector<5x1xf32>
    %cst_9 = arith.constant 1.280000e+02 : f32
    %11 = vector.broadcast %cst_9 : f32 to vector<5x1xf32>
    %12 = arith.divf %10, %11 : vector<5x1xf32>
    %13 = vector.broadcast %12 : vector<5x1xf32> to vector<5x128xf32>
    %14 = arith.subf %4, %13 : vector<5x128xf32>
    %15 = arith.mulf %14, %14 : vector<5x128xf32>
    %cst_10 = arith.constant dense<0.000000e+00> : vector<5xf32>
    %16 = vector.multi_reduction <add>, %15, %cst_10 [1] : vector<5x128xf32> to vector<5xf32>
    %17 = vector.shape_cast %16 : vector<5xf32> to vector<5x1xf32>
    %cst_11 = arith.constant 1.280000e+02 : f32
    %18 = vector.broadcast %cst_11 : f32 to vector<5x1xf32>
    %19 = arith.divf %17, %18 : vector<5x1xf32>
    %20 = vector.broadcast %12 : vector<5x1xf32> to vector<5x128xf32>
    %21 = arith.subf %4, %20 : vector<5x128xf32>
    %cst_12 = arith.constant 9.99999997E-7 : f32
    %22 = vector.broadcast %cst_12 : f32 to vector<5x1xf32>
    %23 = arith.addf %19, %22 : vector<5x1xf32>
    %24 = math.rsqrt %23 : vector<5x1xf32>
    %25 = vector.broadcast %24 : vector<5x1xf32> to vector<5x128xf32>
    %26 = arith.mulf %21, %25 : vector<5x128xf32>
    %27 = vector.broadcast %6 : vector<1x128xf32> to vector<5x128xf32>
    %28 = arith.mulf %26, %27 : vector<5x128xf32>
    %29 = vector.broadcast %8 : vector<1x128xf32> to vector<5x128xf32>
    %30 = arith.addf %28, %29 : vector<5x128xf32>
    %31 = arith.truncf %30 : vector<5x128xf32> to vector<5x128xbf16>
    %c0_13 = arith.constant 0 : index
    %c0_14 = arith.constant 0 : index
    %c0_15 = arith.constant 0 : index
    %32 = vector.load %arg12[%c0_13, %c0_14, %c0_15] : memref<1x1x128xf32, #tpu.memory_space<vmem>>, vector<1x1x128xf32>
    %33 = vector.shape_cast %32 : vector<1x1x128xf32> to vector<1x128xf32>
    %c0_16 = arith.constant 0 : index
    %c0_17 = arith.constant 0 : index
    %c0_18 = arith.constant 0 : index
    %c0_19 = arith.constant 0 : index
    %34 = vector.load %arg5[%c0_16, %c0_17, %c0_18, %c0_19] : memref<1x4x128x32xbf16, #tpu.memory_space<vmem>>, vector<1x1x128x32xbf16>
    %35 = vector.shape_cast %34 : vector<1x1x128x32xbf16> to vector<128x32xbf16>
    %cst_20 = arith.constant dense<0.000000e+00> : vector<5x32xf32>
    %36 = tpu.matmul %31, %35, %cst_20 {dimension_numbers = #tpu.dot_dimension_numbers<[1], [0], [0], [1], [0, 0, 1, 1], [], []>} : vector<5x128xbf16>, vector<128x32xbf16>, vector<5x32xf32> -> vector<5x32xf32>
    %c0_21 = arith.constant 0 : index
    %c0_22 = arith.constant 0 : index
    %c0_23 = arith.constant 0 : index
    %c0_24 = arith.constant 0 : index
    %37 = vector.load %arg6[%c0_21, %c0_22, %c0_23, %c0_24] : memref<1x4x1x32xf32, #tpu.memory_space<vmem>>, vector<1x1x1x32xf32>
    %38 = vector.shape_cast %37 : vector<1x1x1x32xf32> to vector<1x32xf32>
    %39 = vector.broadcast %38 : vector<1x32xf32> to vector<5x32xf32>
    %40 = arith.addf %36, %39 : vector<5x32xf32>
    %c0_25 = arith.constant 0 : index
    %c0_26 = arith.constant 0 : index
    %c0_27 = arith.constant 0 : index
    %c0_28 = arith.constant 0 : index
    %41 = vector.load %arg7[%c0_25, %c0_26, %c0_27, %c0_28] : memref<1x4x128x32xbf16, #tpu.memory_space<vmem>>, vector<1x1x128x32xbf16>
    %42 = vector.shape_cast %41 : vector<1x1x128x32xbf16> to vector<128x32xbf16>
    %cst_29 = arith.constant dense<0.000000e+00> : vector<5x32xf32>
    %43 = tpu.matmul %31, %42, %cst_29 {dimension_numbers = #tpu.dot_dimension_numbers<[1], [0], [0], [1], [0, 0, 1, 1], [], []>} : vector<5x128xbf16>, vector<128x32xbf16>, vector<5x32xf32> -> vector<5x32xf32>
    %c0_30 = arith.constant 0 : index
    %c0_31 = arith.constant 0 : index
    %c0_32 = arith.constant 0 : index
    %c0_33 = arith.constant 0 : index
    %44 = vector.load %arg8[%c0_30, %c0_31, %c0_32, %c0_33] : memref<1x4x1x32xf32, #tpu.memory_space<vmem>>, vector<1x1x1x32xf32>
    %45 = vector.shape_cast %44 : vector<1x1x1x32xf32> to vector<1x32xf32>
    %46 = vector.broadcast %45 : vector<1x32xf32> to vector<5x32xf32>
    %47 = arith.addf %43, %46 : vector<5x32xf32>
    %c0_34 = arith.constant 0 : index
    %c0_35 = arith.constant 0 : index
    %c0_36 = arith.constant 0 : index
    %c0_37 = arith.constant 0 : index
    %48 = vector.load %arg9[%c0_34, %c0_35, %c0_36, %c0_37] : memref<1x4x128x32xbf16, #tpu.memory_space<vmem>>, vector<1x1x128x32xbf16>
    %49 = vector.shape_cast %48 : vector<1x1x128x32xbf16> to vector<128x32xbf16>
    %cst_38 = arith.constant dense<0.000000e+00> : vector<5x32xf32>
    %50 = tpu.matmul %31, %49, %cst_38 {dimension_numbers = #tpu.dot_dimension_numbers<[1], [0], [0], [1], [0, 0, 1, 1], [], []>} : vector<5x128xbf16>, vector<128x32xbf16>, vector<5x32xf32> -> vector<5x32xf32>
    %c0_39 = arith.constant 0 : index
    %c0_40 = arith.constant 0 : index
    %c0_41 = arith.constant 0 : index
    %c0_42 = arith.constant 0 : index
    %51 = vector.load %arg10[%c0_39, %c0_40, %c0_41, %c0_42] : memref<1x4x1x32xf32, #tpu.memory_space<vmem>>, vector<1x1x1x32xf32>
    %52 = vector.shape_cast %51 : vector<1x1x1x32xf32> to vector<1x32xf32>
    %53 = vector.broadcast %52 : vector<1x32xf32> to vector<5x32xf32>
    %54 = arith.addf %50, %53 : vector<5x32xf32>
    %55 = arith.truncf %40 : vector<5x32xf32> to vector<5x32xbf16>
    %56 = arith.truncf %47 : vector<5x32xf32> to vector<5x32xbf16>
    "tpu.trace_start"() <{level = 10 : i32, message = "qd,kd->qk"}> : () -> ()
    %cst_43 = arith.constant dense<0.000000e+00> : vector<5x5xf32>
    %57 = tpu.matmul %55, %56, %cst_43 {dimension_numbers = #tpu.dot_dimension_numbers<[1], [1], [0], [0], [0, 0, 1, 0], [], []>} : vector<5x32xbf16>, vector<5x32xbf16>, vector<5x5xf32> -> vector<5x5xf32>
    "tpu.trace_stop"() : () -> ()
    %cst_44 = arith.constant 0.176776692 : f32
    %58 = vector.broadcast %cst_44 : f32 to vector<5x5xf32>
    %59 = arith.mulf %57, %58 : vector<5x5xf32>
    %cst_45 = arith.constant dense<0xFF800000> : vector<5xf32>
    %60 = vector.multi_reduction <maximumf>, %59, %cst_45 [1] : vector<5x5xf32> to vector<5xf32>
    %61 = vector.shape_cast %60 : vector<5xf32> to vector<5x1xf32>
    %62 = vector.broadcast %61 : vector<5x1xf32> to vector<5x5xf32>
    %63 = arith.subf %59, %62 : vector<5x5xf32>
    %64 = math.exp %63 : vector<5x5xf32>
    %cst_46 = arith.constant dense<0.000000e+00> : vector<5xf32>
    %65 = vector.multi_reduction <add>, %64, %cst_46 [1] : vector<5x5xf32> to vector<5xf32>
    %66 = vector.shape_cast %65 : vector<5xf32> to vector<5x1xf32>
    %67 = tpu.reciprocal %66 {approx = true} : vector<5x1xf32> -> vector<5x1xf32>
    %68 = vector.broadcast %67 : vector<5x1xf32> to vector<5x5xf32>
    %69 = arith.mulf %64, %68 : vector<5x5xf32>
    %70 = arith.truncf %69 : vector<5x5xf32> to vector<5x5xbf16>
    %71 = arith.truncf %54 : vector<5x32xf32> to vector<5x32xbf16>
    %cst_47 = arith.constant dense<0.000000e+00> : vector<5x32xf32>
    %72 = tpu.matmul %70, %71, %cst_47 {dimension_numbers = #tpu.dot_dimension_numbers<[1], [0], [0], [1], [0, 0, 1, 1], [], []>} : vector<5x5xbf16>, vector<5x32xbf16>, vector<5x32xf32> -> vector<5x32xf32>
    %73 = arith.truncf %72 : vector<5x32xf32> to vector<5x32xbf16>
    %c0_48 = arith.constant 0 : index
    %c0_49 = arith.constant 0 : index
    %c0_50 = arith.constant 0 : index
    %c0_51 = arith.constant 0 : index
    %74 = vector.load %arg11[%c0_48, %c0_49, %c0_50, %c0_51] : memref<1x4x32x128xbf16, #tpu.memory_space<vmem>>, vector<1x1x32x128xbf16>
    %75 = vector.shape_cast %74 : vector<1x1x32x128xbf16> to vector<32x128xbf16>
    %cst_52 = arith.constant dense<0.000000e+00> : vector<5x128xf32>
    %76 = tpu.matmul %73, %75, %cst_52 {dimension_numbers = #tpu.dot_dimension_numbers<[1], [0], [0], [1], [0, 0, 1, 1], [], []>} : vector<5x32xbf16>, vector<32x128xbf16>, vector<5x128xf32> -> vector<5x128xf32>
    %77 = vector.broadcast %33 : vector<1x128xf32> to vector<5x128xf32>
    %78 = arith.addf %77, %76 : vector<5x128xf32>
    %c0_53 = arith.constant 0 : index
    %c1 = arith.constant 1 : index
    %c0_54 = arith.constant 0 : index
    %c0_55 = arith.constant 0 : index
    %79 = vector.load %arg5[%c0_53, %c1, %c0_54, %c0_55] : memref<1x4x128x32xbf16, #tpu.memory_space<vmem>>, vector<1x1x128x32xbf16>
    %80 = vector.shape_cast %79 : vector<1x1x128x32xbf16> to vector<128x32xbf16>
    %cst_56 = arith.constant dense<0.000000e+00> : vector<5x32xf32>
    %81 = tpu.matmul %31, %80, %cst_56 {dimension_numbers = #tpu.dot_dimension_numbers<[1], [0], [0], [1], [0, 0, 1, 1], [], []>} : vector<5x128xbf16>, vector<128x32xbf16>, vector<5x32xf32> -> vector<5x32xf32>
    %c0_57 = arith.constant 0 : index
    %c1_58 = arith.constant 1 : index
    %c0_59 = arith.constant 0 : index
    %c0_60 = arith.constant 0 : index
    %82 = vector.load %arg6[%c0_57, %c1_58, %c0_59, %c0_60] : memref<1x4x1x32xf32, #tpu.memory_space<vmem>>, vector<1x1x1x32xf32>
    %83 = vector.shape_cast %82 : vector<1x1x1x32xf32> to vector<1x32xf32>
    %84 = vector.broadcast %83 : vector<1x32xf32> to vector<5x32xf32>
    %85 = arith.addf %81, %84 : vector<5x32xf32>
    %c0_61 = arith.constant 0 : index
    %c1_62 = arith.constant 1 : index
    %c0_63 = arith.constant 0 : index
    %c0_64 = arith.constant 0 : index
    %86 = vector.load %arg7[%c0_61, %c1_62, %c0_63, %c0_64] : memref<1x4x128x32xbf16, #tpu.memory_space<vmem>>, vector<1x1x128x32xbf16>
    %87 = vector.shape_cast %86 : vector<1x1x128x32xbf16> to vector<128x32xbf16>
    %cst_65 = arith.constant dense<0.000000e+00> : vector<5x32xf32>
    %88 = tpu.matmul %31, %87, %cst_65 {dimension_numbers = #tpu.dot_dimension_numbers<[1], [0], [0], [1], [0, 0, 1, 1], [], []>} : vector<5x128xbf16>, vector<128x32xbf16>, vector<5x32xf32> -> vector<5x32xf32>
    %c0_66 = arith.constant 0 : index
    %c1_67 = arith.constant 1 : index
    %c0_68 = arith.constant 0 : index
    %c0_69 = arith.constant 0 : index
    %89 = vector.load %arg8[%c0_66, %c1_67, %c0_68, %c0_69] : memref<1x4x1x32xf32, #tpu.memory_space<vmem>>, vector<1x1x1x32xf32>
    %90 = vector.shape_cast %89 : vector<1x1x1x32xf32> to vector<1x32xf32>
    %91 = vector.broadcast %90 : vector<1x32xf32> to vector<5x32xf32>
    %92 = arith.addf %88, %91 : vector<5x32xf32>
    %c0_70 = arith.constant 0 : index
    %c1_71 = arith.constant 1 : index
    %c0_72 = arith.constant 0 : index
    %c0_73 = arith.constant 0 : index
    %93 = vector.load %arg9[%c0_70, %c1_71, %c0_72, %c0_73] : memref<1x4x128x32xbf16, #tpu.memory_space<vmem>>, vector<1x1x128x32xbf16>
    %94 = vector.shape_cast %93 : vector<1x1x128x32xbf16> to vector<128x32xbf16>
    %cst_74 = arith.constant dense<0.000000e+00> : vector<5x32xf32>
    %95 = tpu.matmul %31, %94, %cst_74 {dimension_numbers = #tpu.dot_dimension_numbers<[1], [0], [0], [1], [0, 0, 1, 1], [], []>} : vector<5x128xbf16>, vector<128x32xbf16>, vector<5x32xf32> -> vector<5x32xf32>
    %c0_75 = arith.constant 0 : index
    %c1_76 = arith.constant 1 : index
    %c0_77 = arith.constant 0 : index
    %c0_78 = arith.constant 0 : index
    %96 = vector.load %arg10[%c0_75, %c1_76, %c0_77, %c0_78] : memref<1x4x1x32xf32, #tpu.memory_space<vmem>>, vector<1x1x1x32xf32>
    %97 = vector.shape_cast %96 : vector<1x1x1x32xf32> to vector<1x32xf32>
    %98 = vector.broadcast %97 : vector<1x32xf32> to vector<5x32xf32>
    %99 = arith.addf %95, %98 : vector<5x32xf32>
    %100 = arith.truncf %85 : vector<5x32xf32> to vector<5x32xbf16>
    %101 = arith.truncf %92 : vector<5x32xf32> to vector<5x32xbf16>
    "tpu.trace_start"() <{level = 10 : i32, message = "qd,kd->qk"}> : () -> ()
    %cst_79 = arith.constant dense<0.000000e+00> : vector<5x5xf32>
    %102 = tpu.matmul %100, %101, %cst_79 {dimension_numbers = #tpu.dot_dimension_numbers<[1], [1], [0], [0], [0, 0, 1, 0], [], []>} : vector<5x32xbf16>, vector<5x32xbf16>, vector<5x5xf32> -> vector<5x5xf32>
    "tpu.trace_stop"() : () -> ()
    %cst_80 = arith.constant 0.176776692 : f32
    %103 = vector.broadcast %cst_80 : f32 to vector<5x5xf32>
    %104 = arith.mulf %102, %103 : vector<5x5xf32>
    %cst_81 = arith.constant dense<0xFF800000> : vector<5xf32>
    %105 = vector.multi_reduction <maximumf>, %104, %cst_81 [1] : vector<5x5xf32> to vector<5xf32>
    %106 = vector.shape_cast %105 : vector<5xf32> to vector<5x1xf32>
    %107 = vector.broadcast %106 : vector<5x1xf32> to vector<5x5xf32>
    %108 = arith.subf %104, %107 : vector<5x5xf32>
    %109 = math.exp %108 : vector<5x5xf32>
    %cst_82 = arith.constant dense<0.000000e+00> : vector<5xf32>
    %110 = vector.multi_reduction <add>, %109, %cst_82 [1] : vector<5x5xf32> to vector<5xf32>
    %111 = vector.shape_cast %110 : vector<5xf32> to vector<5x1xf32>
    %112 = tpu.reciprocal %111 {approx = true} : vector<5x1xf32> -> vector<5x1xf32>
    %113 = vector.broadcast %112 : vector<5x1xf32> to vector<5x5xf32>
    %114 = arith.mulf %109, %113 : vector<5x5xf32>
    %115 = arith.truncf %114 : vector<5x5xf32> to vector<5x5xbf16>
    %116 = arith.truncf %99 : vector<5x32xf32> to vector<5x32xbf16>
    %cst_83 = arith.constant dense<0.000000e+00> : vector<5x32xf32>
    %117 = tpu.matmul %115, %116, %cst_83 {dimension_numbers = #tpu.dot_dimension_numbers<[1], [0], [0], [1], [0, 0, 1, 1], [], []>} : vector<5x5xbf16>, vector<5x32xbf16>, vector<5x32xf32> -> vector<5x32xf32>
    %118 = arith.truncf %117 : vector<5x32xf32> to vector<5x32xbf16>
    %c0_84 = arith.constant 0 : index
    %c1_85 = arith.constant 1 : index
    %c0_86 = arith.constant 0 : index
    %c0_87 = arith.constant 0 : index
    %119 = vector.load %arg11[%c0_84, %c1_85, %c0_86, %c0_87] : memref<1x4x32x128xbf16, #tpu.memory_space<vmem>>, vector<1x1x32x128xbf16>
    %120 = vector.shape_cast %119 : vector<1x1x32x128xbf16> to vector<32x128xbf16>
    %cst_88 = arith.constant dense<0.000000e+00> : vector<5x128xf32>
    %121 = tpu.matmul %118, %120, %cst_88 {dimension_numbers = #tpu.dot_dimension_numbers<[1], [0], [0], [1], [0, 0, 1, 1], [], []>} : vector<5x32xbf16>, vector<32x128xbf16>, vector<5x128xf32> -> vector<5x128xf32>
    %122 = arith.addf %78, %121 : vector<5x128xf32>
    %c0_89 = arith.constant 0 : index
    %c2 = arith.constant 2 : index
    %c0_90 = arith.constant 0 : index
    %c0_91 = arith.constant 0 : index
    %123 = vector.load %arg5[%c0_89, %c2, %c0_90, %c0_91] : memref<1x4x128x32xbf16, #tpu.memory_space<vmem>>, vector<1x1x128x32xbf16>
    %124 = vector.shape_cast %123 : vector<1x1x128x32xbf16> to vector<128x32xbf16>
    %cst_92 = arith.constant dense<0.000000e+00> : vector<5x32xf32>
    %125 = tpu.matmul %31, %124, %cst_92 {dimension_numbers = #tpu.dot_dimension_numbers<[1], [0], [0], [1], [0, 0, 1, 1], [], []>} : vector<5x128xbf16>, vector<128x32xbf16>, vector<5x32xf32> -> vector<5x32xf32>
    %c0_93 = arith.constant 0 : index
    %c2_94 = arith.constant 2 : index
    %c0_95 = arith.constant 0 : index
    %c0_96 = arith.constant 0 : index
    %126 = vector.load %arg6[%c0_93, %c2_94, %c0_95, %c0_96] : memref<1x4x1x32xf32, #tpu.memory_space<vmem>>, vector<1x1x1x32xf32>
    %127 = vector.shape_cast %126 : vector<1x1x1x32xf32> to vector<1x32xf32>
    %128 = vector.broadcast %127 : vector<1x32xf32> to vector<5x32xf32>
    %129 = arith.addf %125, %128 : vector<5x32xf32>
    %c0_97 = arith.constant 0 : index
    %c2_98 = arith.constant 2 : index
    %c0_99 = arith.constant 0 : index
    %c0_100 = arith.constant 0 : index
    %130 = vector.load %arg7[%c0_97, %c2_98, %c0_99, %c0_100] : memref<1x4x128x32xbf16, #tpu.memory_space<vmem>>, vector<1x1x128x32xbf16>
    %131 = vector.shape_cast %130 : vector<1x1x128x32xbf16> to vector<128x32xbf16>
    %cst_101 = arith.constant dense<0.000000e+00> : vector<5x32xf32>
    %132 = tpu.matmul %31, %131, %cst_101 {dimension_numbers = #tpu.dot_dimension_numbers<[1], [0], [0], [1], [0, 0, 1, 1], [], []>} : vector<5x128xbf16>, vector<128x32xbf16>, vector<5x32xf32> -> vector<5x32xf32>
    %c0_102 = arith.constant 0 : index
    %c2_103 = arith.constant 2 : index
    %c0_104 = arith.constant 0 : index
    %c0_105 = arith.constant 0 : index
    %133 = vector.load %arg8[%c0_102, %c2_103, %c0_104, %c0_105] : memref<1x4x1x32xf32, #tpu.memory_space<vmem>>, vector<1x1x1x32xf32>
    %134 = vector.shape_cast %133 : vector<1x1x1x32xf32> to vector<1x32xf32>
    %135 = vector.broadcast %134 : vector<1x32xf32> to vector<5x32xf32>
    %136 = arith.addf %132, %135 : vector<5x32xf32>
    %c0_106 = arith.constant 0 : index
    %c2_107 = arith.constant 2 : index
    %c0_108 = arith.constant 0 : index
    %c0_109 = arith.constant 0 : index
    %137 = vector.load %arg9[%c0_106, %c2_107, %c0_108, %c0_109] : memref<1x4x128x32xbf16, #tpu.memory_space<vmem>>, vector<1x1x128x32xbf16>
    %138 = vector.shape_cast %137 : vector<1x1x128x32xbf16> to vector<128x32xbf16>
    %cst_110 = arith.constant dense<0.000000e+00> : vector<5x32xf32>
    %139 = tpu.matmul %31, %138, %cst_110 {dimension_numbers = #tpu.dot_dimension_numbers<[1], [0], [0], [1], [0, 0, 1, 1], [], []>} : vector<5x128xbf16>, vector<128x32xbf16>, vector<5x32xf32> -> vector<5x32xf32>
    %c0_111 = arith.constant 0 : index
    %c2_112 = arith.constant 2 : index
    %c0_113 = arith.constant 0 : index
    %c0_114 = arith.constant 0 : index
    %140 = vector.load %arg10[%c0_111, %c2_112, %c0_113, %c0_114] : memref<1x4x1x32xf32, #tpu.memory_space<vmem>>, vector<1x1x1x32xf32>
    %141 = vector.shape_cast %140 : vector<1x1x1x32xf32> to vector<1x32xf32>
    %142 = vector.broadcast %141 : vector<1x32xf32> to vector<5x32xf32>
    %143 = arith.addf %139, %142 : vector<5x32xf32>
    %144 = arith.truncf %129 : vector<5x32xf32> to vector<5x32xbf16>
    %145 = arith.truncf %136 : vector<5x32xf32> to vector<5x32xbf16>
    "tpu.trace_start"() <{level = 10 : i32, message = "qd,kd->qk"}> : () -> ()
    %cst_115 = arith.constant dense<0.000000e+00> : vector<5x5xf32>
    %146 = tpu.matmul %144, %145, %cst_115 {dimension_numbers = #tpu.dot_dimension_numbers<[1], [1], [0], [0], [0, 0, 1, 0], [], []>} : vector<5x32xbf16>, vector<5x32xbf16>, vector<5x5xf32> -> vector<5x5xf32>
    "tpu.trace_stop"() : () -> ()
    %cst_116 = arith.constant 0.176776692 : f32
    %147 = vector.broadcast %cst_116 : f32 to vector<5x5xf32>
    %148 = arith.mulf %146, %147 : vector<5x5xf32>
    %cst_117 = arith.constant dense<0xFF800000> : vector<5xf32>
    %149 = vector.multi_reduction <maximumf>, %148, %cst_117 [1] : vector<5x5xf32> to vector<5xf32>
    %150 = vector.shape_cast %149 : vector<5xf32> to vector<5x1xf32>
    %151 = vector.broadcast %150 : vector<5x1xf32> to vector<5x5xf32>
    %152 = arith.subf %148, %151 : vector<5x5xf32>
    %153 = math.exp %152 : vector<5x5xf32>
    %cst_118 = arith.constant dense<0.000000e+00> : vector<5xf32>
    %154 = vector.multi_reduction <add>, %153, %cst_118 [1] : vector<5x5xf32> to vector<5xf32>
    %155 = vector.shape_cast %154 : vector<5xf32> to vector<5x1xf32>
    %156 = tpu.reciprocal %155 {approx = true} : vector<5x1xf32> -> vector<5x1xf32>
    %157 = vector.broadcast %156 : vector<5x1xf32> to vector<5x5xf32>
    %158 = arith.mulf %153, %157 : vector<5x5xf32>
    %159 = arith.truncf %158 : vector<5x5xf32> to vector<5x5xbf16>
    %160 = arith.truncf %143 : vector<5x32xf32> to vector<5x32xbf16>
    %cst_119 = arith.constant dense<0.000000e+00> : vector<5x32xf32>
    %161 = tpu.matmul %159, %160, %cst_119 {dimension_numbers = #tpu.dot_dimension_numbers<[1], [0], [0], [1], [0, 0, 1, 1], [], []>} : vector<5x5xbf16>, vector<5x32xbf16>, vector<5x32xf32> -> vector<5x32xf32>
    %162 = arith.truncf %161 : vector<5x32xf32> to vector<5x32xbf16>
    %c0_120 = arith.constant 0 : index
    %c2_121 = arith.constant 2 : index
    %c0_122 = arith.constant 0 : index
    %c0_123 = arith.constant 0 : index
    %163 = vector.load %arg11[%c0_120, %c2_121, %c0_122, %c0_123] : memref<1x4x32x128xbf16, #tpu.memory_space<vmem>>, vector<1x1x32x128xbf16>
    %164 = vector.shape_cast %163 : vector<1x1x32x128xbf16> to vector<32x128xbf16>
    %cst_124 = arith.constant dense<0.000000e+00> : vector<5x128xf32>
    %165 = tpu.matmul %162, %164, %cst_124 {dimension_numbers = #tpu.dot_dimension_numbers<[1], [0], [0], [1], [0, 0, 1, 1], [], []>} : vector<5x32xbf16>, vector<32x128xbf16>, vector<5x128xf32> -> vector<5x128xf32>
    %166 = arith.addf %122, %165 : vector<5x128xf32>
    %c0_125 = arith.constant 0 : index
    %c3 = arith.constant 3 : index
    %c0_126 = arith.constant 0 : index
    %c0_127 = arith.constant 0 : index
    %167 = vector.load %arg5[%c0_125, %c3, %c0_126, %c0_127] : memref<1x4x128x32xbf16, #tpu.memory_space<vmem>>, vector<1x1x128x32xbf16>
    %168 = vector.shape_cast %167 : vector<1x1x128x32xbf16> to vector<128x32xbf16>
    %cst_128 = arith.constant dense<0.000000e+00> : vector<5x32xf32>
    %169 = tpu.matmul %31, %168, %cst_128 {dimension_numbers = #tpu.dot_dimension_numbers<[1], [0], [0], [1], [0, 0, 1, 1], [], []>} : vector<5x128xbf16>, vector<128x32xbf16>, vector<5x32xf32> -> vector<5x32xf32>
    %c0_129 = arith.constant 0 : index
    %c3_130 = arith.constant 3 : index
    %c0_131 = arith.constant 0 : index
    %c0_132 = arith.constant 0 : index
    %170 = vector.load %arg6[%c0_129, %c3_130, %c0_131, %c0_132] : memref<1x4x1x32xf32, #tpu.memory_space<vmem>>, vector<1x1x1x32xf32>
    %171 = vector.shape_cast %170 : vector<1x1x1x32xf32> to vector<1x32xf32>
    %172 = vector.broadcast %171 : vector<1x32xf32> to vector<5x32xf32>
    %173 = arith.addf %169, %172 : vector<5x32xf32>
    %c0_133 = arith.constant 0 : index
    %c3_134 = arith.constant 3 : index
    %c0_135 = arith.constant 0 : index
    %c0_136 = arith.constant 0 : index
    %174 = vector.load %arg7[%c0_133, %c3_134, %c0_135, %c0_136] : memref<1x4x128x32xbf16, #tpu.memory_space<vmem>>, vector<1x1x128x32xbf16>
    %175 = vector.shape_cast %174 : vector<1x1x128x32xbf16> to vector<128x32xbf16>
    %cst_137 = arith.constant dense<0.000000e+00> : vector<5x32xf32>
    %176 = tpu.matmul %31, %175, %cst_137 {dimension_numbers = #tpu.dot_dimension_numbers<[1], [0], [0], [1], [0, 0, 1, 1], [], []>} : vector<5x128xbf16>, vector<128x32xbf16>, vector<5x32xf32> -> vector<5x32xf32>
    %c0_138 = arith.constant 0 : index
    %c3_139 = arith.constant 3 : index
    %c0_140 = arith.constant 0 : index
    %c0_141 = arith.constant 0 : index
    %177 = vector.load %arg8[%c0_138, %c3_139, %c0_140, %c0_141] : memref<1x4x1x32xf32, #tpu.memory_space<vmem>>, vector<1x1x1x32xf32>
    %178 = vector.shape_cast %177 : vector<1x1x1x32xf32> to vector<1x32xf32>
    %179 = vector.broadcast %178 : vector<1x32xf32> to vector<5x32xf32>
    %180 = arith.addf %176, %179 : vector<5x32xf32>
    %c0_142 = arith.constant 0 : index
    %c3_143 = arith.constant 3 : index
    %c0_144 = arith.constant 0 : index
    %c0_145 = arith.constant 0 : index
    %181 = vector.load %arg9[%c0_142, %c3_143, %c0_144, %c0_145] : memref<1x4x128x32xbf16, #tpu.memory_space<vmem>>, vector<1x1x128x32xbf16>
    %182 = vector.shape_cast %181 : vector<1x1x128x32xbf16> to vector<128x32xbf16>
    %cst_146 = arith.constant dense<0.000000e+00> : vector<5x32xf32>
    %183 = tpu.matmul %31, %182, %cst_146 {dimension_numbers = #tpu.dot_dimension_numbers<[1], [0], [0], [1], [0, 0, 1, 1], [], []>} : vector<5x128xbf16>, vector<128x32xbf16>, vector<5x32xf32> -> vector<5x32xf32>
    %c0_147 = arith.constant 0 : index
    %c3_148 = arith.constant 3 : index
    %c0_149 = arith.constant 0 : index
    %c0_150 = arith.constant 0 : index
    %184 = vector.load %arg10[%c0_147, %c3_148, %c0_149, %c0_150] : memref<1x4x1x32xf32, #tpu.memory_space<vmem>>, vector<1x1x1x32xf32>
    %185 = vector.shape_cast %184 : vector<1x1x1x32xf32> to vector<1x32xf32>
    %186 = vector.broadcast %185 : vector<1x32xf32> to vector<5x32xf32>
    %187 = arith.addf %183, %186 : vector<5x32xf32>
    %188 = arith.truncf %173 : vector<5x32xf32> to vector<5x32xbf16>
    %189 = arith.truncf %180 : vector<5x32xf32> to vector<5x32xbf16>
    "tpu.trace_start"() <{level = 10 : i32, message = "qd,kd->qk"}> : () -> ()
    %cst_151 = arith.constant dense<0.000000e+00> : vector<5x5xf32>
    %190 = tpu.matmul %188, %189, %cst_151 {dimension_numbers = #tpu.dot_dimension_numbers<[1], [1], [0], [0], [0, 0, 1, 0], [], []>} : vector<5x32xbf16>, vector<5x32xbf16>, vector<5x5xf32> -> vector<5x5xf32>
    "tpu.trace_stop"() : () -> ()
    %cst_152 = arith.constant 0.176776692 : f32
    %191 = vector.broadcast %cst_152 : f32 to vector<5x5xf32>
    %192 = arith.mulf %190, %191 : vector<5x5xf32>
    %cst_153 = arith.constant dense<0xFF800000> : vector<5xf32>
    %193 = vector.multi_reduction <maximumf>, %192, %cst_153 [1] : vector<5x5xf32> to vector<5xf32>
    %194 = vector.shape_cast %193 : vector<5xf32> to vector<5x1xf32>
    %195 = vector.broadcast %194 : vector<5x1xf32> to vector<5x5xf32>
    %196 = arith.subf %192, %195 : vector<5x5xf32>
    %197 = math.exp %196 : vector<5x5xf32>
    %cst_154 = arith.constant dense<0.000000e+00> : vector<5xf32>
    %198 = vector.multi_reduction <add>, %197, %cst_154 [1] : vector<5x5xf32> to vector<5xf32>
    %199 = vector.shape_cast %198 : vector<5xf32> to vector<5x1xf32>
    %200 = tpu.reciprocal %199 {approx = true} : vector<5x1xf32> -> vector<5x1xf32>
    %201 = vector.broadcast %200 : vector<5x1xf32> to vector<5x5xf32>
    %202 = arith.mulf %197, %201 : vector<5x5xf32>
    %203 = arith.truncf %202 : vector<5x5xf32> to vector<5x5xbf16>
    %204 = arith.truncf %187 : vector<5x32xf32> to vector<5x32xbf16>
    %cst_155 = arith.constant dense<0.000000e+00> : vector<5x32xf32>
    %205 = tpu.matmul %203, %204, %cst_155 {dimension_numbers = #tpu.dot_dimension_numbers<[1], [0], [0], [1], [0, 0, 1, 1], [], []>} : vector<5x5xbf16>, vector<5x32xbf16>, vector<5x32xf32> -> vector<5x32xf32>
    %206 = arith.truncf %205 : vector<5x32xf32> to vector<5x32xbf16>
    %c0_156 = arith.constant 0 : index
    %c3_157 = arith.constant 3 : index
    %c0_158 = arith.constant 0 : index
    %c0_159 = arith.constant 0 : index
    %207 = vector.load %arg11[%c0_156, %c3_157, %c0_158, %c0_159] : memref<1x4x32x128xbf16, #tpu.memory_space<vmem>>, vector<1x1x32x128xbf16>
    %208 = vector.shape_cast %207 : vector<1x1x32x128xbf16> to vector<32x128xbf16>
    %cst_160 = arith.constant dense<0.000000e+00> : vector<5x128xf32>
    %209 = tpu.matmul %206, %208, %cst_160 {dimension_numbers = #tpu.dot_dimension_numbers<[1], [0], [0], [1], [0, 0, 1, 1], [], []>} : vector<5x32xbf16>, vector<32x128xbf16>, vector<5x128xf32> -> vector<5x128xf32>
    %210 = arith.addf %166, %209 : vector<5x128xf32>
    %211 = arith.addf %4, %210 : vector<5x128xf32>
    %c0_161 = arith.constant 0 : index
    %c0_162 = arith.constant 0 : index
    %c0_163 = arith.constant 0 : index
    %212 = vector.load %arg13[%c0_161, %c0_162, %c0_163] : memref<1x1x128xf32, #tpu.memory_space<vmem>>, vector<1x1x128xf32>
    %213 = vector.shape_cast %212 : vector<1x1x128xf32> to vector<1x128xf32>
    %c0_164 = arith.constant 0 : index
    %c0_165 = arith.constant 0 : index
    %c0_166 = arith.constant 0 : index
    %214 = vector.load %arg14[%c0_164, %c0_165, %c0_166] : memref<1x1x128xf32, #tpu.memory_space<vmem>>, vector<1x1x128xf32>
    %215 = vector.shape_cast %214 : vector<1x1x128xf32> to vector<1x128xf32>
    %cst_167 = arith.constant dense<0.000000e+00> : vector<5xf32>
    %216 = vector.multi_reduction <add>, %211, %cst_167 [1] : vector<5x128xf32> to vector<5xf32>
    %217 = vector.shape_cast %216 : vector<5xf32> to vector<5x1xf32>
    %cst_168 = arith.constant 1.280000e+02 : f32
    %218 = vector.broadcast %cst_168 : f32 to vector<5x1xf32>
    %219 = arith.divf %217, %218 : vector<5x1xf32>
    %220 = vector.broadcast %219 : vector<5x1xf32> to vector<5x128xf32>
    %221 = arith.subf %211, %220 : vector<5x128xf32>
    %222 = arith.mulf %221, %221 : vector<5x128xf32>
    %cst_169 = arith.constant dense<0.000000e+00> : vector<5xf32>
    %223 = vector.multi_reduction <add>, %222, %cst_169 [1] : vector<5x128xf32> to vector<5xf32>
    %224 = vector.shape_cast %223 : vector<5xf32> to vector<5x1xf32>
    %cst_170 = arith.constant 1.280000e+02 : f32
    %225 = vector.broadcast %cst_170 : f32 to vector<5x1xf32>
    %226 = arith.divf %224, %225 : vector<5x1xf32>
    %227 = vector.broadcast %219 : vector<5x1xf32> to vector<5x128xf32>
    %228 = arith.subf %211, %227 : vector<5x128xf32>
    %cst_171 = arith.constant 9.99999997E-7 : f32
    %229 = vector.broadcast %cst_171 : f32 to vector<5x1xf32>
    %230 = arith.addf %226, %229 : vector<5x1xf32>
    %231 = math.rsqrt %230 : vector<5x1xf32>
    %232 = vector.broadcast %231 : vector<5x1xf32> to vector<5x128xf32>
    %233 = arith.mulf %228, %232 : vector<5x128xf32>
    %234 = vector.broadcast %213 : vector<1x128xf32> to vector<5x128xf32>
    %235 = arith.mulf %233, %234 : vector<5x128xf32>
    %236 = vector.broadcast %215 : vector<1x128xf32> to vector<5x128xf32>
    %237 = arith.addf %235, %236 : vector<5x128xf32>
    %238 = arith.truncf %237 : vector<5x128xf32> to vector<5x128xbf16>
    %c0_172 = arith.constant 0 : index
    %c0_173 = arith.constant 0 : index
    %c0_174 = arith.constant 0 : index
    %239 = vector.load %arg15[%c0_172, %c0_173, %c0_174] : memref<1x128x512xbf16, #tpu.memory_space<vmem>>, vector<1x128x512xbf16>
    %240 = vector.shape_cast %239 : vector<1x128x512xbf16> to vector<128x512xbf16>
    %cst_175 = arith.constant dense<0.000000e+00> : vector<5x512xf32>
    %241 = tpu.matmul %238, %240, %cst_175 {dimension_numbers = #tpu.dot_dimension_numbers<[1], [0], [0], [1], [0, 0, 1, 1], [], []>} : vector<5x128xbf16>, vector<128x512xbf16>, vector<5x512xf32> -> vector<5x512xf32>
    %c0_176 = arith.constant 0 : index
    %c0_177 = arith.constant 0 : index
    %c0_178 = arith.constant 0 : index
    %242 = vector.load %arg16[%c0_176, %c0_177, %c0_178] : memref<1x1x512xf32, #tpu.memory_space<vmem>>, vector<1x1x512xf32>
    %243 = vector.shape_cast %242 : vector<1x1x512xf32> to vector<1x512xf32>
    %244 = vector.broadcast %243 : vector<1x512xf32> to vector<5x512xf32>
    %245 = arith.addf %241, %244 : vector<5x512xf32>
    %246 = arith.mulf %245, %245 : vector<5x512xf32>
    %247 = arith.mulf %245, %246 : vector<5x512xf32>
    %cst_179 = arith.constant 4.471500e-02 : f32
    %248 = vector.broadcast %cst_179 : f32 to vector<5x512xf32>
    %249 = arith.mulf %248, %247 : vector<5x512xf32>
    %250 = arith.addf %245, %249 : vector<5x512xf32>
    %cst_180 = arith.constant 0.797884583 : f32
    %251 = vector.broadcast %cst_180 : f32 to vector<5x512xf32>
    %252 = arith.mulf %251, %250 : vector<5x512xf32>
    %253 = math.tanh %252 : vector<5x512xf32>
    %cst_181 = arith.constant 1.000000e+00 : f32
    %254 = vector.broadcast %cst_181 : f32 to vector<5x512xf32>
    %255 = arith.addf %254, %253 : vector<5x512xf32>
    %cst_182 = arith.constant 5.000000e-01 : f32
    %256 = vector.broadcast %cst_182 : f32 to vector<5x512xf32>
    %257 = arith.mulf %256, %255 : vector<5x512xf32>
    %258 = arith.mulf %245, %257 : vector<5x512xf32>
    %259 = arith.truncf %258 : vector<5x512xf32> to vector<5x512xbf16>
    %c0_183 = arith.constant 0 : index
    %c0_184 = arith.constant 0 : index
    %c0_185 = arith.constant 0 : index
    %260 = vector.load %arg17[%c0_183, %c0_184, %c0_185] : memref<1x512x128xbf16, #tpu.memory_space<vmem>>, vector<1x512x128xbf16>
    %261 = vector.shape_cast %260 : vector<1x512x128xbf16> to vector<512x128xbf16>
    %cst_186 = arith.constant dense<0.000000e+00> : vector<5x128xf32>
    %262 = tpu.matmul %259, %261, %cst_186 {dimension_numbers = #tpu.dot_dimension_numbers<[1], [0], [0], [1], [0, 0, 1, 1], [], []>} : vector<5x512xbf16>, vector<512x128xbf16>, vector<5x128xf32> -> vector<5x128xf32>
    %c0_187 = arith.constant 0 : index
    %c0_188 = arith.constant 0 : index
    %c0_189 = arith.constant 0 : index
    %263 = vector.load %arg18[%c0_187, %c0_188, %c0_189] : memref<1x1x128xf32, #tpu.memory_space<vmem>>, vector<1x1x128xf32>
    %264 = vector.shape_cast %263 : vector<1x1x128xf32> to vector<1x128xf32>
    %265 = vector.broadcast %264 : vector<1x128xf32> to vector<5x128xf32>
    %266 = arith.addf %262, %265 : vector<5x128xf32>
    %267 = arith.addf %211, %266 : vector<5x128xf32>
    %c0_190 = arith.constant 0 : index
    %c0_191 = arith.constant 0 : index
    %c0_192 = arith.constant 0 : index
    %268 = vector.load %arg19[%c0_190, %c0_191, %c0_192] : memref<1x5x128xf32, #tpu.memory_space<vmem>>, vector<1x5x128xf32>
    %269 = vector.shape_cast %268 : vector<1x5x128xf32> to vector<5x128xf32>
    %270 = vector.shape_cast %267 : vector<5x128xf32> to vector<1x5x128xf32>
    tpu.vector_store %arg19[%c0_190, %c0_191, %c0_192], %270 {strides = array<i32>} : memref<1x5x128xf32, #tpu.memory_space<vmem>>, vector<1x5x128xf32>,
    return
  }
  func.func @transform_0(%arg0: i32, %arg1: i32) -> (i32, i32, i32) {
    %c0_i32 = arith.constant 0 : i32
    %c0_i32_0 = arith.constant 0 : i32
    %c0_i32_1 = arith.constant 0 : i32
    return %arg0, %c0_i32, %c0_i32_0 : i32, i32, i32
  }
  func.func @transform_1(%arg0: i32, %arg1: i32) -> (i32, i32, i32) {
    %c0_i32 = arith.constant 0 : i32
    %c0_i32_0 = arith.constant 0 : i32
    %c0_i32_1 = arith.constant 0 : i32
    return %arg1, %c0_i32, %c0_i32_0 : i32, i32, i32
  }
  func.func @transform_2(%arg0: i32, %arg1: i32) -> (i32, i32, i32) {
    %c0_i32 = arith.constant 0 : i32
    %c0_i32_0 = arith.constant 0 : i32
    %c0_i32_1 = arith.constant 0 : i32
    return %arg1, %c0_i32, %c0_i32_0 : i32, i32, i32
  }
  func.func @transform_3(%arg0: i32, %arg1: i32) -> (i32, i32, i32, i32) {
    %c0_i32 = arith.constant 0 : i32
    %c0_i32_0 = arith.constant 0 : i32
    %c0_i32_1 = arith.constant 0 : i32
    %c0_i32_2 = arith.constant 0 : i32
    return %arg1, %c0_i32, %c0_i32_0, %c0_i32_1 : i32, i32, i32, i32
  }
  func.func @transform_4(%arg0: i32, %arg1: i32) -> (i32, i32, i32, i32) {
    %c0_i32 = arith.constant 0 : i32
    %c0_i32_0 = arith.constant 0 : i32
    %c0_i32_1 = arith.constant 0 : i32
    %c0_i32_2 = arith.constant 0 : i32
    return %arg1, %c0_i32, %c0_i32_0, %c0_i32_1 : i32, i32, i32, i32
  }
  func.func @transform_5(%arg0: i32, %arg1: i32) -> (i32, i32, i32, i32) {
    %c0_i32 = arith.constant 0 : i32
    %c0_i32_0 = arith.constant 0 : i32
    %c0_i32_1 = arith.constant 0 : i32
    %c0_i32_2 = arith.constant 0 : i32
    return %arg1, %c0_i32, %c0_i32_0, %c0_i32_1 : i32, i32, i32, i32
  }
  func.func @transform_6(%arg0: i32, %arg1: i32) -> (i32, i32, i32, i32) {
    %c0_i32 = arith.constant 0 : i32
    %c0_i32_0 = arith.constant 0 : i32
    %c0_i32_1 = arith.constant 0 : i32
    %c0_i32_2 = arith.constant 0 : i32
    return %arg1, %c0_i32, %c0_i32_0, %c0_i32_1 : i32, i32, i32, i32
  }
  func.func @transform_7(%arg0: i32, %arg1: i32) -> (i32, i32, i32, i32) {
    %c0_i32 = arith.constant 0 : i32
    %c0_i32_0 = arith.constant 0 : i32
    %c0_i32_1 = arith.constant 0 : i32
    %c0_i32_2 = arith.constant 0 : i32
    return %arg1, %c0_i32, %c0_i32_0, %c0_i32_1 : i32, i32, i32, i32
  }
  func.func @transform_8(%arg0: i32, %arg1: i32) -> (i32, i32, i32, i32) {
    %c0_i32 = arith.constant 0 : i32
    %c0_i32_0 = arith.constant 0 : i32
    %c0_i32_1 = arith.constant 0 : i32
    %c0_i32_2 = arith.constant 0 : i32
    return %arg1, %c0_i32, %c0_i32_0, %c0_i32_1 : i32, i32, i32, i32
  }
  func.func @transform_9(%arg0: i32, %arg1: i32) -> (i32, i32, i32, i32) {
    %c0_i32 = arith.constant 0 : i32
    %c0_i32_0 = arith.constant 0 : i32
    %c0_i32_1 = arith.constant 0 : i32
    %c0_i32_2 = arith.constant 0 : i32
    return %arg1, %c0_i32, %c0_i32_0, %c0_i32_1 : i32, i32, i32, i32
  }
  func.func @transform_10(%arg0: i32, %arg1: i32) -> (i32, i32, i32) {
    %c0_i32 = arith.constant 0 : i32
    %c0_i32_0 = arith.constant 0 : i32
    %c0_i32_1 = arith.constant 0 : i32
    return %arg1, %c0_i32, %c0_i32_0 : i32, i32, i32
  }
  func.func @transform_11(%arg0: i32, %arg1: i32) -> (i32, i32, i32) {
    %c0_i32 = arith.constant 0 : i32
    %c0_i32_0 = arith.constant 0 : i32
    %c0_i32_1 = arith.constant 0 : i32
    return %arg1, %c0_i32, %c0_i32_0 : i32, i32, i32
  }
  func.func @transform_12(%arg0: i32, %arg1: i32) -> (i32, i32, i32) {
    %c0_i32 = arith.constant 0 : i32
    %c0_i32_0 = arith.constant 0 : i32
    %c0_i32_1 = arith.constant 0 : i32
    return %arg1, %c0_i32, %c0_i32_0 : i32, i32, i32
  }
  func.func @transform_13(%arg0: i32, %arg1: i32) -> (i32, i32, i32) {
    %c0_i32 = arith.constant 0 : i32
    %c0_i32_0 = arith.constant 0 : i32
    %c0_i32_1 = arith.constant 0 : i32
    return %arg1, %c0_i32, %c0_i32_0 : i32, i32, i32
  }
  func.func @transform_14(%arg0: i32, %arg1: i32) -> (i32, i32, i32) {
    %c0_i32 = arith.constant 0 : i32
    %c0_i32_0 = arith.constant 0 : i32
    %c0_i32_1 = arith.constant 0 : i32
    return %arg1, %c0_i32, %c0_i32_0 : i32, i32, i32
  }
  func.func @transform_15(%arg0: i32, %arg1: i32) -> (i32, i32, i32) {
    %c0_i32 = arith.constant 0 : i32
    %c0_i32_0 = arith.constant 0 : i32
    %c0_i32_1 = arith.constant 0 : i32
    return %arg1, %c0_i32, %c0_i32_0 : i32, i32, i32
  }
  func.func @transform_16(%arg0: i32, %arg1: i32) -> (i32, i32, i32) {
    %c0_i32 = arith.constant 0 : i32
    %c0_i32_0 = arith.constant 0 : i32
    %c0_i32_1 = arith.constant 0 : i32
    return %arg1, %c0_i32, %c0_i32_0 : i32, i32, i32
  }
  func.func @transform_17(%arg0: i32, %arg1: i32) -> (i32, i32, i32) {
    %c0_i32 = arith.constant 0 : i32
    %c0_i32_0 = arith.constant 0 : i32
    %c0_i32_1 = arith.constant 0 : i32
    return %arg0, %c0_i32, %c0_i32_0 : i32, i32, i32
  }
}

module attributes {stable_mosaic.version = 11 : i64} {
  func.func @_blocks_kernel(%arg0: i32, %arg1: i32, %arg2: memref<1x5x128xf32, #tpu.memory_space<vmem>>, %arg3: memref<1x1x128xf32, #tpu.memory_space<vmem>>, %arg4: memref<1x1x128xf32, #tpu.memory_space<vmem>>, %arg5: memref<1x4x128x32xbf16, #tpu.memory_space<vmem>>, %arg6: memref<1x4x1x32xf32, #tpu.memory_space<vmem>>, %arg7: memref<1x4x128x32xbf16, #tpu.memory_space<vmem>>, %arg8: memref<1x4x1x32xf32, #tpu.memory_space<vmem>>, %arg9: memref<1x4x128x32xbf16, #tpu.memory_space<vmem>>, %arg10: memref<1x4x1x32xf32, #tpu.memory_space<vmem>>, %arg11: memref<1x4x32x128xbf16, #tpu.memory_space<vmem>>, %arg12: memref<1x1x128xf32, #tpu.memory_space<vmem>>, %arg13: memref<1x1x128xf32, #tpu.memory_space<vmem>>, %arg14: memref<1x1x128xf32, #tpu.memory_space<vmem>>, %arg15: memref<1x128x512xbf16, #tpu.memory_space<vmem>>, %arg16: memref<1x1x512xf32, #tpu.memory_space<vmem>>, %arg17: memref<1x512x128xbf16, #tpu.memory_space<vmem>>, %arg18: memref<1x1x128xf32, #tpu.memory_space<vmem>>, %arg19: memref<1x5x128xf32, #tpu.memory_space<vmem>>) attributes {dimension_semantics = [#tpu.dimension_semantics<parallel>, #tpu.dimension_semantics<arbitrary>], iteration_bounds = array<i64: 2, 1>, scalar_prefetch = 0 : i64, scratch_operands = 0 : i64, tpu.core_type = #tpu.core_type<tc>, window_params = [{transform_indices = @transform_0, window_bounds = array<i64: 1, 5, 128>}, {transform_indices = @transform_1, window_bounds = array<i64: 1, 1, 128>}, {transform_indices = @transform_2, window_bounds = array<i64: 1, 1, 128>}, {transform_indices = @transform_3, window_bounds = array<i64: 1, 4, 128, 32>}, {transform_indices = @transform_4, window_bounds = array<i64: 1, 4, 1, 32>}, {transform_indices = @transform_5, window_bounds = array<i64: 1, 4, 128, 32>}, {transform_indices = @transform_6, window_bounds = array<i64: 1, 4, 1, 32>}, {transform_indices = @transform_7, window_bounds = array<i64: 1, 4, 128, 32>}, {transform_indices = @transform_8, window_bounds = array<i64: 1, 4, 1, 32>}, {transform_indices = @transform_9, window_bounds = array<i64: 1, 4, 32, 128>}, {transform_indices = @transform_10, window_bounds = array<i64: 1, 1, 128>}, {transform_indices = @transform_11, window_bounds = array<i64: 1, 1, 128>}, {transform_indices = @transform_12, window_bounds = array<i64: 1, 1, 128>}, {transform_indices = @transform_13, window_bounds = array<i64: 1, 128, 512>}, {transform_indices = @transform_14, window_bounds = array<i64: 1, 1, 512>}, {transform_indices = @transform_15, window_bounds = array<i64: 1, 512, 128>}, {transform_indices = @transform_16, window_bounds = array<i64: 1, 1, 128>}, {transform_indices = @transform_17, window_bounds = array<i64: 1, 5, 128>}]} {
    %c0_i32 = arith.constant 0 : i32
    %0 = arith.cmpi eq, %arg1, %c0_i32 : i32
    %1 = arith.extui %0 : i1 to i32
    %c0_i32_0 = arith.constant 0 : i32
    %2 = arith.cmpi ne, %1, %c0_i32_0 : i32
    scf.if %2 {
      %c0_193 = arith.constant 0 : index
      %c0_194 = arith.constant 0 : index
      %c0_195 = arith.constant 0 : index
      %271 = vector.load %arg2[%c0_193, %c0_194, %c0_195] : memref<1x5x128xf32, #tpu.memory_space<vmem>>, vector<1x5x128xf32>
      %272 = vector.shape_cast %271 : vector<1x5x128xf32> to vector<5x128xf32>
      %c0_196 = arith.constant 0 : index
      %c0_197 = arith.constant 0 : index
      %c0_198 = arith.constant 0 : index
      %273 = vector.load %arg19[%c0_196, %c0_197, %c0_198] : memref<1x5x128xf32, #tpu.memory_space<vmem>>, vector<1x5x128xf32>
      %274 = vector.shape_cast %273 : vector<1x5x128xf32> to vector<5x128xf32>
      %275 = vector.shape_cast %272 : vector<5x128xf32> to vector<1x5x128xf32>
      tpu.vector_store %arg19[%c0_196, %c0_197, %c0_198], %275 {strides = array<i32>} : memref<1x5x128xf32, #tpu.memory_space<vmem>>, vector<1x5x128xf32>,
    } else {
    }
    %c0 = arith.constant 0 : index
    %c0_1 = arith.constant 0 : index
    %c0_2 = arith.constant 0 : index
    %3 = vector.load %arg19[%c0, %c0_1, %c0_2] : memref<1x5x128xf32, #tpu.memory_space<vmem>>, vector<1x5x128xf32>
    %4 = vector.shape_cast %3 : vector<1x5x128xf32> to vector<5x128xf32>
    %c0_3 = arith.constant 0 : index
    %c0_4 = arith.constant 0 : index
    %c0_5 = arith.constant 0 : index
    %5 = vector.load %arg3[%c0_3, %c0_4, %c0_5] : memref<1x1x128xf32, #tpu.memory_space<vmem>>, vector<1x1x128xf32>
    %6 = vector.shape_cast %5 : vector<1x1x128xf32> to vector<1x128xf32>
    %c0_6 = arith.constant 0 : index
    %c0_7 = arith.constant 0 : index
    %c0_8 = arith.constant 0 : index
    %7 = vector.load %arg4[%c0_6, %c0_7, %c0_8] : memref<1x1x128xf32, #tpu.memory_space<vmem>>, vector<1x1x128xf32>
    %8 = vector.shape_cast %7 : vector<1x1x128xf32> to vector<1x128xf32>
    %cst = arith.constant dense<0.000000e+00> : vector<5xf32>
    %9 = vector.multi_reduction <add>, %4, %cst [1] : vector<5x128xf32> to vector<5xf32>
    %10 = vector.shape_cast %9 : vector<5xf32> to vector<5x1xf32>
    %cst_9 = arith.constant 1.280000e+02 : f32
    %11 = vector.broadcast %cst_9 : f32 to vector<5x1xf32>
    %12 = arith.divf %10, %11 : vector<5x1xf32>
    %13 = vector.broadcast %12 : vector<5x1xf32> to vector<5x128xf32>
    %14 = arith.subf %4, %13 : vector<5x128xf32>
    %15 = arith.mulf %14, %14 : vector<5x128xf32>
    %cst_10 = arith.constant dense<0.000000e+00> : vector<5xf32>
    %16 = vector.multi_reduction <add>, %15, %cst_10 [1] : vector<5x128xf32> to vector<5xf32>
    %17 = vector.shape_cast %16 : vector<5xf32> to vector<5x1xf32>
    %cst_11 = arith.constant 1.280000e+02 : f32
    %18 = vector.broadcast %cst_11 : f32 to vector<5x1xf32>
    %19 = arith.divf %17, %18 : vector<5x1xf32>
    %20 = vector.broadcast %12 : vector<5x1xf32> to vector<5x128xf32>
    %21 = arith.subf %4, %20 : vector<5x128xf32>
    %cst_12 = arith.constant 9.99999997E-7 : f32
    %22 = vector.broadcast %cst_12 : f32 to vector<5x1xf32>
    %23 = arith.addf %19, %22 : vector<5x1xf32>
    %24 = math.rsqrt %23 : vector<5x1xf32>
    %25 = vector.broadcast %24 : vector<5x1xf32> to vector<5x128xf32>
    %26 = arith.mulf %21, %25 : vector<5x128xf32>
    %27 = vector.broadcast %6 : vector<1x128xf32> to vector<5x128xf32>
    %28 = arith.mulf %26, %27 : vector<5x128xf32>
    %29 = vector.broadcast %8 : vector<1x128xf32> to vector<5x128xf32>
    %30 = arith.addf %28, %29 : vector<5x128xf32>
    %31 = arith.truncf %30 : vector<5x128xf32> to vector<5x128xbf16>
    %c0_13 = arith.constant 0 : index
    %c0_14 = arith.constant 0 : index
    %c0_15 = arith.constant 0 : index
    %32 = vector.load %arg12[%c0_13, %c0_14, %c0_15] : memref<1x1x128xf32, #tpu.memory_space<vmem>>, vector<1x1x128xf32>
    %33 = vector.shape_cast %32 : vector<1x1x128xf32> to vector<1x128xf32>
    %c0_16 = arith.constant 0 : index
    %c0_17 = arith.constant 0 : index
    %c0_18 = arith.constant 0 : index
    %c0_19 = arith.constant 0 : index
    %34 = vector.load %arg5[%c0_16, %c0_17, %c0_18, %c0_19] : memref<1x4x128x32xbf16, #tpu.memory_space<vmem>>, vector<1x1x128x32xbf16>
    %35 = vector.shape_cast %34 : vector<1x1x128x32xbf16> to vector<128x32xbf16>
    %cst_20 = arith.constant dense<0.000000e+00> : vector<5x32xf32>
    %36 = tpu.matmul %31, %35, %cst_20 {dimension_numbers = #tpu.dot_dimension_numbers<[1], [0], [0], [1], [0, 0, 1, 1], [], []>} : vector<5x128xbf16>, vector<128x32xbf16>, vector<5x32xf32> -> vector<5x32xf32>
    %c0_21 = arith.constant 0 : index
    %c0_22 = arith.constant 0 : index
    %c0_23 = arith.constant 0 : index
    %c0_24 = arith.constant 0 : index
    %37 = vector.load %arg6[%c0_21, %c0_22, %c0_23, %c0_24] : memref<1x4x1x32xf32, #tpu.memory_space<vmem>>, vector<1x1x1x32xf32>
    %38 = vector.shape_cast %37 : vector<1x1x1x32xf32> to vector<1x32xf32>
    %39 = vector.broadcast %38 : vector<1x32xf32> to vector<5x32xf32>
    %40 = arith.addf %36, %39 : vector<5x32xf32>
    %c0_25 = arith.constant 0 : index
    %c0_26 = arith.constant 0 : index
    %c0_27 = arith.constant 0 : index
    %c0_28 = arith.constant 0 : index
    %41 = vector.load %arg7[%c0_25, %c0_26, %c0_27, %c0_28] : memref<1x4x128x32xbf16, #tpu.memory_space<vmem>>, vector<1x1x128x32xbf16>
    %42 = vector.shape_cast %41 : vector<1x1x128x32xbf16> to vector<128x32xbf16>
    %cst_29 = arith.constant dense<0.000000e+00> : vector<5x32xf32>
    %43 = tpu.matmul %31, %42, %cst_29 {dimension_numbers = #tpu.dot_dimension_numbers<[1], [0], [0], [1], [0, 0, 1, 1], [], []>} : vector<5x128xbf16>, vector<128x32xbf16>, vector<5x32xf32> -> vector<5x32xf32>
    %c0_30 = arith.constant 0 : index
    %c0_31 = arith.constant 0 : index
    %c0_32 = arith.constant 0 : index
    %c0_33 = arith.constant 0 : index
    %44 = vector.load %arg8[%c0_30, %c0_31, %c0_32, %c0_33] : memref<1x4x1x32xf32, #tpu.memory_space<vmem>>, vector<1x1x1x32xf32>
    %45 = vector.shape_cast %44 : vector<1x1x1x32xf32> to vector<1x32xf32>
    %46 = vector.broadcast %45 : vector<1x32xf32> to vector<5x32xf32>
    %47 = arith.addf %43, %46 : vector<5x32xf32>
    %c0_34 = arith.constant 0 : index
    %c0_35 = arith.constant 0 : index
    %c0_36 = arith.constant 0 : index
    %c0_37 = arith.constant 0 : index
    %48 = vector.load %arg9[%c0_34, %c0_35, %c0_36, %c0_37] : memref<1x4x128x32xbf16, #tpu.memory_space<vmem>>, vector<1x1x128x32xbf16>
    %49 = vector.shape_cast %48 : vector<1x1x128x32xbf16> to vector<128x32xbf16>
    %cst_38 = arith.constant dense<0.000000e+00> : vector<5x32xf32>
    %50 = tpu.matmul %31, %49, %cst_38 {dimension_numbers = #tpu.dot_dimension_numbers<[1], [0], [0], [1], [0, 0, 1, 1], [], []>} : vector<5x128xbf16>, vector<128x32xbf16>, vector<5x32xf32> -> vector<5x32xf32>
    %c0_39 = arith.constant 0 : index
    %c0_40 = arith.constant 0 : index
    %c0_41 = arith.constant 0 : index
    %c0_42 = arith.constant 0 : index
    %51 = vector.load %arg10[%c0_39, %c0_40, %c0_41, %c0_42] : memref<1x4x1x32xf32, #tpu.memory_space<vmem>>, vector<1x1x1x32xf32>
    %52 = vector.shape_cast %51 : vector<1x1x1x32xf32> to vector<1x32xf32>
    %53 = vector.broadcast %52 : vector<1x32xf32> to vector<5x32xf32>
    %54 = arith.addf %50, %53 : vector<5x32xf32>
    %55 = arith.truncf %40 : vector<5x32xf32> to vector<5x32xbf16>
    %56 = arith.truncf %47 : vector<5x32xf32> to vector<5x32xbf16>
    "tpu.trace_start"() <{level = 10 : i32, message = "qd,kd->qk"}> : () -> ()
    %cst_43 = arith.constant dense<0.000000e+00> : vector<5x5xf32>
    %57 = tpu.matmul %55, %56, %cst_43 {dimension_numbers = #tpu.dot_dimension_numbers<[1], [1], [0], [0], [0, 0, 1, 0], [], []>} : vector<5x32xbf16>, vector<5x32xbf16>, vector<5x5xf32> -> vector<5x5xf32>
    "tpu.trace_stop"() : () -> ()
    %cst_44 = arith.constant 0.176776692 : f32
    %58 = vector.broadcast %cst_44 : f32 to vector<5x5xf32>
    %59 = arith.mulf %57, %58 : vector<5x5xf32>
    %cst_45 = arith.constant dense<0xFF800000> : vector<5xf32>
    %60 = vector.multi_reduction <maximumf>, %59, %cst_45 [1] : vector<5x5xf32> to vector<5xf32>
    %61 = vector.shape_cast %60 : vector<5xf32> to vector<5x1xf32>
    %62 = vector.broadcast %61 : vector<5x1xf32> to vector<5x5xf32>
    %63 = arith.subf %59, %62 : vector<5x5xf32>
    %64 = math.exp %63 : vector<5x5xf32>
    %cst_46 = arith.constant dense<0.000000e+00> : vector<5xf32>
    %65 = vector.multi_reduction <add>, %64, %cst_46 [1] : vector<5x5xf32> to vector<5xf32>
    %66 = vector.shape_cast %65 : vector<5xf32> to vector<5x1xf32>
    %67 = tpu.reciprocal %66 {approx = true} : vector<5x1xf32> -> vector<5x1xf32>
    %68 = vector.broadcast %67 : vector<5x1xf32> to vector<5x5xf32>
    %69 = arith.mulf %64, %68 : vector<5x5xf32>
    %70 = arith.truncf %69 : vector<5x5xf32> to vector<5x5xbf16>
    %71 = arith.truncf %54 : vector<5x32xf32> to vector<5x32xbf16>
    %cst_47 = arith.constant dense<0.000000e+00> : vector<5x32xf32>
    %72 = tpu.matmul %70, %71, %cst_47 {dimension_numbers = #tpu.dot_dimension_numbers<[1], [0], [0], [1], [0, 0, 1, 1], [], []>} : vector<5x5xbf16>, vector<5x32xbf16>, vector<5x32xf32> -> vector<5x32xf32>
    %73 = arith.truncf %72 : vector<5x32xf32> to vector<5x32xbf16>
    %c0_48 = arith.constant 0 : index
    %c0_49 = arith.constant 0 : index
    %c0_50 = arith.constant 0 : index
    %c0_51 = arith.constant 0 : index
    %74 = vector.load %arg11[%c0_48, %c0_49, %c0_50, %c0_51] : memref<1x4x32x128xbf16, #tpu.memory_space<vmem>>, vector<1x1x32x128xbf16>
    %75 = vector.shape_cast %74 : vector<1x1x32x128xbf16> to vector<32x128xbf16>
    %cst_52 = arith.constant dense<0.000000e+00> : vector<5x128xf32>
    %76 = tpu.matmul %73, %75, %cst_52 {dimension_numbers = #tpu.dot_dimension_numbers<[1], [0], [0], [1], [0, 0, 1, 1], [], []>} : vector<5x32xbf16>, vector<32x128xbf16>, vector<5x128xf32> -> vector<5x128xf32>
    %77 = vector.broadcast %33 : vector<1x128xf32> to vector<5x128xf32>
    %78 = arith.addf %77, %76 : vector<5x128xf32>
    %c0_53 = arith.constant 0 : index
    %c1 = arith.constant 1 : index
    %c0_54 = arith.constant 0 : index
    %c0_55 = arith.constant 0 : index
    %79 = vector.load %arg5[%c0_53, %c1, %c0_54, %c0_55] : memref<1x4x128x32xbf16, #tpu.memory_space<vmem>>, vector<1x1x128x32xbf16>
    %80 = vector.shape_cast %79 : vector<1x1x128x32xbf16> to vector<128x32xbf16>
    %cst_56 = arith.constant dense<0.000000e+00> : vector<5x32xf32>
    %81 = tpu.matmul %31, %80, %cst_56 {dimension_numbers = #tpu.dot_dimension_numbers<[1], [0], [0], [1], [0, 0, 1, 1], [], []>} : vector<5x128xbf16>, vector<128x32xbf16>, vector<5x32xf32> -> vector<5x32xf32>
    %c0_57 = arith.constant 0 : index
    %c1_58 = arith.constant 1 : index
    %c0_59 = arith.constant 0 : index
    %c0_60 = arith.constant 0 : index
    %82 = vector.load %arg6[%c0_57, %c1_58, %c0_59, %c0_60] : memref<1x4x1x32xf32, #tpu.memory_space<vmem>>, vector<1x1x1x32xf32>
    %83 = vector.shape_cast %82 : vector<1x1x1x32xf32> to vector<1x32xf32>
    %84 = vector.broadcast %83 : vector<1x32xf32> to vector<5x32xf32>
    %85 = arith.addf %81, %84 : vector<5x32xf32>
    %c0_61 = arith.constant 0 : index
    %c1_62 = arith.constant 1 : index
    %c0_63 = arith.constant 0 : index
    %c0_64 = arith.constant 0 : index
    %86 = vector.load %arg7[%c0_61, %c1_62, %c0_63, %c0_64] : memref<1x4x128x32xbf16, #tpu.memory_space<vmem>>, vector<1x1x128x32xbf16>
    %87 = vector.shape_cast %86 : vector<1x1x128x32xbf16> to vector<128x32xbf16>
    %cst_65 = arith.constant dense<0.000000e+00> : vector<5x32xf32>
    %88 = tpu.matmul %31, %87, %cst_65 {dimension_numbers = #tpu.dot_dimension_numbers<[1], [0], [0], [1], [0, 0, 1, 1], [], []>} : vector<5x128xbf16>, vector<128x32xbf16>, vector<5x32xf32> -> vector<5x32xf32>
    %c0_66 = arith.constant 0 : index
    %c1_67 = arith.constant 1 : index
    %c0_68 = arith.constant 0 : index
    %c0_69 = arith.constant 0 : index
    %89 = vector.load %arg8[%c0_66, %c1_67, %c0_68, %c0_69] : memref<1x4x1x32xf32, #tpu.memory_space<vmem>>, vector<1x1x1x32xf32>
    %90 = vector.shape_cast %89 : vector<1x1x1x32xf32> to vector<1x32xf32>
    %91 = vector.broadcast %90 : vector<1x32xf32> to vector<5x32xf32>
    %92 = arith.addf %88, %91 : vector<5x32xf32>
    %c0_70 = arith.constant 0 : index
    %c1_71 = arith.constant 1 : index
    %c0_72 = arith.constant 0 : index
    %c0_73 = arith.constant 0 : index
    %93 = vector.load %arg9[%c0_70, %c1_71, %c0_72, %c0_73] : memref<1x4x128x32xbf16, #tpu.memory_space<vmem>>, vector<1x1x128x32xbf16>
    %94 = vector.shape_cast %93 : vector<1x1x128x32xbf16> to vector<128x32xbf16>
    %cst_74 = arith.constant dense<0.000000e+00> : vector<5x32xf32>
    %95 = tpu.matmul %31, %94, %cst_74 {dimension_numbers = #tpu.dot_dimension_numbers<[1], [0], [0], [1], [0, 0, 1, 1], [], []>} : vector<5x128xbf16>, vector<128x32xbf16>, vector<5x32xf32> -> vector<5x32xf32>
    %c0_75 = arith.constant 0 : index
    %c1_76 = arith.constant 1 : index
    %c0_77 = arith.constant 0 : index
    %c0_78 = arith.constant 0 : index
    %96 = vector.load %arg10[%c0_75, %c1_76, %c0_77, %c0_78] : memref<1x4x1x32xf32, #tpu.memory_space<vmem>>, vector<1x1x1x32xf32>
    %97 = vector.shape_cast %96 : vector<1x1x1x32xf32> to vector<1x32xf32>
    %98 = vector.broadcast %97 : vector<1x32xf32> to vector<5x32xf32>
    %99 = arith.addf %95, %98 : vector<5x32xf32>
    %100 = arith.truncf %85 : vector<5x32xf32> to vector<5x32xbf16>
    %101 = arith.truncf %92 : vector<5x32xf32> to vector<5x32xbf16>
    "tpu.trace_start"() <{level = 10 : i32, message = "qd,kd->qk"}> : () -> ()
    %cst_79 = arith.constant dense<0.000000e+00> : vector<5x5xf32>
    %102 = tpu.matmul %100, %101, %cst_79 {dimension_numbers = #tpu.dot_dimension_numbers<[1], [1], [0], [0], [0, 0, 1, 0], [], []>} : vector<5x32xbf16>, vector<5x32xbf16>, vector<5x5xf32> -> vector<5x5xf32>
    "tpu.trace_stop"() : () -> ()
    %cst_80 = arith.constant 0.176776692 : f32
    %103 = vector.broadcast %cst_80 : f32 to vector<5x5xf32>
    %104 = arith.mulf %102, %103 : vector<5x5xf32>
    %cst_81 = arith.constant dense<0xFF800000> : vector<5xf32>
    %105 = vector.multi_reduction <maximumf>, %104, %cst_81 [1] : vector<5x5xf32> to vector<5xf32>
    %106 = vector.shape_cast %105 : vector<5xf32> to vector<5x1xf32>
    %107 = vector.broadcast %106 : vector<5x1xf32> to vector<5x5xf32>
    %108 = arith.subf %104, %107 : vector<5x5xf32>
    %109 = math.exp %108 : vector<5x5xf32>
    %cst_82 = arith.constant dense<0.000000e+00> : vector<5xf32>
    %110 = vector.multi_reduction <add>, %109, %cst_82 [1] : vector<5x5xf32> to vector<5xf32>
    %111 = vector.shape_cast %110 : vector<5xf32> to vector<5x1xf32>
    %112 = tpu.reciprocal %111 {approx = true} : vector<5x1xf32> -> vector<5x1xf32>
    %113 = vector.broadcast %112 : vector<5x1xf32> to vector<5x5xf32>
    %114 = arith.mulf %109, %113 : vector<5x5xf32>
    %115 = arith.truncf %114 : vector<5x5xf32> to vector<5x5xbf16>
    %116 = arith.truncf %99 : vector<5x32xf32> to vector<5x32xbf16>
    %cst_83 = arith.constant dense<0.000000e+00> : vector<5x32xf32>
    %117 = tpu.matmul %115, %116, %cst_83 {dimension_numbers = #tpu.dot_dimension_numbers<[1], [0], [0], [1], [0, 0, 1, 1], [], []>} : vector<5x5xbf16>, vector<5x32xbf16>, vector<5x32xf32> -> vector<5x32xf32>
    %118 = arith.truncf %117 : vector<5x32xf32> to vector<5x32xbf16>
    %c0_84 = arith.constant 0 : index
    %c1_85 = arith.constant 1 : index
    %c0_86 = arith.constant 0 : index
    %c0_87 = arith.constant 0 : index
    %119 = vector.load %arg11[%c0_84, %c1_85, %c0_86, %c0_87] : memref<1x4x32x128xbf16, #tpu.memory_space<vmem>>, vector<1x1x32x128xbf16>
    %120 = vector.shape_cast %119 : vector<1x1x32x128xbf16> to vector<32x128xbf16>
    %cst_88 = arith.constant dense<0.000000e+00> : vector<5x128xf32>
    %121 = tpu.matmul %118, %120, %cst_88 {dimension_numbers = #tpu.dot_dimension_numbers<[1], [0], [0], [1], [0, 0, 1, 1], [], []>} : vector<5x32xbf16>, vector<32x128xbf16>, vector<5x128xf32> -> vector<5x128xf32>
    %122 = arith.addf %78, %121 : vector<5x128xf32>
    %c0_89 = arith.constant 0 : index
    %c2 = arith.constant 2 : index
    %c0_90 = arith.constant 0 : index
    %c0_91 = arith.constant 0 : index
    %123 = vector.load %arg5[%c0_89, %c2, %c0_90, %c0_91] : memref<1x4x128x32xbf16, #tpu.memory_space<vmem>>, vector<1x1x128x32xbf16>
    %124 = vector.shape_cast %123 : vector<1x1x128x32xbf16> to vector<128x32xbf16>
    %cst_92 = arith.constant dense<0.000000e+00> : vector<5x32xf32>
    %125 = tpu.matmul %31, %124, %cst_92 {dimension_numbers = #tpu.dot_dimension_numbers<[1], [0], [0], [1], [0, 0, 1, 1], [], []>} : vector<5x128xbf16>, vector<128x32xbf16>, vector<5x32xf32> -> vector<5x32xf32>
    %c0_93 = arith.constant 0 : index
    %c2_94 = arith.constant 2 : index
    %c0_95 = arith.constant 0 : index
    %c0_96 = arith.constant 0 : index
    %126 = vector.load %arg6[%c0_93, %c2_94, %c0_95, %c0_96] : memref<1x4x1x32xf32, #tpu.memory_space<vmem>>, vector<1x1x1x32xf32>
    %127 = vector.shape_cast %126 : vector<1x1x1x32xf32> to vector<1x32xf32>
    %128 = vector.broadcast %127 : vector<1x32xf32> to vector<5x32xf32>
    %129 = arith.addf %125, %128 : vector<5x32xf32>
    %c0_97 = arith.constant 0 : index
    %c2_98 = arith.constant 2 : index
    %c0_99 = arith.constant 0 : index
    %c0_100 = arith.constant 0 : index
    %130 = vector.load %arg7[%c0_97, %c2_98, %c0_99, %c0_100] : memref<1x4x128x32xbf16, #tpu.memory_space<vmem>>, vector<1x1x128x32xbf16>
    %131 = vector.shape_cast %130 : vector<1x1x128x32xbf16> to vector<128x32xbf16>
    %cst_101 = arith.constant dense<0.000000e+00> : vector<5x32xf32>
    %132 = tpu.matmul %31, %131, %cst_101 {dimension_numbers = #tpu.dot_dimension_numbers<[1], [0], [0], [1], [0, 0, 1, 1], [], []>} : vector<5x128xbf16>, vector<128x32xbf16>, vector<5x32xf32> -> vector<5x32xf32>
    %c0_102 = arith.constant 0 : index
    %c2_103 = arith.constant 2 : index
    %c0_104 = arith.constant 0 : index
    %c0_105 = arith.constant 0 : index
    %133 = vector.load %arg8[%c0_102, %c2_103, %c0_104, %c0_105] : memref<1x4x1x32xf32, #tpu.memory_space<vmem>>, vector<1x1x1x32xf32>
    %134 = vector.shape_cast %133 : vector<1x1x1x32xf32> to vector<1x32xf32>
    %135 = vector.broadcast %134 : vector<1x32xf32> to vector<5x32xf32>
    %136 = arith.addf %132, %135 : vector<5x32xf32>
    %c0_106 = arith.constant 0 : index
    %c2_107 = arith.constant 2 : index
    %c0_108 = arith.constant 0 : index
    %c0_109 = arith.constant 0 : index
    %137 = vector.load %arg9[%c0_106, %c2_107, %c0_108, %c0_109] : memref<1x4x128x32xbf16, #tpu.memory_space<vmem>>, vector<1x1x128x32xbf16>
    %138 = vector.shape_cast %137 : vector<1x1x128x32xbf16> to vector<128x32xbf16>
    %cst_110 = arith.constant dense<0.000000e+00> : vector<5x32xf32>
    %139 = tpu.matmul %31, %138, %cst_110 {dimension_numbers = #tpu.dot_dimension_numbers<[1], [0], [0], [1], [0, 0, 1, 1], [], []>} : vector<5x128xbf16>, vector<128x32xbf16>, vector<5x32xf32> -> vector<5x32xf32>
    %c0_111 = arith.constant 0 : index
    %c2_112 = arith.constant 2 : index
    %c0_113 = arith.constant 0 : index
    %c0_114 = arith.constant 0 : index
    %140 = vector.load %arg10[%c0_111, %c2_112, %c0_113, %c0_114] : memref<1x4x1x32xf32, #tpu.memory_space<vmem>>, vector<1x1x1x32xf32>
    %141 = vector.shape_cast %140 : vector<1x1x1x32xf32> to vector<1x32xf32>
    %142 = vector.broadcast %141 : vector<1x32xf32> to vector<5x32xf32>
    %143 = arith.addf %139, %142 : vector<5x32xf32>
    %144 = arith.truncf %129 : vector<5x32xf32> to vector<5x32xbf16>
    %145 = arith.truncf %136 : vector<5x32xf32> to vector<5x32xbf16>
    "tpu.trace_start"() <{level = 10 : i32, message = "qd,kd->qk"}> : () -> ()
    %cst_115 = arith.constant dense<0.000000e+00> : vector<5x5xf32>
    %146 = tpu.matmul %144, %145, %cst_115 {dimension_numbers = #tpu.dot_dimension_numbers<[1], [1], [0], [0], [0, 0, 1, 0], [], []>} : vector<5x32xbf16>, vector<5x32xbf16>, vector<5x5xf32> -> vector<5x5xf32>
    "tpu.trace_stop"() : () -> ()
    %cst_116 = arith.constant 0.176776692 : f32
    %147 = vector.broadcast %cst_116 : f32 to vector<5x5xf32>
    %148 = arith.mulf %146, %147 : vector<5x5xf32>
    %cst_117 = arith.constant dense<0xFF800000> : vector<5xf32>
    %149 = vector.multi_reduction <maximumf>, %148, %cst_117 [1] : vector<5x5xf32> to vector<5xf32>
    %150 = vector.shape_cast %149 : vector<5xf32> to vector<5x1xf32>
    %151 = vector.broadcast %150 : vector<5x1xf32> to vector<5x5xf32>
    %152 = arith.subf %148, %151 : vector<5x5xf32>
    %153 = math.exp %152 : vector<5x5xf32>
    %cst_118 = arith.constant dense<0.000000e+00> : vector<5xf32>
    %154 = vector.multi_reduction <add>, %153, %cst_118 [1] : vector<5x5xf32> to vector<5xf32>
    %155 = vector.shape_cast %154 : vector<5xf32> to vector<5x1xf32>
    %156 = tpu.reciprocal %155 {approx = true} : vector<5x1xf32> -> vector<5x1xf32>
    %157 = vector.broadcast %156 : vector<5x1xf32> to vector<5x5xf32>
    %158 = arith.mulf %153, %157 : vector<5x5xf32>
    %159 = arith.truncf %158 : vector<5x5xf32> to vector<5x5xbf16>
    %160 = arith.truncf %143 : vector<5x32xf32> to vector<5x32xbf16>
    %cst_119 = arith.constant dense<0.000000e+00> : vector<5x32xf32>
    %161 = tpu.matmul %159, %160, %cst_119 {dimension_numbers = #tpu.dot_dimension_numbers<[1], [0], [0], [1], [0, 0, 1, 1], [], []>} : vector<5x5xbf16>, vector<5x32xbf16>, vector<5x32xf32> -> vector<5x32xf32>
    %162 = arith.truncf %161 : vector<5x32xf32> to vector<5x32xbf16>
    %c0_120 = arith.constant 0 : index
    %c2_121 = arith.constant 2 : index
    %c0_122 = arith.constant 0 : index
    %c0_123 = arith.constant 0 : index
    %163 = vector.load %arg11[%c0_120, %c2_121, %c0_122, %c0_123] : memref<1x4x32x128xbf16, #tpu.memory_space<vmem>>, vector<1x1x32x128xbf16>
    %164 = vector.shape_cast %163 : vector<1x1x32x128xbf16> to vector<32x128xbf16>
    %cst_124 = arith.constant dense<0.000000e+00> : vector<5x128xf32>
    %165 = tpu.matmul %162, %164, %cst_124 {dimension_numbers = #tpu.dot_dimension_numbers<[1], [0], [0], [1], [0, 0, 1, 1], [], []>} : vector<5x32xbf16>, vector<32x128xbf16>, vector<5x128xf32> -> vector<5x128xf32>
    %166 = arith.addf %122, %165 : vector<5x128xf32>
    %c0_125 = arith.constant 0 : index
    %c3 = arith.constant 3 : index
    %c0_126 = arith.constant 0 : index
    %c0_127 = arith.constant 0 : index
    %167 = vector.load %arg5[%c0_125, %c3, %c0_126, %c0_127] : memref<1x4x128x32xbf16, #tpu.memory_space<vmem>>, vector<1x1x128x32xbf16>
    %168 = vector.shape_cast %167 : vector<1x1x128x32xbf16> to vector<128x32xbf16>
    %cst_128 = arith.constant dense<0.000000e+00> : vector<5x32xf32>
    %169 = tpu.matmul %31, %168, %cst_128 {dimension_numbers = #tpu.dot_dimension_numbers<[1], [0], [0], [1], [0, 0, 1, 1], [], []>} : vector<5x128xbf16>, vector<128x32xbf16>, vector<5x32xf32> -> vector<5x32xf32>
    %c0_129 = arith.constant 0 : index
    %c3_130 = arith.constant 3 : index
    %c0_131 = arith.constant 0 : index
    %c0_132 = arith.constant 0 : index
    %170 = vector.load %arg6[%c0_129, %c3_130, %c0_131, %c0_132] : memref<1x4x1x32xf32, #tpu.memory_space<vmem>>, vector<1x1x1x32xf32>
    %171 = vector.shape_cast %170 : vector<1x1x1x32xf32> to vector<1x32xf32>
    %172 = vector.broadcast %171 : vector<1x32xf32> to vector<5x32xf32>
    %173 = arith.addf %169, %172 : vector<5x32xf32>
    %c0_133 = arith.constant 0 : index
    %c3_134 = arith.constant 3 : index
    %c0_135 = arith.constant 0 : index
    %c0_136 = arith.constant 0 : index
    %174 = vector.load %arg7[%c0_133, %c3_134, %c0_135, %c0_136] : memref<1x4x128x32xbf16, #tpu.memory_space<vmem>>, vector<1x1x128x32xbf16>
    %175 = vector.shape_cast %174 : vector<1x1x128x32xbf16> to vector<128x32xbf16>
    %cst_137 = arith.constant dense<0.000000e+00> : vector<5x32xf32>
    %176 = tpu.matmul %31, %175, %cst_137 {dimension_numbers = #tpu.dot_dimension_numbers<[1], [0], [0], [1], [0, 0, 1, 1], [], []>} : vector<5x128xbf16>, vector<128x32xbf16>, vector<5x32xf32> -> vector<5x32xf32>
    %c0_138 = arith.constant 0 : index
    %c3_139 = arith.constant 3 : index
    %c0_140 = arith.constant 0 : index
    %c0_141 = arith.constant 0 : index
    %177 = vector.load %arg8[%c0_138, %c3_139, %c0_140, %c0_141] : memref<1x4x1x32xf32, #tpu.memory_space<vmem>>, vector<1x1x1x32xf32>
    %178 = vector.shape_cast %177 : vector<1x1x1x32xf32> to vector<1x32xf32>
    %179 = vector.broadcast %178 : vector<1x32xf32> to vector<5x32xf32>
    %180 = arith.addf %176, %179 : vector<5x32xf32>
    %c0_142 = arith.constant 0 : index
    %c3_143 = arith.constant 3 : index
    %c0_144 = arith.constant 0 : index
    %c0_145 = arith.constant 0 : index
    %181 = vector.load %arg9[%c0_142, %c3_143, %c0_144, %c0_145] : memref<1x4x128x32xbf16, #tpu.memory_space<vmem>>, vector<1x1x128x32xbf16>
    %182 = vector.shape_cast %181 : vector<1x1x128x32xbf16> to vector<128x32xbf16>
    %cst_146 = arith.constant dense<0.000000e+00> : vector<5x32xf32>
    %183 = tpu.matmul %31, %182, %cst_146 {dimension_numbers = #tpu.dot_dimension_numbers<[1], [0], [0], [1], [0, 0, 1, 1], [], []>} : vector<5x128xbf16>, vector<128x32xbf16>, vector<5x32xf32> -> vector<5x32xf32>
    %c0_147 = arith.constant 0 : index
    %c3_148 = arith.constant 3 : index
    %c0_149 = arith.constant 0 : index
    %c0_150 = arith.constant 0 : index
    %184 = vector.load %arg10[%c0_147, %c3_148, %c0_149, %c0_150] : memref<1x4x1x32xf32, #tpu.memory_space<vmem>>, vector<1x1x1x32xf32>
    %185 = vector.shape_cast %184 : vector<1x1x1x32xf32> to vector<1x32xf32>
    %186 = vector.broadcast %185 : vector<1x32xf32> to vector<5x32xf32>
    %187 = arith.addf %183, %186 : vector<5x32xf32>
    %188 = arith.truncf %173 : vector<5x32xf32> to vector<5x32xbf16>
    %189 = arith.truncf %180 : vector<5x32xf32> to vector<5x32xbf16>
    "tpu.trace_start"() <{level = 10 : i32, message = "qd,kd->qk"}> : () -> ()
    %cst_151 = arith.constant dense<0.000000e+00> : vector<5x5xf32>
    %190 = tpu.matmul %188, %189, %cst_151 {dimension_numbers = #tpu.dot_dimension_numbers<[1], [1], [0], [0], [0, 0, 1, 0], [], []>} : vector<5x32xbf16>, vector<5x32xbf16>, vector<5x5xf32> -> vector<5x5xf32>
    "tpu.trace_stop"() : () -> ()
    %cst_152 = arith.constant 0.176776692 : f32
    %191 = vector.broadcast %cst_152 : f32 to vector<5x5xf32>
    %192 = arith.mulf %190, %191 : vector<5x5xf32>
    %cst_153 = arith.constant dense<0xFF800000> : vector<5xf32>
    %193 = vector.multi_reduction <maximumf>, %192, %cst_153 [1] : vector<5x5xf32> to vector<5xf32>
    %194 = vector.shape_cast %193 : vector<5xf32> to vector<5x1xf32>
    %195 = vector.broadcast %194 : vector<5x1xf32> to vector<5x5xf32>
    %196 = arith.subf %192, %195 : vector<5x5xf32>
    %197 = math.exp %196 : vector<5x5xf32>
    %cst_154 = arith.constant dense<0.000000e+00> : vector<5xf32>
    %198 = vector.multi_reduction <add>, %197, %cst_154 [1] : vector<5x5xf32> to vector<5xf32>
    %199 = vector.shape_cast %198 : vector<5xf32> to vector<5x1xf32>
    %200 = tpu.reciprocal %199 {approx = true} : vector<5x1xf32> -> vector<5x1xf32>
    %201 = vector.broadcast %200 : vector<5x1xf32> to vector<5x5xf32>
    %202 = arith.mulf %197, %201 : vector<5x5xf32>
    %203 = arith.truncf %202 : vector<5x5xf32> to vector<5x5xbf16>
    %204 = arith.truncf %187 : vector<5x32xf32> to vector<5x32xbf16>
    %cst_155 = arith.constant dense<0.000000e+00> : vector<5x32xf32>
    %205 = tpu.matmul %203, %204, %cst_155 {dimension_numbers = #tpu.dot_dimension_numbers<[1], [0], [0], [1], [0, 0, 1, 1], [], []>} : vector<5x5xbf16>, vector<5x32xbf16>, vector<5x32xf32> -> vector<5x32xf32>
    %206 = arith.truncf %205 : vector<5x32xf32> to vector<5x32xbf16>
    %c0_156 = arith.constant 0 : index
    %c3_157 = arith.constant 3 : index
    %c0_158 = arith.constant 0 : index
    %c0_159 = arith.constant 0 : index
    %207 = vector.load %arg11[%c0_156, %c3_157, %c0_158, %c0_159] : memref<1x4x32x128xbf16, #tpu.memory_space<vmem>>, vector<1x1x32x128xbf16>
    %208 = vector.shape_cast %207 : vector<1x1x32x128xbf16> to vector<32x128xbf16>
    %cst_160 = arith.constant dense<0.000000e+00> : vector<5x128xf32>
    %209 = tpu.matmul %206, %208, %cst_160 {dimension_numbers = #tpu.dot_dimension_numbers<[1], [0], [0], [1], [0, 0, 1, 1], [], []>} : vector<5x32xbf16>, vector<32x128xbf16>, vector<5x128xf32> -> vector<5x128xf32>
    %210 = arith.addf %166, %209 : vector<5x128xf32>
    %211 = arith.addf %4, %210 : vector<5x128xf32>
    %c0_161 = arith.constant 0 : index
    %c0_162 = arith.constant 0 : index
    %c0_163 = arith.constant 0 : index
    %212 = vector.load %arg13[%c0_161, %c0_162, %c0_163] : memref<1x1x128xf32, #tpu.memory_space<vmem>>, vector<1x1x128xf32>
    %213 = vector.shape_cast %212 : vector<1x1x128xf32> to vector<1x128xf32>
    %c0_164 = arith.constant 0 : index
    %c0_165 = arith.constant 0 : index
    %c0_166 = arith.constant 0 : index
    %214 = vector.load %arg14[%c0_164, %c0_165, %c0_166] : memref<1x1x128xf32, #tpu.memory_space<vmem>>, vector<1x1x128xf32>
    %215 = vector.shape_cast %214 : vector<1x1x128xf32> to vector<1x128xf32>
    %cst_167 = arith.constant dense<0.000000e+00> : vector<5xf32>
    %216 = vector.multi_reduction <add>, %211, %cst_167 [1] : vector<5x128xf32> to vector<5xf32>
    %217 = vector.shape_cast %216 : vector<5xf32> to vector<5x1xf32>
    %cst_168 = arith.constant 1.280000e+02 : f32
    %218 = vector.broadcast %cst_168 : f32 to vector<5x1xf32>
    %219 = arith.divf %217, %218 : vector<5x1xf32>
    %220 = vector.broadcast %219 : vector<5x1xf32> to vector<5x128xf32>
    %221 = arith.subf %211, %220 : vector<5x128xf32>
    %222 = arith.mulf %221, %221 : vector<5x128xf32>
    %cst_169 = arith.constant dense<0.000000e+00> : vector<5xf32>
    %223 = vector.multi_reduction <add>, %222, %cst_169 [1] : vector<5x128xf32> to vector<5xf32>
    %224 = vector.shape_cast %223 : vector<5xf32> to vector<5x1xf32>
    %cst_170 = arith.constant 1.280000e+02 : f32
    %225 = vector.broadcast %cst_170 : f32 to vector<5x1xf32>
    %226 = arith.divf %224, %225 : vector<5x1xf32>
    %227 = vector.broadcast %219 : vector<5x1xf32> to vector<5x128xf32>
    %228 = arith.subf %211, %227 : vector<5x128xf32>
    %cst_171 = arith.constant 9.99999997E-7 : f32
    %229 = vector.broadcast %cst_171 : f32 to vector<5x1xf32>
    %230 = arith.addf %226, %229 : vector<5x1xf32>
    %231 = math.rsqrt %230 : vector<5x1xf32>
    %232 = vector.broadcast %231 : vector<5x1xf32> to vector<5x128xf32>
    %233 = arith.mulf %228, %232 : vector<5x128xf32>
    %234 = vector.broadcast %213 : vector<1x128xf32> to vector<5x128xf32>
    %235 = arith.mulf %233, %234 : vector<5x128xf32>
    %236 = vector.broadcast %215 : vector<1x128xf32> to vector<5x128xf32>
    %237 = arith.addf %235, %236 : vector<5x128xf32>
    %238 = arith.truncf %237 : vector<5x128xf32> to vector<5x128xbf16>
    %c0_172 = arith.constant 0 : index
    %c0_173 = arith.constant 0 : index
    %c0_174 = arith.constant 0 : index
    %239 = vector.load %arg15[%c0_172, %c0_173, %c0_174] : memref<1x128x512xbf16, #tpu.memory_space<vmem>>, vector<1x128x512xbf16>
    %240 = vector.shape_cast %239 : vector<1x128x512xbf16> to vector<128x512xbf16>
    %cst_175 = arith.constant dense<0.000000e+00> : vector<5x512xf32>
    %241 = tpu.matmul %238, %240, %cst_175 {dimension_numbers = #tpu.dot_dimension_numbers<[1], [0], [0], [1], [0, 0, 1, 1], [], []>} : vector<5x128xbf16>, vector<128x512xbf16>, vector<5x512xf32> -> vector<5x512xf32>
    %c0_176 = arith.constant 0 : index
    %c0_177 = arith.constant 0 : index
    %c0_178 = arith.constant 0 : index
    %242 = vector.load %arg16[%c0_176, %c0_177, %c0_178] : memref<1x1x512xf32, #tpu.memory_space<vmem>>, vector<1x1x512xf32>
    %243 = vector.shape_cast %242 : vector<1x1x512xf32> to vector<1x512xf32>
    %244 = vector.broadcast %243 : vector<1x512xf32> to vector<5x512xf32>
    %245 = arith.addf %241, %244 : vector<5x512xf32>
    %246 = arith.mulf %245, %245 : vector<5x512xf32>
    %247 = arith.mulf %245, %246 : vector<5x512xf32>
    %cst_179 = arith.constant 4.471500e-02 : f32
    %248 = vector.broadcast %cst_179 : f32 to vector<5x512xf32>
    %249 = arith.mulf %248, %247 : vector<5x512xf32>
    %250 = arith.addf %245, %249 : vector<5x512xf32>
    %cst_180 = arith.constant 0.797884583 : f32
    %251 = vector.broadcast %cst_180 : f32 to vector<5x512xf32>
    %252 = arith.mulf %251, %250 : vector<5x512xf32>
    %253 = math.tanh %252 : vector<5x512xf32>
    %cst_181 = arith.constant 1.000000e+00 : f32
    %254 = vector.broadcast %cst_181 : f32 to vector<5x512xf32>
    %255 = arith.addf %254, %253 : vector<5x512xf32>
    %cst_182 = arith.constant 5.000000e-01 : f32
    %256 = vector.broadcast %cst_182 : f32 to vector<5x512xf32>
    %257 = arith.mulf %256, %255 : vector<5x512xf32>
    %258 = arith.mulf %245, %257 : vector<5x512xf32>
    %259 = arith.truncf %258 : vector<5x512xf32> to vector<5x512xbf16>
    %c0_183 = arith.constant 0 : index
    %c0_184 = arith.constant 0 : index
    %c0_185 = arith.constant 0 : index
    %260 = vector.load %arg17[%c0_183, %c0_184, %c0_185] : memref<1x512x128xbf16, #tpu.memory_space<vmem>>, vector<1x512x128xbf16>
    %261 = vector.shape_cast %260 : vector<1x512x128xbf16> to vector<512x128xbf16>
    %cst_186 = arith.constant dense<0.000000e+00> : vector<5x128xf32>
    %262 = tpu.matmul %259, %261, %cst_186 {dimension_numbers = #tpu.dot_dimension_numbers<[1], [0], [0], [1], [0, 0, 1, 1], [], []>} : vector<5x512xbf16>, vector<512x128xbf16>, vector<5x128xf32> -> vector<5x128xf32>
    %c0_187 = arith.constant 0 : index
    %c0_188 = arith.constant 0 : index
    %c0_189 = arith.constant 0 : index
    %263 = vector.load %arg18[%c0_187, %c0_188, %c0_189] : memref<1x1x128xf32, #tpu.memory_space<vmem>>, vector<1x1x128xf32>
    %264 = vector.shape_cast %263 : vector<1x1x128xf32> to vector<1x128xf32>
    %265 = vector.broadcast %264 : vector<1x128xf32> to vector<5x128xf32>
    %266 = arith.addf %262, %265 : vector<5x128xf32>
    %267 = arith.addf %211, %266 : vector<5x128xf32>
    %c0_190 = arith.constant 0 : index
    %c0_191 = arith.constant 0 : index
    %c0_192 = arith.constant 0 : index
    %268 = vector.load %arg19[%c0_190, %c0_191, %c0_192] : memref<1x5x128xf32, #tpu.memory_space<vmem>>, vector<1x5x128xf32>
    %269 = vector.shape_cast %268 : vector<1x5x128xf32> to vector<5x128xf32>
    %270 = vector.shape_cast %267 : vector<5x128xf32> to vector<1x5x128xf32>
    tpu.vector_store %arg19[%c0_190, %c0_191, %c0_192], %270 {strides = array<i32>} : memref<1x5x128xf32, #tpu.memory_space<vmem>>, vector<1x5x128xf32>,
    return
  }
  func.func @transform_0(%arg0: i32, %arg1: i32) -> (i32, i32, i32) {
    %c0_i32 = arith.constant 0 : i32
    %c0_i32_0 = arith.constant 0 : i32
    %c0_i32_1 = arith.constant 0 : i32
    return %arg0, %c0_i32, %c0_i32_0 : i32, i32, i32
  }
  func.func @transform_1(%arg0: i32, %arg1: i32) -> (i32, i32, i32) {
    %c0_i32 = arith.constant 0 : i32
    %c0_i32_0 = arith.constant 0 : i32
    %c0_i32_1 = arith.constant 0 : i32
    return %arg1, %c0_i32, %c0_i32_0 : i32, i32, i32
  }
  func.func @transform_2(%arg0: i32, %arg1: i32) -> (i32, i32, i32) {
    %c0_i32 = arith.constant 0 : i32
    %c0_i32_0 = arith.constant 0 : i32
    %c0_i32_1 = arith.constant 0 : i32
    return %arg1, %c0_i32, %c0_i32_0 : i32, i32, i32
  }
  func.func @transform_3(%arg0: i32, %arg1: i32) -> (i32, i32, i32, i32) {
    %c0_i32 = arith.constant 0 : i32
    %c0_i32_0 = arith.constant 0 : i32
    %c0_i32_1 = arith.constant 0 : i32
    %c0_i32_2 = arith.constant 0 : i32
    return %arg1, %c0_i32, %c0_i32_0, %c0_i32_1 : i32, i32, i32, i32
  }
  func.func @transform_4(%arg0: i32, %arg1: i32) -> (i32, i32, i32, i32) {
    %c0_i32 = arith.constant 0 : i32
    %c0_i32_0 = arith.constant 0 : i32
    %c0_i32_1 = arith.constant 0 : i32
    %c0_i32_2 = arith.constant 0 : i32
    return %arg1, %c0_i32, %c0_i32_0, %c0_i32_1 : i32, i32, i32, i32
  }
  func.func @transform_5(%arg0: i32, %arg1: i32) -> (i32, i32, i32, i32) {
    %c0_i32 = arith.constant 0 : i32
    %c0_i32_0 = arith.constant 0 : i32
    %c0_i32_1 = arith.constant 0 : i32
    %c0_i32_2 = arith.constant 0 : i32
    return %arg1, %c0_i32, %c0_i32_0, %c0_i32_1 : i32, i32, i32, i32
  }
  func.func @transform_6(%arg0: i32, %arg1: i32) -> (i32, i32, i32, i32) {
    %c0_i32 = arith.constant 0 : i32
    %c0_i32_0 = arith.constant 0 : i32
    %c0_i32_1 = arith.constant 0 : i32
    %c0_i32_2 = arith.constant 0 : i32
    return %arg1, %c0_i32, %c0_i32_0, %c0_i32_1 : i32, i32, i32, i32
  }
  func.func @transform_7(%arg0: i32, %arg1: i32) -> (i32, i32, i32, i32) {
    %c0_i32 = arith.constant 0 : i32
    %c0_i32_0 = arith.constant 0 : i32
    %c0_i32_1 = arith.constant 0 : i32
    %c0_i32_2 = arith.constant 0 : i32
    return %arg1, %c0_i32, %c0_i32_0, %c0_i32_1 : i32, i32, i32, i32
  }
  func.func @transform_8(%arg0: i32, %arg1: i32) -> (i32, i32, i32, i32) {
    %c0_i32 = arith.constant 0 : i32
    %c0_i32_0 = arith.constant 0 : i32
    %c0_i32_1 = arith.constant 0 : i32
    %c0_i32_2 = arith.constant 0 : i32
    return %arg1, %c0_i32, %c0_i32_0, %c0_i32_1 : i32, i32, i32, i32
  }
  func.func @transform_9(%arg0: i32, %arg1: i32) -> (i32, i32, i32, i32) {
    %c0_i32 = arith.constant 0 : i32
    %c0_i32_0 = arith.constant 0 : i32
    %c0_i32_1 = arith.constant 0 : i32
    %c0_i32_2 = arith.constant 0 : i32
    return %arg1, %c0_i32, %c0_i32_0, %c0_i32_1 : i32, i32, i32, i32
  }
  func.func @transform_10(%arg0: i32, %arg1: i32) -> (i32, i32, i32) {
    %c0_i32 = arith.constant 0 : i32
    %c0_i32_0 = arith.constant 0 : i32
    %c0_i32_1 = arith.constant 0 : i32
    return %arg1, %c0_i32, %c0_i32_0 : i32, i32, i32
  }
  func.func @transform_11(%arg0: i32, %arg1: i32) -> (i32, i32, i32) {
    %c0_i32 = arith.constant 0 : i32
    %c0_i32_0 = arith.constant 0 : i32
    %c0_i32_1 = arith.constant 0 : i32
    return %arg1, %c0_i32, %c0_i32_0 : i32, i32, i32
  }
  func.func @transform_12(%arg0: i32, %arg1: i32) -> (i32, i32, i32) {
    %c0_i32 = arith.constant 0 : i32
    %c0_i32_0 = arith.constant 0 : i32
    %c0_i32_1 = arith.constant 0 : i32
    return %arg1, %c0_i32, %c0_i32_0 : i32, i32, i32
  }
  func.func @transform_13(%arg0: i32, %arg1: i32) -> (i32, i32, i32) {
    %c0_i32 = arith.constant 0 : i32
    %c0_i32_0 = arith.constant 0 : i32
    %c0_i32_1 = arith.constant 0 : i32
    return %arg1, %c0_i32, %c0_i32_0 : i32, i32, i32
  }
  func.func @transform_14(%arg0: i32, %arg1: i32) -> (i32, i32, i32) {
    %c0_i32 = arith.constant 0 : i32
    %c0_i32_0 = arith.constant 0 : i32
    %c0_i32_1 = arith.constant 0 : i32
    return %arg1, %c0_i32, %c0_i32_0 : i32, i32, i32
  }
  func.func @transform_15(%arg0: i32, %arg1: i32) -> (i32, i32, i32) {
    %c0_i32 = arith.constant 0 : i32
    %c0_i32_0 = arith.constant 0 : i32
    %c0_i32_1 = arith.constant 0 : i32
    return %arg1, %c0_i32, %c0_i32_0 : i32, i32, i32
  }
  func.func @transform_16(%arg0: i32, %arg1: i32) -> (i32, i32, i32) {
    %c0_i32 = arith.constant 0 : i32
    %c0_i32_0 = arith.constant 0 : i32
    %c0_i32_1 = arith.constant 0 : i32
    return %arg1, %c0_i32, %c0_i32_0 : i32, i32, i32
  }
  func.func @transform_17(%arg0: i32, %arg1: i32) -> (i32, i32, i32) {
    %c0_i32 = arith.constant 0 : i32
    %c0_i32_0 = arith.constant 0 : i32
    %c0_i32_1 = arith.constant 0 : i32
    return %arg0, %c0_i32, %c0_i32_0 : i32, i32, i32
  }
}

module attributes {stable_mosaic.version = 11 : i64} {
  func.func @_head_eval_kernel(%arg0: i32, %arg1: memref<3x2x128xf32, #tpu.memory_space<vmem>>, %arg2: memref<2x128xf32, #tpu.memory_space<vmem>>, %arg3: memref<1x128xf32, #tpu.memory_space<vmem>>, %arg4: memref<1x128xf32, #tpu.memory_space<vmem>>, %arg5: memref<1x128xf32, #tpu.memory_space<vmem>>, %arg6: memref<1x128xf32, #tpu.memory_space<vmem>>, %arg7: memref<4x128xf32, #tpu.memory_space<vmem>>, %arg8: memref<4x128xf32, #tpu.memory_space<vmem>>, %arg9: memref<4x128xf32, #tpu.memory_space<vmem>>, %arg10: memref<4x128xf32, #tpu.memory_space<vmem>>, %arg11: memref<2x512xf32, #tpu.memory_space<vmem>>) attributes {dimension_semantics = [#tpu.dimension_semantics<arbitrary>], iteration_bounds = array<i64: 1>, scalar_prefetch = 0 : i64, scratch_operands = 0 : i64, tpu.core_type = #tpu.core_type<tc>, window_params = [{pipeline_mode = #tpu.pipeline_mode<synchronous>, transform_indices = @transform_0, window_bounds = array<i64: 3, 2, 128>}, {pipeline_mode = #tpu.pipeline_mode<synchronous>, transform_indices = @transform_1, window_bounds = array<i64: 2, 128>}, {pipeline_mode = #tpu.pipeline_mode<synchronous>, transform_indices = @transform_2, window_bounds = array<i64: 1, 128>}, {pipeline_mode = #tpu.pipeline_mode<synchronous>, transform_indices = @transform_3, window_bounds = array<i64: 1, 128>}, {pipeline_mode = #tpu.pipeline_mode<synchronous>, transform_indices = @transform_4, window_bounds = array<i64: 1, 128>}, {pipeline_mode = #tpu.pipeline_mode<synchronous>, transform_indices = @transform_5, window_bounds = array<i64: 1, 128>}, {pipeline_mode = #tpu.pipeline_mode<synchronous>, transform_indices = @transform_6, window_bounds = array<i64: 4, 128>}, {pipeline_mode = #tpu.pipeline_mode<synchronous>, transform_indices = @transform_7, window_bounds = array<i64: 4, 128>}, {pipeline_mode = #tpu.pipeline_mode<synchronous>, transform_indices = @transform_8, window_bounds = array<i64: 4, 128>}, {pipeline_mode = #tpu.pipeline_mode<synchronous>, transform_indices = @transform_9, window_bounds = array<i64: 4, 128>}, {pipeline_mode = #tpu.pipeline_mode<synchronous>, transform_indices = @transform_10, window_bounds = array<i64: 2, 512>}]} {
    %c0 = arith.constant 0 : index
    %c0_0 = arith.constant 0 : index
    %c0_1 = arith.constant 0 : index
    %0 = vector.load %arg1[%c0, %c0_0, %c0_1] : memref<3x2x128xf32, #tpu.memory_space<vmem>>, vector<3x2x128xf32>
    %c0_2 = arith.constant 0 : index
    %c0_3 = arith.constant 0 : index
    %1 = vector.load %arg3[%c0_2, %c0_3] : memref<1x128xf32, #tpu.memory_space<vmem>>, vector<1x128xf32>
    %c0_4 = arith.constant 0 : index
    %c0_5 = arith.constant 0 : index
    %2 = vector.load %arg4[%c0_4, %c0_5] : memref<1x128xf32, #tpu.memory_space<vmem>>, vector<1x128xf32>
    %cst = arith.constant dense<0.000000e+00> : vector<3x2xf32>
    %3 = vector.multi_reduction <add>, %0, %cst [2] : vector<3x2x128xf32> to vector<3x2xf32>
    %4 = vector.shape_cast %3 : vector<3x2xf32> to vector<3x2x1xf32>
    %cst_6 = arith.constant 1.280000e+02 : f32
    %5 = vector.broadcast %cst_6 : f32 to vector<3x2x1xf32>
    %6 = arith.divf %4, %5 : vector<3x2x1xf32>
    %7 = vector.broadcast %6 : vector<3x2x1xf32> to vector<3x2x128xf32>
    %8 = arith.subf %0, %7 : vector<3x2x128xf32>
    %9 = arith.mulf %8, %8 : vector<3x2x128xf32>
    %cst_7 = arith.constant dense<0.000000e+00> : vector<3x2xf32>
    %10 = vector.multi_reduction <add>, %9, %cst_7 [2] : vector<3x2x128xf32> to vector<3x2xf32>
    %11 = vector.shape_cast %10 : vector<3x2xf32> to vector<3x2x1xf32>
    %cst_8 = arith.constant 1.280000e+02 : f32
    %12 = vector.broadcast %cst_8 : f32 to vector<3x2x1xf32>
    %13 = arith.divf %11, %12 : vector<3x2x1xf32>
    %14 = vector.broadcast %6 : vector<3x2x1xf32> to vector<3x2x128xf32>
    %15 = arith.subf %0, %14 : vector<3x2x128xf32>
    %cst_9 = arith.constant 9.99999997E-7 : f32
    %16 = vector.broadcast %cst_9 : f32 to vector<3x2x1xf32>
    %17 = arith.addf %13, %16 : vector<3x2x1xf32>
    %18 = math.rsqrt %17 : vector<3x2x1xf32>
    %19 = vector.broadcast %18 : vector<3x2x1xf32> to vector<3x2x128xf32>
    %20 = arith.mulf %15, %19 : vector<3x2x128xf32>
    %21 = vector.shape_cast %1 : vector<1x128xf32> to vector<1x1x128xf32>
    %22 = vector.broadcast %21 : vector<1x1x128xf32> to vector<3x2x128xf32>
    %23 = arith.mulf %20, %22 : vector<3x2x128xf32>
    %24 = vector.shape_cast %2 : vector<1x128xf32> to vector<1x1x128xf32>
    %25 = vector.broadcast %24 : vector<1x1x128xf32> to vector<3x2x128xf32>
    %26 = arith.addf %23, %25 : vector<3x2x128xf32>
    %c0_10 = arith.constant 0 : index
    %c0_11 = arith.constant 0 : index
    %27 = vector.load %arg2[%c0_10, %c0_11] : memref<2x128xf32, #tpu.memory_space<vmem>>, vector<2x128xf32>
    %c0_12 = arith.constant 0 : index
    %c0_13 = arith.constant 0 : index
    %28 = vector.load %arg5[%c0_12, %c0_13] : memref<1x128xf32, #tpu.memory_space<vmem>>, vector<1x128xf32>
    %c0_14 = arith.constant 0 : index
    %c0_15 = arith.constant 0 : index
    %29 = vector.load %arg6[%c0_14, %c0_15] : memref<1x128xf32, #tpu.memory_space<vmem>>, vector<1x128xf32>
    %cst_16 = arith.constant dense<0.000000e+00> : vector<2xf32>
    %30 = vector.multi_reduction <add>, %27, %cst_16 [1] : vector<2x128xf32> to vector<2xf32>
    %31 = vector.shape_cast %30 : vector<2xf32> to vector<2x1xf32>
    %cst_17 = arith.constant 1.280000e+02 : f32
    %32 = vector.broadcast %cst_17 : f32 to vector<2x1xf32>
    %33 = arith.divf %31, %32 : vector<2x1xf32>
    %34 = vector.broadcast %33 : vector<2x1xf32> to vector<2x128xf32>
    %35 = arith.subf %27, %34 : vector<2x128xf32>
    %36 = arith.mulf %35, %35 : vector<2x128xf32>
    %cst_18 = arith.constant dense<0.000000e+00> : vector<2xf32>
    %37 = vector.multi_reduction <add>, %36, %cst_18 [1] : vector<2x128xf32> to vector<2xf32>
    %38 = vector.shape_cast %37 : vector<2xf32> to vector<2x1xf32>
    %cst_19 = arith.constant 1.280000e+02 : f32
    %39 = vector.broadcast %cst_19 : f32 to vector<2x1xf32>
    %40 = arith.divf %38, %39 : vector<2x1xf32>
    %41 = vector.broadcast %33 : vector<2x1xf32> to vector<2x128xf32>
    %42 = arith.subf %27, %41 : vector<2x128xf32>
    %cst_20 = arith.constant 9.99999997E-7 : f32
    %43 = vector.broadcast %cst_20 : f32 to vector<2x1xf32>
    %44 = arith.addf %40, %43 : vector<2x1xf32>
    %45 = math.rsqrt %44 : vector<2x1xf32>
    %46 = vector.broadcast %45 : vector<2x1xf32> to vector<2x128xf32>
    %47 = arith.mulf %42, %46 : vector<2x128xf32>
    %48 = vector.broadcast %28 : vector<1x128xf32> to vector<2x128xf32>
    %49 = arith.mulf %47, %48 : vector<2x128xf32>
    %50 = vector.broadcast %29 : vector<1x128xf32> to vector<2x128xf32>
    %51 = arith.addf %49, %50 : vector<2x128xf32>
    %52 = vector.extract_strided_slice %26 {offsets = [0, 0, 0], sizes = [1, 2, 128], strides = [1, 1, 1]} : vector<3x2x128xf32> to vector<1x2x128xf32>
    %53 = vector.shape_cast %52 : vector<1x2x128xf32> to vector<2x128xf32>
    %c0_21 = arith.constant 0 : index
    %c0_22 = arith.constant 0 : index
    %54 = vector.load %arg9[%c0_21, %c0_22] : memref<4x128xf32, #tpu.memory_space<vmem>>, vector<1x128xf32>
    %55 = vector.broadcast %54 : vector<1x128xf32> to vector<2x128xf32>
    %56 = arith.subf %53, %55 : vector<2x128xf32>
    %c0_23 = arith.constant 0 : index
    %c0_24 = arith.constant 0 : index
    %57 = vector.load %arg10[%c0_23, %c0_24] : memref<4x128xf32, #tpu.memory_space<vmem>>, vector<1x128xf32>
    %cst_25 = arith.constant 9.99999974E-6 : f32
    %58 = vector.broadcast %cst_25 : f32 to vector<1x128xf32>
    %59 = arith.addf %57, %58 : vector<1x128xf32>
    %60 = math.rsqrt %59 : vector<1x128xf32>
    %61 = vector.broadcast %60 : vector<1x128xf32> to vector<2x128xf32>
    %62 = arith.mulf %56, %61 : vector<2x128xf32>
    %c0_26 = arith.constant 0 : index
    %c0_27 = arith.constant 0 : index
    %63 = vector.load %arg7[%c0_26, %c0_27] : memref<4x128xf32, #tpu.memory_space<vmem>>, vector<1x128xf32>
    %64 = vector.broadcast %63 : vector<1x128xf32> to vector<2x128xf32>
    %65 = arith.mulf %62, %64 : vector<2x128xf32>
    %c0_28 = arith.constant 0 : index
    %c0_29 = arith.constant 0 : index
    %66 = vector.load %arg8[%c0_28, %c0_29] : memref<4x128xf32, #tpu.memory_space<vmem>>, vector<1x128xf32>
    %67 = vector.broadcast %66 : vector<1x128xf32> to vector<2x128xf32>
    %68 = arith.addf %65, %67 : vector<2x128xf32>
    %69 = vector.extract_strided_slice %26 {offsets = [1, 0, 0], sizes = [1, 2, 128], strides = [1, 1, 1]} : vector<3x2x128xf32> to vector<1x2x128xf32>
    %70 = vector.shape_cast %69 : vector<1x2x128xf32> to vector<2x128xf32>
    %c1 = arith.constant 1 : index
    %c0_30 = arith.constant 0 : index
    %71 = vector.load %arg9[%c1, %c0_30] : memref<4x128xf32, #tpu.memory_space<vmem>>, vector<1x128xf32>
    %72 = vector.broadcast %71 : vector<1x128xf32> to vector<2x128xf32>
    %73 = arith.subf %70, %72 : vector<2x128xf32>
    %c1_31 = arith.constant 1 : index
    %c0_32 = arith.constant 0 : index
    %74 = vector.load %arg10[%c1_31, %c0_32] : memref<4x128xf32, #tpu.memory_space<vmem>>, vector<1x128xf32>
    %cst_33 = arith.constant 9.99999974E-6 : f32
    %75 = vector.broadcast %cst_33 : f32 to vector<1x128xf32>
    %76 = arith.addf %74, %75 : vector<1x128xf32>
    %77 = math.rsqrt %76 : vector<1x128xf32>
    %78 = vector.broadcast %77 : vector<1x128xf32> to vector<2x128xf32>
    %79 = arith.mulf %73, %78 : vector<2x128xf32>
    %c1_34 = arith.constant 1 : index
    %c0_35 = arith.constant 0 : index
    %80 = vector.load %arg7[%c1_34, %c0_35] : memref<4x128xf32, #tpu.memory_space<vmem>>, vector<1x128xf32>
    %81 = vector.broadcast %80 : vector<1x128xf32> to vector<2x128xf32>
    %82 = arith.mulf %79, %81 : vector<2x128xf32>
    %c1_36 = arith.constant 1 : index
    %c0_37 = arith.constant 0 : index
    %83 = vector.load %arg8[%c1_36, %c0_37] : memref<4x128xf32, #tpu.memory_space<vmem>>, vector<1x128xf32>
    %84 = vector.broadcast %83 : vector<1x128xf32> to vector<2x128xf32>
    %85 = arith.addf %82, %84 : vector<2x128xf32>
    %cst_38 = arith.constant 5.000000e-01 : f32
    %86 = vector.broadcast %cst_38 : f32 to vector<2x128xf32>
    %87 = arith.mulf %85, %86 : vector<2x128xf32>
    %88 = vector.extract_strided_slice %26 {offsets = [2, 0, 0], sizes = [1, 2, 128], strides = [1, 1, 1]} : vector<3x2x128xf32> to vector<1x2x128xf32>
    %89 = vector.shape_cast %88 : vector<1x2x128xf32> to vector<2x128xf32>
    %c2 = arith.constant 2 : index
    %c0_39 = arith.constant 0 : index
    %90 = vector.load %arg9[%c2, %c0_39] : memref<4x128xf32, #tpu.memory_space<vmem>>, vector<1x128xf32>
    %91 = vector.broadcast %90 : vector<1x128xf32> to vector<2x128xf32>
    %92 = arith.subf %89, %91 : vector<2x128xf32>
    %c2_40 = arith.constant 2 : index
    %c0_41 = arith.constant 0 : index
    %93 = vector.load %arg10[%c2_40, %c0_41] : memref<4x128xf32, #tpu.memory_space<vmem>>, vector<1x128xf32>
    %cst_42 = arith.constant 9.99999974E-6 : f32
    %94 = vector.broadcast %cst_42 : f32 to vector<1x128xf32>
    %95 = arith.addf %93, %94 : vector<1x128xf32>
    %96 = math.rsqrt %95 : vector<1x128xf32>
    %97 = vector.broadcast %96 : vector<1x128xf32> to vector<2x128xf32>
    %98 = arith.mulf %92, %97 : vector<2x128xf32>
    %c2_43 = arith.constant 2 : index
    %c0_44 = arith.constant 0 : index
    %99 = vector.load %arg7[%c2_43, %c0_44] : memref<4x128xf32, #tpu.memory_space<vmem>>, vector<1x128xf32>
    %100 = vector.broadcast %99 : vector<1x128xf32> to vector<2x128xf32>
    %101 = arith.mulf %98, %100 : vector<2x128xf32>
    %c2_45 = arith.constant 2 : index
    %c0_46 = arith.constant 0 : index
    %102 = vector.load %arg8[%c2_45, %c0_46] : memref<4x128xf32, #tpu.memory_space<vmem>>, vector<1x128xf32>
    %103 = vector.broadcast %102 : vector<1x128xf32> to vector<2x128xf32>
    %104 = arith.addf %101, %103 : vector<2x128xf32>
    %cst_47 = arith.constant 5.000000e-01 : f32
    %105 = vector.broadcast %cst_47 : f32 to vector<2x128xf32>
    %106 = arith.mulf %104, %105 : vector<2x128xf32>
    %c3 = arith.constant 3 : index
    %c0_48 = arith.constant 0 : index
    %107 = vector.load %arg9[%c3, %c0_48] : memref<4x128xf32, #tpu.memory_space<vmem>>, vector<1x128xf32>
    %108 = vector.broadcast %107 : vector<1x128xf32> to vector<2x128xf32>
    %109 = arith.subf %51, %108 : vector<2x128xf32>
    %c3_49 = arith.constant 3 : index
    %c0_50 = arith.constant 0 : index
    %110 = vector.load %arg10[%c3_49, %c0_50] : memref<4x128xf32, #tpu.memory_space<vmem>>, vector<1x128xf32>
    %cst_51 = arith.constant 9.99999974E-6 : f32
    %111 = vector.broadcast %cst_51 : f32 to vector<1x128xf32>
    %112 = arith.addf %110, %111 : vector<1x128xf32>
    %113 = math.rsqrt %112 : vector<1x128xf32>
    %114 = vector.broadcast %113 : vector<1x128xf32> to vector<2x128xf32>
    %115 = arith.mulf %109, %114 : vector<2x128xf32>
    %c3_52 = arith.constant 3 : index
    %c0_53 = arith.constant 0 : index
    %116 = vector.load %arg7[%c3_52, %c0_53] : memref<4x128xf32, #tpu.memory_space<vmem>>, vector<1x128xf32>
    %117 = vector.broadcast %116 : vector<1x128xf32> to vector<2x128xf32>
    %118 = arith.mulf %115, %117 : vector<2x128xf32>
    %c3_54 = arith.constant 3 : index
    %c0_55 = arith.constant 0 : index
    %119 = vector.load %arg8[%c3_54, %c0_55] : memref<4x128xf32, #tpu.memory_space<vmem>>, vector<1x128xf32>
    %120 = vector.broadcast %119 : vector<1x128xf32> to vector<2x128xf32>
    %121 = arith.addf %118, %120 : vector<2x128xf32>
    %122 = arith.mulf %68, %68 : vector<2x128xf32>
    %cst_56 = arith.constant dense<0.000000e+00> : vector<2xf32>
    %123 = vector.multi_reduction <add>, %122, %cst_56 [1] : vector<2x128xf32> to vector<2xf32>
    %124 = vector.shape_cast %123 : vector<2xf32> to vector<2x1xf32>
    %cst_57 = arith.constant 0.000000e+00 : f32
    %125 = vector.broadcast %cst_57 : f32 to vector<2x1xf32>
    %126 = arith.addf %125, %124 : vector<2x1xf32>
    %127 = arith.mulf %87, %87 : vector<2x128xf32>
    %cst_58 = arith.constant dense<0.000000e+00> : vector<2xf32>
    %128 = vector.multi_reduction <add>, %127, %cst_58 [1] : vector<2x128xf32> to vector<2xf32>
    %129 = vector.shape_cast %128 : vector<2xf32> to vector<2x1xf32>
    %130 = arith.addf %126, %129 : vector<2x1xf32>
    %131 = arith.mulf %106, %106 : vector<2x128xf32>
    %cst_59 = arith.constant dense<0.000000e+00> : vector<2xf32>
    %132 = vector.multi_reduction <add>, %131, %cst_59 [1] : vector<2x128xf32> to vector<2xf32>
    %133 = vector.shape_cast %132 : vector<2xf32> to vector<2x1xf32>
    %134 = arith.addf %130, %133 : vector<2x1xf32>
    %135 = arith.mulf %121, %121 : vector<2x128xf32>
    %cst_60 = arith.constant dense<0.000000e+00> : vector<2xf32>
    %136 = vector.multi_reduction <add>, %135, %cst_60 [1] : vector<2x128xf32> to vector<2xf32>
    %137 = vector.shape_cast %136 : vector<2xf32> to vector<2x1xf32>
    %138 = arith.addf %134, %137 : vector<2x1xf32>
    %cst_61 = arith.constant 1.000000e-24 : f32
    %139 = vector.broadcast %cst_61 : f32 to vector<2x1xf32>
    %140 = arith.addf %138, %139 : vector<2x1xf32>
    %141 = math.rsqrt %140 : vector<2x1xf32>
    %142 = vector.broadcast %141 : vector<2x1xf32> to vector<2x128xf32>
    %143 = arith.mulf %68, %142 : vector<2x128xf32>
    %c0_62 = arith.constant 0 : index
    %c0_63 = arith.constant 0 : index
    %144 = vector.load %arg11[%c0_62, %c0_63] : memref<2x512xf32, #tpu.memory_space<vmem>>, vector<2x128xf32>
    tpu.vector_store %arg11[%c0_62, %c0_63], %143 {strides = array<i32>} : memref<2x512xf32, #tpu.memory_space<vmem>>, vector<2x128xf32>,
    %145 = vector.broadcast %141 : vector<2x1xf32> to vector<2x128xf32>
    %146 = arith.mulf %87, %145 : vector<2x128xf32>
    %c0_64 = arith.constant 0 : index
    %c128 = arith.constant 128 : index
    %147 = vector.load %arg11[%c0_64, %c128] : memref<2x512xf32, #tpu.memory_space<vmem>>, vector<2x128xf32>
    tpu.vector_store %arg11[%c0_64, %c128], %146 {strides = array<i32>} : memref<2x512xf32, #tpu.memory_space<vmem>>, vector<2x128xf32>,
    %148 = vector.broadcast %141 : vector<2x1xf32> to vector<2x128xf32>
    %149 = arith.mulf %106, %148 : vector<2x128xf32>
    %c0_65 = arith.constant 0 : index
    %c256 = arith.constant 256 : index
    %150 = vector.load %arg11[%c0_65, %c256] : memref<2x512xf32, #tpu.memory_space<vmem>>, vector<2x128xf32>
    tpu.vector_store %arg11[%c0_65, %c256], %149 {strides = array<i32>} : memref<2x512xf32, #tpu.memory_space<vmem>>, vector<2x128xf32>,
    %151 = vector.broadcast %141 : vector<2x1xf32> to vector<2x128xf32>
    %152 = arith.mulf %121, %151 : vector<2x128xf32>
    %c0_66 = arith.constant 0 : index
    %c384 = arith.constant 384 : index
    %153 = vector.load %arg11[%c0_66, %c384] : memref<2x512xf32, #tpu.memory_space<vmem>>, vector<2x128xf32>
    tpu.vector_store %arg11[%c0_66, %c384], %152 {strides = array<i32>} : memref<2x512xf32, #tpu.memory_space<vmem>>, vector<2x128xf32>,
    return
  }
  func.func @transform_0(%arg0: i32) -> (i32, i32, i32) {
    %c0_i32 = arith.constant 0 : i32
    %c0_i32_0 = arith.constant 0 : i32
    %c0_i32_1 = arith.constant 0 : i32
    %c0_i32_2 = arith.constant 0 : i32
    return %c0_i32, %c0_i32_0, %c0_i32_1 : i32, i32, i32
  }
  func.func @transform_1(%arg0: i32) -> (i32, i32) {
    %c0_i32 = arith.constant 0 : i32
    %c0_i32_0 = arith.constant 0 : i32
    %c0_i32_1 = arith.constant 0 : i32
    return %c0_i32, %c0_i32_0 : i32, i32
  }
  func.func @transform_2(%arg0: i32) -> (i32, i32) {
    %c0_i32 = arith.constant 0 : i32
    %c0_i32_0 = arith.constant 0 : i32
    %c0_i32_1 = arith.constant 0 : i32
    return %c0_i32, %c0_i32_0 : i32, i32
  }
  func.func @transform_3(%arg0: i32) -> (i32, i32) {
    %c0_i32 = arith.constant 0 : i32
    %c0_i32_0 = arith.constant 0 : i32
    %c0_i32_1 = arith.constant 0 : i32
    return %c0_i32, %c0_i32_0 : i32, i32
  }
  func.func @transform_4(%arg0: i32) -> (i32, i32) {
    %c0_i32 = arith.constant 0 : i32
    %c0_i32_0 = arith.constant 0 : i32
    %c0_i32_1 = arith.constant 0 : i32
    return %c0_i32, %c0_i32_0 : i32, i32
  }
  func.func @transform_5(%arg0: i32) -> (i32, i32) {
    %c0_i32 = arith.constant 0 : i32
    %c0_i32_0 = arith.constant 0 : i32
    %c0_i32_1 = arith.constant 0 : i32
    return %c0_i32, %c0_i32_0 : i32, i32
  }
  func.func @transform_6(%arg0: i32) -> (i32, i32) {
    %c0_i32 = arith.constant 0 : i32
    %c0_i32_0 = arith.constant 0 : i32
    %c0_i32_1 = arith.constant 0 : i32
    return %c0_i32, %c0_i32_0 : i32, i32
  }
  func.func @transform_7(%arg0: i32) -> (i32, i32) {
    %c0_i32 = arith.constant 0 : i32
    %c0_i32_0 = arith.constant 0 : i32
    %c0_i32_1 = arith.constant 0 : i32
    return %c0_i32, %c0_i32_0 : i32, i32
  }
  func.func @transform_8(%arg0: i32) -> (i32, i32) {
    %c0_i32 = arith.constant 0 : i32
    %c0_i32_0 = arith.constant 0 : i32
    %c0_i32_1 = arith.constant 0 : i32
    return %c0_i32, %c0_i32_0 : i32, i32
  }
  func.func @transform_9(%arg0: i32) -> (i32, i32) {
    %c0_i32 = arith.constant 0 : i32
    %c0_i32_0 = arith.constant 0 : i32
    %c0_i32_1 = arith.constant 0 : i32
    return %c0_i32, %c0_i32_0 : i32, i32
  }
  func.func @transform_10(%arg0: i32) -> (i32, i32) {
    %c0_i32 = arith.constant 0 : i32
    %c0_i32_0 = arith.constant 0 : i32
    %c0_i32_1 = arith.constant 0 : i32
    return %c0_i32, %c0_i32_0 : i32, i32
  }
}

</mosaic_0001>

<bundles_post_ra>
// kernel: _lambda_.7
= control target key start
LH: loop header
LB: loop body
LE: loop exit
PB: predicated region body
PF: predicated region fallthrough
CT: control target
= control target key end

     0   :  { %vm41_vm0 = vcmask 1041408   ;;  %s629_s0 = inlined_call_operand.vmem [shape: f32[3,2,128], index: 0, kind: input, shape index: {}]   ;;  %s630_s1 = inlined_call_operand.vmem [shape: f32[2,128], index: 1, kind: input, shape index: {}]   ;;  %s631_s2 = inlined_call_operand.vmem [shape: f32[1,128], index: 2, kind: input, shape index: {}]   ;;  %s632_s3 = inlined_call_operand.vmem [shape: f32[1,128], index: 3, kind: input, shape index: {}]   ;;  %s633_s4 = inlined_call_operand.vmem [shape: f32[1,128], index: 4, kind: input, shape index: {}]   ;;  %s634_s5 = inlined_call_operand.vmem [shape: f32[1,128], index: 5, kind: input, shape index: {}]   ;;  %s635_s6 = inlined_call_operand.vmem [shape: f32[4,128], index: 6, kind: input, shape index: {}]   ;;  %s636_s7 = inlined_call_operand.vmem [shape: f32[4,128], index: 7, kind: input, shape index: {}]   ;;  %s637_s8 = inlined_call_operand.vmem [shape: f32[4,128], index: 8, kind: input, shape index: {}]   ;;  %s638_s9 = inlined_call_operand.vmem [shape: f32[4,128], index: 9, kind: input, shape index: {}]   ;;  %s639_s10 = inlined_call_operand.hbm [shape: f32[2,512], index: 10, kind: output, shape index: {}]  }
   0x1   :  { %v38_v0 = vld [vmem:[%s629_s0 + $0x4] sm:$0x3]  ;;  %v37_v1 = vld [vmem:[%s629_s0 + $0x2] sm:$0x3]  ;;  %v127_v4 = vld [vmem:[%s630_s1] sm:$0x3] }
   0x2   :  { %v48_v2 = vsel %vm41_vm0, %v38_v0, 0.0  ;;  %v45_v3 = vsel %vm41_vm0, %v37_v1, 0.0  ;;  %v36_v5 = vld [vmem:[%s629_s0] sm:$0x3]  ;;  %v130_v6 = vsel %vm41_vm0, %v127_v4, 0.0 }
   0x3   :  { %49 = vadd.xlane.f32.xlu1 %v48_v2  ;;  %46 = vadd.xlane.f32.xlu0 %v45_v3  ;;  %v42_v7 = vsel %vm41_vm0, %v36_v5, 0.0 }
   0x4   :  { %15 = vsyncpa [#allocation3], 0  ;;  %v373_v8 = vmov 128.0   ;;  %v186_v35 = vld [vmem:[%s638_s9 + $0x1] sm:$0x1] }
   0x5   :  { %327 = vrcp.f32 %v373_v8  ;;  %v210_v36 = vld [vmem:[%s638_s9 + $0x2] sm:$0x1]  ;;  %v187_v37 = vadd.f32 1e-05, %v186_v35  ;;  %v163_v39 = vld [vmem:[%s638_s9] sm:$0x1] }
   0x6   :  { %v472_v38 = vadd.f32 1e-05, %v210_v36  ;;  %v234_v40 = vld [vmem:[%s638_s9 + $0x3] sm:$0x1]  ;;  %v481_v41 = vadd.f32 1e-05, %v163_v39 }
   0x7   :  { %329 = vrsqrt.f32 %v187_v37  ;;  %v485_v43 = vadd.f32 1e-05, %v234_v40  ;;  %vm194_vm2 = vweird.f32 %v187_v37 }
   0x8   :  { %331 = vrsqrt.f32 %v472_v38  ;;  %vm218_vm4 = vweird.f32 %v472_v38  ;;  %vm171_vm14 = vweird.f32 %v481_v41 }
   0x9   :  { %333 = vrsqrt.f32 %v481_v41 }
   0xa   :  { %335 = vrsqrt.f32 %v485_v43 }
   0xb   :  { %131 = vadd.xlane.f32.xlu1 %v130_v6  ;;  %43 = vadd.xlane.f32.xlu0 %v42_v7  ;;  %v328_v9 = vpop.eup %327 }
   0xc   :  { %v52_v10 = vmul.f32 128.0, %v328_v9  ;;  %vm56_vm1 = vweird.f32 %v328_v9 }
   0xd   :  { %v483_v42 = vpop.eup %329 }
   0xe   :  { %v53_v11 = vsub.f32 1.0, %v52_v10  ;;  %v487_v44 = vpop.eup %331  ;;  %v189_v49 = vmul.f32 %v483_v42, %v187_v37  ;;  %vm195_vm3 = vweird.f32 %v483_v42 }
   0xf   :  { %v213_v50 = vmul.f32 %v487_v44, %v472_v38  ;;  %v496_v55 = vpop.eup %333  ;;  %vm219_vm5 = vweird.f32 %v487_v44  ;;  %vm516_vm7 = vmor %vm194_vm2, %vm195_vm3 }
  0x10   :  { %v54_v12 = vmul.f32 %v328_v9, %v53_v11  ;;  %v190_v53 = vmul.f32 %v483_v42, %v189_v49  ;;  %v498_v56 = vpop.eup %335  ;;  %v166_v63 = vmul.f32 %v496_v55, %v481_v41  ;;  %vm521_vm10 = vmor %vm218_vm4, %vm219_vm5  ;;  %vm172_vm15 = vweird.f32 %v496_v55  ;;  %v312_v41 = vld [vmem:[%s633_s4] ss:$0 sm:$0xff] }
  0x11   :  { %v214_v54 = vmul.f32 %v487_v44, %v213_v50  ;;  %v237_v3 = vmul.f32 %v498_v56, %v485_v43  ;;  %vm243_vm2 = vweird.f32 %v498_v56 }
  0x12   :  { %v55_v13 = vadd.f32 %v328_v9, %v54_v12  ;;  %v191_v61 = vmul.f32 0.5, %v190_v53  ;;  %v167_v10 = vmul.f32 %v496_v55, %v166_v63 }
  0x13   :  { %v215_v62 = vmul.f32 0.5, %v214_v54  ;;  %v238_v12 = vmul.f32 %v498_v56, %v237_v3 }
  0x14   :  { %v57_v14 = vsel %vm56_vm1, %v328_v9, %v55_v13  ;;  %v192_v7 = vsub.f32 1.5, %v191_v61  ;;  %vm242_vm1 = vweird.f32 %v485_v43 }
  0x15   :  { %v216_v9 = vsub.f32 1.5, %v215_v62 }
  0x76   :  { %v50_v15 = vpop.xlane.xlu1 %49  ;;  %v47_v16 = vpop.xlane.xlu0 %46 }
  0x77   :  { %v60_v17 = vmul.f32 %v57_v14, %v50_v15  ;;  %v59_v18 = vmul.f32 %v57_v14, %v47_v16  ;;  %v193_v15 = vmul.f32 %v483_v42, %v192_v7 }
  0x79   :  { %v446_v19 = vsub.f32 %v38_v0, %v60_v17  ;;  %v448_v20 = vsub.f32 %v37_v1, %v59_v18  ;;  %v217_v18 = vmul.f32 %v487_v44, %v216_v9  ;;  %v323_v9 = vld [vmem:[%s634_s5] ss:$0 sm:$0xff] }
  0x7b   :  { %v65_v21 = vmul.f32 %v448_v20, %v448_v20  ;;  %v66_v22 = vmul.f32 %v446_v19, %v446_v19  ;;  %v221_v37 = vsel %vm521_vm10, %v487_v44, %v217_v18  ;;  %v320_v18 = vld [vmem:[%s637_s8] ss:$0 sm:$0xff] }
  0x7d   :  { %v70_v23 = vsel %vm41_vm0, %v65_v21, 0.0  ;;  %v73_v24 = vsel %vm41_vm0, %v66_v22, 0.0  ;;  %v168_v21 = vmul.f32 0.5, %v167_v10 }
  0x7e   :  { %v132_v25 = vpop.xlane.xlu1 %131  ;;  %71 = vadd.xlane.f32.xlu2 %v70_v23  ;;  %74 = vadd.xlane.f32.xlu0 %v73_v24  ;;  %v44_v26 = vpop.xlane.xlu0 %43 }
  0x7f   :  { %v133_v27 = vmul.f32 %v132_v25, %v57_v14  ;;  %v58_v28 = vmul.f32 %v57_v14, %v44_v26  ;;  %v239_v25 = vmul.f32 0.5, %v238_v12  ;;  %v169_v38 = vsub.f32 1.5, %v168_v21  ;;  %v319_v12 = vld [vmem:[%s636_s7 + $0x2] ss:$0 sm:$0xff] }
  0x81   :  { %v456_v29 = vsub.f32 %v127_v4, %v133_v27  ;;  %v458_v30 = vsub.f32 %v36_v5, %v58_v28  ;;  %v170_v61 = vmul.f32 %v496_v55, %v169_v38 }
  0x83   :  { %v135_v31 = vmul.f32 %v456_v29, %v456_v29  ;;  %v64_v32 = vmul.f32 %v458_v30, %v458_v30 }
  0x85   :  { %v136_v33 = vsel %vm41_vm0, %v135_v31, 0.0  ;;  %v67_v34 = vsel %vm41_vm0, %v64_v32, 0.0  ;;  %v529_v31 = vld [vmem:[%s631_s2] ss:$0 sm:$0xff] }
  0x86   :  { %137 = vadd.xlane.f32.xlu1 %v136_v33  ;;  %68 = vadd.xlane.f32.xlu2 %v67_v34  ;;  %v197_v34 = vsel %vm516_vm7, %v483_v42, %v193_v15  ;;  %vm570_vm7 = vmor %vm242_vm1, %vm243_vm2  ;;  %v324_v15 = vld [vmem:[%s637_s8 + $0x3] ss:$0 sm:$0xff] }
  0x87   :  { %v198_v54 = vperm.slane %v197_v34, 0 }
  0xf1   :  { %v72_v45 = vpop.xlane.xlu2 %71  ;;  %v75_v46 = vpop.xlane.xlu0 %74 }
  0xf2   :  { %v77_v47 = vmul.f32 %v72_v45, %v57_v14  ;;  %v78_v48 = vmul.f32 %v75_v46, %v57_v14  ;;  %v313_v46 = vld [vmem:[%s632_s3] ss:$0 sm:$0xff]  ;;  %s300_s3 = sshll.u32 %s639_s10, 4  ;;  %s301_s3 = int_to_ptr.hbm [resolvable:$true] %s300_s3 }
  0xf4   :  { %v80_v51 = vadd.f32 1e-06, %v77_v47  ;;  %v81_v52 = vadd.f32 1e-06, %v78_v48  ;;  %v240_v47 = vsub.f32 1.5, %v239_v25 }
  0xf6   :  { %337 = vrsqrt.f32 %v80_v51  ;;  %vm108_vm8 = vweird.f32 %v81_v52  ;;  %vm98_vm11 = vweird.f32 %v80_v51  ;;  %v241_v3 = vmul.f32 %v498_v56, %v240_v47  ;;  %v326_v47 = vld [vmem:[%s636_s7 + $0x3] ss:$0 sm:$0xff] }
  0xf7   :  { %339 = vrsqrt.f32 %v81_v52 }
  0xf9   :  { %v138_v57 = vpop.xlane.xlu1 %137  ;;  %v69_v58 = vpop.xlane.xlu2 %68 }
  0xfa   :  { %v139_v59 = vmul.f32 %v138_v57, %v57_v14  ;;  %v76_v60 = vmul.f32 %v69_v58, %v57_v14 }
  0xfc   :  { %v338_v0 = vpop.eup %337  ;;  %v502_v1 = vadd.f32 1e-06, %v139_v59  ;;  %v504_v2 = vadd.f32 1e-06, %v76_v60  ;;  %v222_v60 = vperm.slane %v221_v37, 0 }
  0xfd   :  { %v340_v4 = vpop.eup %339  ;;  %v93_v5 = vmul.f32 %v338_v0, %v80_v51  ;;  %vm99_vm6 = vweird.f32 %v338_v0  ;;  %v325_v37 = vld [vmem:[%s635_s6 + $0x3] ss:$0 sm:$0xff] }
  0xfe   :  { %v103_v6 = vmul.f32 %v340_v4, %v81_v52  ;;  %341 = vrsqrt.f32 %v502_v1  ;;  %vm109_vm9 = vweird.f32 %v340_v4  ;;  %vm100_vm12 = vmor %vm98_vm11, %vm99_vm6  ;;  %vm147_vm3 = vweird.f32 %v502_v1 }
  0xff   :  { %v94_v8 = vmul.f32 %v338_v0, %v93_v5  ;;  %343 = vrsqrt.f32 %v504_v2  ;;  %vm110_vm13 = vmor %vm108_vm8, %vm109_vm9  ;;  %vm88_vm9 = vweird.f32 %v504_v2  ;;  %v318_v5 = vld [vmem:[%s635_s6 + $0x2] ss:$0 sm:$0xff] }
 0x100   :  { %v104_v11 = vmul.f32 %v340_v4, %v103_v6  ;;  %vm561_vm6 = vmor %vm171_vm14, %vm172_vm15 }
 0x101   :  { %v95_v13 = vmul.f32 0.5, %v94_v8 }
 0x102   :  { %v105_v14 = vmul.f32 0.5, %v104_v11 }
 0x103   :  { %v96_v16 = vsub.f32 1.5, %v95_v13 }
 0x104   :  { %v342_v22 = vpop.eup %341  ;;  %v106_v23 = vsub.f32 1.5, %v105_v14 }
 0x105   :  { %v344_v26 = vpop.eup %343  ;;  %v97_v27 = vmul.f32 %v338_v0, %v96_v16  ;;  %v142_v28 = vmul.f32 %v342_v22, %v502_v1  ;;  %vm148_vm4 = vweird.f32 %v342_v22  ;;  %v315_v1 = vld [vmem:[%s635_s6 + $0x1] ss:$0 sm:$0xff]  ;;  %v245_v16 = vsel %vm570_vm7, %v498_v56, %v241_v3  ;;  %v321_v56 = vld [vmem:[%s635_s6] ss:$0 sm:$0xff]  ;;  %s374_s6 = smov [#allocation2]  }
 0x106   :  { %v107_v32 = vmul.f32 %v340_v4, %v106_v23  ;;  %v83_v33 = vmul.f32 %v344_v26, %v504_v2  ;;  %vm89_vm5 = vweird.f32 %v344_v26  ;;  %vm149_vm8 = vmor %vm147_vm3, %vm148_vm4  ;;  %v316_v2 = vld [vmem:[%s636_s7 + $0x1] ss:$0 sm:$0xff]  ;;  %v246_v25 = vperm.slane %v245_v16, 0 }
 0x107   :  { %v101_v35 = vsel %vm100_vm12, %v338_v0, %v97_v27  ;;  %v143_v36 = vmul.f32 %v342_v22, %v142_v28  ;;  %vm90_vm10 = vmor %vm88_vm9, %vm89_vm5 }
 0x108   :  { %v113_v39 = vmul.f32 %v101_v35, %v448_v20  ;;  %v111_v40 = vsel %vm110_vm13, %v340_v4, %v107_v32  ;;  %v84_v45 = vmul.f32 %v344_v26, %v83_v33  ;;  %v314_v20 = vld [vmem:[%s637_s8 + $0x1] ss:$0 sm:$0xff]  ;;  %v322_v35 = vld [vmem:[%s636_s7] ss:$0 sm:$0xff]  ;;  %s298_s7 = sshll.u32 %s374_s6, 4  ;;  %s299_s7 = int_to_ptr.vmem [resolvable:$true] %s298_s7 }
 0x109   :  { %v114_v48 = vmul.f32 %v111_v40, %v446_v19  ;;  %v144_v42 = vmul.f32 0.5, %v143_v36  ;;  %v317_v19 = vld [vmem:[%s637_s8 + $0x2] ss:$0 sm:$0xff] }
 0x10a   :  { %v119_v49 = vmul.f32 %v529_v31, %v113_v39  ;;  %v85_v44 = vmul.f32 0.5, %v84_v45 }
 0x10b   :  { %v120_v50 = vmul.f32 %v529_v31, %v114_v48  ;;  %v145_v51 = vsub.f32 1.5, %v144_v42 }
 0x10c   :  { %v86_v52 = vsub.f32 1.5, %v85_v44  ;;  %v125_v53 = vadd.f32 %v313_v46, %v119_v49 }
 0x10d   :  { %v146_v58 = vmul.f32 %v342_v22, %v145_v51  ;;  %v126_v59 = vadd.f32 %v313_v46, %v120_v50 }
 0x10e   :  { %v87_v63 = vmul.f32 %v344_v26, %v86_v52  ;;  %v185_v0 = vsub.f32 %v125_v53, %v314_v20 }
 0x10f   :  { %v150_v43 = vsel %vm149_vm8, %v342_v22, %v146_v58  ;;  %v209_v4 = vsub.f32 %v126_v59, %v317_v19 }
 0x110   :  { %v151_v6 = vmul.f32 %v150_v43, %v456_v29  ;;  %v91_v7 = vsel %vm90_vm10, %v344_v26, %v87_v63  ;;  %v199_v8 = vmul.f32 %v198_v54, %v185_v0  ;;  %v174_v29 = vsel %vm561_vm6, %v496_v55, %v170_v61 }
 0x111   :  { %v112_v10 = vmul.f32 %v91_v7, %v458_v30  ;;  %v223_v11 = vmul.f32 %v222_v60, %v209_v4  ;;  %v175_v55 = vperm.slane %v174_v29, 0 }
 0x112   :  { %v155_v13 = vmul.f32 %v312_v41, %v151_v6  ;;  %v202_v14 = vmul.f32 %v315_v1, %v199_v8 }
 0x113   :  { %v118_v30 = vmul.f32 %v529_v31, %v112_v10  ;;  %v226_v17 = vmul.f32 %v318_v5, %v223_v11 }
 0x114   :  { %v205_v21 = vadd.f32 %v316_v2, %v202_v14  ;;  %v159_v22 = vadd.f32 %v323_v9, %v155_v13 }
 0x115   :  { %v229_v23 = vadd.f32 %v319_v12, %v226_v17  ;;  %v124_v24 = vadd.f32 %v313_v46, %v118_v30 }
 0x116   :  { %v206_v26 = vmul.f32 0.5, %v205_v21  ;;  %v233_v27 = vsub.f32 %v159_v22, %v324_v15 }
 0x117   :  { %v230_v28 = vmul.f32 0.5, %v229_v23  ;;  %v162_v32 = vsub.f32 %v124_v24, %v320_v18 }
 0x118   :  { %v259_v31 = vmul.f32 %v206_v26, %v206_v26  ;;  %v247_v36 = vmul.f32 %v246_v25, %v233_v27 }
 0x119   :  { %v264_v33 = vmul.f32 %v230_v28, %v230_v28  ;;  %v176_v34 = vmul.f32 %v175_v55, %v162_v32 }
 0x11a   :  { %v260_v38 = vsel %vm41_vm0, %v259_v31, 0.0  ;;  %v250_v46 = vmul.f32 %v325_v37, %v247_v36 }
 0x11b   :  { %261 = vadd.xlane.f32.xlu0 %v260_v38  ;;  %v265_v39 = vsel %vm41_vm0, %v264_v33, 0.0  ;;  %v179_v40 = vmul.f32 %v321_v56, %v176_v34 }
 0x11c   :  { %266 = vadd.xlane.f32.xlu1 %v265_v39  ;;  %v253_v49 = vadd.f32 %v326_v47, %v250_v46 }
 0x11d   :  { %v182_v45 = vadd.f32 %v322_v35, %v179_v40 }
 0x11e   :  { %v269_v44 = vmul.f32 %v253_v49, %v253_v49 }
 0x11f   :  { %v254_v48 = vmul.f32 %v182_v45, %v182_v45 }
 0x120   :  { %v270_v20 = vsel %vm41_vm0, %v269_v44, 0.0 }
 0x121   :  { %v255_v42 = vsel %vm41_vm0, %v254_v48, 0.0 }
 0x122   :  { %256 = vadd.xlane.f32.xlu2 %v255_v42 }
 0x12a   :  { %271 = vadd.xlane.f32.xlu2 %v270_v20 }
 0x18e   :  { %v262_v51 = vpop.xlane.xlu0 %261 }
 0x18f   :  { %v267_v52 = vpop.xlane.xlu1 %266 }
 0x195   :  { %v257_v50 = vpop.xlane.xlu2 %256 }
 0x196   :  { %v263_v19 = vadd.f32 %v262_v51, %v257_v50 }
 0x198   :  { %v268_v53 = vadd.f32 %v267_v52, %v263_v19 }
 0x19d   :  { %v272_v54 = vpop.xlane.xlu2 %271 }
 0x19e   :  { %v273_v57 = vadd.f32 %v272_v54, %v268_v53 }
 0x1a0   :  { %v274_v58 = vadd.f32 1e-24, %v273_v57 }
 0x1a2   :  { %345 = vrsqrt.f32 %v274_v58  ;;  %vm281_vm12 = vweird.f32 %v274_v58 }
 0x1a8   :  { %v346_v59 = vpop.eup %345 }
 0x1a9   :  { %v276_v60 = vmul.f32 %v346_v59, %v274_v58  ;;  %vm282_vm11 = vweird.f32 %v346_v59 }
 0x1aa   :  { %vm283_vm13 = vmor %vm281_vm12, %vm282_vm11 }
 0x1ab   :  { %v277_v61 = vmul.f32 %v346_v59, %v276_v60 }
 0x1ad   :  { %v278_v62 = vmul.f32 0.5, %v277_v61 }
 0x1af   :  { %v279_v41 = vsub.f32 1.5, %v278_v62 }
 0x1b1   :  { %v280_v63 = vmul.f32 %v346_v59, %v279_v41 }
 0x1b3   :  { %v284_v0 = vsel %vm283_vm13, %v346_v59, %v280_v63 }
 0x1b4   :  { %v285_v1 = vmul.f32 %v284_v0, %v182_v45  ;;  %v287_v3 = vmul.f32 %v284_v0, %v206_v26  ;;  %v289_v43 = vmul.f32 %v284_v0, %v230_v28  ;;  %v291_v4 = vmul.f32 %v284_v0, %v253_v49 }
 0x1b6   :  { %286 = vst [vmem:[#allocation2] sm:$0x3] %v285_v1 }
 0x1b7   :  { %288 = vst [vmem:[#allocation2 + $0x2] sm:$0x3] %v287_v3 }
 0x1b8   :  { %290 = vst [vmem:[#allocation2 + $0x4] sm:$0x3] %v289_v43 }
 0x1b9   :  { %292 = vst [vmem:[#allocation2 + $0x6] sm:$0x3] %v291_v4 }
 0x1ba   :  { %303 = dma.vmem_to_hbm [thread:$0]  %s299_s7, 128, %s301_s3, [#allocation3]  }
 0x1bb   :  { %371 = dma.done.wait [#allocation3], 128  }
 0x1bc   :  { %372 = vsyncadd [#allocation3], 4294967168 }
 0x1bd   :  { %308 = vsyncpa [#allocation3], 1 }

// kernel: _lambda_.5
= control target key start
LH: loop header
LB: loop body
LE: loop exit
PB: predicated region body
PF: predicated region fallthrough
CT: control target
= control target key end

     0   :  { %s4391_s24 = smov 0   ;;  %s4393_s25 = smov 0   ;;  %s5169_s0 = inlined_call_operand.vmem [shape: f32[6,5,128], index: 0, kind: input, shape index: {}]   ;;  %s5170_s1 = inlined_call_operand.vmem [shape: f32[1,1,128], index: 1, kind: input, shape index: {}]   ;;  %s5171_s2 = inlined_call_operand.vmem [shape: f32[1,1,128], index: 2, kind: input, shape index: {}]   ;;  %s5172_s3 = inlined_call_operand.vmem [shape: bf16[1,4,128,32], index: 3, kind: input, shape index: {}]   ;;  %s5173_s4 = inlined_call_operand.vmem [shape: f32[1,4,1,32], index: 4, kind: input, shape index: {}]   ;;  %s5174_s5 = inlined_call_operand.vmem [shape: bf16[1,4,128,32], index: 5, kind: input, shape index: {}]   ;;  %s5175_s6 = inlined_call_operand.vmem [shape: f32[1,4,1,32], index: 6, kind: input, shape index: {}]   ;;  %s5176_s7 = inlined_call_operand.vmem [shape: bf16[1,4,128,32], index: 7, kind: input, shape index: {}]   ;;  %s5177_s8 = inlined_call_operand.vmem [shape: f32[1,4,1,32], index: 8, kind: input, shape index: {}]   ;;  %s5178_s9 = inlined_call_operand.vmem [shape: bf16[1,4,32,128], index: 9, kind: input, shape index: {}]   ;;  %s5179_s10 = inlined_call_operand.vmem [shape: f32[1,1,128], index: 10, kind: input, shape index: {}]   ;;  %s5180_s11 = inlined_call_operand.vmem [shape: f32[1,1,128], index: 11, kind: input, shape index: {}]   ;;  %s5181_s12 = inlined_call_operand.vmem [shape: f32[1,1,128], index: 12, kind: input, shape index: {}]   ;;  %s5182_s13 = inlined_call_operand.vmem [shape: bf16[1,128,512], index: 13, kind: input, shape index: {}]   ;;  %s5183_s14 = inlined_call_operand.vmem [shape: f32[1,1,512], index: 14, kind: input, shape index: {}]   ;;  %s5184_s15 = inlined_call_operand.vmem [shape: bf16[1,512,128], index: 15, kind: input, shape index: {}]   ;;  %s5185_s16 = inlined_call_operand.vmem [shape: f32[1,1,128], index: 16, kind: input, shape index: {}]   ;;  %s5186_s17 = inlined_call_operand.vmem [shape: f32[6,5,128], index: 17, kind: output, shape index: {}]  }
   0x1   :  { %5187 = sst [smem:[#allocation2_spill]] %s5169_s0  ;;  %s4395_s26 = smov 0  }
   0x2   :  { %5188 = sst [smem:[#allocation3_spill]] %s5170_s1 }
   0x3 LB: > { %s39_s27 = sadd.s32 1, %s4293_s25  ;;  %p3179_p0 = scmp.ge.s32.totalorder %s4297_s26, 1  ;;  %s4297_s26 = sphi %s4395_s26, %s27_s26   ;;  %s4293_s25 = sphi %s4393_s25, %s5192_s25   ;;  %s4289_s24 = sphi %s4391_s24, %s5191_s24  }
   0x4   : > { %p41_p1 = scmp.ge.s32.totalorder %s39_s27, 6  ;;  %p642_p2 = scmp.lt.s32.totalorder %s4297_s26, 7 }
   0x6   : > { %s5194_s27 = smov (%p41_p1, %s39_s27), 0  ;;  %p643_p3 = pnand %p3179_p0, %p642_p2 }
   0x7   : > { %p756_p4 = scmp.lt.s32.totalorder (!%p643_p3), %s4289_s24, 5  ;;  %s5189_s30 = sld [smem:[#allocation2_spill]] (!%p643_p3) }
   0x8   : > { %646 = sbr.rel (%p643_p3) target bundleno = 3261 (0xcbd), region = 88  ;;  %s5190_s1 = sld [smem:[#allocation3_spill]] (!%p643_p3) }
   0xd   : > { %s5196_s24 = smov (!%p756_p4, %s4289_s24), 5  ;;  %vm838_vm0 = vcmask 1044480   ;;  %v4299_v3 = vmov 128.0   ;;  %v4056_v4 = vld [vmem:[%s5176_s7 + $0x38] sm:$0xff]  ;;  %v4055_v6 = vld [vmem:[%s5176_s7 + $0x30] sm:$0xff]  ;;  %v4054_v12 = vld [vmem:[%s5176_s7 + $0x28] sm:$0xff] }
   0xe   : > { %s3180_s28 = sshll.u32 %s5196_s24, 3  ;;  %4245 = vrcp.f32 %v4299_v3  ;;  %v4048_v5 = vld [vmem:[%s5174_s5 + $0x38] sm:$0xff]  ;;  %1108 = vmatpush.bf16.msra.mxu2 %v4056_v4  ;;  %v4047_v7 = vld [vmem:[%s5174_s5 + $0x30] sm:$0xff]  ;;  %v4046_v13 = vld [vmem:[%s5174_s5 + $0x28] sm:$0xff]  ;;  %vm1123_vm5 = vcmask 261120   ;;  %vm1162_vm6 = vcmask 1041408  }
   0xf   : > { %s759_s18 = scalar_lea.vmem %s5189_s30, %s3180_s28  ;;  %s4415_s20 = scalar_lea.vmem %s5186_s17, %s3180_s28  ;;  %1027 = vmatpush.bf16.msra.mxu1 %v4048_v5  ;;  %v4040_v8 = vld [vmem:[%s5172_s3 + $0x38] sm:$0xff]  ;;  %v4039_v10 = vld [vmem:[%s5172_s3 + $0x30] sm:$0xff]  ;;  %v4038_v14 = vld [vmem:[%s5172_s3 + $0x28] sm:$0xff]  ;;  %vm1163_vm7 = vcmask 1042432   ;;  %vm1144_vm8 = vcmask 36864   ;;  %vm1158_vm9 = vcmask 39936  }
  0x10   : > { %v833_v0 = vld [vmem:[%s759_s18] sm:$0x1f]  ;;  %946 = vmatpush.bf16.msra.mxu0 %v4040_v8  ;;  %v4052_v20 = vld [vmem:[%s5176_s7 + $0x18] sm:$0xff]  ;;  %v4051_v23 = vld [vmem:[%s5176_s7 + $0x10] sm:$0xff] }
  0x11   : > { %834 = vst [vmem:[%s4415_s20] sm:$0x1f] %v833_v0  ;;  %v4053_v16 = vld [vmem:[%s5176_s7 + $0x20] sm:$0xff]  ;;  %v4044_v21 = vld [vmem:[%s5174_s5 + $0x18] sm:$0xff]  ;;  %v4043_v24 = vld [vmem:[%s5174_s5 + $0x10] sm:$0xff] }
  0x12   : > { %1109 = vmatpush.bf16.msra.mxu2 %v4055_v6  ;;  %v4045_v17 = vld [vmem:[%s5174_s5 + $0x20] sm:$0xff]  ;;  %v4050_v26 = vld [vmem:[%s5176_s7 + $0x8] sm:$0xff]  ;;  %v4082_v35 = vld [vmem:[%s5176_s7 + $0x78] sm:$0xff] }
  0x13   : > { %1028 = vmatpush.bf16.msra.mxu1 %v4047_v7  ;;  %v4037_v18 = vld [vmem:[%s5172_s3 + $0x20] sm:$0xff]  ;;  %v4042_v27 = vld [vmem:[%s5174_s5 + $0x8] sm:$0xff]  ;;  %v4036_v36 = vld [vmem:[%s5172_s3 + $0x18] sm:$0xff] }
  0x14   : > { %v4246_v9 = vpop.eup %4245  ;;  %947 = vmatpush.bf16.msra.mxu0 %v4039_v10  ;;  %v4049_v33 = vld [vmem:[%s5176_s7] sm:$0xff]  ;;  %v4074_v37 = vld [vmem:[%s5174_s5 + $0x78] sm:$0xff]  ;;  %v4081_v38 = vld [vmem:[%s5176_s7 + $0x70] sm:$0xff] }
  0x15   : > { %v843_v11 = vmul.f32 128.0, %v4246_v9  ;;  %vm847_vm1 = vweird.f32 %v4246_v9  ;;  %v4041_v34 = vld [vmem:[%s5174_s5] sm:$0xff]  ;;  %v4035_v39 = vld [vmem:[%s5172_s3 + $0x10] sm:$0xff]  ;;  %v4080_v41 = vld [vmem:[%s5176_s7 + $0x68] sm:$0xff] }
  0x16   : > { %1110 = vmatpush.bf16.msra.mxu2 %v4054_v12  ;;  %v4073_v40 = vld [vmem:[%s5174_s5 + $0x70] sm:$0xff]  ;;  %v4034_v42 = vld [vmem:[%s5172_s3 + $0x8] sm:$0xff]  ;;  %v4079_v44 = vld [vmem:[%s5176_s7 + $0x60] sm:$0xff] }
  0x17   : > { %v844_v15 = vsub.f32 1.0, %v843_v11  ;;  %1029 = vmatpush.bf16.msra.mxu1 %v4046_v13  ;;  %v4072_v43 = vld [vmem:[%s5174_s5 + $0x68] sm:$0xff]  ;;  %v4033_v45 = vld [vmem:[%s5172_s3] sm:$0xff]  ;;  %v4066_v47 = vld [vmem:[%s5172_s3 + $0x78] sm:$0xff] }
  0x18   : > { %v4419_v1 = vld [vmem:[%s4415_s20] sm:$0x1f]  ;;  %948 = vmatpush.bf16.msra.mxu0 %v4038_v14  ;;  %v4078_v48 = vld [vmem:[%s5176_s7 + $0x58] sm:$0xff]  ;;  %v4065_v50 = vld [vmem:[%s5172_s3 + $0x70] sm:$0xff] }
  0x19   : > { %v839_v2 = vsel %vm838_vm0, %v4419_v1, 0.0  ;;  %v845_v19 = vmul.f32 %v4246_v9, %v844_v15  ;;  %v4071_v46 = vld [vmem:[%s5174_s5 + $0x60] sm:$0xff]  ;;  %v4070_v49 = vld [vmem:[%s5174_s5 + $0x58] sm:$0xff]  ;;  %v4077_v51 = vld [vmem:[%s5176_s7 + $0x50] sm:$0xff] }
  0x1a   : > { %840 = vadd.xlane.f32.xlu0 %v839_v2  ;;  %1111 = vmatpush.bf16.msra.mxu2 %v4053_v16  ;;  %v4069_v52 = vld [vmem:[%s5174_s5 + $0x50] sm:$0xff]  ;;  %v4064_v53 = vld [vmem:[%s5172_s3 + $0x68] sm:$0xff]  ;;  %v4063_v56 = vld [vmem:[%s5172_s3 + $0x60] sm:$0xff] }
  0x1b   : > { %1030 = vmatpush.bf16.msra.mxu1 %v4045_v17  ;;  %v846_v22 = vadd.f32 %v4246_v9, %v845_v19  ;;  %v4076_v54 = vld [vmem:[%s5176_s7 + $0x48] sm:$0xff]  ;;  %v4075_v57 = vld [vmem:[%s5176_s7 + $0x40] sm:$0xff]  ;;  %v4062_v60 = vld [vmem:[%s5172_s3 + $0x58] sm:$0xff] }
  0x1c   : > { %949 = vmatpush.bf16.msra.mxu0 %v4037_v18  ;;  %v4068_v55 = vld [vmem:[%s5174_s5 + $0x48] sm:$0xff]  ;;  %v4067_v58 = vld [vmem:[%s5174_s5 + $0x40] sm:$0xff]  ;;  %v4061_v63 = vld [vmem:[%s5172_s3 + $0x50] sm:$0xff] }
  0x1d   : > { %v4471_v25 = vsel %vm847_vm1, %v4246_v9, %v846_v22  ;;  %v4060_v0 = vld [vmem:[%s5172_s3 + $0x48] sm:$0xff]  ;;  %v4059_v4 = vld [vmem:[%s5172_s3 + $0x40] sm:$0xff]  ;;  %v4092_v15 = vld [vmem:[%s5172_s3 + $0xb8] sm:$0xff] }
  0x1e   : > { %1112 = vmatpush.bf16.msra.mxu2 %v4052_v20  ;;  %v4227_v9 = vld [vmem:[%s5190_s1] ss:$0 sm:$0xff]  ;;  %v4100_v17 = vld [vmem:[%s5174_s5 + $0xb8] sm:$0xff]  ;;  %v4091_v18 = vld [vmem:[%s5172_s3 + $0xb0] sm:$0xff] }
  0x1f   : > { %1031 = vmatpush.bf16.msra.mxu1 %v4044_v21  ;;  %v4228_v11 = vld [vmem:[%s5171_s2] ss:$0 sm:$0xff]  ;;  %v4099_v19 = vld [vmem:[%s5174_s5 + $0xb0] sm:$0xff]  ;;  %v4090_v20 = vld [vmem:[%s5172_s3 + $0xa8] sm:$0xff] }
  0x20   : > { %950 = vmatpush.bf16.msra.mxu0 %v4036_v36  ;;  %v4098_v21 = vld [vmem:[%s5174_s5 + $0xa8] sm:$0xff]  ;;  %v4089_v22 = vld [vmem:[%s5172_s3 + $0xa0] sm:$0xff] }
  0x21   : > { %v4115_v36 = vld [vmem:[%s5172_s3 + $0xe0] sm:$0xff] }
  0x22   : > { %1113 = vmatpush.bf16.msra.mxu2 %v4051_v23  ;;  %v4097_v23 = vld [vmem:[%s5174_s5 + $0xa0] sm:$0xff] }
  0x23   : > { %1032 = vmatpush.bf16.msra.mxu1 %v4043_v24  ;;  %v4088_v24 = vld [vmem:[%s5172_s3 + $0x98] sm:$0xff] }
  0x24   : > { %951 = vmatpush.bf16.msra.mxu0 %v4035_v39  ;;  %v4112_v39 = vld [vmem:[%s5172_s3 + $0xc8] sm:$0xff] }
  0x26   : > { %1114 = vmatpush.bf16.msra.mxu2 %v4050_v26  ;;  %v4096_v26 = vld [vmem:[%s5174_s5 + $0x98] sm:$0xff] }
  0x27   : > { %1033 = vmatpush.bf16.msra.mxu1 %v4042_v27  ;;  %v4087_v27 = vld [vmem:[%s5172_s3 + $0x90] sm:$0xff] }
  0x28   : > { %952 = vmatpush.bf16.msra.mxu0 %v4034_v42 }
  0x2a   : > { %1115 = vmatpush.bf16.msra.mxu2 %v4049_v33  ;;  %v4118_v33 = vld [vmem:[%s5172_s3 + $0xf8] sm:$0xff] }
  0x2b   : > { %1034 = vmatpush.bf16.msra.mxu1 %v4041_v34  ;;  %v4117_v34 = vld [vmem:[%s5172_s3 + $0xf0] sm:$0xff] }
  0x2c   : > { %953 = vmatpush.bf16.msra.mxu0 %v4033_v45  ;;  %v4229_v45 = vld [vmem:[%s5173_s4] ss:$0 sm:$0xff] }
  0x2e   : > { %1455 = vmatpush.bf16.msrb.mxu2 %v4082_v35  ;;  %v4116_v35 = vld [vmem:[%s5172_s3 + $0xe8] sm:$0xff] }
  0x2f   : > { %1372 = vmatpush.bf16.msrb.mxu1 %v4074_v37  ;;  %v4114_v37 = vld [vmem:[%s5172_s3 + $0xd8] sm:$0xff] }
  0x30   : > { %1289 = vmatpush.bf16.msrb.mxu0 %v4066_v47  ;;  %v4231_v47 = vld [vmem:[%s5177_s8] ss:$0 sm:$0xff] }
  0x32   : > { %1456 = vmatpush.bf16.msrb.mxu2 %v4081_v38  ;;  %v4113_v38 = vld [vmem:[%s5172_s3 + $0xd0] sm:$0xff] }
  0x33   : > { %1373 = vmatpush.bf16.msrb.mxu1 %v4073_v40  ;;  %v4111_v40 = vld [vmem:[%s5172_s3 + $0xc0] sm:$0xff] }
  0x34   : > { %1290 = vmatpush.bf16.msrb.mxu0 %v4065_v50 }
  0x36   : > { %1457 = vmatpush.bf16.msrb.mxu2 %v4080_v41  ;;  %v4230_v41 = vld [vmem:[%s5175_s6] ss:$0 sm:$0xff] }
  0x37   : > { %1374 = vmatpush.bf16.msrb.mxu1 %v4072_v43 }
  0x38   : > { %1291 = vmatpush.bf16.msrb.mxu0 %v4064_v53  ;;  %v4084_v53 = vld [vmem:[%s5178_s9 + $0x18] sm:$0xff] }
  0x3a   : > { %1458 = vmatpush.bf16.msrb.mxu2 %v4079_v44 }
  0x3b   : > { %1375 = vmatpush.bf16.msrb.mxu1 %v4071_v46 }
  0x3c   : > { %1292 = vmatpush.bf16.msrb.mxu0 %v4063_v56 }
  0x3e   : > { %1459 = vmatpush.bf16.msrb.mxu2 %v4078_v48 }
  0x3f   : > { %1376 = vmatpush.bf16.msrb.mxu1 %v4070_v49  ;;  %v4300_v49 = vmov 65535  }
  0x40   : > { %1293 = vmatpush.bf16.msrb.mxu0 %v4062_v60  ;;  %v1164_v50 = vsel %vm1162_vm6, 4294967295, %v4300_v49  ;;  %v4083_v60 = vld [vmem:[%s5178_s9 + $0x10] sm:$0xff] }
  0x42   : > { %1460 = vmatpush.bf16.msrb.mxu2 %v4077_v51 }
  0x43   : > { %1377 = vmatpush.bf16.msrb.mxu1 %v4069_v52 }
  0x44   : > { %1294 = vmatpush.bf16.msrb.mxu0 %v4061_v63 }
  0x46   : > { %1461 = vmatpush.bf16.msrb.mxu2 %v4076_v54 }
  0x47   : > { %1378 = vmatpush.bf16.msrb.mxu1 %v4068_v55 }
  0x48   : > { %1295 = vmatpush.bf16.msrb.mxu0 %v4060_v0 }
  0x4a   : > { %1462 = vmatpush.bf16.msrb.mxu2 %v4075_v57  ;;  %v4680_v57 = vsel %vm1163_vm7, %v1164_v50, 0 }
  0x4b   : > { %1379 = vmatpush.bf16.msrb.mxu1 %v4067_v58 }
  0x4c   : > { %1296 = vmatpush.bf16.msrb.mxu0 %v4059_v4 }
  0x8d   : > { %v841_v28 = vpop.xlane.xlu0 %840 }
  0x8e   : > { %v849_v29 = vmul.f32 %v4471_v25, %v841_v28  ;;  %v4095_v28 = vld [vmem:[%s5174_s5 + $0x90] sm:$0xff] }
  0x90   : > { %v4481_v30 = vsub.f32 %v4419_v1, %v849_v29  ;;  %v4086_v29 = vld [vmem:[%s5172_s3 + $0x88] sm:$0xff] }
  0x92   : > { %v851_v31 = vmul.f32 %v4481_v30, %v4481_v30 }
  0x94   : > { %v852_v32 = vsel %vm838_vm0, %v851_v31, 0.0  ;;  %v4085_v31 = vld [vmem:[%s5172_s3 + $0x80] sm:$0xff] }
  0x95   : > { %853 = vadd.xlane.f32.xlu0 %v852_v32  ;;  %v4093_v32 = vld [vmem:[%s5174_s5 + $0x80] sm:$0xff] }
 0x108   : > { %v854_v59 = vpop.xlane.xlu0 %853 }
 0x109   : > { %v855_v61 = vmul.f32 %v854_v59, %v4471_v25 }
 0x10b   : > { %v856_v62 = vadd.f32 1e-06, %v855_v61 }
 0x10d   : > { %4247 = vrsqrt.f32 %v856_v62  ;;  %vm863_vm3 = vweird.f32 %v856_v62 }
 0x113   : > { %v4248_v2 = vpop.eup %4247 }
 0x114   : > { %v858_v3 = vmul.f32 %v4248_v2, %v856_v62  ;;  %vm864_vm2 = vweird.f32 %v4248_v2 }
 0x115   : > { %vm865_vm4 = vmor %vm863_vm3, %vm864_vm2 }
 0x116   : > { %v859_v5 = vmul.f32 %v4248_v2, %v858_v3 }
 0x118   : > { %v860_v6 = vmul.f32 0.5, %v859_v5 }
 0x11a   : > { %v861_v7 = vsub.f32 1.5, %v860_v6 }
 0x11c   : > { %v862_v8 = vmul.f32 %v4248_v2, %v861_v7  ;;  %v4236_v7 = vld [vmem:[%s5175_s6 + $0x2] ss:$0 sm:$0xff] }
 0x11e   : > { %v866_v10 = vsel %vm865_vm4, %v4248_v2, %v862_v8 }
 0x11f   : > { %v867_v12 = vmul.f32 %v866_v10, %v4481_v30  ;;  %v4094_v30 = vld [vmem:[%s5174_s5 + $0x88] sm:$0xff] }
 0x121   : > { %v871_v13 = vmul.f32 %v4227_v9, %v867_v12 }
 0x123   : > { %v875_v14 = vadd.f32 %v4228_v11, %v871_v13 }
 0x125   : > { %v4587_v16 = vpack.c.bf16 %v875_v14, %v875_v14 }
 0x127   : > { %954 = vmatmul.bf16.vlgmr.msra.gmra.mxu0 %v4587_v16  ;;  %1035 = vmatmul.bf16.vlgmr.msra.gmra.mxu1 %v4587_v16 }
 0x128   : > { %1116 = vmatmul.bf16.vlgmr.msra.gmra.mxu2 %v4587_v16  ;;  %1627 = vmatpush.bf16.msra.mxu1 %v4092_v15 }
 0x129   : > { %1710 = vmatpush.bf16.msra.mxu2 %v4100_v17  ;;  %1549 = vmatpush.bf16.msra.mxu0 %v4084_v53  ;;  %v4108_v53 = vld [vmem:[%s5176_s7 + $0xb8] sm:$0xff] }
 0x12c   : > { %1628 = vmatpush.bf16.msra.mxu1 %v4091_v18 }
 0x12d   : > { %1711 = vmatpush.bf16.msra.mxu2 %v4099_v19  ;;  %1550 = vmatpush.bf16.msra.mxu0 %v4083_v60 }
 0x130   : > { %1629 = vmatpush.bf16.msra.mxu1 %v4090_v20 }
 0x131   : > { %1712 = vmatpush.bf16.msra.mxu2 %v4098_v21 }
 0x134   : > { %1630 = vmatpush.bf16.msra.mxu1 %v4089_v22 }
 0x135   : > { %1713 = vmatpush.bf16.msra.mxu2 %v4097_v23 }
 0x137   : > { %1297 = vmatmul.bf16.vlgmr.msrb.gmra.mxu0 %v4587_v16  ;;  %1380 = vmatmul.bf16.vlgmr.msrb.gmra.mxu1 %v4587_v16 }
 0x138   : > { %1463 = vmatmul.bf16.vlgmr.msrb.gmra.mxu2 %v4587_v16  ;;  %1631 = vmatpush.bf16.msra.mxu1 %v4088_v24 }
 0x139   : > { %1714 = vmatpush.bf16.msra.mxu2 %v4096_v26 }
 0x13c   : > { %1632 = vmatpush.bf16.msra.mxu1 %v4087_v27  ;;  %v4058_v27 = vld [vmem:[%s5178_s9 + $0x8] sm:$0xff] }
 0x13d   : > { %1715 = vmatpush.bf16.msra.mxu2 %v4095_v28  ;;  %v4057_v28 = vld [vmem:[%s5178_s9] sm:$0xff] }
 0x140   : > { %1633 = vmatpush.bf16.msra.mxu1 %v4086_v29  ;;  %v4233_v29 = vld [vmem:[%s5175_s6 + $0x1] ss:$0 sm:$0xff] }
 0x141   : > { %1716 = vmatpush.bf16.msra.mxu2 %v4094_v30 }
 0x144   : > { %1634 = vmatpush.bf16.msra.mxu1 %v4085_v31 }
 0x145   : > { %1717 = vmatpush.bf16.msra.mxu2 %v4093_v32 }
 0x147   : > { %1635 = vmatmul.bf16.vlgmr.msra.gmra.mxu1 %v4587_v16 }
 0x148   : > { %1718 = vmatmul.bf16.vlgmr.msra.gmra.mxu2 %v4587_v16 }
 0x149   : > { %1965 = vmatpush.bf16.msrb.mxu2 %v4118_v33 }
 0x14d   : > { %1966 = vmatpush.bf16.msrb.mxu2 %v4117_v34 }
 0x151   : > { %1967 = vmatpush.bf16.msrb.mxu2 %v4116_v35 }
 0x155   : > { %1968 = vmatpush.bf16.msrb.mxu2 %v4115_v36 }
 0x159   : > { %1969 = vmatpush.bf16.msrb.mxu2 %v4114_v37  ;;  %v4234_v37 = vld [vmem:[%s5177_s8 + $0x1] ss:$0 sm:$0xff] }
 0x15d   : > { %1970 = vmatpush.bf16.msrb.mxu2 %v4113_v38 }
 0x161   : > { %1971 = vmatpush.bf16.msrb.mxu2 %v4112_v39 }
 0x165   : > { %1972 = vmatpush.bf16.msrb.mxu2 %v4111_v40 }
 0x168   : > { %1973 = vmatmul.bf16.vlgmr.msrb.gmra.mxu2 %v4587_v16 }
 0x1a4   : > { %v955_v42 = vpop.f32.mrf.mxu0  ;;  %v1036_v43 = vpop.f32.mrf.mxu1 }
 0x1a5   : > { %v1037_v44 = vadd.f32 %v4230_v41, %v1036_v43  ;;  %v956_v51 = vadd.f32 %v4229_v45, %v955_v42 }
 0x1a7   : > { %v1122_v46 = vpack.c.bf16 %v1037_v44, %v1037_v44  ;;  %v1121_v59 = vpack.c.bf16 %v956_v51, %v956_v51  ;;  %v4232_v44 = vld [vmem:[%s5173_s4 + $0x1] ss:$0 sm:$0xff] }
 0x1a9   : > { %v1128_v48 = vsel %vm1123_vm5, %v1122_v46, 0 }
 0x1aa   : > { %1137 = vmatpush.bf16.xpose.msra.mxu3 %v1128_v48 }
 0x1ab   : > { %v1117_v52 = vpop.f32.mrf.mxu2 }
 0x1ac   : > { %v1118_v54 = vadd.f32 %v4231_v47, %v1117_v52  ;;  %v957_v55 = vpop.f32.mrf.mxu0  ;;  %v1038_v56 = vpop.f32.mrf.mxu1 }
 0x1ad   : > { %v4106_v55 = vld [vmem:[%s5176_s7 + $0xa8] sm:$0xff]  ;;  %v4105_v56 = vld [vmem:[%s5176_s7 + $0xa0] sm:$0xff] }
 0x1ae   : > { %v1157_v58 = vpack.c.bf16 %v1118_v54, %v1118_v54  ;;  %v4107_v54 = vld [vmem:[%s5176_s7 + $0xb0] sm:$0xff] }
 0x1b0   : > { %v1167_v61 = vand.u32 %v4680_v57, %v1157_v58  ;;  %v4104_v58 = vld [vmem:[%s5176_s7 + $0x98] sm:$0xff] }
 0x1b1   : > { %3278 = vmatmul.msk.bf16.vlgmr.msra.gmra.mxu3 %vm1123_vm5, %v1121_v59 }
 0x1b2   : > { %1176 = vmatpush.bf16.msrb.mxu3 %v1167_v61 }
 0x1b3   : > { %v1119_v62 = vpop.f32.mrf.mxu2 }
 0x1b4   : > { %v1298_v63 = vpop.f32.mrf.mxu0  ;;  %v1381_v0 = vpop.f32.mrf.mxu1 }
 0x1b5   : > { %v1382_v31 = vadd.f32 %v4233_v29, %v1381_v0  ;;  %v1299_v45 = vadd.f32 %v4232_v44, %v1298_v63  ;;  %v4103_v0 = vld [vmem:[%s5176_s7 + $0x90] sm:$0xff] }
 0x1b6   : > { %1208 = vmatpush.bf16.msra.mxu3 %v4058_v27  ;;  %v4239_v27 = vld [vmem:[%s5177_s8 + $0x2] ss:$0 sm:$0xff] }
 0x1b7   : > { %v1469_v33 = vpack.c.bf16 %v1382_v31, %v1382_v31  ;;  %v1468_v46 = vpack.c.bf16 %v1299_v45, %v1299_v45 }
 0x1b9   : > { %v1474_v36 = vsel %vm1123_vm5, %v1469_v33, 0 }
 0x1ba   : > { %1209 = vmatpush.bf16.msra.mxu3 %v4057_v28 }
 0x1bb   : > { %v1464_v2 = vpop.f32.mrf.mxu2 }
 0x1bc   : > { %v1300_v3 = vpop.f32.mrf.mxu0  ;;  %v1383_v4 = vpop.f32.mrf.mxu1  ;;  %v1465_v38 = vadd.f32 %v4234_v37, %v1464_v2  ;;  %v4102_v2 = vld [vmem:[%s5176_s7 + $0x88] sm:$0xff] }
 0x1bd   : > { %v4101_v3 = vld [vmem:[%s5176_s7 + $0x80] sm:$0xff] }
 0x1be   : > { %v1502_v39 = vpack.c.bf16 %v1465_v38, %v1465_v38 }
 0x1c0   : > { %v1507_v42 = vand.u32 %v1502_v39, %v4680_v57  ;;  %v4238_v39 = vld [vmem:[%s5179_s10] ss:$0 sm:$0xff] }
 0x1c3   : > { %v1466_v5 = vpop.f32.mrf.mxu2 }
 0x1c4   : > { %v4687_v6 = vpop.f32.mrf.mxu1 }
 0x1cb   : > { %v1719_v8 = vpop.f32.mrf.mxu2 }
 0x1cc   : > { %v1720_v9 = vadd.f32 %v4236_v7, %v1719_v8  ;;  %v1638_v10 = vpop.f32.mrf.mxu1  ;;  %v4126_v8 = vld [vmem:[%s5174_s5 + $0xf8] sm:$0xff] }
 0x1cd   : > { %v4125_v10 = vld [vmem:[%s5174_s5 + $0xf0] sm:$0xff] }
 0x1ce   : > { %v1807_v11 = vpack.c.bf16 %v1720_v9, %v1720_v9 }
 0x1d0   : > { %v1812_v12 = vsel %vm1123_vm5, %v1807_v11, 0  ;;  %v4124_v11 = vld [vmem:[%s5174_s5 + $0xe8] sm:$0xff] }
 0x1d1   : > { %1821 = vmatpush.bf16.xpose.msrb.mxu0 %v1812_v12  ;;  %v4123_v12 = vld [vmem:[%s5174_s5 + $0xe0] sm:$0xff] }
 0x1d3   : > { %v1721_v13 = vpop.f32.mrf.mxu2 }
 0x1d4   : > { %v4122_v13 = vld [vmem:[%s5174_s5 + $0xd8] sm:$0xff] }
 0x1eb   : > { %v4693_v14 = vpop.f32.mrf.mxu2 }
 0x1f3   : > { %v1976_v15 = vpop.f32.mrf.mxu2 }
 0x1f4   : > { %v4121_v15 = vld [vmem:[%s5174_s5 + $0xd0] sm:$0xff] }
 0x234   : > { %v1139_v17 = vpop.f32.mrf.mxu3 }
 0x235   : > { %v1143_v18 = vmul.f32 0.17677669, %v1139_v17  ;;  %v4120_v17 = vld [vmem:[%s5174_s5 + $0xc8] sm:$0xff] }
 0x237   : > { %v1145_v19 = vsel %vm1144_vm8, %v1143_v18, -inf }
 0x238   : > { %1146 = vmax.xlane.f32.xlu1 %v1145_v19 }
 0x23c   : > { %v1141_v20 = vpop.f32.mrf.mxu3 }
 0x2ab   : > { %v1147_v21 = vpop.xlane.xlu1 %1146 }
 0x2ac   : > { %v1148_v22 = vsub.f32 %v1143_v18, %v1147_v21  ;;  %v4119_v18 = vld [vmem:[%s5174_s5 + $0xc0] sm:$0xff]  ;;  %v4110_v21 = vld [vmem:[%s5178_s9 + $0x28] sm:$0xff] }
 0x2ad   : > { %1887 = vmatpush.bf16.msrb.mxu1 %v4110_v21 }
 0x2ae   : > { %v1149_v23 = vmul.f32 1.442695, %v1148_v22  ;;  %v4109_v22 = vld [vmem:[%s5178_s9 + $0x20] sm:$0xff] }
 0x2b0   : > { %4249 = vpow2.f32 %v1149_v23 }
 0x2b1   : > { %1888 = vmatpush.bf16.msrb.mxu1 %v4109_v22 }
 0x2b6   : > { %v4250_v24 = vpop.eup %4249 }
 0x2b7   : > { %v1151_v26 = vsel %vm1144_vm8, %v4250_v24, 0.0 }
 0x2b8   : > { %1152 = vadd.xlane.f32.xlu1 %v1151_v26 }
 0x32b   : > { %v1153_v30 = vpop.xlane.xlu1 %1152 }
 0x32c   : > { %4251 = vrcp.f32 %v1153_v30 }
 0x332   : > { %v4252_v32 = vpop.eup %4251 }
 0x333   : > { %v1155_v34 = vmul.f32 %v4252_v32, %v4250_v24  ;;  %v4235_v24 = vld [vmem:[%s5173_s4 + $0x2] ss:$0 sm:$0xff] }
 0x334   : > { %v1637_v26 = vadd.f32 %v4235_v24, %v4687_v6 }
 0x335   : > { %v1156_v35 = vpack.c.bf16 %v1155_v34, %v1155_v34  ;;  %v4240_v34 = vld [vmem:[%s5175_s6 + $0x3] ss:$0 sm:$0xff] }
 0x336   : > { %v1806_v29 = vpack.c.bf16 %v1637_v26, %v1637_v26 }
 0x337   : > { %3279 = vmatmul.msk.bf16.vlgmr.msrb.gmra.mxu3 %vm1158_vm9, %v1156_v35 }
 0x338   : > { %1483 = vmatpush.bf16.xpose.msrb.mxu3 %v1474_v36 }
 0x3ba   : > { %v1178_v40 = vpop.f32.mrf.mxu3 }
 0x3bb   : > { %v1182_v41 = vpack.c.bf16 %v1178_v40, %v1178_v40 }
 0x3bd   : > { %3288 = vmatmul.msk.bf16.vlgmr.msra.gmra.mxu3 %vm1123_vm5, %v1182_v41 }
 0x3be   : > { %1516 = vmatpush.bf16.msra.mxu3 %v1507_v42 }
 0x3c2   : > { %v1180_v43 = vpop.f32.mrf.mxu3 }
 0x3cd   : > { %3436 = vmatmul.msk.bf16.vlgmr.msrb.gmra.mxu3 %vm1123_vm5, %v1468_v46 }
 0x3ce   : > { %1793 = vmatpush.bf16.msrb.mxu3 %v4108_v53 }
 0x3d2   : > { %1794 = vmatpush.bf16.msrb.mxu3 %v4107_v54  ;;  %v4133_v54 = vld [vmem:[%s5176_s7 + $0xf0] sm:$0xff] }
 0x3d6   : > { %1795 = vmatpush.bf16.msrb.mxu3 %v4106_v55  ;;  %v4132_v55 = vld [vmem:[%s5176_s7 + $0xe8] sm:$0xff] }
 0x3da   : > { %1796 = vmatpush.bf16.msrb.mxu3 %v4105_v56  ;;  %v4131_v56 = vld [vmem:[%s5176_s7 + $0xe0] sm:$0xff] }
 0x3de   : > { %1797 = vmatpush.bf16.msrb.mxu3 %v4104_v58  ;;  %v4130_v58 = vld [vmem:[%s5176_s7 + $0xd8] sm:$0xff] }
 0x3e2   : > { %1798 = vmatpush.bf16.msrb.mxu3 %v4103_v0 }
 0x3e6   : > { %1799 = vmatpush.bf16.msrb.mxu3 %v4102_v2 }
 0x3ea   : > { %1800 = vmatpush.bf16.msrb.mxu3 %v4101_v3 }
 0x440   : > { %v4717_v47 = vpop.f32.mrf.mxu3 }
 0x441   : > { %v1218_v40 = vadd.f32 %v4238_v39, %v4717_v47 }
 0x448   : > { %v1213_v48 = vpop.f32.mrf.mxu3 }
 0x450   : > { %v1485_v49 = vpop.f32.mrf.mxu3 }
 0x451   : > { %v1489_v50 = vmul.f32 0.17677669, %v1485_v49  ;;  %v4134_v49 = vld [vmem:[%s5176_s7 + $0xf8] sm:$0xff] }
 0x453   : > { %v1490_v51 = vsel %vm1144_vm8, %v1489_v50, -inf }
 0x454   : > { %1491 = vmax.xlane.f32.xlu2 %v1490_v51 }
 0x458   : > { %v1487_v52 = vpop.f32.mrf.mxu3 }
 0x4c7   : > { %v1492_v59 = vpop.xlane.xlu2 %1491 }
 0x4c8   : > { %v1493_v60 = vsub.f32 %v1489_v50, %v1492_v59  ;;  %v4129_v59 = vld [vmem:[%s5176_s7 + $0xd0] sm:$0xff] }
 0x4ca   : > { %v1494_v61 = vmul.f32 1.442695, %v1493_v60  ;;  %v4128_v60 = vld [vmem:[%s5176_s7 + $0xc8] sm:$0xff] }
 0x4cc   : > { %4253 = vpow2.f32 %v1494_v61  ;;  %v4127_v61 = vld [vmem:[%s5176_s7 + $0xc0] sm:$0xff] }
 0x4d2   : > { %v4254_v62 = vpop.eup %4253 }
 0x4d3   : > { %v1496_v63 = vsel %vm1144_vm8, %v4254_v62, 0.0 }
 0x4d4   : > { %1497 = vadd.xlane.f32.xlu2 %v1496_v63 }
 0x547   : > { %v1498_v4 = vpop.xlane.xlu2 %1497 }
 0x548   : > { %4255 = vrcp.f32 %v1498_v4 }
 0x54e   : > { %v4256_v5 = vpop.eup %4255 }
 0x54f   : > { %v1500_v7 = vmul.f32 %v4256_v5, %v4254_v62 }
 0x551   : > { %v1501_v9 = vpack.c.bf16 %v1500_v7, %v1500_v7  ;;  %v4237_v7 = vld [vmem:[%s5173_s4 + $0x3] ss:$0 sm:$0xff] }
 0x553   : > { %3437 = vmatmul.msk.bf16.vlgmr.msra.gmra.mxu3 %vm1158_vm9, %v1501_v9  ;;  %v4241_v9 = vld [vmem:[%s5177_s8 + $0x3] ss:$0 sm:$0xff] }
 0x554   : > { %2048 = vmatpush.bf16.msra.mxu3 %v4126_v8  ;;  %v1975_v8 = vadd.f32 %v4237_v7, %v4693_v14 }
 0x558   : > { %2049 = vmatpush.bf16.msra.mxu3 %v4125_v10 }
 0x55c   : > { %2050 = vmatpush.bf16.msra.mxu3 %v4124_v11  ;;  %v2144_v11 = vpack.c.bf16 %v1975_v8, %v1975_v8  ;;  %v3857_v8 = vld [vmem:[%s5182_s13 + $0xa0] sm:$0xf] }
 0x560   : > { %2051 = vmatpush.bf16.msra.mxu3 %v4123_v12 }
 0x563   : > { %1801 = vmatmul.bf16.vlgmr.msrb.gmra.mxu3 %v4587_v16 }
 0x564   : > { %2052 = vmatpush.bf16.msra.mxu3 %v4122_v13 }
 0x568   : > { %2053 = vmatpush.bf16.msra.mxu3 %v4121_v15 }
 0x56c   : > { %2054 = vmatpush.bf16.msra.mxu3 %v4120_v17 }
 0x570   : > { %2055 = vmatpush.bf16.msra.mxu3 %v4119_v18 }
 0x573   : > { %2056 = vmatmul.bf16.vlgmr.msra.gmra.mxu3 %v4587_v16 }
 0x5d6   : > { %v1518_v19 = vpop.f32.mrf.mxu3 }
 0x5d7   : > { %v1522_v20 = vpack.c.bf16 %v1518_v19, %v1518_v19 }
 0x5d9   : > { %3450 = vmatmul.msk.bf16.vlgmr.msra.gmra.mxu0 %vm1123_vm5, %v1522_v20 }
 0x5de   : > { %v1520_v23 = vpop.f32.mrf.mxu3 }
 0x5e6   : > { %v1802_v28 = vpop.f32.mrf.mxu3 }
 0x5e7   : > { %v1803_v30 = vadd.f32 %v4239_v27, %v1802_v28 }
 0x5e9   : > { %v1840_v31 = vpack.c.bf16 %v1803_v30, %v1803_v30  ;;  %3598 = vmatmul.msk.bf16.vlgmr.msrb.gmra.mxu0 %vm1123_vm5, %v1806_v29  ;;  %v4135_v29 = vld [vmem:[%s5178_s9 + $0x30] sm:$0xff] }
 0x5eb   : > { %v1845_v32 = vand.u32 %v1840_v31, %v4680_v57 }
 0x5ed   : > { %1854 = vmatpush.bf16.msra.mxu0 %v1845_v32 }
 0x5ee   : > { %v1804_v33 = vpop.f32.mrf.mxu3 }
 0x5f1   : > { %2131 = vmatpush.bf16.msrb.mxu0 %v4134_v49 }
 0x5f5   : > { %2132 = vmatpush.bf16.msrb.mxu0 %v4133_v54 }
 0x5f6   : > { %v2057_v35 = vpop.f32.mrf.mxu3 }
 0x5f7   : > { %v2058_v6 = vadd.f32 %v4240_v34, %v2057_v35 }
 0x5f9   : > { %v2145_v36 = vpack.c.bf16 %v2058_v6, %v2058_v6  ;;  %2133 = vmatpush.bf16.msrb.mxu0 %v4132_v55 }
 0x5fb   : > { %v2150_v37 = vsel %vm1123_vm5, %v2145_v36, 0 }
 0x5fc   : > { %2159 = vmatpush.bf16.xpose.msra.mxu1 %v2150_v37 }
 0x5fd   : > { %2134 = vmatpush.bf16.msrb.mxu0 %v4131_v56 }
 0x5fe   : > { %v2059_v38 = vpop.f32.mrf.mxu3 }
 0x601   : > { %2135 = vmatpush.bf16.msrb.mxu0 %v4130_v58  ;;  %v3873_v58 = vld [vmem:[%s5182_s13 + $0xc0] sm:$0xf] }
 0x605   : > { %2136 = vmatpush.bf16.msrb.mxu0 %v4129_v59  ;;  %v4163_v59 = vld [vmem:[%s5182_s13 + $0xcc] sm:$0xf0] }
 0x609   : > { %2137 = vmatpush.bf16.msrb.mxu0 %v4128_v60  ;;  %v4161_v60 = vld [vmem:[%s5182_s13 + $0xc4] sm:$0xf] }
 0x60d   : > { %2138 = vmatpush.bf16.msrb.mxu0 %v4127_v61  ;;  %v3874_v61 = vor.u32 %v4163_v59, %v3873_v58  ;;  %v4143_v58 = vld [vmem:[%s5182_s13 + $0x2c] sm:$0xf0]  ;;  %v4141_v59 = vld [vmem:[%s5182_s13 + $0x24] sm:$0xf] }
 0x656   : > { %v1552_v41 = vpop.f32.mrf.mxu0 }
 0x657   : > { %v1556_v42 = vadd.f32 %v1552_v41, %v1218_v40  ;;  %v3889_v41 = vld [vmem:[%s5182_s13 + $0xe0] sm:$0xf] }
 0x65e   : > { %v1554_v43 = vpop.f32.mrf.mxu0 }
 0x65f   : > { %v4165_v43 = vld [vmem:[%s5182_s13 + $0xe4] sm:$0xf] }
 0x666   : > { %v1823_v44 = vpop.f32.mrf.mxu0 }
 0x667   : > { %v1827_v45 = vmul.f32 0.17677669, %v1823_v44 }
 0x669   : > { %v1828_v46 = vsel %vm1144_vm8, %v1827_v45, -inf }
 0x66a   : > { %1829 = vmax.xlane.f32.xlu0 %v1828_v46  ;;  %v4168_v46 = vld [vmem:[%s5182_s13 + $0xf4] sm:$0xf0] }
 0x66e   : > { %v1825_v48 = vpop.f32.mrf.mxu0 }
 0x6dd   : > { %v1830_v50 = vpop.xlane.xlu0 %1829 }
 0x6de   : > { %v1831_v51 = vsub.f32 %v1827_v45, %v1830_v50  ;;  %v3897_v45 = vld [vmem:[%s5182_s13 + $0xe8] sm:$0xf]  ;;  %v4166_v50 = vld [vmem:[%s5182_s13 + $0xec] sm:$0xf] }
 0x6df   : > { %v3898_v49 = vor.u32 %v4168_v46, %v3897_v45  ;;  %v4145_v45 = vld [vmem:[%s5182_s13 + $0x44] sm:$0xf] }
 0x6e0   : > { %v1832_v52 = vmul.f32 1.442695, %v1831_v51  ;;  %v3899_v51 = vld [vmem:[%s5182_s13 + $0xf8] sm:$0xf0] }
 0x6e2   : > { %4257 = vpow2.f32 %v1832_v52  ;;  %v3902_v52 = vor.u32 %v4166_v50, %v3899_v51  ;;  %v4148_v50 = vld [vmem:[%s5182_s13 + $0x54] sm:$0xf0] }
 0x6e8   : > { %v4258_v53 = vpop.eup %4257 }
 0x6e9   : > { %v1834_v47 = vsel %vm1144_vm8, %v4258_v53, 0.0 }
 0x6ea   : > { %1835 = vadd.xlane.f32.xlu1 %v1834_v47 }
 0x75d   : > { %v1836_v62 = vpop.xlane.xlu1 %1835 }
 0x75e   : > { %4259 = vrcp.f32 %v1836_v62  ;;  %v3875_v62 = vld [vmem:[%s5182_s13 + $0xd0] sm:$0xf0] }
 0x764   : > { %v4260_v63 = vpop.eup %4259 }
 0x765   : > { %v1838_v0 = vmul.f32 %v4260_v63, %v4258_v53  ;;  %v3881_v63 = vld [vmem:[%s5182_s13 + $0xc8] sm:$0xf] }
 0x767   : > { %v1839_v2 = vpack.c.bf16 %v1838_v0, %v1838_v0  ;;  %v4164_v0 = vld [vmem:[%s5182_s13 + $0xd4] sm:$0xf0] }
 0x769   : > { %3599 = vmatmul.msk.bf16.vlgmr.msra.gmra.mxu0 %vm1158_vm9, %v1839_v2  ;;  %v3878_v2 = vor.u32 %v4161_v60, %v3875_v62  ;;  %v3801_v62 = vld [vmem:[%s5182_s13 + $0x28] sm:$0xf] }
 0x779   : > { %2139 = vmatmul.bf16.vlgmr.msrb.gmra.mxu0 %v4587_v16 }
 0x7e6   : > { %v1856_v3 = vpop.f32.mrf.mxu0 }
 0x7e7   : > { %v1860_v4 = vpack.c.bf16 %v1856_v3, %v1856_v3  ;;  %v3882_v3 = vor.u32 %v4164_v0, %v3881_v63  ;;  %v4144_v63 = vld [vmem:[%s5182_s13 + $0x34] sm:$0xf0] }
 0x7e9   : > { %3612 = vmatmul.msk.bf16.vlgmr.msrb.gmra.mxu1 %vm1123_vm5, %v1860_v4  ;;  %v4162_v4 = vld [vmem:[%s5182_s13 + $0xcc] sm:$0xf] }
 0x7ee   : > { %v1858_v5 = vpop.f32.mrf.mxu0 }
 0x7ef   : > { %v3883_v5 = vld [vmem:[%s5182_s13 + $0xd8] sm:$0xf0] }
 0x7f0   : > { %v3886_v7 = vor.u32 %v4162_v4, %v3883_v5  ;;  %v3803_v4 = vld [vmem:[%s5182_s13 + $0x38] sm:$0xf0]  ;;  %v3777_v5 = vld [vmem:[%s5182_s13] sm:$0xf] }
 0x7f6   : > { %v2140_v10 = vpop.f32.mrf.mxu0 }
 0x7f7   : > { %v2141_v12 = vadd.f32 %v4241_v9, %v2140_v10  ;;  %v4159_v9 = vld [vmem:[%s5182_s13 + $0xac] sm:$0xf0]  ;;  %v4157_v10 = vld [vmem:[%s5182_s13 + $0xa4] sm:$0xf] }
 0x7f9   : > { %v2178_v13 = vpack.c.bf16 %v2141_v12, %v2141_v12  ;;  %3760 = vmatmul.msk.bf16.vlgmr.msra.gmra.mxu1 %vm1123_vm5, %v2144_v11  ;;  %v3858_v11 = vor.u32 %v4159_v9, %v3857_v8  ;;  %v3859_v12 = vld [vmem:[%s5182_s13 + $0xb0] sm:$0xf0]  ;;  %v4139_v8 = vld [vmem:[%s5182_s13 + $0xc] sm:$0xf0]  ;;  %v4137_v9 = vld [vmem:[%s5182_s13 + $0x4] sm:$0xf] }
 0x7fb   : > { %v2183_v16 = vand.u32 %v2178_v13, %v4680_v57  ;;  %v4136_v57 = vld [vmem:[%s5178_s9 + $0x38] sm:$0xff]  ;;  %v3865_v13 = vld [vmem:[%s5182_s13 + $0xa8] sm:$0xf] }
 0x7fc   : > { %2225 = vmatpush.bf16.msra.mxu2 %v4136_v57 }
 0x7fd   : > { %2192 = vmatpush.bf16.msrb.mxu1 %v2183_v16  ;;  %v4160_v16 = vld [vmem:[%s5182_s13 + $0xb4] sm:$0xf0] }
 0x7fe   : > { %v2142_v15 = vpop.f32.mrf.mxu0 }
 0x7ff   : > { %v3862_v15 = vor.u32 %v4157_v10, %v3859_v12  ;;  %v3779_v10 = vld [vmem:[%s5182_s13 + $0x10] sm:$0xf0] }
 0x800   : > { %2226 = vmatpush.bf16.msra.mxu2 %v4135_v29  ;;  %v4154_v29 = vld [vmem:[%s5182_s13 + $0x8c] sm:$0xf]  ;;  %v3782_v12 = vor.u32 %v4137_v9, %v3779_v10 }
 0x801   : > { %2495 = vmatpush.bf16.msra.mxu1 %v3898_v49  ;;  %v3817_v49 = vld [vmem:[%s5182_s13 + $0x48] sm:$0xf] }
 0x804   : > { %2508 = vmatpush.bf16.msrb.mxu2 %v3902_v52  ;;  %v3818_v52 = vor.u32 %v4148_v50, %v3817_v49  ;;  %v4173_v49 = vld [vmem:[%s5184_s15 + $0x20] sm:$0xff] }
 0x805   : > { %2496 = vmatpush.bf16.msra.mxu1 %v3882_v3  ;;  %v4142_v3 = vld [vmem:[%s5182_s13 + $0x2c] sm:$0xf]  ;;  %v4197_v50 = vld [vmem:[%s5184_s15 + $0xe0] sm:$0xff] }
 0x808   : > { %2509 = vmatpush.bf16.msrb.mxu2 %v3886_v7  ;;  %v3806_v7 = vor.u32 %v4142_v3, %v3803_v4  ;;  %v4169_v3 = vld [vmem:[%s5184_s15] sm:$0xff] }
 0x809   : > { %v4193_v4 = vld [vmem:[%s5184_s15 + $0xc0] sm:$0xff] }
 0x866   : > { %v1890_v17 = vpop.f32.mrf.mxu1 }
 0x867   : > { %v1894_v18 = vadd.f32 %v1890_v17, %v1556_v42  ;;  %v4167_v42 = vld [vmem:[%s5182_s13 + $0xec] sm:$0xf0]  ;;  %v3866_v17 = vor.u32 %v4160_v16, %v3865_v13  ;;  %v3785_v13 = vld [vmem:[%s5182_s13 + $0x8] sm:$0xf]  ;;  %v4140_v16 = vld [vmem:[%s5182_s13 + $0x14] sm:$0xf0] }
 0x868   : > { %v3890_v44 = vor.u32 %v4167_v42, %v3889_v41  ;;  %v4150_v41 = vld [vmem:[%s5182_s13 + $0x6c] sm:$0xf]  ;;  %v3835_v42 = vld [vmem:[%s5182_s13 + $0x78] sm:$0xf0] }
 0x869   : > { %2497 = vmatpush.bf16.msra.mxu1 %v3866_v17  ;;  %v3786_v17 = vor.u32 %v4140_v16, %v3785_v13 }
 0x86a   : > { %2469 = vmatpush.bf16.msrb.mxu3 %v3890_v44  ;;  %v3809_v44 = vld [vmem:[%s5182_s13 + $0x40] sm:$0xf] }
 0x86e   : > { %v1892_v19 = vpop.f32.mrf.mxu1  ;;  %2470 = vmatpush.bf16.msrb.mxu3 %v3874_v61  ;;  %v3795_v61 = vld [vmem:[%s5182_s13 + $0x30] sm:$0xf0] }
 0x86f   : > { %v3867_v19 = vld [vmem:[%s5182_s13 + $0xb8] sm:$0xf0]  ;;  %v3798_v0 = vor.u32 %v4141_v59, %v3795_v61  ;;  %v4195_v59 = vld [vmem:[%s5184_s15 + $0xd0] sm:$0xff]  ;;  %v4185_v61 = vld [vmem:[%s5184_s15 + $0x80] sm:$0xff] }
 0x872   : > { %2471 = vmatpush.bf16.msrb.mxu3 %v3858_v11  ;;  %v3778_v11 = vor.u32 %v4139_v8, %v3777_v5 }
 0x876   : > { %v2161_v20 = vpop.f32.mrf.mxu1 }
 0x877   : > { %v2165_v21 = vmul.f32 0.17677669, %v2161_v20 }
 0x879   : > { %v2166_v14 = vsel %vm1144_vm8, %v2165_v21, -inf }
 0x87a   : > { %2167 = vmax.xlane.f32.xlu2 %v2166_v14  ;;  %v4155_v14 = vld [vmem:[%s5182_s13 + $0x8c] sm:$0xf0] }
 0x87e   : > { %v2163_v22 = vpop.f32.mrf.mxu1 }
 0x87f   : > { %v4153_v22 = vld [vmem:[%s5182_s13 + $0x84] sm:$0xf] }
 0x8ed   : > { %v2168_v23 = vpop.xlane.xlu2 %2167 }
 0x8ee   : > { %v2169_v24 = vsub.f32 %v2165_v21, %v2168_v23  ;;  %v3841_v21 = vld [vmem:[%s5182_s13 + $0x80] sm:$0xf] }
 0x8ef   : > { %v3842_v23 = vor.u32 %v4155_v14, %v3841_v21  ;;  %v4184_v21 = vld [vmem:[%s5184_s15 + $0x78] sm:$0xff] }
 0x8f0   : > { %v2170_v26 = vmul.f32 1.442695, %v2169_v24  ;;  %v3843_v24 = vld [vmem:[%s5182_s13 + $0x90] sm:$0xf0]  ;;  %v4192_v14 = vld [vmem:[%s5184_s15 + $0xb8] sm:$0xff] }
 0x8f1   : > { %2472 = vmatpush.bf16.msrb.mxu3 %v3842_v23 }
 0x8f2   : > { %4261 = vpow2.f32 %v2170_v26  ;;  %v3849_v26 = vld [vmem:[%s5182_s13 + $0x88] sm:$0xf] }
 0x8f8   : > { %v4262_v27 = vpop.eup %4261 }
 0x8f9   : > { %v2172_v28 = vsel %vm1144_vm8, %v4262_v27, 0.0 }
 0x8fa   : > { %2173 = vadd.xlane.f32.xlu0 %v2172_v28  ;;  %v3846_v28 = vor.u32 %v4153_v22, %v3843_v24 }
 0x96d   : > { %v2174_v30 = vpop.xlane.xlu0 %2173 }
 0x96e   : > { %4263 = vrcp.f32 %v2174_v30  ;;  %v3851_v30 = vld [vmem:[%s5182_s13 + $0x98] sm:$0xf0] }
 0x974   : > { %v4264_v31 = vpop.eup %4263 }
 0x975   : > { %v2176_v32 = vmul.f32 %v4264_v31, %v4262_v27  ;;  %v4156_v27 = vld [vmem:[%s5182_s13 + $0x94] sm:$0xf0]  ;;  %v3854_v31 = vor.u32 %v4154_v29, %v3851_v30  ;;  %v4242_v30 = vld [vmem:[%s5180_s11] ss:$0 sm:$0xff] }
 0x976   : > { %v3850_v57 = vor.u32 %v4156_v27, %v3849_v26 }
 0x977   : > { %v2177_v33 = vpack.c.bf16 %v2176_v32, %v2176_v32  ;;  %v3825_v32 = vld [vmem:[%s5182_s13 + $0x60] sm:$0xf] }
 0x978   : > { %2498 = vmatpush.bf16.msra.mxu1 %v3850_v57 }
 0x979   : > { %3761 = vmatmul.msk.bf16.vlgmr.msrb.gmra.mxu1 %vm1158_vm9, %v2177_v33  ;;  %v4151_v33 = vld [vmem:[%s5182_s13 + $0x6c] sm:$0xf0] }
 0x9f6   : > { %v2194_v34 = vpop.f32.mrf.mxu1 }
 0x9f7   : > { %v2198_v35 = vpack.c.bf16 %v2194_v34, %v2194_v34  ;;  %v4149_v34 = vld [vmem:[%s5182_s13 + $0x64] sm:$0xf] }
 0x9f9   : > { %3774 = vmatmul.msk.bf16.vlgmr.msra.gmra.mxu2 %vm1123_vm5, %v2198_v35  ;;  %v3826_v35 = vor.u32 %v4151_v33, %v3825_v32  ;;  %v4243_v32 = vld [vmem:[%s5181_s12] ss:$0 sm:$0xff] }
 0x9fb   : > { %2473 = vmatpush.bf16.msrb.mxu3 %v3826_v35 }
 0x9fe   : > { %v2196_v6 = vpop.f32.mrf.mxu1 }
 0x9ff   : > { %v3827_v6 = vld [vmem:[%s5182_s13 + $0x70] sm:$0xf0] }
 0xa7c   : > { %v2228_v36 = vpop.f32.mrf.mxu2 }
 0xa7d   : > { %v2232_v37 = vadd.f32 %v2228_v36, %v1894_v18  ;;  %v4158_v18 = vld [vmem:[%s5182_s13 + $0xac] sm:$0xf]  ;;  %v3833_v36 = vld [vmem:[%s5182_s13 + $0x68] sm:$0xf] }
 0xa7e   : > { %v3870_v20 = vor.u32 %v4158_v18, %v3867_v19  ;;  %v3787_v18 = vld [vmem:[%s5182_s13 + $0x18] sm:$0xf0] }
 0xa7f   : > { %v4845_v38 = vadd.f32 %v2232_v37, %v4419_v1  ;;  %v3891_v1 = vld [vmem:[%s5182_s13 + $0xf0] sm:$0xf0]  ;;  %v4152_v37 = vld [vmem:[%s5182_s13 + $0x74] sm:$0xf0] }
 0xa80   : > { %v3894_v48 = vor.u32 %v4165_v43, %v3891_v1  ;;  %2510 = vmatpush.bf16.msrb.mxu2 %v3870_v20  ;;  %v3838_v43 = vor.u32 %v4150_v41, %v3835_v42  ;;  %v4147_v1 = vld [vmem:[%s5182_s13 + $0x4c] sm:$0xf0] }
 0xa81   : > { %v2236_v39 = vsel %vm838_vm0, %v4845_v38, 0.0  ;;  %v3810_v46 = vor.u32 %v4147_v1, %v3809_v44  ;;  %v4175_v41 = vld [vmem:[%s5184_s15 + $0x30] sm:$0xff]  ;;  %v4189_v44 = vld [vmem:[%s5184_s15 + $0xa0] sm:$0xff]  ;;  %v4174_v1 = vld [vmem:[%s5184_s15 + $0x28] sm:$0xff] }
 0xa82   : > { %2237 = vadd.xlane.f32.xlu1 %v2236_v39  ;;  %2482 = vmatpush.bf16.msra.mxu0 %v3894_v48  ;;  %v3830_v39 = vor.u32 %v4149_v34, %v3827_v6  ;;  %v3811_v48 = vld [vmem:[%s5182_s13 + $0x50] sm:$0xf0] }
 0xa83   : > { %v3814_v51 = vor.u32 %v4145_v45, %v3811_v48  ;;  %2474 = vmatpush.bf16.msrb.mxu3 %v3810_v46  ;;  %v4183_v6 = vld [vmem:[%s5184_s15 + $0x70] sm:$0xff]  ;;  %v4198_v45 = vld [vmem:[%s5184_s15 + $0xe8] sm:$0xff]  ;;  %v4180_v46 = vld [vmem:[%s5184_s15 + $0x58] sm:$0xff] }
 0xa84   : > { %v2230_v40 = vpop.f32.mrf.mxu2  ;;  %2511 = vmatpush.bf16.msrb.mxu2 %v3854_v31  ;;  %v4199_v42 = vld [vmem:[%s5184_s15 + $0xf0] sm:$0xff]  ;;  %v4188_v48 = vld [vmem:[%s5184_s15 + $0x98] sm:$0xff] }
 0xa85   : > { %v3834_v40 = vor.u32 %v4152_v37, %v3833_v36  ;;  %v4191_v36 = vld [vmem:[%s5184_s15 + $0xb0] sm:$0xff]  ;;  %v4200_v37 = vld [vmem:[%s5184_s15 + $0xf8] sm:$0xff] }
 0xa86   : > { %2483 = vmatpush.bf16.msra.mxu0 %v3878_v2  ;;  %v3802_v2 = vor.u32 %v4144_v63, %v3801_v62  ;;  %v4170_v62 = vld [vmem:[%s5184_s15 + $0x8] sm:$0xff] }
 0xa87   : > { %2499 = vmatpush.bf16.msra.mxu1 %v3834_v40  ;;  %v4190_v40 = vld [vmem:[%s5184_s15 + $0xa8] sm:$0xff] }
 0xa88   : > { %2512 = vmatpush.bf16.msrb.mxu2 %v3838_v43  ;;  %v4181_v43 = vld [vmem:[%s5184_s15 + $0x60] sm:$0xff]  ;;  %v4194_v63 = vld [vmem:[%s5184_s15 + $0xc8] sm:$0xff] }
 0xa8a   : > { %2484 = vmatpush.bf16.msra.mxu0 %v3862_v15  ;;  %v4138_v15 = vld [vmem:[%s5182_s13 + $0xc] sm:$0xf] }
 0xa8b   : > { %2500 = vmatpush.bf16.msra.mxu1 %v3818_v52  ;;  %v3790_v19 = vor.u32 %v4138_v15, %v3787_v18  ;;  %v4187_v52 = vld [vmem:[%s5184_s15 + $0x90] sm:$0xff] }
 0xa8e   : > { %2485 = vmatpush.bf16.msra.mxu0 %v3846_v28 }
 0xa8f   : > { %2501 = vmatpush.bf16.msra.mxu1 %v3802_v2 }
 0xa92   : > { %2486 = vmatpush.bf16.msra.mxu0 %v3830_v39  ;;  %v4182_v39 = vld [vmem:[%s5184_s15 + $0x68] sm:$0xff] }
 0xa93   : > { %2502 = vmatpush.bf16.msra.mxu1 %v3786_v17 }
 0xa96   : > { %2487 = vmatpush.bf16.msra.mxu0 %v3814_v51  ;;  %v4179_v51 = vld [vmem:[%s5184_s15 + $0x50] sm:$0xff] }
 0xa97   : > { %2847 = vmatpush.bf16.msrb.mxu1 %v4192_v14 }
 0xa9a   : > { %2488 = vmatpush.bf16.msra.mxu0 %v3798_v0  ;;  %v2299_v0 = vld [vmem:[%s5183_s14] sm:$0xf] }
 0xa9b   : > { %2848 = vmatpush.bf16.msrb.mxu1 %v4191_v36  ;;  %v2302_v2 = vperm.slane %v2299_v0, 1  ;;  %v2303_v5 = vperm.slane %v2299_v0, 2  ;;  %v2304_v16 = vperm.slane %v2299_v0, 3 }
 0xa9e   : > { %2489 = vmatpush.bf16.msra.mxu0 %v3782_v12  ;;  %v2301_v12 = vperm.slane %v2299_v0, 0  ;;  %v4244_v0 = vld [vmem:[%s5185_s16] ss:$0 sm:$0xff] }
 0xa9f   : > { %2849 = vmatpush.bf16.msrb.mxu1 %v4190_v40 }
 0xaa2   : > { %2834 = vmatpush.bf16.msrb.mxu0 %v4184_v21 }
 0xaa3   : > { %2850 = vmatpush.bf16.msrb.mxu1 %v4189_v44 }
 0xaa6   : > { %2835 = vmatpush.bf16.msrb.mxu0 %v4183_v6 }
 0xaa7   : > { %2851 = vmatpush.bf16.msrb.mxu1 %v4188_v48 }
 0xaaa   : > { %2836 = vmatpush.bf16.msrb.mxu0 %v4182_v39 }
 0xaab   : > { %2852 = vmatpush.bf16.msrb.mxu1 %v4187_v52 }
 0xaae   : > { %2837 = vmatpush.bf16.msrb.mxu0 %v4181_v43 }
 0xab2   : > { %2838 = vmatpush.bf16.msrb.mxu0 %v4180_v46 }
 0xab6   : > { %2839 = vmatpush.bf16.msrb.mxu0 %v4179_v51 }
 0xaf5   : > { %v2238_v53 = vpop.xlane.xlu1 %2237 }
 0xaf6   : > { %v2239_v47 = vmul.f32 %v2238_v53, %v4471_v25  ;;  %v4146_v53 = vld [vmem:[%s5182_s13 + $0x4c] sm:$0xf] }
 0xaf8   : > { %v4875_v54 = vsub.f32 %v4845_v38, %v2239_v47  ;;  %v3819_v47 = vld [vmem:[%s5182_s13 + $0x58] sm:$0xf0] }
 0xafa   : > { %v2241_v55 = vmul.f32 %v4875_v54, %v4875_v54 }
 0xafc   : > { %v2242_v56 = vsel %vm838_vm0, %v2241_v55, 0.0  ;;  %v3822_v55 = vor.u32 %v4146_v53, %v3819_v47  ;;  %v4172_v53 = vld [vmem:[%s5184_s15 + $0x18] sm:$0xff] }
 0xafd   : > { %2243 = vadd.xlane.f32.xlu2 %v2242_v56  ;;  %v3793_v56 = vld [vmem:[%s5182_s13 + $0x20] sm:$0xf]  ;;  %v4196_v47 = vld [vmem:[%s5184_s15 + $0xd8] sm:$0xff] }
 0xafe   : > { %2513 = vmatpush.bf16.msrb.mxu2 %v3822_v55  ;;  %v3794_v60 = vor.u32 %v4143_v58, %v3793_v56  ;;  %v4178_v55 = vld [vmem:[%s5184_s15 + $0x48] sm:$0xff]  ;;  %v4171_v58 = vld [vmem:[%s5184_s15 + $0x10] sm:$0xff] }
 0xaff   : > { %v4186_v56 = vld [vmem:[%s5184_s15 + $0x88] sm:$0xff]  ;;  %2840 = vmatpush.bf16.msrb.mxu0 %v4178_v55 }
 0xb00   : > { %2475 = vmatpush.bf16.msrb.mxu3 %v3794_v60  ;;  %2853 = vmatpush.bf16.msrb.mxu1 %v4186_v56  ;;  %v4177_v60 = vld [vmem:[%s5184_s15 + $0x40] sm:$0xff] }
 0xb02   : > { %2514 = vmatpush.bf16.msrb.mxu2 %v3806_v7 }
 0xb03   : > { %2841 = vmatpush.bf16.msrb.mxu0 %v4177_v60 }
 0xb04   : > { %2476 = vmatpush.bf16.msrb.mxu3 %v3778_v11  ;;  %2854 = vmatpush.bf16.msrb.mxu1 %v4185_v61 }
 0xb06   : > { %2515 = vmatpush.bf16.msrb.mxu2 %v3790_v19 }
 0xb0a   : > { %2860 = vmatpush.bf16.msra.mxu2 %v4200_v37 }
 0xb0e   : > { %2861 = vmatpush.bf16.msra.mxu2 %v4199_v42 }
 0xb12   : > { %2862 = vmatpush.bf16.msra.mxu2 %v4198_v45 }
 0xb16   : > { %2863 = vmatpush.bf16.msra.mxu2 %v4197_v50 }
 0xb1a   : > { %2864 = vmatpush.bf16.msra.mxu2 %v4196_v47 }
 0xb1e   : > { %2865 = vmatpush.bf16.msra.mxu2 %v4195_v59 }
 0xb22   : > { %2866 = vmatpush.bf16.msra.mxu2 %v4194_v63 }
 0xb26   : > { %2867 = vmatpush.bf16.msra.mxu2 %v4193_v4 }
 0xb70   : > { %v2244_v20 = vpop.xlane.xlu2 %2243 }
 0xb71   : > { %v2245_v22 = vmul.f32 %v2244_v20, %v4471_v25 }
 0xb73   : > { %v2246_v23 = vadd.f32 1e-06, %v2245_v22 }
 0xb75   : > { %4265 = vrsqrt.f32 %v2246_v23  ;;  %vm2253_vm11 = vweird.f32 %v2246_v23 }
 0xb7b   : > { %v4266_v24 = vpop.eup %4265 }
 0xb7c   : > { %v2248_v26 = vmul.f32 %v4266_v24, %v2246_v23  ;;  %vm2254_vm10 = vweird.f32 %v4266_v24 }
 0xb7d   : > { %vm2255_vm12 = vmor %vm2253_vm11, %vm2254_vm10 }
 0xb7e   : > { %v2249_v27 = vmul.f32 %v4266_v24, %v2248_v26 }
 0xb80   : > { %v2250_v28 = vmul.f32 0.5, %v2249_v27 }
 0xb82   : > { %v2251_v57 = vsub.f32 1.5, %v2250_v28 }
 0xb84   : > { %v2252_v29 = vmul.f32 %v4266_v24, %v2251_v57 }
 0xb86   : > { %v2256_v31 = vsel %vm2255_vm12, %v4266_v24, %v2252_v29 }
 0xb87   : > { %v2257_v25 = vmul.f32 %v2256_v31, %v4875_v54  ;;  %v4176_v54 = vld [vmem:[%s5184_s15 + $0x38] sm:$0xff] }
 0xb88   : > { %2821 = vmatpush.bf16.msra.mxu3 %v4176_v54 }
 0xb89   : > { %v2261_v33 = vmul.f32 %v4242_v30, %v2257_v25 }
 0xb8b   : > { %v2265_v34 = vadd.f32 %v4243_v32, %v2261_v33 }
 0xb8c   : > { %2822 = vmatpush.bf16.msra.mxu3 %v4175_v41 }
 0xb8d   : > { %v2266_v35 = vpack.c.bf16 %v2265_v34, %v2265_v34 }
 0xb8f   : > { %2477 = vmatmul.bf16.vlgmr.msrb.gmra.mxu3 %v2266_v35  ;;  %2490 = vmatmul.bf16.vlgmr.msra.gmra.mxu0 %v2266_v35 }
 0xb90   : > { %2503 = vmatmul.bf16.vlgmr.msra.gmra.mxu1 %v2266_v35  ;;  %2516 = vmatmul.bf16.vlgmr.msrb.gmra.mxu2 %v2266_v35 }
 0xb91   : > { %2823 = vmatpush.bf16.msra.mxu3 %v4174_v1 }
 0xb95   : > { %2824 = vmatpush.bf16.msra.mxu3 %v4173_v49 }
 0xb99   : > { %2825 = vmatpush.bf16.msra.mxu3 %v4172_v53 }
 0xb9d   : > { %2826 = vmatpush.bf16.msra.mxu3 %v4171_v58 }
 0xba1   : > { %2827 = vmatpush.bf16.msra.mxu3 %v4170_v62 }
 0xba5   : > { %2828 = vmatpush.bf16.msra.mxu3 %v4169_v3 }
 0xc0c   : > { %v2491_v7 = vpop.f32.mrf.mxu0 }
 0xc0d   : > { %v2492_v8 = vadd.f32 %v2491_v7, %v2302_v2  ;;  %v2504_v9 = vpop.f32.mrf.mxu1 }
 0xc0e   : > { %v2505_v10 = vadd.f32 %v2504_v9, %v2303_v5 }
 0xc0f   : > { %v2522_v11 = vmul.f32 %v2492_v8, %v2492_v8 }
 0xc10   : > { %v2523_v13 = vmul.f32 %v2505_v10, %v2505_v10 }
 0xc11   : > { %v2526_v15 = vmul.f32 %v2522_v11, %v2492_v8 }
 0xc12   : > { %v2527_v17 = vmul.f32 %v2523_v13, %v2505_v10  ;;  %v2478_v18 = vpop.f32.mrf.mxu3 }
 0xc13   : > { %v2530_v19 = vmul.f32 0.044715, %v2526_v15  ;;  %v2479_v20 = vadd.f32 %v2478_v18, %v2301_v12  ;;  %v2517_v21 = vpop.f32.mrf.mxu2 }
 0xc14   : > { %v2531_v14 = vmul.f32 0.044715, %v2527_v17  ;;  %v2518_v22 = vadd.f32 %v2517_v21, %v2304_v16  ;;  %v2493_v23 = vpop.f32.mrf.mxu0 }
 0xc15   : > { %v2534_v24 = vadd.f32 %v2530_v19, %v2492_v8  ;;  %v2521_v26 = vmul.f32 %v2479_v20, %v2479_v20  ;;  %v2506_v27 = vpop.f32.mrf.mxu1 }
 0xc16   : > { %v2535_v28 = vadd.f32 %v2531_v14, %v2505_v10  ;;  %v2524_v57 = vmul.f32 %v2518_v22, %v2518_v22 }
 0xc17   : > { %v2538_v29 = vmul.f32 0.7978846, %v2534_v24  ;;  %v2525_v30 = vmul.f32 %v2521_v26, %v2479_v20 }
 0xc18   : > { %v2539_v31 = vmul.f32 0.7978846, %v2535_v28  ;;  %v2528_v25 = vmul.f32 %v2524_v57, %v2518_v22 }
 0xc19   : > { %4267 = vtanh.f32 %v2538_v29  ;;  %v2529_v32 = vmul.f32 0.044715, %v2525_v30 }
 0xc1a   : > { %4269 = vtanh.f32 %v2539_v31  ;;  %v2532_v33 = vmul.f32 0.044715, %v2528_v25  ;;  %v2480_v34 = vpop.f32.mrf.mxu3 }
 0xc1b   : > { %v2533_v35 = vadd.f32 %v2529_v32, %v2479_v20  ;;  %v2519_v6 = vpop.f32.mrf.mxu2 }
 0xc1c   : > { %v2536_v36 = vadd.f32 %v2532_v33, %v2518_v22 }
 0xc1d   : > { %v2537_v54 = vmul.f32 0.7978846, %v2533_v35 }
 0xc1e   : > { %v2540_v37 = vmul.f32 0.7978846, %v2536_v36 }
 0xc1f   : > { %v4268_v39 = vpop.eup %4267  ;;  %4271 = vtanh.f32 %v2537_v54 }
 0xc20   : > { %v4270_v40 = vpop.eup %4269  ;;  %4273 = vtanh.f32 %v2540_v37  ;;  %v2546_v41 = vadd.f32 1.0, %v4268_v39 }
 0xc21   : > { %v2547_v42 = vadd.f32 1.0, %v4270_v40 }
 0xc22   : > { %v2550_v43 = vmul.f32 0.5, %v2546_v41 }
 0xc23   : > { %v2551_v44 = vmul.f32 0.5, %v2547_v42 }
 0xc24   : > { %v2554_v1 = vmul.f32 %v2550_v43, %v2492_v8 }
 0xc25   : > { %v4272_v45 = vpop.eup %4271  ;;  %v2555_v46 = vmul.f32 %v2551_v44, %v2505_v10 }
 0xc26   : > { %v4274_v48 = vpop.eup %4273  ;;  %v2558_v49 = vpack.c.bf16 %v2554_v1, %v2554_v1  ;;  %v2545_v50 = vadd.f32 1.0, %v4272_v45 }
 0xc27   : > { %v2559_v51 = vpack.c.bf16 %v2555_v46, %v2555_v46  ;;  %v2548_v52 = vadd.f32 1.0, %v4274_v48 }
 0xc28   : > { %2842 = vmatmul.bf16.vlgmr.msrb.gmra.mxu0 %v2558_v49  ;;  %v2549_v53 = vmul.f32 0.5, %v2545_v50 }
 0xc29   : > { %2855 = vmatmul.bf16.vlgmr.msrb.gmra.mxu1 %v2559_v51  ;;  %v2552_v47 = vmul.f32 0.5, %v2548_v52 }
 0xc2a   : > { %v2553_v55 = vmul.f32 %v2549_v53, %v2479_v20 }
 0xc2b   : > { %v2556_v56 = vmul.f32 %v2552_v47, %v2518_v22 }
 0xc2c   : > { %v2557_v58 = vpack.c.bf16 %v2553_v55, %v2553_v55 }
 0xc2d   : > { %v2560_v59 = vpack.c.bf16 %v2556_v56, %v2556_v56 }
 0xc2e   : > { %2829 = vmatmul.bf16.vlgmr.msra.gmra.mxu3 %v2557_v58 }
 0xc2f   : > { %2868 = vmatmul.bf16.vlgmr.msra.gmra.mxu2 %v2560_v59 }
 0xca5   : > { %v2843_v60 = vpop.f32.mrf.mxu0 }
 0xca6   : > { %v2856_v61 = vpop.f32.mrf.mxu1 }
 0xcad   : > { %v2845_v62 = vpop.f32.mrf.mxu0 }
 0xcae   : > { %v2858_v63 = vpop.f32.mrf.mxu1 }
 0xcb1   : > { %v2830_v2 = vpop.f32.mrf.mxu3 }
 0xcb2   : > { %v2831_v3 = vadd.f32 %v4244_v0, %v2830_v2  ;;  %v2869_v4 = vpop.f32.mrf.mxu2 }
 0xcb4   : > { %v2844_v5 = vadd.f32 %v2843_v60, %v2831_v3 }
 0xcb6   : > { %v2857_v7 = vadd.f32 %v2856_v61, %v2844_v5 }
 0xcb8   : > { %v2870_v8 = vadd.f32 %v2869_v4, %v2857_v7 }
 0xcb9   : > { %v2832_v9 = vpop.f32.mrf.mxu3 }
 0xcba   : > { %v2873_v10 = vadd.f32 %v2870_v8, %v4845_v38  ;;  %v2871_v11 = vpop.f32.mrf.mxu2 }
 0xcbc   : > { %2874 = vst [vmem:[%s4415_s20] sm:$0x1f] %v2873_v10 }
 0xcbd PF: > { %s27_s26 = sadd.s32 1, %s4297_s26   ;;  %s5191_s24 = smov %s4293_s25 }
 0xcbe   : > { %p24_p5 = scmp.ge.s32.totalorder %s27_s26, 8   ;;  %s5192_s25 = smov %s5194_s27 }
 0xcc0   :  { %26 = sbr.rel (!%p24_p5) target bundleno = 3 (0x3), region = 191 }

// kernel: _lambda_.4
= control target key start
LH: loop header
LB: loop body
LE: loop exit
PB: predicated region body
PF: predicated region fallthrough
CT: control target
= control target key end

     0   :  { %s4727_s25 = smov 0   ;;  %s4729_s26 = smov 0   ;;  %s5244_s0 = inlined_call_operand.vmem [shape: f32[2,4,192], index: 0, kind: input, shape index: {}]   ;;  %s5245_s1 = inlined_call_operand.vmem [shape: bf16[192,128], index: 1, kind: input, shape index: {}]   ;;  %s5246_s2 = inlined_call_operand.vmem [shape: f32[1,128], index: 2, kind: input, shape index: {}]   ;;  %s5247_s3 = inlined_call_operand.vmem [shape: f32[1,128], index: 3, kind: input, shape index: {}]   ;;  %s5248_s4 = inlined_call_operand.vmem [shape: f32[4,128], index: 4, kind: input, shape index: {}]   ;;  %s5249_s5 = inlined_call_operand.vmem [shape: f32[3,1,128], index: 5, kind: input, shape index: {}]   ;;  %s5250_s6 = inlined_call_operand.vmem [shape: f32[3,1,128], index: 6, kind: input, shape index: {}]   ;;  %s5251_s7 = inlined_call_operand.vmem [shape: bf16[3,4,128,32], index: 7, kind: input, shape index: {}]   ;;  %s5252_s8 = inlined_call_operand.vmem [shape: f32[3,4,1,32], index: 8, kind: input, shape index: {}]   ;;  %s5253_s9 = inlined_call_operand.vmem [shape: bf16[3,4,128,32], index: 9, kind: input, shape index: {}]   ;;  %s5254_s10 = inlined_call_operand.vmem [shape: f32[3,4,1,32], index: 10, kind: input, shape index: {}]   ;;  %s5255_s11 = inlined_call_operand.vmem [shape: bf16[3,4,128,32], index: 11, kind: input, shape index: {}]   ;;  %s5256_s12 = inlined_call_operand.vmem [shape: f32[3,4,1,32], index: 12, kind: input, shape index: {}]   ;;  %s5257_s13 = inlined_call_operand.vmem [shape: bf16[3,4,32,128], index: 13, kind: input, shape index: {}]   ;;  %s5258_s14 = inlined_call_operand.vmem [shape: f32[3,1,128], index: 14, kind: input, shape index: {}]   ;;  %s5259_s15 = inlined_call_operand.vmem [shape: f32[3,1,128], index: 15, kind: input, shape index: {}]   ;;  %s5260_s16 = inlined_call_operand.vmem [shape: f32[3,1,128], index: 16, kind: input, shape index: {}]   ;;  %s5261_s17 = inlined_call_operand.vmem [shape: bf16[3,128,512], index: 17, kind: input, shape index: {}]   ;;  %s5262_s18 = inlined_call_operand.vmem [shape: f32[3,1,512], index: 18, kind: input, shape index: {}]   ;;  %s5263_s19 = inlined_call_operand.vmem [shape: bf16[3,512,128], index: 19, kind: input, shape index: {}]   ;;  %s5264_s20 = inlined_call_operand.vmem [shape: f32[3,1,128], index: 20, kind: input, shape index: {}]   ;;  %s5265_s21 = inlined_call_operand.vmem [shape: f32[2,5,128], index: 21, kind: output, shape index: {}]  }
   0x1   :  { %5274 = sst [smem:[#allocation11_spill]] %s5244_s0  ;;  %s4731_s27 = smov 0  }
   0x2   :  { %5275 = sst [smem:[#allocation12_spill]] %s5245_s1 }
   0x3   :  { %5276 = sst [smem:[#allocation13_spill]] %s5246_s2  ;;  %s4725_s2 = smov 0  }
   0x4   :  { %5277 = sst [smem:[#allocation14_spill]] %s5247_s3  ;;  %s4733_s3 = smov 0  }
   0x5   :  { %5278 = sst [smem:[#allocation15_spill]] %s5248_s4 }
   0x6   :  { %5279 = sst [smem:[#allocation16_spill]] %s5249_s5 }
   0x7   :  { %5280 = sst [smem:[#allocation17_spill]] %s5251_s7 }
   0x8   :  { %5281 = sst [smem:[#allocation18_spill]] %s5252_s8 }
   0x9   :  { %5282 = sst [smem:[#allocation19_spill]] %s5253_s9 }
   0xa   :  { %5283 = sst [smem:[#allocation20_spill]] %s5254_s10 }
   0xb   :  { %5284 = sst [smem:[#allocation21_spill]] %s5255_s11 }
   0xc   :  { %5285 = sst [smem:[#allocation22_spill]] %s5256_s12 }
   0xd   :  { %5286 = sst [smem:[#allocation23_spill]] %s5257_s13 }
   0xe   :  { %5287 = sst [smem:[#allocation24_spill]] %s5259_s15 }
   0xf   :  { %5288 = sst [smem:[#allocation25_spill]] %s5260_s16 }
  0x10   :  { %5289 = sst [smem:[#allocation26_spill]] %s5263_s19 }
  0x11   :  { %5290 = sst [smem:[#allocation27_spill]] %s5264_s20 }
  0x12   :  { %5291 = sst [smem:[#allocation28_spill]] %s5265_s21 }
  0x13 LB: > { %5292 = sst [smem:[#allocation2_spill]] %s4595_s2  ;;  %s40_s28 = sadd.s32 1, %s4603_s26  ;;  %s4611_s3 = sphi %s4733_s3, %s31_s3   ;;  %s4607_s27 = sphi %s4731_s27, %s5337_s27   ;;  %s4603_s26 = sphi %s4729_s26, %s5336_s26   ;;  %s4599_s25 = sphi %s4727_s25, %s5335_s25   ;;  %s4595_s2 = sphi %s4725_s2, %s5334_s2  }
  0x14   : > { %5293 = sst [smem:[#allocation3_spill]] %s4603_s26  ;;  %s43_s29 = sadd.s32 1, %s4607_s27 }
  0x15   : > { %5294 = sst [smem:[#allocation4_spill]] %s4607_s27  ;;  %p41_p0 = scmp.ge.s32.totalorder %s40_s28, 3 }
  0x16   : > { %5295 = sst [smem:[#allocation5_spill]] %s4611_s3  ;;  %p3374_p1 = scmp.ge.s32.totalorder %s4611_s3, 1 }
  0x17   : > { %p743_p2 = scmp.lt.s32.totalorder %s4611_s3, 7  ;;  %s5339_s28 = smov (%p41_p0, %s40_s28), 0 }
  0x18   : > { %5296 = sst [smem:[#allocation6_spill]] %s5339_s28  ;;  %s5341_s29 = smov (!%p41_p0, %s43_s29), %s4607_s27 }
  0x19   : > { %p744_p3 = pnand %p3374_p1, %p743_p2  ;;  %p45_p4 = scmp.ge.s32.totalorder %s5341_s29, 2 }
  0x1b   : > { %s5343_s29 = smov (%p45_p4, %s5341_s29), 0  ;;  %747 = sbr.rel (%p744_p3) target bundleno = 3474 (0xd92), region = 104 }
  0x1c   : > { %5297 = sst [smem:[#allocation7_spill]] %s5343_s29 }
  0x20   : > { %p866_p5 = scmp.lt.s32.totalorder %s4599_s25, 1  ;;  %p871_p6 = scmp.lt.s32.totalorder %s4595_s2, 2 }
  0x21   : > { %s5298_s22 = sld [smem:[#allocation11_spill]] }
  0x22   : > { %s5345_s25 = smov (!%p866_p5, %s4599_s25), 1  ;;  %s5300_s7 = sld [smem:[#allocation17_spill]] }
  0x23   : > { %s4759_s0 = scalar_select %p871_p6, %s4595_s2, 2 }
  0x24   : > { %s4295_s4 = sshll.u32 %s5345_s25, 3  ;;  %s5301_s8 = sld [smem:[#allocation18_spill]] }
  0x25   : > { %s4296_s2 = sshll.u32 %s4759_s0, 8  ;;  %s4779_s25 = sshll.u32 %s4759_s0, 2 }
  0x26   : > { %s5303_s9 = sld [smem:[#allocation19_spill]] }
  0x27   : > { %s870_s23 = scalar_lea.vmem %s5298_s22, %s4295_s4  ;;  %s5304_s10 = sld [smem:[#allocation20_spill]] }
  0x28   : > { %s4776_s19 = scalar_lea.vmem %s5300_s7, %s4296_s2  ;;  %s5306_s11 = sld [smem:[#allocation21_spill]] }
  0x29   : > { %s5307_s12 = sld [smem:[#allocation22_spill]] }
  0x2a   : > { %s4785_s29 = scalar_lea.vmem %s5301_s8, %s4779_s25  ;;  %s4299_s8 = sshll.u32 %s4759_s0, 6 }
  0x2b   : > { %5302 = sst [smem:[#allocation8_spill]] %s4785_s29 }
  0x2c   : > { %s4790_s22 = scalar_lea.vmem %s5303_s9, %s4296_s2  ;;  %s5309_s13 = sld [smem:[#allocation23_spill]] }
  0x2d   : > { %s4796_s1 = scalar_lea.vmem %s5304_s10, %s4779_s25  ;;  %s5312_s20 = sld [smem:[#allocation26_spill]] }
  0x2e   : > { %5305 = sst [smem:[#allocation9_spill]] %s4796_s1  ;;  %s4801_s28 = scalar_lea.vmem %s5306_s11, %s4296_s2 }
  0x2f   : > { %s4807_s7 = scalar_lea.vmem %s5307_s12, %s4779_s25  ;;  %s5313_s3 = sld [smem:[#allocation27_spill]] }
  0x30   : > { %5308 = sst [smem:[#allocation10_spill]] %s4807_s7  ;;  %s4830_s7 = scalar_lea.vmem %s5261_s17, %s4296_s2 }
  0x31   : > { %s5314_s30 = sld [smem:[#allocation28_spill]] }
  0x32   : > { %s4813_s27 = scalar_lea.vmem %s5309_s13, %s4299_s8  ;;  %s5315_s12 = sld [smem:[#allocation2_spill]] }
  0x33   : > { %s4839_s21 = scalar_lea.vmem %s5312_s20, %s4296_s2 }
  0x35   : > { %s934_s15 = scalar_lea.vmem %s5313_s3, %s4759_s0 }
  0x37   : > { %s4848_s16 = scalar_lea.vmem %s5314_s30, %s4295_s4 }
  0x38   : > { %p3394_p7 = scmp.ne.s32.totalorder %s5315_s12, 0 }
  0x39   : > { %s5316_s8 = sld [smem:[#allocation12_spill]] (!%p3394_p7) }
  0x3a   : > { %943 = sbr.rel (%p3394_p7) target bundleno = 231 (0xe7), region = 108  ;;  %s5317_s26 = sld [smem:[#allocation13_spill]] (!%p3394_p7) }
  0x3b   : > { %s5318_s11 = sld [smem:[#allocation15_spill]] (!%p3394_p7) }
  0x3f   : > { %v4309_v0 = vld [vmem:[%s5316_s8 + $0x38] sm:$0xff]  ;;  %v4308_v2 = vld [vmem:[%s5316_s8 + $0x30] sm:$0xff]  ;;  %v944_v4 = vld [vmem:[%s870_s23] sm:$0xff]  ;;  %vm1053_vm0 = vcmask 523264   ;;  %s5319_s23 = sld [smem:[#allocation14_spill]]  ;;  %vm1089_vm1 = vcmask 1040384  }
  0x40   : > { %v4313_v1 = vld [vmem:[%s5316_s8 + $0x58] sm:$0xff]  ;;  %1057 = vmatpush.bf16.msra.mxu0 %v4309_v0  ;;  %v4312_v3 = vld [vmem:[%s5316_s8 + $0x50] sm:$0xff]  ;;  %946 = vst [vmem:[#allocation1] ss:$2 sm:$0xff] %v944_v4  ;;  %v4307_v5 = vld [vmem:[%s5316_s8 + $0x28] sm:$0xff] }
  0x41   : > { %1074 = vmatpush.bf16.msra.mxu1 %v4313_v1  ;;  %v4311_v6 = vld [vmem:[%s5316_s8 + $0x48] sm:$0xff]  ;;  %v4306_v7 = vld [vmem:[%s5316_s8 + $0x20] sm:$0xff]  ;;  %v4305_v10 = vld [vmem:[%s5316_s8 + $0x18] sm:$0xff] }
  0x42   : > { %v4310_v8 = vld [vmem:[%s5316_s8 + $0x40] sm:$0xff]  ;;  %v4304_v12 = vld [vmem:[%s5316_s8 + $0x10] sm:$0xff]  ;;  %v4303_v13 = vld [vmem:[%s5316_s8 + $0x8] sm:$0xff] }
  0x43   : > { %v4302_v14 = vld [vmem:[%s5316_s8] sm:$0xff] }
  0x44   : > { %1058 = vmatpush.bf16.msra.mxu0 %v4308_v2  ;;  %v4524_v19 = vld [vmem:[%s5317_s26] ss:$0 sm:$0xff] }
  0x45   : > { %1075 = vmatpush.bf16.msra.mxu1 %v4312_v3  ;;  %v1083_v22 = vld [vmem:[%s5318_s11] sm:$0xf] }
  0x46   : > { %v1085_v25 = vld [vmem:[%s5319_s23] sm:$0x1] }
  0x47   : > { %v948_v9 = vld.sshfl [vmem:[#allocation1 + $0x8] sm:$0xff pattern:$0x75316420]  ;;  %v947_v15 = vld.sshfl [vmem:[#allocation1] sm:$0xff pattern:$0x75316420] }
  0x48   : > { %1059 = vmatpush.bf16.msra.mxu0 %v4307_v5  ;;  %v952_v11 = vpack.c.bf16 %v948_v9, %v948_v9  ;;  %v951_v16 = vpack.c.bf16 %v947_v15, %v947_v15 }
  0x49   : > { %1076 = vmatpush.bf16.msra.mxu1 %v4311_v6 }
  0x4c   : > { %1060 = vmatpush.bf16.msra.mxu0 %v4306_v7 }
  0x4d   : > { %1077 = vmatpush.bf16.msra.mxu1 %v4310_v8 }
  0x50   : > { %1061 = vmatpush.bf16.msra.mxu0 %v4305_v10  ;;  %3443 = vmatmul.msk.bf16.vlgmr.msra.gmra.mxu1 %vm1053_vm0, %v952_v11 }
  0x54   : > { %1062 = vmatpush.bf16.msra.mxu0 %v4304_v12 }
  0x58   : > { %1063 = vmatpush.bf16.msra.mxu0 %v4303_v13 }
  0x5c   : > { %1064 = vmatpush.bf16.msra.mxu0 %v4302_v14 }
  0x5f   : > { %1065 = vmatmul.bf16.vlgmr.msra.gmra.mxu0 %v951_v16 }
  0xcd   : > { %v1079_v17 = vpop.f32.mrf.mxu1 }
  0xd5   : > { %v1081_v18 = vpop.f32.mrf.mxu1 }
  0xdc   : > { %v1066_v20 = vpop.f32.mrf.mxu0 }
  0xdd   : > { %v1067_v21 = vadd.f32 %v4524_v19, %v1066_v20 }
  0xdf   : > { %v1080_v23 = vadd.f32 %v1079_v17, %v1067_v21 }
  0xe1   : > { %v1084_v24 = vadd.f32 %v1083_v22, %v1080_v23 }
  0xe3   : > { %v1087_v26 = vrot.slane %v1084_v24, 7 }
  0xe4   : > { %v1068_v27 = vpop.f32.mrf.mxu0 }
  0xe5   : > { %v1090_v28 = vsel %vm1089_vm1, %v1085_v25, %v1087_v26 }
  0xe6   : > { %1091 = vst [vmem:[%s4848_s16] sm:$0x1f] %v1090_v28 }
  0xe7 PF: > { %vm1095_vm2 = vcmask 1044480   ;;  %v4613_v31 = vmov 128.0   ;;  %v4337_v32 = vld [vmem:[%s4801_s28 + $0x38] sm:$0xff]  ;;  %v4336_v34 = vld [vmem:[%s4801_s28 + $0x30] sm:$0xff]  ;;  %v4335_v40 = vld [vmem:[%s4801_s28 + $0x28] sm:$0xff]  ;;  %s5320_s13 = sld [smem:[#allocation16_spill]]  ;;  %s5322_s4 = scalar_lea.vmem %s5250_s6, %s4759_s0 }
  0xe8   : > { %4543 = vrcp.f32 %v4613_v31  ;;  %v4329_v33 = vld [vmem:[%s4790_s22 + $0x38] sm:$0xff]  ;;  %1365 = vmatpush.bf16.msra.mxu2 %v4337_v32  ;;  %v4328_v35 = vld [vmem:[%s4790_s22 + $0x30] sm:$0xff]  ;;  %v4327_v41 = vld [vmem:[%s4790_s22 + $0x28] sm:$0xff]  ;;  %s5323_s30 = sld [smem:[#allocation9_spill]]  ;;  %vm1380_vm7 = vcmask 261120   ;;  %vm1419_vm8 = vcmask 1041408   ;;  %s5326_s10 = scalar_lea.vmem %s5258_s14, %s4759_s0 }
  0xe9   : > { %1284 = vmatpush.bf16.msra.mxu1 %v4329_v33  ;;  %v4321_v36 = vld [vmem:[%s4776_s19 + $0x38] sm:$0xff]  ;;  %v4320_v38 = vld [vmem:[%s4776_s19 + $0x30] sm:$0xff]  ;;  %v4319_v42 = vld [vmem:[%s4776_s19 + $0x28] sm:$0xff]  ;;  %s5324_s20 = sld [smem:[#allocation8_spill]]  ;;  %vm1420_vm9 = vcmask 1042432   ;;  %vm1401_vm10 = vcmask 36864  }
  0xea   : > { %1203 = vmatpush.bf16.msra.mxu0 %v4321_v36  ;;  %v4334_v44 = vld [vmem:[%s4801_s28 + $0x20] sm:$0xff]  ;;  %v4333_v48 = vld [vmem:[%s4801_s28 + $0x18] sm:$0xff]  ;;  %v4332_v51 = vld [vmem:[%s4801_s28 + $0x10] sm:$0xff]  ;;  %s5325_s26 = sld [smem:[#allocation10_spill]]  ;;  %vm1415_vm11 = vcmask 39936  }
  0xeb   : > { %v4326_v45 = vld [vmem:[%s4790_s22 + $0x20] sm:$0xff]  ;;  %v4325_v49 = vld [vmem:[%s4790_s22 + $0x18] sm:$0xff]  ;;  %v4324_v52 = vld [vmem:[%s4790_s22 + $0x10] sm:$0xff]  ;;  %s5329_s12 = sld [smem:[#allocation25_spill]] }
  0xec   : > { %1366 = vmatpush.bf16.msra.mxu2 %v4336_v34  ;;  %v4318_v46 = vld [vmem:[%s4776_s19 + $0x20] sm:$0xff]  ;;  %v4331_v54 = vld [vmem:[%s4801_s28 + $0x8] sm:$0xff]  ;;  %v4363_v63 = vld [vmem:[%s4801_s28 + $0x78] sm:$0xff] }
  0xed   : > { %v4898_v29 = vld [vmem:[%s4848_s16] sm:$0x1f]  ;;  %1285 = vmatpush.bf16.msra.mxu1 %v4328_v35  ;;  %v4323_v55 = vld [vmem:[%s4790_s22 + $0x8] sm:$0xff]  ;;  %v4317_v0 = vld [vmem:[%s4776_s19 + $0x18] sm:$0xff]  ;;  %s5321_s2 = scalar_lea.vmem %s5320_s13, %s4759_s0  ;;  %s5331_s13 = scalar_lea.vmem %s5262_s18, %s4779_s25 }
  0xee   : > { %v1096_v30 = vsel %vm1095_vm2, %v4898_v29, 0.0  ;;  %v4544_v37 = vpop.eup %4543  ;;  %1204 = vmatpush.bf16.msra.mxu0 %v4320_v38  ;;  %v4330_v61 = vld [vmem:[%s4801_s28] sm:$0xff]  ;;  %v4355_v1 = vld [vmem:[%s4790_s22 + $0x78] sm:$0xff]  ;;  %v4362_v2 = vld [vmem:[%s4801_s28 + $0x70] sm:$0xff] }
  0xef   : > { %1097 = vadd.xlane.f32.xlu0 %v1096_v30  ;;  %v1100_v39 = vmul.f32 128.0, %v4544_v37  ;;  %vm1104_vm3 = vweird.f32 %v4544_v37  ;;  %v4322_v62 = vld [vmem:[%s4790_s22] sm:$0xff]  ;;  %v4316_v3 = vld [vmem:[%s4776_s19 + $0x10] sm:$0xff]  ;;  %v4361_v5 = vld [vmem:[%s4801_s28 + $0x68] sm:$0xff] }
  0xf0   : > { %1367 = vmatpush.bf16.msra.mxu2 %v4335_v40  ;;  %v4354_v4 = vld [vmem:[%s4790_s22 + $0x70] sm:$0xff]  ;;  %v4315_v6 = vld [vmem:[%s4776_s19 + $0x8] sm:$0xff]  ;;  %v4360_v8 = vld [vmem:[%s4801_s28 + $0x60] sm:$0xff] }
  0xf1   : > { %v1101_v43 = vsub.f32 1.0, %v1100_v39  ;;  %1286 = vmatpush.bf16.msra.mxu1 %v4327_v41  ;;  %v4353_v7 = vld [vmem:[%s4790_s22 + $0x68] sm:$0xff]  ;;  %v4314_v9 = vld [vmem:[%s4776_s19] sm:$0xff]  ;;  %v4347_v11 = vld [vmem:[%s4776_s19 + $0x78] sm:$0xff]  ;;  %s5330_s23 = scalar_lea.vmem %s5329_s12, %s4759_s0 }
  0xf2   : > { %1205 = vmatpush.bf16.msra.mxu0 %v4319_v42  ;;  %v4352_v10 = vld [vmem:[%s4790_s22 + $0x60] sm:$0xff]  ;;  %v4359_v12 = vld [vmem:[%s4801_s28 + $0x58] sm:$0xff]  ;;  %v4346_v14 = vld [vmem:[%s4776_s19 + $0x70] sm:$0xff] }
  0xf3   : > { %v1102_v47 = vmul.f32 %v4544_v37, %v1101_v43  ;;  %v4351_v13 = vld [vmem:[%s4790_s22 + $0x58] sm:$0xff]  ;;  %v4358_v15 = vld [vmem:[%s4801_s28 + $0x50] sm:$0xff]  ;;  %v4345_v17 = vld [vmem:[%s4776_s19 + $0x68] sm:$0xff] }
  0xf4   : > { %1368 = vmatpush.bf16.msra.mxu2 %v4334_v44  ;;  %v4350_v16 = vld [vmem:[%s4790_s22 + $0x50] sm:$0xff]  ;;  %v4357_v18 = vld [vmem:[%s4801_s28 + $0x48] sm:$0xff]  ;;  %v4344_v20 = vld [vmem:[%s4776_s19 + $0x60] sm:$0xff] }
  0xf5   : > { %1287 = vmatpush.bf16.msra.mxu1 %v4326_v45  ;;  %v1103_v50 = vadd.f32 %v4544_v37, %v1102_v47  ;;  %v4349_v19 = vld [vmem:[%s4790_s22 + $0x48] sm:$0xff]  ;;  %v4356_v21 = vld [vmem:[%s4801_s28 + $0x40] sm:$0xff]  ;;  %v4343_v24 = vld [vmem:[%s4776_s19 + $0x58] sm:$0xff] }
  0xf6   : > { %1206 = vmatpush.bf16.msra.mxu0 %v4318_v46  ;;  %v4348_v22 = vld [vmem:[%s4790_s22 + $0x40] sm:$0xff]  ;;  %v4342_v27 = vld [vmem:[%s4776_s19 + $0x50] sm:$0xff]  ;;  %v4341_v28 = vld [vmem:[%s4776_s19 + $0x48] sm:$0xff] }
  0xf7   : > { %v4918_v53 = vsel %vm1104_vm3, %v4544_v37, %v1103_v50  ;;  %v4340_v32 = vld [vmem:[%s4776_s19 + $0x40] sm:$0xff]  ;;  %v4373_v43 = vld [vmem:[%s4776_s19 + $0xb8] sm:$0xff]  ;;  %v4372_v46 = vld [vmem:[%s4776_s19 + $0xb0] sm:$0xff] }
  0xf8   : > { %1369 = vmatpush.bf16.msra.mxu2 %v4333_v48  ;;  %v4525_v37 = vld [vmem:[%s5321_s2] ss:$0 sm:$0xff]  ;;  %v4381_v45 = vld [vmem:[%s4790_s22 + $0xb8] sm:$0xff]  ;;  %v4380_v47 = vld [vmem:[%s4790_s22 + $0xb0] sm:$0xff] }
  0xf9   : > { %1288 = vmatpush.bf16.msra.mxu1 %v4325_v49  ;;  %v4526_v39 = vld [vmem:[%s5322_s4] ss:$0 sm:$0xff]  ;;  %v4371_v48 = vld [vmem:[%s4776_s19 + $0xa8] sm:$0xff] }
  0xfa   : > { %1207 = vmatpush.bf16.msra.mxu0 %v4317_v0  ;;  %v4379_v49 = vld [vmem:[%s4790_s22 + $0xa8] sm:$0xff]  ;;  %v4370_v50 = vld [vmem:[%s4776_s19 + $0xa0] sm:$0xff] }
  0xfb   : > { %v4396_v0 = vld [vmem:[%s4776_s19 + $0xe0] sm:$0xff] }
  0xfc   : > { %1370 = vmatpush.bf16.msra.mxu2 %v4332_v51  ;;  %v4378_v51 = vld [vmem:[%s4790_s22 + $0xa0] sm:$0xff] }
  0xfd   : > { %1289 = vmatpush.bf16.msra.mxu1 %v4324_v52  ;;  %v4369_v52 = vld [vmem:[%s4776_s19 + $0x98] sm:$0xff] }
  0xfe   : > { %1208 = vmatpush.bf16.msra.mxu0 %v4316_v3  ;;  %v4393_v3 = vld [vmem:[%s4776_s19 + $0xc8] sm:$0xff] }
 0x100   : > { %1371 = vmatpush.bf16.msra.mxu2 %v4331_v54  ;;  %v4377_v54 = vld [vmem:[%s4790_s22 + $0x98] sm:$0xff] }
 0x101   : > { %1290 = vmatpush.bf16.msra.mxu1 %v4323_v55  ;;  %v4368_v55 = vld [vmem:[%s4776_s19 + $0x90] sm:$0xff] }
 0x102   : > { %1209 = vmatpush.bf16.msra.mxu0 %v4315_v6 }
 0x104   : > { %1372 = vmatpush.bf16.msra.mxu2 %v4330_v61  ;;  %v4399_v61 = vld [vmem:[%s4776_s19 + $0xf8] sm:$0xff] }
 0x105   : > { %1291 = vmatpush.bf16.msra.mxu1 %v4322_v62  ;;  %v4398_v62 = vld [vmem:[%s4776_s19 + $0xf0] sm:$0xff] }
 0x106   : > { %1210 = vmatpush.bf16.msra.mxu0 %v4314_v9  ;;  %v4527_v9 = vld [vmem:[%s5324_s20] ss:$0 sm:$0xff] }
 0x108   : > { %1712 = vmatpush.bf16.msrb.mxu2 %v4363_v63  ;;  %v4397_v63 = vld [vmem:[%s4776_s19 + $0xe8] sm:$0xff] }
 0x109   : > { %1629 = vmatpush.bf16.msrb.mxu1 %v4355_v1  ;;  %v4395_v1 = vld [vmem:[%s4776_s19 + $0xd8] sm:$0xff] }
 0x10a   : > { %1546 = vmatpush.bf16.msrb.mxu0 %v4347_v11  ;;  %v4529_v11 = vld [vmem:[%s5325_s26] ss:$0 sm:$0xff] }
 0x10c   : > { %1713 = vmatpush.bf16.msrb.mxu2 %v4362_v2  ;;  %v4394_v2 = vld [vmem:[%s4776_s19 + $0xd0] sm:$0xff] }
 0x10d   : > { %1630 = vmatpush.bf16.msrb.mxu1 %v4354_v4  ;;  %v4392_v4 = vld [vmem:[%s4776_s19 + $0xc0] sm:$0xff] }
 0x10e   : > { %1547 = vmatpush.bf16.msrb.mxu0 %v4346_v14 }
 0x110   : > { %1714 = vmatpush.bf16.msrb.mxu2 %v4361_v5  ;;  %v4528_v5 = vld [vmem:[%s5323_s30] ss:$0 sm:$0xff] }
 0x111   : > { %1631 = vmatpush.bf16.msrb.mxu1 %v4353_v7 }
 0x112   : > { %1548 = vmatpush.bf16.msrb.mxu0 %v4345_v17  ;;  %v4365_v17 = vld [vmem:[%s4813_s27 + $0x18] sm:$0xff] }
 0x114   : > { %1715 = vmatpush.bf16.msrb.mxu2 %v4360_v8 }
 0x115   : > { %1632 = vmatpush.bf16.msrb.mxu1 %v4352_v10 }
 0x116   : > { %1549 = vmatpush.bf16.msrb.mxu0 %v4344_v20 }
 0x118   : > { %1716 = vmatpush.bf16.msrb.mxu2 %v4359_v12 }
 0x119   : > { %1633 = vmatpush.bf16.msrb.mxu1 %v4351_v13  ;;  %v4614_v13 = vmov 65535  }
 0x11a   : > { %1550 = vmatpush.bf16.msrb.mxu0 %v4343_v24  ;;  %v1421_v14 = vsel %vm1419_vm8, 4294967295, %v4614_v13  ;;  %v4364_v24 = vld [vmem:[%s4813_s27 + $0x10] sm:$0xff] }
 0x11c   : > { %1717 = vmatpush.bf16.msrb.mxu2 %v4358_v15 }
 0x11d   : > { %1634 = vmatpush.bf16.msrb.mxu1 %v4350_v16 }
 0x11e   : > { %1551 = vmatpush.bf16.msrb.mxu0 %v4342_v27 }
 0x120   : > { %1718 = vmatpush.bf16.msrb.mxu2 %v4357_v18 }
 0x121   : > { %1635 = vmatpush.bf16.msrb.mxu1 %v4349_v19 }
 0x122   : > { %1552 = vmatpush.bf16.msrb.mxu0 %v4341_v28 }
 0x124   : > { %1719 = vmatpush.bf16.msrb.mxu2 %v4356_v21  ;;  %v5011_v21 = vsel %vm1420_vm9, %v1421_v14, 0 }
 0x125   : > { %1636 = vmatpush.bf16.msrb.mxu1 %v4348_v22 }
 0x126   : > { %1553 = vmatpush.bf16.msrb.mxu0 %v4340_v32 }
 0x162   : > { %v1098_v56 = vpop.xlane.xlu0 %1097 }
 0x163   : > { %v1106_v57 = vmul.f32 %v4918_v53, %v1098_v56  ;;  %v4376_v56 = vld [vmem:[%s4790_s22 + $0x90] sm:$0xff] }
 0x165   : > { %v4924_v58 = vsub.f32 %v4898_v29, %v1106_v57  ;;  %v4367_v57 = vld [vmem:[%s4776_s19 + $0x88] sm:$0xff] }
 0x167   : > { %v1108_v59 = vmul.f32 %v4924_v58, %v4924_v58 }
 0x169   : > { %v1109_v60 = vsel %vm1095_vm2, %v1108_v59, 0.0  ;;  %v4366_v59 = vld [vmem:[%s4776_s19 + $0x80] sm:$0xff] }
 0x16a   : > { %1110 = vadd.xlane.f32.xlu0 %v1109_v60  ;;  %v4374_v60 = vld [vmem:[%s4790_s22 + $0x80] sm:$0xff] }
 0x1dd   : > { %v1111_v23 = vpop.xlane.xlu0 %1110 }
 0x1de   : > { %v1112_v25 = vmul.f32 %v1111_v23, %v4918_v53 }
 0x1e0   : > { %v1113_v26 = vadd.f32 1e-06, %v1112_v25 }
 0x1e2   : > { %4545 = vrsqrt.f32 %v1113_v26  ;;  %vm1120_vm5 = vweird.f32 %v1113_v26 }
 0x1e8   : > { %v4546_v30 = vpop.eup %4545 }
 0x1e9   : > { %v1115_v31 = vmul.f32 %v4546_v30, %v1113_v26  ;;  %vm1121_vm4 = vweird.f32 %v4546_v30 }
 0x1ea   : > { %vm1122_vm6 = vmor %vm1120_vm5, %vm1121_vm4 }
 0x1eb   : > { %v1116_v33 = vmul.f32 %v4546_v30, %v1115_v31 }
 0x1ed   : > { %v1117_v34 = vmul.f32 0.5, %v1116_v33 }
 0x1ef   : > { %v1118_v35 = vsub.f32 1.5, %v1117_v34 }
 0x1f1   : > { %v1119_v36 = vmul.f32 %v4546_v30, %v1118_v35  ;;  %v4534_v35 = vld [vmem:[%s5323_s30 + $0x2] ss:$0 sm:$0xff] }
 0x1f3   : > { %v1123_v38 = vsel %vm1122_vm6, %v4546_v30, %v1119_v36 }
 0x1f4   : > { %v1124_v40 = vmul.f32 %v1123_v38, %v4924_v58  ;;  %v4375_v58 = vld [vmem:[%s4790_s22 + $0x88] sm:$0xff] }
 0x1f6   : > { %v1128_v41 = vmul.f32 %v4525_v37, %v1124_v40 }
 0x1f8   : > { %v1132_v42 = vadd.f32 %v4526_v39, %v1128_v41 }
 0x1fa   : > { %v4972_v44 = vpack.c.bf16 %v1132_v42, %v1132_v42 }
 0x1fc   : > { %1211 = vmatmul.bf16.vlgmr.msra.gmra.mxu0 %v4972_v44  ;;  %1292 = vmatmul.bf16.vlgmr.msra.gmra.mxu1 %v4972_v44 }
 0x1fd   : > { %1373 = vmatmul.bf16.vlgmr.msra.gmra.mxu2 %v4972_v44  ;;  %1884 = vmatpush.bf16.msra.mxu1 %v4373_v43 }
 0x1fe   : > { %1967 = vmatpush.bf16.msra.mxu2 %v4381_v45  ;;  %1806 = vmatpush.bf16.msra.mxu0 %v4365_v17  ;;  %v4389_v17 = vld [vmem:[%s4801_s28 + $0xb8] sm:$0xff] }
 0x201   : > { %1885 = vmatpush.bf16.msra.mxu1 %v4372_v46 }
 0x202   : > { %1968 = vmatpush.bf16.msra.mxu2 %v4380_v47  ;;  %1807 = vmatpush.bf16.msra.mxu0 %v4364_v24 }
 0x205   : > { %1886 = vmatpush.bf16.msra.mxu1 %v4371_v48 }
 0x206   : > { %1969 = vmatpush.bf16.msra.mxu2 %v4379_v49 }
 0x209   : > { %1887 = vmatpush.bf16.msra.mxu1 %v4370_v50 }
 0x20a   : > { %1970 = vmatpush.bf16.msra.mxu2 %v4378_v51 }
 0x20c   : > { %1554 = vmatmul.bf16.vlgmr.msrb.gmra.mxu0 %v4972_v44  ;;  %1637 = vmatmul.bf16.vlgmr.msrb.gmra.mxu1 %v4972_v44 }
 0x20d   : > { %1720 = vmatmul.bf16.vlgmr.msrb.gmra.mxu2 %v4972_v44  ;;  %1888 = vmatpush.bf16.msra.mxu1 %v4369_v52 }
 0x20e   : > { %1971 = vmatpush.bf16.msra.mxu2 %v4377_v54 }
 0x211   : > { %1889 = vmatpush.bf16.msra.mxu1 %v4368_v55  ;;  %v4339_v55 = vld [vmem:[%s4813_s27 + $0x8] sm:$0xff] }
 0x212   : > { %1972 = vmatpush.bf16.msra.mxu2 %v4376_v56  ;;  %v4338_v56 = vld [vmem:[%s4813_s27] sm:$0xff] }
 0x215   : > { %1890 = vmatpush.bf16.msra.mxu1 %v4367_v57  ;;  %v4531_v57 = vld [vmem:[%s5323_s30 + $0x1] ss:$0 sm:$0xff] }
 0x216   : > { %1973 = vmatpush.bf16.msra.mxu2 %v4375_v58 }
 0x219   : > { %1891 = vmatpush.bf16.msra.mxu1 %v4366_v59 }
 0x21a   : > { %1974 = vmatpush.bf16.msra.mxu2 %v4374_v60 }
 0x21c   : > { %1892 = vmatmul.bf16.vlgmr.msra.gmra.mxu1 %v4972_v44 }
 0x21d   : > { %1975 = vmatmul.bf16.vlgmr.msra.gmra.mxu2 %v4972_v44 }
 0x21e   : > { %2222 = vmatpush.bf16.msrb.mxu2 %v4399_v61 }
 0x222   : > { %2223 = vmatpush.bf16.msrb.mxu2 %v4398_v62 }
 0x226   : > { %2224 = vmatpush.bf16.msrb.mxu2 %v4397_v63 }
 0x22a   : > { %2225 = vmatpush.bf16.msrb.mxu2 %v4396_v0 }
 0x22e   : > { %2226 = vmatpush.bf16.msrb.mxu2 %v4395_v1  ;;  %v4532_v1 = vld [vmem:[%s5325_s26 + $0x1] ss:$0 sm:$0xff] }
 0x232   : > { %2227 = vmatpush.bf16.msrb.mxu2 %v4394_v2 }
 0x236   : > { %2228 = vmatpush.bf16.msrb.mxu2 %v4393_v3 }
 0x23a   : > { %2229 = vmatpush.bf16.msrb.mxu2 %v4392_v4 }
 0x23d   : > { %2230 = vmatmul.bf16.vlgmr.msrb.gmra.mxu2 %v4972_v44 }
 0x279   : > { %v1212_v6 = vpop.f32.mrf.mxu0  ;;  %v1293_v7 = vpop.f32.mrf.mxu1 }
 0x27a   : > { %v1294_v8 = vadd.f32 %v4528_v5, %v1293_v7  ;;  %v1213_v15 = vadd.f32 %v4527_v9, %v1212_v6 }
 0x27c   : > { %v1379_v10 = vpack.c.bf16 %v1294_v8, %v1294_v8  ;;  %v1378_v23 = vpack.c.bf16 %v1213_v15, %v1213_v15  ;;  %v4530_v8 = vld [vmem:[%s5324_s20 + $0x1] ss:$0 sm:$0xff] }
 0x27e   : > { %v1385_v12 = vsel %vm1380_vm7, %v1379_v10, 0 }
 0x27f   : > { %1394 = vmatpush.bf16.xpose.msra.mxu3 %v1385_v12 }
 0x280   : > { %v1374_v16 = vpop.f32.mrf.mxu2 }
 0x281   : > { %v1375_v18 = vadd.f32 %v4529_v11, %v1374_v16  ;;  %v1214_v19 = vpop.f32.mrf.mxu0  ;;  %v1295_v20 = vpop.f32.mrf.mxu1 }
 0x282   : > { %v4387_v19 = vld [vmem:[%s4801_s28 + $0xa8] sm:$0xff]  ;;  %v4386_v20 = vld [vmem:[%s4801_s28 + $0xa0] sm:$0xff] }
 0x283   : > { %v1414_v22 = vpack.c.bf16 %v1375_v18, %v1375_v18  ;;  %v4388_v18 = vld [vmem:[%s4801_s28 + $0xb0] sm:$0xff] }
 0x285   : > { %v1424_v25 = vand.u32 %v5011_v21, %v1414_v22  ;;  %v4385_v22 = vld [vmem:[%s4801_s28 + $0x98] sm:$0xff] }
 0x286   : > { %3540 = vmatmul.msk.bf16.vlgmr.msra.gmra.mxu3 %vm1380_vm7, %v1378_v23 }
 0x287   : > { %1433 = vmatpush.bf16.msrb.mxu3 %v1424_v25 }
 0x288   : > { %v1376_v26 = vpop.f32.mrf.mxu2 }
 0x289   : > { %v1555_v27 = vpop.f32.mrf.mxu0  ;;  %v1638_v28 = vpop.f32.mrf.mxu1 }
 0x28a   : > { %v1639_v59 = vadd.f32 %v4531_v57, %v1638_v28  ;;  %v1556_v9 = vadd.f32 %v4530_v8, %v1555_v27  ;;  %v4384_v28 = vld [vmem:[%s4801_s28 + $0x90] sm:$0xff] }
 0x28b   : > { %1465 = vmatpush.bf16.msra.mxu3 %v4339_v55  ;;  %v4537_v55 = vld [vmem:[%s5325_s26 + $0x2] ss:$0 sm:$0xff] }
 0x28c   : > { %v1726_v61 = vpack.c.bf16 %v1639_v59, %v1639_v59  ;;  %v1725_v10 = vpack.c.bf16 %v1556_v9, %v1556_v9 }
 0x28e   : > { %v1731_v0 = vsel %vm1380_vm7, %v1726_v61, 0 }
 0x28f   : > { %1466 = vmatpush.bf16.msra.mxu3 %v4338_v56 }
 0x290   : > { %v1721_v30 = vpop.f32.mrf.mxu2 }
 0x291   : > { %v1557_v31 = vpop.f32.mrf.mxu0  ;;  %v1640_v32 = vpop.f32.mrf.mxu1  ;;  %v1722_v2 = vadd.f32 %v4532_v1, %v1721_v30  ;;  %v4383_v30 = vld [vmem:[%s4801_s28 + $0x88] sm:$0xff] }
 0x292   : > { %v4382_v31 = vld [vmem:[%s4801_s28 + $0x80] sm:$0xff] }
 0x293   : > { %v1759_v3 = vpack.c.bf16 %v1722_v2, %v1722_v2 }
 0x295   : > { %v1764_v6 = vand.u32 %v1759_v3, %v5011_v21  ;;  %v4536_v3 = vld [vmem:[%s5326_s10] ss:$0 sm:$0xff] }
 0x298   : > { %v1723_v33 = vpop.f32.mrf.mxu2 }
 0x299   : > { %v5016_v34 = vpop.f32.mrf.mxu1 }
 0x2a0   : > { %v1976_v36 = vpop.f32.mrf.mxu2 }
 0x2a1   : > { %v1977_v37 = vadd.f32 %v4534_v35, %v1976_v36  ;;  %v1895_v38 = vpop.f32.mrf.mxu1  ;;  %v4407_v36 = vld [vmem:[%s4790_s22 + $0xf8] sm:$0xff] }
 0x2a2   : > { %v4406_v38 = vld [vmem:[%s4790_s22 + $0xf0] sm:$0xff] }
 0x2a3   : > { %v2064_v39 = vpack.c.bf16 %v1977_v37, %v1977_v37 }
 0x2a5   : > { %v2069_v40 = vsel %vm1380_vm7, %v2064_v39, 0  ;;  %v4405_v39 = vld [vmem:[%s4790_s22 + $0xe8] sm:$0xff] }
 0x2a6   : > { %2078 = vmatpush.bf16.xpose.msrb.mxu0 %v2069_v40  ;;  %v4404_v40 = vld [vmem:[%s4790_s22 + $0xe0] sm:$0xff] }
 0x2a8   : > { %v1978_v41 = vpop.f32.mrf.mxu2 }
 0x2a9   : > { %v4403_v41 = vld [vmem:[%s4790_s22 + $0xd8] sm:$0xff] }
 0x2c0   : > { %v5020_v42 = vpop.f32.mrf.mxu2 }
 0x2c8   : > { %v2233_v43 = vpop.f32.mrf.mxu2 }
 0x2c9   : > { %v4402_v43 = vld [vmem:[%s4790_s22 + $0xd0] sm:$0xff] }
 0x309   : > { %v1396_v45 = vpop.f32.mrf.mxu3 }
 0x30a   : > { %v1400_v46 = vmul.f32 0.17677669, %v1396_v45  ;;  %v4401_v45 = vld [vmem:[%s4790_s22 + $0xc8] sm:$0xff] }
 0x30c   : > { %v1402_v47 = vsel %vm1401_vm10, %v1400_v46, -inf }
 0x30d   : > { %1403 = vmax.xlane.f32.xlu1 %v1402_v47 }
 0x311   : > { %v1398_v48 = vpop.f32.mrf.mxu3 }
 0x380   : > { %v1404_v49 = vpop.xlane.xlu1 %1403 }
 0x381   : > { %v1405_v50 = vsub.f32 %v1400_v46, %v1404_v49  ;;  %v4400_v46 = vld [vmem:[%s4790_s22 + $0xc0] sm:$0xff]  ;;  %v4391_v49 = vld [vmem:[%s4813_s27 + $0x28] sm:$0xff] }
 0x382   : > { %2144 = vmatpush.bf16.msrb.mxu1 %v4391_v49 }
 0x383   : > { %v1406_v51 = vmul.f32 1.442695, %v1405_v50  ;;  %v4390_v50 = vld [vmem:[%s4813_s27 + $0x20] sm:$0xff] }
 0x385   : > { %4547 = vpow2.f32 %v1406_v51 }
 0x386   : > { %2145 = vmatpush.bf16.msrb.mxu1 %v4390_v50 }
 0x38b   : > { %v4548_v52 = vpop.eup %4547 }
 0x38c   : > { %v1408_v54 = vsel %vm1401_vm10, %v4548_v52, 0.0 }
 0x38d   : > { %1409 = vadd.xlane.f32.xlu1 %v1408_v54 }
 0x400   : > { %v1410_v58 = vpop.xlane.xlu1 %1409 }
 0x401   : > { %4549 = vrcp.f32 %v1410_v58 }
 0x407   : > { %v4550_v60 = vpop.eup %4549 }
 0x408   : > { %v1412_v62 = vmul.f32 %v4550_v60, %v4548_v52  ;;  %v4533_v52 = vld [vmem:[%s5324_s20 + $0x2] ss:$0 sm:$0xff] }
 0x409   : > { %v1894_v54 = vadd.f32 %v4533_v52, %v5016_v34 }
 0x40a   : > { %v1413_v63 = vpack.c.bf16 %v1412_v62, %v1412_v62  ;;  %v4538_v62 = vld [vmem:[%s5323_s30 + $0x3] ss:$0 sm:$0xff] }
 0x40b   : > { %v2063_v57 = vpack.c.bf16 %v1894_v54, %v1894_v54 }
 0x40c   : > { %3541 = vmatmul.msk.bf16.vlgmr.msrb.gmra.mxu3 %vm1415_vm11, %v1413_v63 }
 0x40d   : > { %1740 = vmatpush.bf16.xpose.msrb.mxu3 %v1731_v0 }
 0x48f   : > { %v1435_v4 = vpop.f32.mrf.mxu3 }
 0x490   : > { %v1439_v5 = vpack.c.bf16 %v1435_v4, %v1435_v4 }
 0x492   : > { %3550 = vmatmul.msk.bf16.vlgmr.msra.gmra.mxu3 %vm1380_vm7, %v1439_v5 }
 0x493   : > { %1773 = vmatpush.bf16.msra.mxu3 %v1764_v6 }
 0x497   : > { %v1437_v7 = vpop.f32.mrf.mxu3 }
 0x4a2   : > { %3698 = vmatmul.msk.bf16.vlgmr.msrb.gmra.mxu3 %vm1380_vm7, %v1725_v10 }
 0x4a3   : > { %2050 = vmatpush.bf16.msrb.mxu3 %v4389_v17 }
 0x4a7   : > { %2051 = vmatpush.bf16.msrb.mxu3 %v4388_v18  ;;  %v4414_v18 = vld [vmem:[%s4801_s28 + $0xf0] sm:$0xff] }
 0x4ab   : > { %2052 = vmatpush.bf16.msrb.mxu3 %v4387_v19  ;;  %v4413_v19 = vld [vmem:[%s4801_s28 + $0xe8] sm:$0xff] }
 0x4af   : > { %2053 = vmatpush.bf16.msrb.mxu3 %v4386_v20  ;;  %v4412_v20 = vld [vmem:[%s4801_s28 + $0xe0] sm:$0xff] }
 0x4b3   : > { %2054 = vmatpush.bf16.msrb.mxu3 %v4385_v22  ;;  %v4411_v22 = vld [vmem:[%s4801_s28 + $0xd8] sm:$0xff] }
 0x4b7   : > { %2055 = vmatpush.bf16.msrb.mxu3 %v4384_v28 }
 0x4bb   : > { %2056 = vmatpush.bf16.msrb.mxu3 %v4383_v30 }
 0x4bf   : > { %2057 = vmatpush.bf16.msrb.mxu3 %v4382_v31 }
 0x515   : > { %v5034_v11 = vpop.f32.mrf.mxu3 }
 0x516   : > { %v1475_v4 = vadd.f32 %v4536_v3, %v5034_v11 }
 0x51d   : > { %v1470_v12 = vpop.f32.mrf.mxu3 }
 0x525   : > { %v1742_v13 = vpop.f32.mrf.mxu3 }
 0x526   : > { %v1746_v14 = vmul.f32 0.17677669, %v1742_v13  ;;  %v4415_v13 = vld [vmem:[%s4801_s28 + $0xf8] sm:$0xff] }
 0x528   : > { %v1747_v15 = vsel %vm1401_vm10, %v1746_v14, -inf }
 0x529   : > { %1748 = vmax.xlane.f32.xlu2 %v1747_v15 }
 0x52d   : > { %v1744_v16 = vpop.f32.mrf.mxu3 }
 0x59c   : > { %v1749_v23 = vpop.xlane.xlu2 %1748 }
 0x59d   : > { %v1750_v24 = vsub.f32 %v1746_v14, %v1749_v23  ;;  %v4410_v23 = vld [vmem:[%s4801_s28 + $0xd0] sm:$0xff] }
 0x59f   : > { %v1751_v25 = vmul.f32 1.442695, %v1750_v24  ;;  %v4409_v24 = vld [vmem:[%s4801_s28 + $0xc8] sm:$0xff] }
 0x5a1   : > { %4551 = vpow2.f32 %v1751_v25  ;;  %v4408_v25 = vld [vmem:[%s4801_s28 + $0xc0] sm:$0xff] }
 0x5a7   : > { %v4552_v26 = vpop.eup %4551 }
 0x5a8   : > { %v1753_v27 = vsel %vm1401_vm10, %v4552_v26, 0.0 }
 0x5a9   : > { %1754 = vadd.xlane.f32.xlu2 %v1753_v27 }
 0x61c   : > { %v1755_v32 = vpop.xlane.xlu2 %1754 }
 0x61d   : > { %4553 = vrcp.f32 %v1755_v32 }
 0x623   : > { %v4554_v33 = vpop.eup %4553 }
 0x624   : > { %v1757_v35 = vmul.f32 %v4554_v33, %v4552_v26 }
 0x626   : > { %v1758_v37 = vpack.c.bf16 %v1757_v35, %v1757_v35  ;;  %v4535_v35 = vld [vmem:[%s5324_s20 + $0x3] ss:$0 sm:$0xff] }
 0x628   : > { %3699 = vmatmul.msk.bf16.vlgmr.msra.gmra.mxu3 %vm1415_vm11, %v1758_v37  ;;  %v4539_v37 = vld [vmem:[%s5325_s26 + $0x3] ss:$0 sm:$0xff] }
 0x629   : > { %2305 = vmatpush.bf16.msra.mxu3 %v4407_v36  ;;  %v2232_v36 = vadd.f32 %v4535_v35, %v5020_v42 }
 0x62d   : > { %2306 = vmatpush.bf16.msra.mxu3 %v4406_v38 }
 0x631   : > { %2307 = vmatpush.bf16.msra.mxu3 %v4405_v39  ;;  %v2401_v39 = vpack.c.bf16 %v2232_v36, %v2232_v36  ;;  %v4119_v36 = vld [vmem:[%s4830_s7 + $0xa0] sm:$0xf] }
 0x635   : > { %2308 = vmatpush.bf16.msra.mxu3 %v4404_v40 }
 0x638   : > { %2058 = vmatmul.bf16.vlgmr.msrb.gmra.mxu3 %v4972_v44 }
 0x639   : > { %2309 = vmatpush.bf16.msra.mxu3 %v4403_v41 }
 0x63d   : > { %2310 = vmatpush.bf16.msra.mxu3 %v4402_v43 }
 0x641   : > { %2311 = vmatpush.bf16.msra.mxu3 %v4401_v45 }
 0x645   : > { %2312 = vmatpush.bf16.msra.mxu3 %v4400_v46 }
 0x648   : > { %2313 = vmatmul.bf16.vlgmr.msra.gmra.mxu3 %v4972_v44 }
 0x6ab   : > { %v1775_v47 = vpop.f32.mrf.mxu3 }
 0x6ac   : > { %v1779_v48 = vpack.c.bf16 %v1775_v47, %v1775_v47 }
 0x6ae   : > { %3712 = vmatmul.msk.bf16.vlgmr.msra.gmra.mxu0 %vm1380_vm7, %v1779_v48 }
 0x6b3   : > { %v1777_v51 = vpop.f32.mrf.mxu3 }
 0x6bb   : > { %v2059_v56 = vpop.f32.mrf.mxu3 }
 0x6bc   : > { %v2060_v58 = vadd.f32 %v4537_v55, %v2059_v56  ;;  %v4417_v56 = vld [vmem:[%s4813_s27 + $0x38] sm:$0xff] }
 0x6bd   : > { %2482 = vmatpush.bf16.msra.mxu2 %v4417_v56 }
 0x6be   : > { %v2097_v59 = vpack.c.bf16 %v2060_v58, %v2060_v58  ;;  %3860 = vmatmul.msk.bf16.vlgmr.msrb.gmra.mxu0 %vm1380_vm7, %v2063_v57  ;;  %v4416_v57 = vld [vmem:[%s4813_s27 + $0x30] sm:$0xff]  ;;  %s5327_s27 = sld [smem:[#allocation24_spill]] }
 0x6c0   : > { %v2102_v60 = vand.u32 %v2097_v59, %v5011_v21 }
 0x6c1   : > { %2483 = vmatpush.bf16.msra.mxu2 %v4416_v57  ;;  %v4435_v57 = vld [vmem:[%s4830_s7 + $0x8c] sm:$0xf] }
 0x6c2   : > { %2111 = vmatpush.bf16.msra.mxu0 %v2102_v60 }
 0x6c3   : > { %v2061_v61 = vpop.f32.mrf.mxu3 }
 0x6c4   : > { %s5328_s1 = scalar_lea.vmem %s5327_s27, %s4759_s0 }
 0x6c6   : > { %2388 = vmatpush.bf16.msrb.mxu0 %v4415_v13 }
 0x6ca   : > { %2389 = vmatpush.bf16.msrb.mxu0 %v4414_v18 }
 0x6cb   : > { %v2314_v63 = vpop.f32.mrf.mxu3 }
 0x6cc   : > { %v2315_v0 = vadd.f32 %v4538_v62, %v2314_v63 }
 0x6ce   : > { %v2402_v1 = vpack.c.bf16 %v2315_v0, %v2315_v0  ;;  %2390 = vmatpush.bf16.msrb.mxu0 %v4413_v19 }
 0x6d0   : > { %v2407_v2 = vsel %vm1380_vm7, %v2402_v1, 0 }
 0x6d1   : > { %2416 = vmatpush.bf16.xpose.msra.mxu1 %v2407_v2 }
 0x6d2   : > { %2391 = vmatpush.bf16.msrb.mxu0 %v4412_v20 }
 0x6d3   : > { %v2316_v34 = vpop.f32.mrf.mxu3 }
 0x6d6   : > { %2392 = vmatpush.bf16.msrb.mxu0 %v4411_v22  ;;  %v4135_v22 = vld [vmem:[%s4830_s7 + $0xc0] sm:$0xf] }
 0x6da   : > { %2393 = vmatpush.bf16.msrb.mxu0 %v4410_v23  ;;  %v4444_v23 = vld [vmem:[%s4830_s7 + $0xcc] sm:$0xf0] }
 0x6de   : > { %2394 = vmatpush.bf16.msrb.mxu0 %v4409_v24  ;;  %v4442_v24 = vld [vmem:[%s4830_s7 + $0xc4] sm:$0xf] }
 0x6e2   : > { %2395 = vmatpush.bf16.msrb.mxu0 %v4408_v25  ;;  %v4136_v25 = vor.u32 %v4444_v23, %v4135_v22  ;;  %v4424_v22 = vld [vmem:[%s4830_s7 + $0x2c] sm:$0xf0]  ;;  %v4422_v23 = vld [vmem:[%s4830_s7 + $0x24] sm:$0xf] }
 0x72b   : > { %v1809_v5 = vpop.f32.mrf.mxu0 }
 0x72c   : > { %v1813_v6 = vadd.f32 %v1809_v5, %v1475_v4  ;;  %v4151_v5 = vld [vmem:[%s4830_s7 + $0xe0] sm:$0xf] }
 0x733   : > { %v1811_v7 = vpop.f32.mrf.mxu0 }
 0x734   : > { %v4446_v7 = vld [vmem:[%s4830_s7 + $0xe4] sm:$0xf] }
 0x73b   : > { %v2080_v8 = vpop.f32.mrf.mxu0 }
 0x73c   : > { %v2084_v9 = vmul.f32 0.17677669, %v2080_v8 }
 0x73e   : > { %v2085_v10 = vsel %vm1401_vm10, %v2084_v9, -inf }
 0x73f   : > { %2086 = vmax.xlane.f32.xlu0 %v2085_v10  ;;  %v4159_v10 = vld [vmem:[%s4830_s7 + $0xe8] sm:$0xf] }
 0x743   : > { %v2082_v12 = vpop.f32.mrf.mxu0 }
 0x744   : > { %v4449_v12 = vld [vmem:[%s4830_s7 + $0xf4] sm:$0xf0] }
 0x7b2   : > { %v2087_v14 = vpop.xlane.xlu0 %2086 }
 0x7b3   : > { %v2088_v15 = vsub.f32 %v2084_v9, %v2087_v14  ;;  %v4153_v9 = vld [vmem:[%s4830_s7 + $0xf0] sm:$0xf0]  ;;  %v4160_v14 = vor.u32 %v4449_v12, %v4159_v10  ;;  %v4426_v10 = vld [vmem:[%s4830_s7 + $0x44] sm:$0xf] }
 0x7b4   : > { %v4156_v13 = vor.u32 %v4446_v7, %v4153_v9  ;;  %v4428_v9 = vld [vmem:[%s4830_s7 + $0x4c] sm:$0xf0] }
 0x7b5   : > { %v2089_v11 = vmul.f32 1.442695, %v2088_v15  ;;  %v4447_v15 = vld [vmem:[%s4830_s7 + $0xec] sm:$0xf] }
 0x7b7   : > { %4555 = vpow2.f32 %v2089_v11 }
 0x7bd   : > { %v4556_v16 = vpop.eup %4555 }
 0x7be   : > { %v2091_v17 = vsel %vm1401_vm10, %v4556_v16, 0.0 }
 0x7bf   : > { %2092 = vadd.xlane.f32.xlu1 %v2091_v17 }
 0x832   : > { %v2093_v26 = vpop.xlane.xlu1 %2092 }
 0x833   : > { %4557 = vrcp.f32 %v2093_v26  ;;  %v4137_v26 = vld [vmem:[%s4830_s7 + $0xd0] sm:$0xf0] }
 0x839   : > { %v4558_v27 = vpop.eup %4557 }
 0x83a   : > { %v2095_v28 = vmul.f32 %v4558_v27, %v4556_v16  ;;  %v4143_v27 = vld [vmem:[%s4830_s7 + $0xc8] sm:$0xf] }
 0x83c   : > { %v2096_v30 = vpack.c.bf16 %v2095_v28, %v2095_v28  ;;  %v4445_v28 = vld [vmem:[%s4830_s7 + $0xd4] sm:$0xf0] }
 0x83e   : > { %3861 = vmatmul.msk.bf16.vlgmr.msra.gmra.mxu0 %vm1415_vm11, %v2096_v30  ;;  %v4140_v30 = vor.u32 %v4442_v24, %v4137_v26  ;;  %v4063_v26 = vld [vmem:[%s4830_s7 + $0x28] sm:$0xf] }
 0x83f   : > { %2739 = vmatpush.bf16.msra.mxu0 %v4156_v13  ;;  %v4073_v13 = vld [vmem:[%s4830_s7 + $0x50] sm:$0xf0] }
 0x843   : > { %2740 = vmatpush.bf16.msra.mxu0 %v4140_v30 }
 0x84e   : > { %2396 = vmatmul.bf16.vlgmr.msrb.gmra.mxu0 %v4972_v44 }
 0x8bb   : > { %v2113_v31 = vpop.f32.mrf.mxu0 }
 0x8bc   : > { %v2117_v32 = vpack.c.bf16 %v2113_v31, %v2113_v31  ;;  %v4144_v31 = vor.u32 %v4445_v28, %v4143_v27  ;;  %v4425_v27 = vld [vmem:[%s4830_s7 + $0x34] sm:$0xf0] }
 0x8bd   : > { %v4064_v30 = vor.u32 %v4425_v27, %v4063_v26  ;;  %v4451_v26 = vld [vmem:[%s4839_s21 + $0x8] sm:$0xff] }
 0x8be   : > { %3874 = vmatmul.msk.bf16.vlgmr.msrb.gmra.mxu1 %vm1380_vm7, %v2117_v32  ;;  %v4443_v32 = vld [vmem:[%s4830_s7 + $0xcc] sm:$0xf] }
 0x8bf   : > { %v4475_v27 = vld [vmem:[%s4839_s21 + $0xc8] sm:$0xff] }
 0x8c3   : > { %v2115_v33 = vpop.f32.mrf.mxu0 }
 0x8c4   : > { %v4145_v33 = vld [vmem:[%s4830_s7 + $0xd8] sm:$0xf0] }
 0x8c5   : > { %v4148_v35 = vor.u32 %v4443_v32, %v4145_v33  ;;  %v4065_v32 = vld [vmem:[%s4830_s7 + $0x38] sm:$0xf0]  ;;  %v4039_v33 = vld [vmem:[%s4830_s7] sm:$0xf] }
 0x8cb   : > { %v2397_v38 = vpop.f32.mrf.mxu0 }
 0x8cc   : > { %v2398_v40 = vadd.f32 %v4539_v37, %v2397_v38  ;;  %v4440_v37 = vld [vmem:[%s4830_s7 + $0xac] sm:$0xf0]  ;;  %v4438_v38 = vld [vmem:[%s4830_s7 + $0xa4] sm:$0xf] }
 0x8ce   : > { %v2435_v41 = vpack.c.bf16 %v2398_v40, %v2398_v40  ;;  %4022 = vmatmul.msk.bf16.vlgmr.msra.gmra.mxu1 %vm1380_vm7, %v2401_v39  ;;  %v4120_v39 = vor.u32 %v4440_v37, %v4119_v36  ;;  %v4121_v40 = vld [vmem:[%s4830_s7 + $0xb0] sm:$0xf0]  ;;  %v4420_v36 = vld [vmem:[%s4830_s7 + $0xc] sm:$0xf0]  ;;  %v4418_v37 = vld [vmem:[%s4830_s7 + $0x4] sm:$0xf] }
 0x8d0   : > { %v2440_v43 = vand.u32 %v2435_v41, %v5011_v21  ;;  %v4127_v41 = vld [vmem:[%s4830_s7 + $0xa8] sm:$0xf] }
 0x8d2   : > { %2449 = vmatpush.bf16.msrb.mxu1 %v2440_v43  ;;  %v4441_v43 = vld [vmem:[%s4830_s7 + $0xb4] sm:$0xf0] }
 0x8d3   : > { %v2399_v45 = vpop.f32.mrf.mxu0 }
 0x8d4   : > { %v4124_v45 = vor.u32 %v4438_v38, %v4121_v40  ;;  %v4041_v38 = vld [vmem:[%s4830_s7 + $0x10] sm:$0xf0] }
 0x8d5   : > { %v4044_v40 = vor.u32 %v4418_v37, %v4041_v38 }
 0x8d6   : > { %2752 = vmatpush.bf16.msra.mxu1 %v4160_v14  ;;  %2741 = vmatpush.bf16.msra.mxu0 %v4124_v45  ;;  %v4079_v14 = vld [vmem:[%s4830_s7 + $0x48] sm:$0xf]  ;;  %v4419_v45 = vld [vmem:[%s4830_s7 + $0xc] sm:$0xf] }
 0x8da   : > { %2753 = vmatpush.bf16.msra.mxu1 %v4144_v31  ;;  %v4423_v31 = vld [vmem:[%s4830_s7 + $0x2c] sm:$0xf] }
 0x93b   : > { %v2147_v44 = vpop.f32.mrf.mxu1 }
 0x93c   : > { %v2151_v46 = vadd.f32 %v2147_v44, %v1813_v6  ;;  %v4448_v6 = vld [vmem:[%s4830_s7 + $0xec] sm:$0xf0]  ;;  %v4128_v44 = vor.u32 %v4441_v43, %v4127_v41  ;;  %v4047_v41 = vld [vmem:[%s4830_s7 + $0x8] sm:$0xf]  ;;  %v4421_v43 = vld [vmem:[%s4830_s7 + $0x14] sm:$0xf0] }
 0x93d   : > { %v4152_v8 = vor.u32 %v4448_v6, %v4151_v5  ;;  %v4431_v5 = vld [vmem:[%s4830_s7 + $0x6c] sm:$0xf]  ;;  %v4097_v6 = vld [vmem:[%s4830_s7 + $0x78] sm:$0xf0] }
 0x93e   : > { %2754 = vmatpush.bf16.msra.mxu1 %v4128_v44  ;;  %v4100_v7 = vor.u32 %v4431_v5, %v4097_v6  ;;  %v4048_v44 = vor.u32 %v4421_v43, %v4047_v41  ;;  %v4456_v5 = vld [vmem:[%s4839_s21 + $0x30] sm:$0xff] }
 0x93f   : > { %2726 = vmatpush.bf16.msrb.mxu3 %v4152_v8  ;;  %v4071_v8 = vld [vmem:[%s4830_s7 + $0x40] sm:$0xf]  ;;  %v4480_v6 = vld [vmem:[%s4839_s21 + $0xf0] sm:$0xff] }
 0x940   : > { %v4072_v12 = vor.u32 %v4428_v9, %v4071_v8  ;;  %v4470_v8 = vld [vmem:[%s4839_s21 + $0xa0] sm:$0xff]  ;;  %v4455_v9 = vld [vmem:[%s4839_s21 + $0x28] sm:$0xff] }
 0x943   : > { %v2149_v47 = vpop.f32.mrf.mxu1  ;;  %2727 = vmatpush.bf16.msrb.mxu3 %v4136_v25  ;;  %v4057_v25 = vld [vmem:[%s4830_s7 + $0x30] sm:$0xf0] }
 0x944   : > { %v4129_v47 = vld [vmem:[%s4830_s7 + $0xb8] sm:$0xf0]  ;;  %v4060_v28 = vor.u32 %v4422_v23, %v4057_v25  ;;  %v4476_v23 = vld [vmem:[%s4839_s21 + $0xd0] sm:$0xff]  ;;  %v4466_v25 = vld [vmem:[%s4839_s21 + $0x80] sm:$0xff] }
 0x947   : > { %2728 = vmatpush.bf16.msrb.mxu3 %v4120_v39  ;;  %v4040_v39 = vor.u32 %v4420_v36, %v4039_v33 }
 0x94b   : > { %v2418_v48 = vpop.f32.mrf.mxu1 }
 0x94c   : > { %v2422_v49 = vmul.f32 0.17677669, %v2418_v48 }
 0x94e   : > { %v2423_v42 = vsel %vm1401_vm10, %v2422_v49, -inf }
 0x94f   : > { %2424 = vmax.xlane.f32.xlu2 %v2423_v42  ;;  %v4436_v42 = vld [vmem:[%s4830_s7 + $0x8c] sm:$0xf0] }
 0x953   : > { %v2420_v50 = vpop.f32.mrf.mxu1 }
 0x954   : > { %v4434_v50 = vld [vmem:[%s4830_s7 + $0x84] sm:$0xf] }
 0x9c2   : > { %v2425_v51 = vpop.xlane.xlu2 %2424 }
 0x9c3   : > { %v2426_v52 = vsub.f32 %v2422_v49, %v2425_v51  ;;  %v4103_v49 = vld [vmem:[%s4830_s7 + $0x80] sm:$0xf] }
 0x9c4   : > { %v4104_v51 = vor.u32 %v4436_v42, %v4103_v49  ;;  %v4465_v49 = vld [vmem:[%s4839_s21 + $0x78] sm:$0xff] }
 0x9c5   : > { %v2427_v54 = vmul.f32 1.442695, %v2426_v52  ;;  %v4105_v52 = vld [vmem:[%s4830_s7 + $0x90] sm:$0xf0]  ;;  %v4473_v42 = vld [vmem:[%s4839_s21 + $0xb8] sm:$0xff] }
 0x9c6   : > { %2729 = vmatpush.bf16.msrb.mxu3 %v4104_v51 }
 0x9c7   : > { %4559 = vpow2.f32 %v2427_v54  ;;  %v4111_v54 = vld [vmem:[%s4830_s7 + $0x88] sm:$0xf] }
 0x9cd   : > { %v4560_v55 = vpop.eup %4559 }
 0x9ce   : > { %v2429_v21 = vsel %vm1401_vm10, %v4560_v55, 0.0 }
 0x9cf   : > { %2430 = vadd.xlane.f32.xlu0 %v2429_v21  ;;  %v4108_v21 = vor.u32 %v4434_v50, %v4105_v52 }
 0x9d1   : > { %2742 = vmatpush.bf16.msra.mxu0 %v4108_v21 }
 0xa42   : > { %v2431_v58 = vpop.xlane.xlu0 %2430 }
 0xa43   : > { %4561 = vrcp.f32 %v2431_v58  ;;  %v4113_v58 = vld [vmem:[%s4830_s7 + $0x98] sm:$0xf0] }
 0xa49   : > { %v4562_v59 = vpop.eup %4561 }
 0xa4a   : > { %v2433_v60 = vmul.f32 %v4562_v59, %v4560_v55  ;;  %v4437_v55 = vld [vmem:[%s4830_s7 + $0x94] sm:$0xf0]  ;;  %v4116_v59 = vor.u32 %v4435_v57, %v4113_v58 }
 0xa4b   : > { %v4112_v56 = vor.u32 %v4437_v55, %v4111_v54 }
 0xa4c   : > { %v2434_v61 = vpack.c.bf16 %v2433_v60, %v2433_v60  ;;  %v4087_v60 = vld [vmem:[%s4830_s7 + $0x60] sm:$0xf] }
 0xa4d   : > { %2755 = vmatpush.bf16.msra.mxu1 %v4112_v56 }
 0xa4e   : > { %4023 = vmatmul.msk.bf16.vlgmr.msrb.gmra.mxu1 %vm1415_vm11, %v2434_v61  ;;  %v4432_v61 = vld [vmem:[%s4830_s7 + $0x6c] sm:$0xf0] }
 0xacb   : > { %v2451_v62 = vpop.f32.mrf.mxu1 }
 0xacc   : > { %v2455_v63 = vpack.c.bf16 %v2451_v62, %v2451_v62  ;;  %v4430_v62 = vld [vmem:[%s4830_s7 + $0x64] sm:$0xf] }
 0xace   : > { %4036 = vmatmul.msk.bf16.vlgmr.msra.gmra.mxu2 %vm1380_vm7, %v2455_v63  ;;  %v4088_v63 = vor.u32 %v4432_v61, %v4087_v60  ;;  %v4541_v60 = vld [vmem:[%s5330_s23] ss:$0 sm:$0xff] }
 0xad0   : > { %2730 = vmatpush.bf16.msrb.mxu3 %v4088_v63 }
 0xad3   : > { %v2453_v0 = vpop.f32.mrf.mxu1 }
 0xad4   : > { %v4089_v0 = vld [vmem:[%s4830_s7 + $0x70] sm:$0xf0]  ;;  %2731 = vmatpush.bf16.msrb.mxu3 %v4072_v12  ;;  %v4461_v12 = vld [vmem:[%s4839_s21 + $0x58] sm:$0xff] }
 0xb51   : > { %v2485_v1 = vpop.f32.mrf.mxu2 }
 0xb52   : > { %v2489_v2 = vadd.f32 %v2485_v1, %v2151_v46  ;;  %v4439_v46 = vld [vmem:[%s4830_s7 + $0xac] sm:$0xf]  ;;  %v4095_v1 = vld [vmem:[%s4830_s7 + $0x68] sm:$0xf] }
 0xb53   : > { %v4132_v48 = vor.u32 %v4439_v46, %v4129_v47  ;;  %v4049_v46 = vld [vmem:[%s4830_s7 + $0x18] sm:$0xf0] }
 0xb54   : > { %v5098_v34 = vadd.f32 %v2489_v2, %v4898_v29  ;;  %v4161_v29 = vld [vmem:[%s4830_s7 + $0xf8] sm:$0xf0]  ;;  %v4433_v2 = vld [vmem:[%s4830_s7 + $0x74] sm:$0xf0]  ;;  %v4052_v47 = vor.u32 %v4419_v45, %v4049_v46 }
 0xb55   : > { %v4164_v11 = vor.u32 %v4447_v15, %v4161_v29  ;;  %v4429_v15 = vld [vmem:[%s4830_s7 + $0x54] sm:$0xf0]  ;;  %v4076_v29 = vor.u32 %v4426_v10, %v4073_v13  ;;  %v4479_v10 = vld [vmem:[%s4839_s21 + $0xe8] sm:$0xff] }
 0xb56   : > { %v2493_v3 = vsel %vm1095_vm2, %v5098_v34, 0.0  ;;  %v4469_v13 = vld [vmem:[%s4839_s21 + $0x98] sm:$0xff] }
 0xb57   : > { %2494 = vadd.xlane.f32.xlu1 %v2493_v3  ;;  %2765 = vmatpush.bf16.msrb.mxu2 %v4164_v11  ;;  %v4092_v3 = vor.u32 %v4430_v62, %v4089_v0  ;;  %v4080_v11 = vor.u32 %v4429_v15, %v4079_v14  ;;  %v4464_v0 = vld [vmem:[%s4839_s21 + $0x70] sm:$0xff]  ;;  %v4454_v14 = vld [vmem:[%s4839_s21 + $0x20] sm:$0xff] }
 0xb58   : > { %v4478_v15 = vld [vmem:[%s4839_s21 + $0xe0] sm:$0xff] }
 0xb59   : > { %v2487_v4 = vpop.f32.mrf.mxu2  ;;  %2743 = vmatpush.bf16.msra.mxu0 %v4092_v3  ;;  %v4463_v3 = vld [vmem:[%s4839_s21 + $0x68] sm:$0xff] }
 0xb5a   : > { %v4096_v4 = vor.u32 %v4433_v2, %v4095_v1  ;;  %v4472_v1 = vld [vmem:[%s4839_s21 + $0xb0] sm:$0xff]  ;;  %v4481_v2 = vld [vmem:[%s4839_s21 + $0xf8] sm:$0xff] }
 0xb5b   : > { %2766 = vmatpush.bf16.msrb.mxu2 %v4148_v35  ;;  %v4068_v35 = vor.u32 %v4423_v31, %v4065_v32  ;;  %v4450_v31 = vld [vmem:[%s4839_s21] sm:$0xff] }
 0xb5c   : > { %2756 = vmatpush.bf16.msra.mxu1 %v4096_v4  ;;  %v4471_v4 = vld [vmem:[%s4839_s21 + $0xa8] sm:$0xff]  ;;  %v4474_v32 = vld [vmem:[%s4839_s21 + $0xc0] sm:$0xff] }
 0xb5d   : > { %2744 = vmatpush.bf16.msra.mxu0 %v4076_v29  ;;  %v4460_v29 = vld [vmem:[%s4839_s21 + $0x50] sm:$0xff] }
 0xb5f   : > { %2767 = vmatpush.bf16.msrb.mxu2 %v4132_v48 }
 0xb60   : > { %2757 = vmatpush.bf16.msra.mxu1 %v4080_v11  ;;  %v4468_v11 = vld [vmem:[%s4839_s21 + $0x90] sm:$0xff] }
 0xb61   : > { %2745 = vmatpush.bf16.msra.mxu0 %v4060_v28  ;;  %v2556_v28 = vld [vmem:[%s5331_s13] sm:$0xf] }
 0xb62   : > { %v2560_v33 = vperm.slane %v2556_v28, 2  ;;  %v2561_v43 = vperm.slane %v2556_v28, 3 }
 0xb63   : > { %2768 = vmatpush.bf16.msrb.mxu2 %v4116_v59 }
 0xb64   : > { %2758 = vmatpush.bf16.msra.mxu1 %v4064_v30  ;;  %v2559_v30 = vperm.slane %v2556_v28, 1 }
 0xb65   : > { %2746 = vmatpush.bf16.msra.mxu0 %v4044_v40  ;;  %v2558_v40 = vperm.slane %v2556_v28, 0  ;;  %v4542_v28 = vld [vmem:[%s934_s15] ss:$0 sm:$0xff] }
 0xb67   : > { %2769 = vmatpush.bf16.msrb.mxu2 %v4100_v7  ;;  %v4462_v7 = vld [vmem:[%s4839_s21 + $0x60] sm:$0xff] }
 0xb68   : > { %2759 = vmatpush.bf16.msra.mxu1 %v4048_v44 }
 0xb69   : > { %3091 = vmatpush.bf16.msrb.mxu0 %v4465_v49 }
 0xb6c   : > { %3104 = vmatpush.bf16.msrb.mxu1 %v4473_v42 }
 0xb6d   : > { %3092 = vmatpush.bf16.msrb.mxu0 %v4464_v0 }
 0xb70   : > { %3105 = vmatpush.bf16.msrb.mxu1 %v4472_v1 }
 0xb71   : > { %3093 = vmatpush.bf16.msrb.mxu0 %v4463_v3 }
 0xb74   : > { %3106 = vmatpush.bf16.msrb.mxu1 %v4471_v4 }
 0xb75   : > { %3094 = vmatpush.bf16.msrb.mxu0 %v4462_v7 }
 0xb78   : > { %3107 = vmatpush.bf16.msrb.mxu1 %v4470_v8 }
 0xb79   : > { %3095 = vmatpush.bf16.msrb.mxu0 %v4461_v12 }
 0xb7c   : > { %3108 = vmatpush.bf16.msrb.mxu1 %v4469_v13 }
 0xb7d   : > { %3096 = vmatpush.bf16.msrb.mxu0 %v4460_v29 }
 0xb80   : > { %3109 = vmatpush.bf16.msrb.mxu1 %v4468_v11 }
 0xbca   : > { %v2495_v16 = vpop.xlane.xlu1 %2494 }
 0xbcb   : > { %v2496_v17 = vmul.f32 %v2495_v16, %v4918_v53  ;;  %v4427_v16 = vld [vmem:[%s4830_s7 + $0x4c] sm:$0xf] }
 0xbcd   : > { %v5112_v18 = vsub.f32 %v5098_v34, %v2496_v17  ;;  %v4081_v17 = vld [vmem:[%s4830_s7 + $0x58] sm:$0xf0] }
 0xbcf   : > { %v2498_v19 = vmul.f32 %v5112_v18, %v5112_v18 }
 0xbd1   : > { %v2499_v20 = vsel %vm1095_vm2, %v2498_v19, 0.0  ;;  %v4084_v19 = vor.u32 %v4427_v16, %v4081_v17  ;;  %v4453_v16 = vld [vmem:[%s4839_s21 + $0x18] sm:$0xff] }
 0xbd2   : > { %2500 = vadd.xlane.f32.xlu2 %v2499_v20  ;;  %v4055_v20 = vld [vmem:[%s4830_s7 + $0x20] sm:$0xf]  ;;  %v4477_v17 = vld [vmem:[%s4839_s21 + $0xd8] sm:$0xff] }
 0xbd3   : > { %2770 = vmatpush.bf16.msrb.mxu2 %v4084_v19  ;;  %v4056_v24 = vor.u32 %v4424_v22, %v4055_v20  ;;  %v4459_v19 = vld [vmem:[%s4839_s21 + $0x48] sm:$0xff]  ;;  %v4452_v22 = vld [vmem:[%s4839_s21 + $0x10] sm:$0xff] }
 0xbd4   : > { %v4467_v20 = vld [vmem:[%s4839_s21 + $0x88] sm:$0xff]  ;;  %3097 = vmatpush.bf16.msrb.mxu0 %v4459_v19 }
 0xbd5   : > { %2732 = vmatpush.bf16.msrb.mxu3 %v4056_v24  ;;  %3110 = vmatpush.bf16.msrb.mxu1 %v4467_v20  ;;  %v4458_v24 = vld [vmem:[%s4839_s21 + $0x40] sm:$0xff] }
 0xbd7   : > { %2771 = vmatpush.bf16.msrb.mxu2 %v4068_v35 }
 0xbd8   : > { %3098 = vmatpush.bf16.msrb.mxu0 %v4458_v24 }
 0xbd9   : > { %2733 = vmatpush.bf16.msrb.mxu3 %v4040_v39  ;;  %3111 = vmatpush.bf16.msrb.mxu1 %v4466_v25 }
 0xbdb   : > { %2772 = vmatpush.bf16.msrb.mxu2 %v4052_v47 }
 0xbdf   : > { %3117 = vmatpush.bf16.msra.mxu2 %v4481_v2 }
 0xbe3   : > { %3118 = vmatpush.bf16.msra.mxu2 %v4480_v6 }
 0xbe7   : > { %3119 = vmatpush.bf16.msra.mxu2 %v4479_v10 }
 0xbeb   : > { %3120 = vmatpush.bf16.msra.mxu2 %v4478_v15 }
 0xbef   : > { %3121 = vmatpush.bf16.msra.mxu2 %v4477_v17 }
 0xbf3   : > { %3122 = vmatpush.bf16.msra.mxu2 %v4476_v23 }
 0xbf7   : > { %3123 = vmatpush.bf16.msra.mxu2 %v4475_v27 }
 0xbfb   : > { %3124 = vmatpush.bf16.msra.mxu2 %v4474_v32 }
 0xc45   : > { %v2501_v48 = vpop.xlane.xlu2 %2500 }
 0xc46   : > { %v2502_v50 = vmul.f32 %v2501_v48, %v4918_v53  ;;  %v4540_v53 = vld [vmem:[%s5328_s1] ss:$0 sm:$0xff] }
 0xc48   : > { %v2503_v51 = vadd.f32 1e-06, %v2502_v50 }
 0xc4a   : > { %4563 = vrsqrt.f32 %v2503_v51  ;;  %vm2510_vm13 = vweird.f32 %v2503_v51 }
 0xc50   : > { %v4564_v52 = vpop.eup %4563 }
 0xc51   : > { %v2505_v54 = vmul.f32 %v4564_v52, %v2503_v51  ;;  %vm2511_vm12 = vweird.f32 %v4564_v52 }
 0xc52   : > { %vm2512_vm14 = vmor %vm2510_vm13, %vm2511_vm12 }
 0xc53   : > { %v2506_v55 = vmul.f32 %v4564_v52, %v2505_v54 }
 0xc55   : > { %v2507_v21 = vmul.f32 0.5, %v2506_v55 }
 0xc57   : > { %v2508_v56 = vsub.f32 1.5, %v2507_v21 }
 0xc59   : > { %v2509_v57 = vmul.f32 %v4564_v52, %v2508_v56 }
 0xc5b   : > { %v2513_v58 = vsel %vm2512_vm14, %v4564_v52, %v2509_v57 }
 0xc5c   : > { %v2514_v59 = vmul.f32 %v2513_v58, %v5112_v18  ;;  %v4457_v18 = vld [vmem:[%s4839_s21 + $0x38] sm:$0xff] }
 0xc5d   : > { %3078 = vmatpush.bf16.msra.mxu3 %v4457_v18 }
 0xc5e   : > { %v2518_v61 = vmul.f32 %v4540_v53, %v2514_v59 }
 0xc60   : > { %v2522_v62 = vadd.f32 %v4541_v60, %v2518_v61 }
 0xc61   : > { %3079 = vmatpush.bf16.msra.mxu3 %v4456_v5 }
 0xc62   : > { %v2523_v63 = vpack.c.bf16 %v2522_v62, %v2522_v62 }
 0xc64   : > { %2734 = vmatmul.bf16.vlgmr.msrb.gmra.mxu3 %v2523_v63  ;;  %2747 = vmatmul.bf16.vlgmr.msra.gmra.mxu0 %v2523_v63 }
 0xc65   : > { %2760 = vmatmul.bf16.vlgmr.msra.gmra.mxu1 %v2523_v63  ;;  %2773 = vmatmul.bf16.vlgmr.msrb.gmra.mxu2 %v2523_v63 }
 0xc66   : > { %3080 = vmatpush.bf16.msra.mxu3 %v4455_v9 }
 0xc6a   : > { %3081 = vmatpush.bf16.msra.mxu3 %v4454_v14 }
 0xc6e   : > { %3082 = vmatpush.bf16.msra.mxu3 %v4453_v16 }
 0xc72   : > { %3083 = vmatpush.bf16.msra.mxu3 %v4452_v22 }
 0xc76   : > { %3084 = vmatpush.bf16.msra.mxu3 %v4451_v26 }
 0xc7a   : > { %3085 = vmatpush.bf16.msra.mxu3 %v4450_v31 }
 0xce1   : > { %v2748_v35 = vpop.f32.mrf.mxu0 }
 0xce2   : > { %v2749_v36 = vadd.f32 %v2748_v35, %v2559_v30  ;;  %v2761_v37 = vpop.f32.mrf.mxu1 }
 0xce3   : > { %v2762_v38 = vadd.f32 %v2761_v37, %v2560_v33 }
 0xce4   : > { %v2779_v39 = vmul.f32 %v2749_v36, %v2749_v36 }
 0xce5   : > { %v2780_v41 = vmul.f32 %v2762_v38, %v2762_v38 }
 0xce6   : > { %v2783_v45 = vmul.f32 %v2779_v39, %v2749_v36 }
 0xce7   : > { %v2784_v44 = vmul.f32 %v2780_v41, %v2762_v38  ;;  %v2735_v46 = vpop.f32.mrf.mxu3 }
 0xce8   : > { %v2787_v47 = vmul.f32 0.044715, %v2783_v45  ;;  %v2736_v48 = vadd.f32 %v2735_v46, %v2558_v40  ;;  %v2774_v49 = vpop.f32.mrf.mxu2 }
 0xce9   : > { %v2788_v42 = vmul.f32 0.044715, %v2784_v44  ;;  %v2775_v50 = vadd.f32 %v2774_v49, %v2561_v43  ;;  %v2750_v51 = vpop.f32.mrf.mxu0 }
 0xcea   : > { %v2791_v52 = vadd.f32 %v2787_v47, %v2749_v36  ;;  %v2778_v54 = vmul.f32 %v2736_v48, %v2736_v48  ;;  %v2763_v55 = vpop.f32.mrf.mxu1 }
 0xceb   : > { %v2792_v21 = vadd.f32 %v2788_v42, %v2762_v38  ;;  %v2781_v56 = vmul.f32 %v2775_v50, %v2775_v50 }
 0xcec   : > { %v2795_v57 = vmul.f32 0.7978846, %v2791_v52  ;;  %v2782_v53 = vmul.f32 %v2778_v54, %v2736_v48 }
 0xced   : > { %v2796_v58 = vmul.f32 0.7978846, %v2792_v21  ;;  %v2785_v59 = vmul.f32 %v2781_v56, %v2775_v50 }
 0xcee   : > { %4565 = vtanh.f32 %v2795_v57  ;;  %v2786_v60 = vmul.f32 0.044715, %v2782_v53 }
 0xcef   : > { %4567 = vtanh.f32 %v2796_v58  ;;  %v2789_v61 = vmul.f32 0.044715, %v2785_v59  ;;  %v2737_v62 = vpop.f32.mrf.mxu3 }
 0xcf0   : > { %v2790_v63 = vadd.f32 %v2786_v60, %v2736_v48  ;;  %v2776_v0 = vpop.f32.mrf.mxu2 }
 0xcf1   : > { %v2793_v1 = vadd.f32 %v2789_v61, %v2775_v50 }
 0xcf2   : > { %v2794_v18 = vmul.f32 0.7978846, %v2790_v63 }
 0xcf3   : > { %v2797_v2 = vmul.f32 0.7978846, %v2793_v1 }
 0xcf4   : > { %v4566_v3 = vpop.eup %4565  ;;  %4569 = vtanh.f32 %v2794_v18 }
 0xcf5   : > { %v4568_v4 = vpop.eup %4567  ;;  %4571 = vtanh.f32 %v2797_v2  ;;  %v2803_v5 = vadd.f32 1.0, %v4566_v3 }
 0xcf6   : > { %v2804_v6 = vadd.f32 1.0, %v4568_v4 }
 0xcf7   : > { %v2807_v7 = vmul.f32 0.5, %v2803_v5 }
 0xcf8   : > { %v2808_v8 = vmul.f32 0.5, %v2804_v6 }
 0xcf9   : > { %v2811_v9 = vmul.f32 %v2807_v7, %v2749_v36 }
 0xcfa   : > { %v4570_v10 = vpop.eup %4569  ;;  %v2812_v12 = vmul.f32 %v2808_v8, %v2762_v38 }
 0xcfb   : > { %v4572_v13 = vpop.eup %4571  ;;  %v2815_v14 = vpack.c.bf16 %v2811_v9, %v2811_v9  ;;  %v2802_v15 = vadd.f32 1.0, %v4570_v10 }
 0xcfc   : > { %v2816_v29 = vpack.c.bf16 %v2812_v12, %v2812_v12  ;;  %v2805_v11 = vadd.f32 1.0, %v4572_v13 }
 0xcfd   : > { %3099 = vmatmul.bf16.vlgmr.msrb.gmra.mxu0 %v2815_v14  ;;  %v2806_v16 = vmul.f32 0.5, %v2802_v15 }
 0xcfe   : > { %3112 = vmatmul.bf16.vlgmr.msrb.gmra.mxu1 %v2816_v29  ;;  %v2809_v17 = vmul.f32 0.5, %v2805_v11 }
 0xcff   : > { %v2810_v19 = vmul.f32 %v2806_v16, %v2736_v48 }
 0xd00   : > { %v2813_v20 = vmul.f32 %v2809_v17, %v2775_v50 }
 0xd01   : > { %v2814_v22 = vpack.c.bf16 %v2810_v19, %v2810_v19 }
 0xd02   : > { %v2817_v23 = vpack.c.bf16 %v2813_v20, %v2813_v20 }
 0xd03   : > { %3086 = vmatmul.bf16.vlgmr.msra.gmra.mxu3 %v2814_v22 }
 0xd04   : > { %3125 = vmatmul.bf16.vlgmr.msra.gmra.mxu2 %v2817_v23 }
 0xd7a   : > { %v3100_v24 = vpop.f32.mrf.mxu0 }
 0xd7b   : > { %v3113_v25 = vpop.f32.mrf.mxu1 }
 0xd82   : > { %v3102_v26 = vpop.f32.mrf.mxu0 }
 0xd83   : > { %v3115_v27 = vpop.f32.mrf.mxu1 }
 0xd86   : > { %v3087_v30 = vpop.f32.mrf.mxu3 }
 0xd87   : > { %v3088_v31 = vadd.f32 %v4542_v28, %v3087_v30  ;;  %v3126_v32 = vpop.f32.mrf.mxu2 }
 0xd89   : > { %v3101_v33 = vadd.f32 %v3100_v24, %v3088_v31 }
 0xd8b   : > { %v3114_v35 = vadd.f32 %v3113_v25, %v3101_v33 }
 0xd8d   : > { %v3127_v36 = vadd.f32 %v3126_v32, %v3114_v35 }
 0xd8e   : > { %v3089_v37 = vpop.f32.mrf.mxu3 }
 0xd8f   : > { %v3130_v38 = vadd.f32 %v3127_v36, %v5098_v34  ;;  %v3128_v39 = vpop.f32.mrf.mxu2 }
 0xd91   : > { %3131 = vst [vmem:[%s4848_s16] sm:$0x1f] %v3130_v38 }
 0xd92 PF: > { %s5333_s9 = sld [smem:[#allocation5_spill]] }
 0xd93   : > { %s5334_s2 = sld [smem:[#allocation3_spill]] }
 0xd94   : > { %s5335_s25 = sld [smem:[#allocation4_spill]] }
 0xd95   : > { %s5336_s26 = sld [smem:[#allocation6_spill]] }
 0xd96   : > { %s5337_s27 = sld [smem:[#allocation7_spill]] }
 0xd98   : > { %s31_s3 = sadd.s32 1, %s5333_s9  }
 0xd99   : > { %p28_p8 = scmp.ge.s32.totalorder %s31_s3, 8  }
 0xd9b   :  { %30 = sbr.rel (!%p28_p8) target bundleno = 19 (0x13), region = 207 }

// kernel: _lambda_.6
= control target key start
LH: loop header
LB: loop body
LE: loop exit
PB: predicated region body
PF: predicated region fallthrough
CT: control target
= control target key end

     0   :  { %s4391_s24 = smov 0   ;;  %s4393_s25 = smov 0   ;;  %s5169_s0 = inlined_call_operand.vmem [shape: f32[2,5,128], index: 0, kind: input, shape index: {}]   ;;  %s5170_s1 = inlined_call_operand.vmem [shape: f32[1,1,128], index: 1, kind: input, shape index: {}]   ;;  %s5171_s2 = inlined_call_operand.vmem [shape: f32[1,1,128], index: 2, kind: input, shape index: {}]   ;;  %s5172_s3 = inlined_call_operand.vmem [shape: bf16[1,4,128,32], index: 3, kind: input, shape index: {}]   ;;  %s5173_s4 = inlined_call_operand.vmem [shape: f32[1,4,1,32], index: 4, kind: input, shape index: {}]   ;;  %s5174_s5 = inlined_call_operand.vmem [shape: bf16[1,4,128,32], index: 5, kind: input, shape index: {}]   ;;  %s5175_s6 = inlined_call_operand.vmem [shape: f32[1,4,1,32], index: 6, kind: input, shape index: {}]   ;;  %s5176_s7 = inlined_call_operand.vmem [shape: bf16[1,4,128,32], index: 7, kind: input, shape index: {}]   ;;  %s5177_s8 = inlined_call_operand.vmem [shape: f32[1,4,1,32], index: 8, kind: input, shape index: {}]   ;;  %s5178_s9 = inlined_call_operand.vmem [shape: bf16[1,4,32,128], index: 9, kind: input, shape index: {}]   ;;  %s5179_s10 = inlined_call_operand.vmem [shape: f32[1,1,128], index: 10, kind: input, shape index: {}]   ;;  %s5180_s11 = inlined_call_operand.vmem [shape: f32[1,1,128], index: 11, kind: input, shape index: {}]   ;;  %s5181_s12 = inlined_call_operand.vmem [shape: f32[1,1,128], index: 12, kind: input, shape index: {}]   ;;  %s5182_s13 = inlined_call_operand.vmem [shape: bf16[1,128,512], index: 13, kind: input, shape index: {}]   ;;  %s5183_s14 = inlined_call_operand.vmem [shape: f32[1,1,512], index: 14, kind: input, shape index: {}]   ;;  %s5184_s15 = inlined_call_operand.vmem [shape: bf16[1,512,128], index: 15, kind: input, shape index: {}]   ;;  %s5185_s16 = inlined_call_operand.vmem [shape: f32[1,1,128], index: 16, kind: input, shape index: {}]   ;;  %s5186_s17 = inlined_call_operand.vmem [shape: f32[2,5,128], index: 17, kind: output, shape index: {}]  }
   0x1   :  { %5187 = sst [smem:[#allocation2_spill]] %s5169_s0  ;;  %s4395_s26 = smov 0  }
   0x2   :  { %5188 = sst [smem:[#allocation3_spill]] %s5170_s1 }
   0x3 LB: > { %s39_s27 = sadd.s32 1, %s4293_s25  ;;  %p3179_p0 = scmp.ge.s32.totalorder %s4297_s26, 1  ;;  %s4297_s26 = sphi %s4395_s26, %s27_s26   ;;  %s4293_s25 = sphi %s4393_s25, %s5192_s25   ;;  %s4289_s24 = sphi %s4391_s24, %s5191_s24  }
   0x4   : > { %p41_p1 = scmp.ge.s32.totalorder %s39_s27, 2  ;;  %p642_p2 = scmp.lt.s32.totalorder %s4297_s26, 3 }
   0x6   : > { %s5194_s27 = smov (%p41_p1, %s39_s27), 0  ;;  %p643_p3 = pnand %p3179_p0, %p642_p2 }
   0x7   : > { %p756_p4 = scmp.lt.s32.totalorder (!%p643_p3), %s4289_s24, 1  ;;  %s5189_s30 = sld [smem:[#allocation2_spill]] (!%p643_p3) }
   0x8   : > { %646 = sbr.rel (%p643_p3) target bundleno = 3261 (0xcbd), region = 88  ;;  %s5190_s1 = sld [smem:[#allocation3_spill]] (!%p643_p3) }
   0xd   : > { %s5196_s24 = smov (!%p756_p4, %s4289_s24), 1  ;;  %vm838_vm0 = vcmask 1044480   ;;  %v4299_v3 = vmov 128.0   ;;  %v4056_v4 = vld [vmem:[%s5176_s7 + $0x38] sm:$0xff]  ;;  %v4055_v6 = vld [vmem:[%s5176_s7 + $0x30] sm:$0xff]  ;;  %v4054_v12 = vld [vmem:[%s5176_s7 + $0x28] sm:$0xff] }
   0xe   : > { %s3180_s28 = sshll.u32 %s5196_s24, 3  ;;  %4245 = vrcp.f32 %v4299_v3  ;;  %v4048_v5 = vld [vmem:[%s5174_s5 + $0x38] sm:$0xff]  ;;  %1108 = vmatpush.bf16.msra.mxu2 %v4056_v4  ;;  %v4047_v7 = vld [vmem:[%s5174_s5 + $0x30] sm:$0xff]  ;;  %v4046_v13 = vld [vmem:[%s5174_s5 + $0x28] sm:$0xff]  ;;  %vm1123_vm5 = vcmask 261120   ;;  %vm1162_vm6 = vcmask 1041408  }
   0xf   : > { %s759_s18 = scalar_lea.vmem %s5189_s30, %s3180_s28  ;;  %s4415_s20 = scalar_lea.vmem %s5186_s17, %s3180_s28  ;;  %1027 = vmatpush.bf16.msra.mxu1 %v4048_v5  ;;  %v4040_v8 = vld [vmem:[%s5172_s3 + $0x38] sm:$0xff]  ;;  %v4039_v10 = vld [vmem:[%s5172_s3 + $0x30] sm:$0xff]  ;;  %v4038_v14 = vld [vmem:[%s5172_s3 + $0x28] sm:$0xff]  ;;  %vm1163_vm7 = vcmask 1042432   ;;  %vm1144_vm8 = vcmask 36864   ;;  %vm1158_vm9 = vcmask 39936  }
  0x10   : > { %v833_v0 = vld [vmem:[%s759_s18] sm:$0x1f]  ;;  %946 = vmatpush.bf16.msra.mxu0 %v4040_v8  ;;  %v4052_v20 = vld [vmem:[%s5176_s7 + $0x18] sm:$0xff]  ;;  %v4051_v23 = vld [vmem:[%s5176_s7 + $0x10] sm:$0xff] }
  0x11   : > { %834 = vst [vmem:[%s4415_s20] sm:$0x1f] %v833_v0  ;;  %v4053_v16 = vld [vmem:[%s5176_s7 + $0x20] sm:$0xff]  ;;  %v4044_v21 = vld [vmem:[%s5174_s5 + $0x18] sm:$0xff]  ;;  %v4043_v24 = vld [vmem:[%s5174_s5 + $0x10] sm:$0xff] }
  0x12   : > { %1109 = vmatpush.bf16.msra.mxu2 %v4055_v6  ;;  %v4045_v17 = vld [vmem:[%s5174_s5 + $0x20] sm:$0xff]  ;;  %v4050_v26 = vld [vmem:[%s5176_s7 + $0x8] sm:$0xff]  ;;  %v4082_v35 = vld [vmem:[%s5176_s7 + $0x78] sm:$0xff] }
  0x13   : > { %1028 = vmatpush.bf16.msra.mxu1 %v4047_v7  ;;  %v4037_v18 = vld [vmem:[%s5172_s3 + $0x20] sm:$0xff]  ;;  %v4042_v27 = vld [vmem:[%s5174_s5 + $0x8] sm:$0xff]  ;;  %v4036_v36 = vld [vmem:[%s5172_s3 + $0x18] sm:$0xff] }
  0x14   : > { %v4246_v9 = vpop.eup %4245  ;;  %947 = vmatpush.bf16.msra.mxu0 %v4039_v10  ;;  %v4049_v33 = vld [vmem:[%s5176_s7] sm:$0xff]  ;;  %v4074_v37 = vld [vmem:[%s5174_s5 + $0x78] sm:$0xff]  ;;  %v4081_v38 = vld [vmem:[%s5176_s7 + $0x70] sm:$0xff] }
  0x15   : > { %v843_v11 = vmul.f32 128.0, %v4246_v9  ;;  %vm847_vm1 = vweird.f32 %v4246_v9  ;;  %v4041_v34 = vld [vmem:[%s5174_s5] sm:$0xff]  ;;  %v4035_v39 = vld [vmem:[%s5172_s3 + $0x10] sm:$0xff]  ;;  %v4080_v41 = vld [vmem:[%s5176_s7 + $0x68] sm:$0xff] }
  0x16   : > { %1110 = vmatpush.bf16.msra.mxu2 %v4054_v12  ;;  %v4073_v40 = vld [vmem:[%s5174_s5 + $0x70] sm:$0xff]  ;;  %v4034_v42 = vld [vmem:[%s5172_s3 + $0x8] sm:$0xff]  ;;  %v4079_v44 = vld [vmem:[%s5176_s7 + $0x60] sm:$0xff] }
  0x17   : > { %v844_v15 = vsub.f32 1.0, %v843_v11  ;;  %1029 = vmatpush.bf16.msra.mxu1 %v4046_v13  ;;  %v4072_v43 = vld [vmem:[%s5174_s5 + $0x68] sm:$0xff]  ;;  %v4033_v45 = vld [vmem:[%s5172_s3] sm:$0xff]  ;;  %v4066_v47 = vld [vmem:[%s5172_s3 + $0x78] sm:$0xff] }
  0x18   : > { %v4419_v1 = vld [vmem:[%s4415_s20] sm:$0x1f]  ;;  %948 = vmatpush.bf16.msra.mxu0 %v4038_v14  ;;  %v4078_v48 = vld [vmem:[%s5176_s7 + $0x58] sm:$0xff]  ;;  %v4065_v50 = vld [vmem:[%s5172_s3 + $0x70] sm:$0xff] }
  0x19   : > { %v839_v2 = vsel %vm838_vm0, %v4419_v1, 0.0  ;;  %v845_v19 = vmul.f32 %v4246_v9, %v844_v15  ;;  %v4071_v46 = vld [vmem:[%s5174_s5 + $0x60] sm:$0xff]  ;;  %v4070_v49 = vld [vmem:[%s5174_s5 + $0x58] sm:$0xff]  ;;  %v4077_v51 = vld [vmem:[%s5176_s7 + $0x50] sm:$0xff] }
  0x1a   : > { %840 = vadd.xlane.f32.xlu0 %v839_v2  ;;  %1111 = vmatpush.bf16.msra.mxu2 %v4053_v16  ;;  %v4069_v52 = vld [vmem:[%s5174_s5 + $0x50] sm:$0xff]  ;;  %v4064_v53 = vld [vmem:[%s5172_s3 + $0x68] sm:$0xff]  ;;  %v4063_v56 = vld [vmem:[%s5172_s3 + $0x60] sm:$0xff] }
  0x1b   : > { %1030 = vmatpush.bf16.msra.mxu1 %v4045_v17  ;;  %v846_v22 = vadd.f32 %v4246_v9, %v845_v19  ;;  %v4076_v54 = vld [vmem:[%s5176_s7 + $0x48] sm:$0xff]  ;;  %v4075_v57 = vld [vmem:[%s5176_s7 + $0x40] sm:$0xff]  ;;  %v4062_v60 = vld [vmem:[%s5172_s3 + $0x58] sm:$0xff] }
  0x1c   : > { %949 = vmatpush.bf16.msra.mxu0 %v4037_v18  ;;  %v4068_v55 = vld [vmem:[%s5174_s5 + $0x48] sm:$0xff]  ;;  %v4067_v58 = vld [vmem:[%s5174_s5 + $0x40] sm:$0xff]  ;;  %v4061_v63 = vld [vmem:[%s5172_s3 + $0x50] sm:$0xff] }
  0x1d   : > { %v4471_v25 = vsel %vm847_vm1, %v4246_v9, %v846_v22  ;;  %v4060_v0 = vld [vmem:[%s5172_s3 + $0x48] sm:$0xff]  ;;  %v4059_v4 = vld [vmem:[%s5172_s3 + $0x40] sm:$0xff]  ;;  %v4092_v15 = vld [vmem:[%s5172_s3 + $0xb8] sm:$0xff] }
  0x1e   : > { %1112 = vmatpush.bf16.msra.mxu2 %v4052_v20  ;;  %v4227_v9 = vld [vmem:[%s5190_s1] ss:$0 sm:$0xff]  ;;  %v4100_v17 = vld [vmem:[%s5174_s5 + $0xb8] sm:$0xff]  ;;  %v4091_v18 = vld [vmem:[%s5172_s3 + $0xb0] sm:$0xff] }
  0x1f   : > { %1031 = vmatpush.bf16.msra.mxu1 %v4044_v21  ;;  %v4228_v11 = vld [vmem:[%s5171_s2] ss:$0 sm:$0xff]  ;;  %v4099_v19 = vld [vmem:[%s5174_s5 + $0xb0] sm:$0xff]  ;;  %v4090_v20 = vld [vmem:[%s5172_s3 + $0xa8] sm:$0xff] }
  0x20   : > { %950 = vmatpush.bf16.msra.mxu0 %v4036_v36  ;;  %v4098_v21 = vld [vmem:[%s5174_s5 + $0xa8] sm:$0xff]  ;;  %v4089_v22 = vld [vmem:[%s5172_s3 + $0xa0] sm:$0xff] }
  0x21   : > { %v4115_v36 = vld [vmem:[%s5172_s3 + $0xe0] sm:$0xff] }
  0x22   : > { %1113 = vmatpush.bf16.msra.mxu2 %v4051_v23  ;;  %v4097_v23 = vld [vmem:[%s5174_s5 + $0xa0] sm:$0xff] }
  0x23   : > { %1032 = vmatpush.bf16.msra.mxu1 %v4043_v24  ;;  %v4088_v24 = vld [vmem:[%s5172_s3 + $0x98] sm:$0xff] }
  0x24   : > { %951 = vmatpush.bf16.msra.mxu0 %v4035_v39  ;;  %v4112_v39 = vld [vmem:[%s5172_s3 + $0xc8] sm:$0xff] }
  0x26   : > { %1114 = vmatpush.bf16.msra.mxu2 %v4050_v26  ;;  %v4096_v26 = vld [vmem:[%s5174_s5 + $0x98] sm:$0xff] }
  0x27   : > { %1033 = vmatpush.bf16.msra.mxu1 %v4042_v27  ;;  %v4087_v27 = vld [vmem:[%s5172_s3 + $0x90] sm:$0xff] }
  0x28   : > { %952 = vmatpush.bf16.msra.mxu0 %v4034_v42 }
  0x2a   : > { %1115 = vmatpush.bf16.msra.mxu2 %v4049_v33  ;;  %v4118_v33 = vld [vmem:[%s5172_s3 + $0xf8] sm:$0xff] }
  0x2b   : > { %1034 = vmatpush.bf16.msra.mxu1 %v4041_v34  ;;  %v4117_v34 = vld [vmem:[%s5172_s3 + $0xf0] sm:$0xff] }
  0x2c   : > { %953 = vmatpush.bf16.msra.mxu0 %v4033_v45  ;;  %v4229_v45 = vld [vmem:[%s5173_s4] ss:$0 sm:$0xff] }
  0x2e   : > { %1455 = vmatpush.bf16.msrb.mxu2 %v4082_v35  ;;  %v4116_v35 = vld [vmem:[%s5172_s3 + $0xe8] sm:$0xff] }
  0x2f   : > { %1372 = vmatpush.bf16.msrb.mxu1 %v4074_v37  ;;  %v4114_v37 = vld [vmem:[%s5172_s3 + $0xd8] sm:$0xff] }
  0x30   : > { %1289 = vmatpush.bf16.msrb.mxu0 %v4066_v47  ;;  %v4231_v47 = vld [vmem:[%s5177_s8] ss:$0 sm:$0xff] }
  0x32   : > { %1456 = vmatpush.bf16.msrb.mxu2 %v4081_v38  ;;  %v4113_v38 = vld [vmem:[%s5172_s3 + $0xd0] sm:$0xff] }
  0x33   : > { %1373 = vmatpush.bf16.msrb.mxu1 %v4073_v40  ;;  %v4111_v40 = vld [vmem:[%s5172_s3 + $0xc0] sm:$0xff] }
  0x34   : > { %1290 = vmatpush.bf16.msrb.mxu0 %v4065_v50 }
  0x36   : > { %1457 = vmatpush.bf16.msrb.mxu2 %v4080_v41  ;;  %v4230_v41 = vld [vmem:[%s5175_s6] ss:$0 sm:$0xff] }
  0x37   : > { %1374 = vmatpush.bf16.msrb.mxu1 %v4072_v43 }
  0x38   : > { %1291 = vmatpush.bf16.msrb.mxu0 %v4064_v53  ;;  %v4084_v53 = vld [vmem:[%s5178_s9 + $0x18] sm:$0xff] }
  0x3a   : > { %1458 = vmatpush.bf16.msrb.mxu2 %v4079_v44 }
  0x3b   : > { %1375 = vmatpush.bf16.msrb.mxu1 %v4071_v46 }
  0x3c   : > { %1292 = vmatpush.bf16.msrb.mxu0 %v4063_v56 }
  0x3e   : > { %1459 = vmatpush.bf16.msrb.mxu2 %v4078_v48 }
  0x3f   : > { %1376 = vmatpush.bf16.msrb.mxu1 %v4070_v49  ;;  %v4300_v49 = vmov 65535  }
  0x40   : > { %1293 = vmatpush.bf16.msrb.mxu0 %v4062_v60  ;;  %v1164_v50 = vsel %vm1162_vm6, 4294967295, %v4300_v49  ;;  %v4083_v60 = vld [vmem:[%s5178_s9 + $0x10] sm:$0xff] }
  0x42   : > { %1460 = vmatpush.bf16.msrb.mxu2 %v4077_v51 }
  0x43   : > { %1377 = vmatpush.bf16.msrb.mxu1 %v4069_v52 }
  0x44   : > { %1294 = vmatpush.bf16.msrb.mxu0 %v4061_v63 }
  0x46   : > { %1461 = vmatpush.bf16.msrb.mxu2 %v4076_v54 }
  0x47   : > { %1378 = vmatpush.bf16.msrb.mxu1 %v4068_v55 }
  0x48   : > { %1295 = vmatpush.bf16.msrb.mxu0 %v4060_v0 }
  0x4a   : > { %1462 = vmatpush.bf16.msrb.mxu2 %v4075_v57  ;;  %v4680_v57 = vsel %vm1163_vm7, %v1164_v50, 0 }
  0x4b   : > { %1379 = vmatpush.bf16.msrb.mxu1 %v4067_v58 }
  0x4c   : > { %1296 = vmatpush.bf16.msrb.mxu0 %v4059_v4 }
  0x8d   : > { %v841_v28 = vpop.xlane.xlu0 %840 }
  0x8e   : > { %v849_v29 = vmul.f32 %v4471_v25, %v841_v28  ;;  %v4095_v28 = vld [vmem:[%s5174_s5 + $0x90] sm:$0xff] }
  0x90   : > { %v4481_v30 = vsub.f32 %v4419_v1, %v849_v29  ;;  %v4086_v29 = vld [vmem:[%s5172_s3 + $0x88] sm:$0xff] }
  0x92   : > { %v851_v31 = vmul.f32 %v4481_v30, %v4481_v30 }
  0x94   : > { %v852_v32 = vsel %vm838_vm0, %v851_v31, 0.0  ;;  %v4085_v31 = vld [vmem:[%s5172_s3 + $0x80] sm:$0xff] }
  0x95   : > { %853 = vadd.xlane.f32.xlu0 %v852_v32  ;;  %v4093_v32 = vld [vmem:[%s5174_s5 + $0x80] sm:$0xff] }
 0x108   : > { %v854_v59 = vpop.xlane.xlu0 %853 }
 0x109   : > { %v855_v61 = vmul.f32 %v854_v59, %v4471_v25 }
 0x10b   : > { %v856_v62 = vadd.f32 1e-06, %v855_v61 }
 0x10d   : > { %4247 = vrsqrt.f32 %v856_v62  ;;  %vm863_vm3 = vweird.f32 %v856_v62 }
 0x113   : > { %v4248_v2 = vpop.eup %4247 }
 0x114   : > { %v858_v3 = vmul.f32 %v4248_v2, %v856_v62  ;;  %vm864_vm2 = vweird.f32 %v4248_v2 }
 0x115   : > { %vm865_vm4 = vmor %vm863_vm3, %vm864_vm2 }
 0x116   : > { %v859_v5 = vmul.f32 %v4248_v2, %v858_v3 }
 0x118   : > { %v860_v6 = vmul.f32 0.5, %v859_v5 }
 0x11a   : > { %v861_v7 = vsub.f32 1.5, %v860_v6 }
 0x11c   : > { %v862_v8 = vmul.f32 %v4248_v2, %v861_v7  ;;  %v4236_v7 = vld [vmem:[%s5175_s6 + $0x2] ss:$0 sm:$0xff] }
 0x11e   : > { %v866_v10 = vsel %vm865_vm4, %v4248_v2, %v862_v8 }
 0x11f   : > { %v867_v12 = vmul.f32 %v866_v10, %v4481_v30  ;;  %v4094_v30 = vld [vmem:[%s5174_s5 + $0x88] sm:$0xff] }
 0x121   : > { %v871_v13 = vmul.f32 %v4227_v9, %v867_v12 }
 0x123   : > { %v875_v14 = vadd.f32 %v4228_v11, %v871_v13 }
 0x125   : > { %v4587_v16 = vpack.c.bf16 %v875_v14, %v875_v14 }
 0x127   : > { %954 = vmatmul.bf16.vlgmr.msra.gmra.mxu0 %v4587_v16  ;;  %1035 = vmatmul.bf16.vlgmr.msra.gmra.mxu1 %v4587_v16 }
 0x128   : > { %1116 = vmatmul.bf16.vlgmr.msra.gmra.mxu2 %v4587_v16  ;;  %1627 = vmatpush.bf16.msra.mxu1 %v4092_v15 }
 0x129   : > { %1710 = vmatpush.bf16.msra.mxu2 %v4100_v17  ;;  %1549 = vmatpush.bf16.msra.mxu0 %v4084_v53  ;;  %v4108_v53 = vld [vmem:[%s5176_s7 + $0xb8] sm:$0xff] }
 0x12c   : > { %1628 = vmatpush.bf16.msra.mxu1 %v4091_v18 }
 0x12d   : > { %1711 = vmatpush.bf16.msra.mxu2 %v4099_v19  ;;  %1550 = vmatpush.bf16.msra.mxu0 %v4083_v60 }
 0x130   : > { %1629 = vmatpush.bf16.msra.mxu1 %v4090_v20 }
 0x131   : > { %1712 = vmatpush.bf16.msra.mxu2 %v4098_v21 }
 0x134   : > { %1630 = vmatpush.bf16.msra.mxu1 %v4089_v22 }
 0x135   : > { %1713 = vmatpush.bf16.msra.mxu2 %v4097_v23 }
 0x137   : > { %1297 = vmatmul.bf16.vlgmr.msrb.gmra.mxu0 %v4587_v16  ;;  %1380 = vmatmul.bf16.vlgmr.msrb.gmra.mxu1 %v4587_v16 }
 0x138   : > { %1463 = vmatmul.bf16.vlgmr.msrb.gmra.mxu2 %v4587_v16  ;;  %1631 = vmatpush.bf16.msra.mxu1 %v4088_v24 }
 0x139   : > { %1714 = vmatpush.bf16.msra.mxu2 %v4096_v26 }
 0x13c   : > { %1632 = vmatpush.bf16.msra.mxu1 %v4087_v27  ;;  %v4058_v27 = vld [vmem:[%s5178_s9 + $0x8] sm:$0xff] }
 0x13d   : > { %1715 = vmatpush.bf16.msra.mxu2 %v4095_v28  ;;  %v4057_v28 = vld [vmem:[%s5178_s9] sm:$0xff] }
 0x140   : > { %1633 = vmatpush.bf16.msra.mxu1 %v4086_v29  ;;  %v4233_v29 = vld [vmem:[%s5175_s6 + $0x1] ss:$0 sm:$0xff] }
 0x141   : > { %1716 = vmatpush.bf16.msra.mxu2 %v4094_v30 }
 0x144   : > { %1634 = vmatpush.bf16.msra.mxu1 %v4085_v31 }
 0x145   : > { %1717 = vmatpush.bf16.msra.mxu2 %v4093_v32 }
 0x147   : > { %1635 = vmatmul.bf16.vlgmr.msra.gmra.mxu1 %v4587_v16 }
 0x148   : > { %1718 = vmatmul.bf16.vlgmr.msra.gmra.mxu2 %v4587_v16 }
 0x149   : > { %1965 = vmatpush.bf16.msrb.mxu2 %v4118_v33 }
 0x14d   : > { %1966 = vmatpush.bf16.msrb.mxu2 %v4117_v34 }
 0x151   : > { %1967 = vmatpush.bf16.msrb.mxu2 %v4116_v35 }
 0x155   : > { %1968 = vmatpush.bf16.msrb.mxu2 %v4115_v36 }
 0x159   : > { %1969 = vmatpush.bf16.msrb.mxu2 %v4114_v37  ;;  %v4234_v37 = vld [vmem:[%s5177_s8 + $0x1] ss:$0 sm:$0xff] }
 0x15d   : > { %1970 = vmatpush.bf16.msrb.mxu2 %v4113_v38 }
 0x161   : > { %1971 = vmatpush.bf16.msrb.mxu2 %v4112_v39 }
 0x165   : > { %1972 = vmatpush.bf16.msrb.mxu2 %v4111_v40 }
 0x168   : > { %1973 = vmatmul.bf16.vlgmr.msrb.gmra.mxu2 %v4587_v16 }
 0x1a4   : > { %v955_v42 = vpop.f32.mrf.mxu0  ;;  %v1036_v43 = vpop.f32.mrf.mxu1 }
 0x1a5   : > { %v1037_v44 = vadd.f32 %v4230_v41, %v1036_v43  ;;  %v956_v51 = vadd.f32 %v4229_v45, %v955_v42 }
 0x1a7   : > { %v1122_v46 = vpack.c.bf16 %v1037_v44, %v1037_v44  ;;  %v1121_v59 = vpack.c.bf16 %v956_v51, %v956_v51  ;;  %v4232_v44 = vld [vmem:[%s5173_s4 + $0x1] ss:$0 sm:$0xff] }
 0x1a9   : > { %v1128_v48 = vsel %vm1123_vm5, %v1122_v46, 0 }
 0x1aa   : > { %1137 = vmatpush.bf16.xpose.msra.mxu3 %v1128_v48 }
 0x1ab   : > { %v1117_v52 = vpop.f32.mrf.mxu2 }
 0x1ac   : > { %v1118_v54 = vadd.f32 %v4231_v47, %v1117_v52  ;;  %v957_v55 = vpop.f32.mrf.mxu0  ;;  %v1038_v56 = vpop.f32.mrf.mxu1 }
 0x1ad   : > { %v4106_v55 = vld [vmem:[%s5176_s7 + $0xa8] sm:$0xff]  ;;  %v4105_v56 = vld [vmem:[%s5176_s7 + $0xa0] sm:$0xff] }
 0x1ae   : > { %v1157_v58 = vpack.c.bf16 %v1118_v54, %v1118_v54  ;;  %v4107_v54 = vld [vmem:[%s5176_s7 + $0xb0] sm:$0xff] }
 0x1b0   : > { %v1167_v61 = vand.u32 %v4680_v57, %v1157_v58  ;;  %v4104_v58 = vld [vmem:[%s5176_s7 + $0x98] sm:$0xff] }
 0x1b1   : > { %3278 = vmatmul.msk.bf16.vlgmr.msra.gmra.mxu3 %vm1123_vm5, %v1121_v59 }
 0x1b2   : > { %1176 = vmatpush.bf16.msrb.mxu3 %v1167_v61 }
 0x1b3   : > { %v1119_v62 = vpop.f32.mrf.mxu2 }
 0x1b4   : > { %v1298_v63 = vpop.f32.mrf.mxu0  ;;  %v1381_v0 = vpop.f32.mrf.mxu1 }
 0x1b5   : > { %v1382_v31 = vadd.f32 %v4233_v29, %v1381_v0  ;;  %v1299_v45 = vadd.f32 %v4232_v44, %v1298_v63  ;;  %v4103_v0 = vld [vmem:[%s5176_s7 + $0x90] sm:$0xff] }
 0x1b6   : > { %1208 = vmatpush.bf16.msra.mxu3 %v4058_v27  ;;  %v4239_v27 = vld [vmem:[%s5177_s8 + $0x2] ss:$0 sm:$0xff] }
 0x1b7   : > { %v1469_v33 = vpack.c.bf16 %v1382_v31, %v1382_v31  ;;  %v1468_v46 = vpack.c.bf16 %v1299_v45, %v1299_v45 }
 0x1b9   : > { %v1474_v36 = vsel %vm1123_vm5, %v1469_v33, 0 }
 0x1ba   : > { %1209 = vmatpush.bf16.msra.mxu3 %v4057_v28 }
 0x1bb   : > { %v1464_v2 = vpop.f32.mrf.mxu2 }
 0x1bc   : > { %v1300_v3 = vpop.f32.mrf.mxu0  ;;  %v1383_v4 = vpop.f32.mrf.mxu1  ;;  %v1465_v38 = vadd.f32 %v4234_v37, %v1464_v2  ;;  %v4102_v2 = vld [vmem:[%s5176_s7 + $0x88] sm:$0xff] }
 0x1bd   : > { %v4101_v3 = vld [vmem:[%s5176_s7 + $0x80] sm:$0xff] }
 0x1be   : > { %v1502_v39 = vpack.c.bf16 %v1465_v38, %v1465_v38 }
 0x1c0   : > { %v1507_v42 = vand.u32 %v1502_v39, %v4680_v57  ;;  %v4238_v39 = vld [vmem:[%s5179_s10] ss:$0 sm:$0xff] }
 0x1c3   : > { %v1466_v5 = vpop.f32.mrf.mxu2 }
 0x1c4   : > { %v4687_v6 = vpop.f32.mrf.mxu1 }
 0x1cb   : > { %v1719_v8 = vpop.f32.mrf.mxu2 }
 0x1cc   : > { %v1720_v9 = vadd.f32 %v4236_v7, %v1719_v8  ;;  %v1638_v10 = vpop.f32.mrf.mxu1  ;;  %v4126_v8 = vld [vmem:[%s5174_s5 + $0xf8] sm:$0xff] }
 0x1cd   : > { %v4125_v10 = vld [vmem:[%s5174_s5 + $0xf0] sm:$0xff] }
 0x1ce   : > { %v1807_v11 = vpack.c.bf16 %v1720_v9, %v1720_v9 }
 0x1d0   : > { %v1812_v12 = vsel %vm1123_vm5, %v1807_v11, 0  ;;  %v4124_v11 = vld [vmem:[%s5174_s5 + $0xe8] sm:$0xff] }
 0x1d1   : > { %1821 = vmatpush.bf16.xpose.msrb.mxu0 %v1812_v12  ;;  %v4123_v12 = vld [vmem:[%s5174_s5 + $0xe0] sm:$0xff] }
 0x1d3   : > { %v1721_v13 = vpop.f32.mrf.mxu2 }
 0x1d4   : > { %v4122_v13 = vld [vmem:[%s5174_s5 + $0xd8] sm:$0xff] }
 0x1eb   : > { %v4693_v14 = vpop.f32.mrf.mxu2 }
 0x1f3   : > { %v1976_v15 = vpop.f32.mrf.mxu2 }
 0x1f4   : > { %v4121_v15 = vld [vmem:[%s5174_s5 + $0xd0] sm:$0xff] }
 0x234   : > { %v1139_v17 = vpop.f32.mrf.mxu3 }
 0x235   : > { %v1143_v18 = vmul.f32 0.17677669, %v1139_v17  ;;  %v4120_v17 = vld [vmem:[%s5174_s5 + $0xc8] sm:$0xff] }
 0x237   : > { %v1145_v19 = vsel %vm1144_vm8, %v1143_v18, -inf }
 0x238   : > { %1146 = vmax.xlane.f32.xlu1 %v1145_v19 }
 0x23c   : > { %v1141_v20 = vpop.f32.mrf.mxu3 }
 0x2ab   : > { %v1147_v21 = vpop.xlane.xlu1 %1146 }
 0x2ac   : > { %v1148_v22 = vsub.f32 %v1143_v18, %v1147_v21  ;;  %v4119_v18 = vld [vmem:[%s5174_s5 + $0xc0] sm:$0xff]  ;;  %v4110_v21 = vld [vmem:[%s5178_s9 + $0x28] sm:$0xff] }
 0x2ad   : > { %1887 = vmatpush.bf16.msrb.mxu1 %v4110_v21 }
 0x2ae   : > { %v1149_v23 = vmul.f32 1.442695, %v1148_v22  ;;  %v4109_v22 = vld [vmem:[%s5178_s9 + $0x20] sm:$0xff] }
 0x2b0   : > { %4249 = vpow2.f32 %v1149_v23 }
 0x2b1   : > { %1888 = vmatpush.bf16.msrb.mxu1 %v4109_v22 }
 0x2b6   : > { %v4250_v24 = vpop.eup %4249 }
 0x2b7   : > { %v1151_v26 = vsel %vm1144_vm8, %v4250_v24, 0.0 }
 0x2b8   : > { %1152 = vadd.xlane.f32.xlu1 %v1151_v26 }
 0x32b   : > { %v1153_v30 = vpop.xlane.xlu1 %1152 }
 0x32c   : > { %4251 = vrcp.f32 %v1153_v30 }
 0x332   : > { %v4252_v32 = vpop.eup %4251 }
 0x333   : > { %v1155_v34 = vmul.f32 %v4252_v32, %v4250_v24  ;;  %v4235_v24 = vld [vmem:[%s5173_s4 + $0x2] ss:$0 sm:$0xff] }
 0x334   : > { %v1637_v26 = vadd.f32 %v4235_v24, %v4687_v6 }
 0x335   : > { %v1156_v35 = vpack.c.bf16 %v1155_v34, %v1155_v34  ;;  %v4240_v34 = vld [vmem:[%s5175_s6 + $0x3] ss:$0 sm:$0xff] }
 0x336   : > { %v1806_v29 = vpack.c.bf16 %v1637_v26, %v1637_v26 }
 0x337   : > { %3279 = vmatmul.msk.bf16.vlgmr.msrb.gmra.mxu3 %vm1158_vm9, %v1156_v35 }
 0x338   : > { %1483 = vmatpush.bf16.xpose.msrb.mxu3 %v1474_v36 }
 0x3ba   : > { %v1178_v40 = vpop.f32.mrf.mxu3 }
 0x3bb   : > { %v1182_v41 = vpack.c.bf16 %v1178_v40, %v1178_v40 }
 0x3bd   : > { %3288 = vmatmul.msk.bf16.vlgmr.msra.gmra.mxu3 %vm1123_vm5, %v1182_v41 }
 0x3be   : > { %1516 = vmatpush.bf16.msra.mxu3 %v1507_v42 }
 0x3c2   : > { %v1180_v43 = vpop.f32.mrf.mxu3 }
 0x3cd   : > { %3436 = vmatmul.msk.bf16.vlgmr.msrb.gmra.mxu3 %vm1123_vm5, %v1468_v46 }
 0x3ce   : > { %1793 = vmatpush.bf16.msrb.mxu3 %v4108_v53 }
 0x3d2   : > { %1794 = vmatpush.bf16.msrb.mxu3 %v4107_v54  ;;  %v4133_v54 = vld [vmem:[%s5176_s7 + $0xf0] sm:$0xff] }
 0x3d6   : > { %1795 = vmatpush.bf16.msrb.mxu3 %v4106_v55  ;;  %v4132_v55 = vld [vmem:[%s5176_s7 + $0xe8] sm:$0xff] }
 0x3da   : > { %1796 = vmatpush.bf16.msrb.mxu3 %v4105_v56  ;;  %v4131_v56 = vld [vmem:[%s5176_s7 + $0xe0] sm:$0xff] }
 0x3de   : > { %1797 = vmatpush.bf16.msrb.mxu3 %v4104_v58  ;;  %v4130_v58 = vld [vmem:[%s5176_s7 + $0xd8] sm:$0xff] }
 0x3e2   : > { %1798 = vmatpush.bf16.msrb.mxu3 %v4103_v0 }
 0x3e6   : > { %1799 = vmatpush.bf16.msrb.mxu3 %v4102_v2 }
 0x3ea   : > { %1800 = vmatpush.bf16.msrb.mxu3 %v4101_v3 }
 0x440   : > { %v4717_v47 = vpop.f32.mrf.mxu3 }
 0x441   : > { %v1218_v40 = vadd.f32 %v4238_v39, %v4717_v47 }
 0x448   : > { %v1213_v48 = vpop.f32.mrf.mxu3 }
 0x450   : > { %v1485_v49 = vpop.f32.mrf.mxu3 }
 0x451   : > { %v1489_v50 = vmul.f32 0.17677669, %v1485_v49  ;;  %v4134_v49 = vld [vmem:[%s5176_s7 + $0xf8] sm:$0xff] }
 0x453   : > { %v1490_v51 = vsel %vm1144_vm8, %v1489_v50, -inf }
 0x454   : > { %1491 = vmax.xlane.f32.xlu2 %v1490_v51 }
 0x458   : > { %v1487_v52 = vpop.f32.mrf.mxu3 }
 0x4c7   : > { %v1492_v59 = vpop.xlane.xlu2 %1491 }
 0x4c8   : > { %v1493_v60 = vsub.f32 %v1489_v50, %v1492_v59  ;;  %v4129_v59 = vld [vmem:[%s5176_s7 + $0xd0] sm:$0xff] }
 0x4ca   : > { %v1494_v61 = vmul.f32 1.442695, %v1493_v60  ;;  %v4128_v60 = vld [vmem:[%s5176_s7 + $0xc8] sm:$0xff] }
 0x4cc   : > { %4253 = vpow2.f32 %v1494_v61  ;;  %v4127_v61 = vld [vmem:[%s5176_s7 + $0xc0] sm:$0xff] }
 0x4d2   : > { %v4254_v62 = vpop.eup %4253 }
 0x4d3   : > { %v1496_v63 = vsel %vm1144_vm8, %v4254_v62, 0.0 }
 0x4d4   : > { %1497 = vadd.xlane.f32.xlu2 %v1496_v63 }
 0x547   : > { %v1498_v4 = vpop.xlane.xlu2 %1497 }
 0x548   : > { %4255 = vrcp.f32 %v1498_v4 }
 0x54e   : > { %v4256_v5 = vpop.eup %4255 }
 0x54f   : > { %v1500_v7 = vmul.f32 %v4256_v5, %v4254_v62 }
 0x551   : > { %v1501_v9 = vpack.c.bf16 %v1500_v7, %v1500_v7  ;;  %v4237_v7 = vld [vmem:[%s5173_s4 + $0x3] ss:$0 sm:$0xff] }
 0x553   : > { %3437 = vmatmul.msk.bf16.vlgmr.msra.gmra.mxu3 %vm1158_vm9, %v1501_v9  ;;  %v4241_v9 = vld [vmem:[%s5177_s8 + $0x3] ss:$0 sm:$0xff] }
 0x554   : > { %2048 = vmatpush.bf16.msra.mxu3 %v4126_v8  ;;  %v1975_v8 = vadd.f32 %v4237_v7, %v4693_v14 }
 0x558   : > { %2049 = vmatpush.bf16.msra.mxu3 %v4125_v10 }
 0x55c   : > { %2050 = vmatpush.bf16.msra.mxu3 %v4124_v11  ;;  %v2144_v11 = vpack.c.bf16 %v1975_v8, %v1975_v8  ;;  %v3857_v8 = vld [vmem:[%s5182_s13 + $0xa0] sm:$0xf] }
 0x560   : > { %2051 = vmatpush.bf16.msra.mxu3 %v4123_v12 }
 0x563   : > { %1801 = vmatmul.bf16.vlgmr.msrb.gmra.mxu3 %v4587_v16 }
 0x564   : > { %2052 = vmatpush.bf16.msra.mxu3 %v4122_v13 }
 0x568   : > { %2053 = vmatpush.bf16.msra.mxu3 %v4121_v15 }
 0x56c   : > { %2054 = vmatpush.bf16.msra.mxu3 %v4120_v17 }
 0x570   : > { %2055 = vmatpush.bf16.msra.mxu3 %v4119_v18 }
 0x573   : > { %2056 = vmatmul.bf16.vlgmr.msra.gmra.mxu3 %v4587_v16 }
 0x5d6   : > { %v1518_v19 = vpop.f32.mrf.mxu3 }
 0x5d7   : > { %v1522_v20 = vpack.c.bf16 %v1518_v19, %v1518_v19 }
 0x5d9   : > { %3450 = vmatmul.msk.bf16.vlgmr.msra.gmra.mxu0 %vm1123_vm5, %v1522_v20 }
 0x5de   : > { %v1520_v23 = vpop.f32.mrf.mxu3 }
 0x5e6   : > { %v1802_v28 = vpop.f32.mrf.mxu3 }
 0x5e7   : > { %v1803_v30 = vadd.f32 %v4239_v27, %v1802_v28 }
 0x5e9   : > { %v1840_v31 = vpack.c.bf16 %v1803_v30, %v1803_v30  ;;  %3598 = vmatmul.msk.bf16.vlgmr.msrb.gmra.mxu0 %vm1123_vm5, %v1806_v29  ;;  %v4135_v29 = vld [vmem:[%s5178_s9 + $0x30] sm:$0xff] }
 0x5eb   : > { %v1845_v32 = vand.u32 %v1840_v31, %v4680_v57 }
 0x5ed   : > { %1854 = vmatpush.bf16.msra.mxu0 %v1845_v32 }
 0x5ee   : > { %v1804_v33 = vpop.f32.mrf.mxu3 }
 0x5f1   : > { %2131 = vmatpush.bf16.msrb.mxu0 %v4134_v49 }
 0x5f5   : > { %2132 = vmatpush.bf16.msrb.mxu0 %v4133_v54 }
 0x5f6   : > { %v2057_v35 = vpop.f32.mrf.mxu3 }
 0x5f7   : > { %v2058_v6 = vadd.f32 %v4240_v34, %v2057_v35 }
 0x5f9   : > { %v2145_v36 = vpack.c.bf16 %v2058_v6, %v2058_v6  ;;  %2133 = vmatpush.bf16.msrb.mxu0 %v4132_v55 }
 0x5fb   : > { %v2150_v37 = vsel %vm1123_vm5, %v2145_v36, 0 }
 0x5fc   : > { %2159 = vmatpush.bf16.xpose.msra.mxu1 %v2150_v37 }
 0x5fd   : > { %2134 = vmatpush.bf16.msrb.mxu0 %v4131_v56 }
 0x5fe   : > { %v2059_v38 = vpop.f32.mrf.mxu3 }
 0x601   : > { %2135 = vmatpush.bf16.msrb.mxu0 %v4130_v58  ;;  %v3873_v58 = vld [vmem:[%s5182_s13 + $0xc0] sm:$0xf] }
 0x605   : > { %2136 = vmatpush.bf16.msrb.mxu0 %v4129_v59  ;;  %v4163_v59 = vld [vmem:[%s5182_s13 + $0xcc] sm:$0xf0] }
 0x609   : > { %2137 = vmatpush.bf16.msrb.mxu0 %v4128_v60  ;;  %v4161_v60 = vld [vmem:[%s5182_s13 + $0xc4] sm:$0xf] }
 0x60d   : > { %2138 = vmatpush.bf16.msrb.mxu0 %v4127_v61  ;;  %v3874_v61 = vor.u32 %v4163_v59, %v3873_v58  ;;  %v4143_v58 = vld [vmem:[%s5182_s13 + $0x2c] sm:$0xf0]  ;;  %v4141_v59 = vld [vmem:[%s5182_s13 + $0x24] sm:$0xf] }
 0x656   : > { %v1552_v41 = vpop.f32.mrf.mxu0 }
 0x657   : > { %v1556_v42 = vadd.f32 %v1552_v41, %v1218_v40  ;;  %v3889_v41 = vld [vmem:[%s5182_s13 + $0xe0] sm:$0xf] }
 0x65e   : > { %v1554_v43 = vpop.f32.mrf.mxu0 }
 0x65f   : > { %v4165_v43 = vld [vmem:[%s5182_s13 + $0xe4] sm:$0xf] }
 0x666   : > { %v1823_v44 = vpop.f32.mrf.mxu0 }
 0x667   : > { %v1827_v45 = vmul.f32 0.17677669, %v1823_v44 }
 0x669   : > { %v1828_v46 = vsel %vm1144_vm8, %v1827_v45, -inf }
 0x66a   : > { %1829 = vmax.xlane.f32.xlu0 %v1828_v46  ;;  %v4168_v46 = vld [vmem:[%s5182_s13 + $0xf4] sm:$0xf0] }
 0x66e   : > { %v1825_v48 = vpop.f32.mrf.mxu0 }
 0x6dd   : > { %v1830_v50 = vpop.xlane.xlu0 %1829 }
 0x6de   : > { %v1831_v51 = vsub.f32 %v1827_v45, %v1830_v50  ;;  %v3897_v45 = vld [vmem:[%s5182_s13 + $0xe8] sm:$0xf]  ;;  %v4166_v50 = vld [vmem:[%s5182_s13 + $0xec] sm:$0xf] }
 0x6df   : > { %v3898_v49 = vor.u32 %v4168_v46, %v3897_v45  ;;  %v4145_v45 = vld [vmem:[%s5182_s13 + $0x44] sm:$0xf] }
 0x6e0   : > { %v1832_v52 = vmul.f32 1.442695, %v1831_v51  ;;  %v3899_v51 = vld [vmem:[%s5182_s13 + $0xf8] sm:$0xf0] }
 0x6e2   : > { %4257 = vpow2.f32 %v1832_v52  ;;  %v3902_v52 = vor.u32 %v4166_v50, %v3899_v51  ;;  %v4148_v50 = vld [vmem:[%s5182_s13 + $0x54] sm:$0xf0] }
 0x6e8   : > { %v4258_v53 = vpop.eup %4257 }
 0x6e9   : > { %v1834_v47 = vsel %vm1144_vm8, %v4258_v53, 0.0 }
 0x6ea   : > { %1835 = vadd.xlane.f32.xlu1 %v1834_v47 }
 0x75d   : > { %v1836_v62 = vpop.xlane.xlu1 %1835 }
 0x75e   : > { %4259 = vrcp.f32 %v1836_v62  ;;  %v3875_v62 = vld [vmem:[%s5182_s13 + $0xd0] sm:$0xf0] }
 0x764   : > { %v4260_v63 = vpop.eup %4259 }
 0x765   : > { %v1838_v0 = vmul.f32 %v4260_v63, %v4258_v53  ;;  %v3881_v63 = vld [vmem:[%s5182_s13 + $0xc8] sm:$0xf] }
 0x767   : > { %v1839_v2 = vpack.c.bf16 %v1838_v0, %v1838_v0  ;;  %v4164_v0 = vld [vmem:[%s5182_s13 + $0xd4] sm:$0xf0] }
 0x769   : > { %3599 = vmatmul.msk.bf16.vlgmr.msra.gmra.mxu0 %vm1158_vm9, %v1839_v2  ;;  %v3878_v2 = vor.u32 %v4161_v60, %v3875_v62  ;;  %v3801_v62 = vld [vmem:[%s5182_s13 + $0x28] sm:$0xf] }
 0x779   : > { %2139 = vmatmul.bf16.vlgmr.msrb.gmra.mxu0 %v4587_v16 }
 0x7e6   : > { %v1856_v3 = vpop.f32.mrf.mxu0 }
 0x7e7   : > { %v1860_v4 = vpack.c.bf16 %v1856_v3, %v1856_v3  ;;  %v3882_v3 = vor.u32 %v4164_v0, %v3881_v63  ;;  %v4144_v63 = vld [vmem:[%s5182_s13 + $0x34] sm:$0xf0] }
 0x7e9   : > { %3612 = vmatmul.msk.bf16.vlgmr.msrb.gmra.mxu1 %vm1123_vm5, %v1860_v4  ;;  %v4162_v4 = vld [vmem:[%s5182_s13 + $0xcc] sm:$0xf] }
 0x7ee   : > { %v1858_v5 = vpop.f32.mrf.mxu0 }
 0x7ef   : > { %v3883_v5 = vld [vmem:[%s5182_s13 + $0xd8] sm:$0xf0] }
 0x7f0   : > { %v3886_v7 = vor.u32 %v4162_v4, %v3883_v5  ;;  %v3803_v4 = vld [vmem:[%s5182_s13 + $0x38] sm:$0xf0]  ;;  %v3777_v5 = vld [vmem:[%s5182_s13] sm:$0xf] }
 0x7f6   : > { %v2140_v10 = vpop.f32.mrf.mxu0 }
 0x7f7   : > { %v2141_v12 = vadd.f32 %v4241_v9, %v2140_v10  ;;  %v4159_v9 = vld [vmem:[%s5182_s13 + $0xac] sm:$0xf0]  ;;  %v4157_v10 = vld [vmem:[%s5182_s13 + $0xa4] sm:$0xf] }
 0x7f9   : > { %v2178_v13 = vpack.c.bf16 %v2141_v12, %v2141_v12  ;;  %3760 = vmatmul.msk.bf16.vlgmr.msra.gmra.mxu1 %vm1123_vm5, %v2144_v11  ;;  %v3858_v11 = vor.u32 %v4159_v9, %v3857_v8  ;;  %v3859_v12 = vld [vmem:[%s5182_s13 + $0xb0] sm:$0xf0]  ;;  %v4139_v8 = vld [vmem:[%s5182_s13 + $0xc] sm:$0xf0]  ;;  %v4137_v9 = vld [vmem:[%s5182_s13 + $0x4] sm:$0xf] }
 0x7fb   : > { %v2183_v16 = vand.u32 %v2178_v13, %v4680_v57  ;;  %v4136_v57 = vld [vmem:[%s5178_s9 + $0x38] sm:$0xff]  ;;  %v3865_v13 = vld [vmem:[%s5182_s13 + $0xa8] sm:$0xf] }
 0x7fc   : > { %2225 = vmatpush.bf16.msra.mxu2 %v4136_v57 }
 0x7fd   : > { %2192 = vmatpush.bf16.msrb.mxu1 %v2183_v16  ;;  %v4160_v16 = vld [vmem:[%s5182_s13 + $0xb4] sm:$0xf0] }
 0x7fe   : > { %v2142_v15 = vpop.f32.mrf.mxu0 }
 0x7ff   : > { %v3862_v15 = vor.u32 %v4157_v10, %v3859_v12  ;;  %v3779_v10 = vld [vmem:[%s5182_s13 + $0x10] sm:$0xf0] }
 0x800   : > { %2226 = vmatpush.bf16.msra.mxu2 %v4135_v29  ;;  %v4154_v29 = vld [vmem:[%s5182_s13 + $0x8c] sm:$0xf]  ;;  %v3782_v12 = vor.u32 %v4137_v9, %v3779_v10 }
 0x801   : > { %2495 = vmatpush.bf16.msra.mxu1 %v3898_v49  ;;  %v3817_v49 = vld [vmem:[%s5182_s13 + $0x48] sm:$0xf] }
 0x804   : > { %2508 = vmatpush.bf16.msrb.mxu2 %v3902_v52  ;;  %v3818_v52 = vor.u32 %v4148_v50, %v3817_v49  ;;  %v4173_v49 = vld [vmem:[%s5184_s15 + $0x20] sm:$0xff] }
 0x805   : > { %2496 = vmatpush.bf16.msra.mxu1 %v3882_v3  ;;  %v4142_v3 = vld [vmem:[%s5182_s13 + $0x2c] sm:$0xf]  ;;  %v4197_v50 = vld [vmem:[%s5184_s15 + $0xe0] sm:$0xff] }
 0x808   : > { %2509 = vmatpush.bf16.msrb.mxu2 %v3886_v7  ;;  %v3806_v7 = vor.u32 %v4142_v3, %v3803_v4  ;;  %v4169_v3 = vld [vmem:[%s5184_s15] sm:$0xff] }
 0x809   : > { %v4193_v4 = vld [vmem:[%s5184_s15 + $0xc0] sm:$0xff] }
 0x866   : > { %v1890_v17 = vpop.f32.mrf.mxu1 }
 0x867   : > { %v1894_v18 = vadd.f32 %v1890_v17, %v1556_v42  ;;  %v4167_v42 = vld [vmem:[%s5182_s13 + $0xec] sm:$0xf0]  ;;  %v3866_v17 = vor.u32 %v4160_v16, %v3865_v13  ;;  %v3785_v13 = vld [vmem:[%s5182_s13 + $0x8] sm:$0xf]  ;;  %v4140_v16 = vld [vmem:[%s5182_s13 + $0x14] sm:$0xf0] }
 0x868   : > { %v3890_v44 = vor.u32 %v4167_v42, %v3889_v41  ;;  %v4150_v41 = vld [vmem:[%s5182_s13 + $0x6c] sm:$0xf]  ;;  %v3835_v42 = vld [vmem:[%s5182_s13 + $0x78] sm:$0xf0] }
 0x869   : > { %2497 = vmatpush.bf16.msra.mxu1 %v3866_v17  ;;  %v3786_v17 = vor.u32 %v4140_v16, %v3785_v13 }
 0x86a   : > { %2469 = vmatpush.bf16.msrb.mxu3 %v3890_v44  ;;  %v3809_v44 = vld [vmem:[%s5182_s13 + $0x40] sm:$0xf] }
 0x86e   : > { %v1892_v19 = vpop.f32.mrf.mxu1  ;;  %2470 = vmatpush.bf16.msrb.mxu3 %v3874_v61  ;;  %v3795_v61 = vld [vmem:[%s5182_s13 + $0x30] sm:$0xf0] }
 0x86f   : > { %v3867_v19 = vld [vmem:[%s5182_s13 + $0xb8] sm:$0xf0]  ;;  %v3798_v0 = vor.u32 %v4141_v59, %v3795_v61  ;;  %v4195_v59 = vld [vmem:[%s5184_s15 + $0xd0] sm:$0xff]  ;;  %v4185_v61 = vld [vmem:[%s5184_s15 + $0x80] sm:$0xff] }
 0x872   : > { %2471 = vmatpush.bf16.msrb.mxu3 %v3858_v11  ;;  %v3778_v11 = vor.u32 %v4139_v8, %v3777_v5 }
 0x876   : > { %v2161_v20 = vpop.f32.mrf.mxu1 }
 0x877   : > { %v2165_v21 = vmul.f32 0.17677669, %v2161_v20 }
 0x879   : > { %v2166_v14 = vsel %vm1144_vm8, %v2165_v21, -inf }
 0x87a   : > { %2167 = vmax.xlane.f32.xlu2 %v2166_v14  ;;  %v4155_v14 = vld [vmem:[%s5182_s13 + $0x8c] sm:$0xf0] }
 0x87e   : > { %v2163_v22 = vpop.f32.mrf.mxu1 }
 0x87f   : > { %v4153_v22 = vld [vmem:[%s5182_s13 + $0x84] sm:$0xf] }
 0x8ed   : > { %v2168_v23 = vpop.xlane.xlu2 %2167 }
 0x8ee   : > { %v2169_v24 = vsub.f32 %v2165_v21, %v2168_v23  ;;  %v3841_v21 = vld [vmem:[%s5182_s13 + $0x80] sm:$0xf] }
 0x8ef   : > { %v3842_v23 = vor.u32 %v4155_v14, %v3841_v21  ;;  %v4184_v21 = vld [vmem:[%s5184_s15 + $0x78] sm:$0xff] }
 0x8f0   : > { %v2170_v26 = vmul.f32 1.442695, %v2169_v24  ;;  %v3843_v24 = vld [vmem:[%s5182_s13 + $0x90] sm:$0xf0]  ;;  %v4192_v14 = vld [vmem:[%s5184_s15 + $0xb8] sm:$0xff] }
 0x8f1   : > { %2472 = vmatpush.bf16.msrb.mxu3 %v3842_v23 }
 0x8f2   : > { %4261 = vpow2.f32 %v2170_v26  ;;  %v3849_v26 = vld [vmem:[%s5182_s13 + $0x88] sm:$0xf] }
 0x8f8   : > { %v4262_v27 = vpop.eup %4261 }
 0x8f9   : > { %v2172_v28 = vsel %vm1144_vm8, %v4262_v27, 0.0 }
 0x8fa   : > { %2173 = vadd.xlane.f32.xlu0 %v2172_v28  ;;  %v3846_v28 = vor.u32 %v4153_v22, %v3843_v24 }
 0x96d   : > { %v2174_v30 = vpop.xlane.xlu0 %2173 }
 0x96e   : > { %4263 = vrcp.f32 %v2174_v30  ;;  %v3851_v30 = vld [vmem:[%s5182_s13 + $0x98] sm:$0xf0] }
 0x974   : > { %v4264_v31 = vpop.eup %4263 }
 0x975   : > { %v2176_v32 = vmul.f32 %v4264_v31, %v4262_v27  ;;  %v4156_v27 = vld [vmem:[%s5182_s13 + $0x94] sm:$0xf0]  ;;  %v3854_v31 = vor.u32 %v4154_v29, %v3851_v30  ;;  %v4242_v30 = vld [vmem:[%s5180_s11] ss:$0 sm:$0xff] }
 0x976   : > { %v3850_v57 = vor.u32 %v4156_v27, %v3849_v26 }
 0x977   : > { %v2177_v33 = vpack.c.bf16 %v2176_v32, %v2176_v32  ;;  %v3825_v32 = vld [vmem:[%s5182_s13 + $0x60] sm:$0xf] }
 0x978   : > { %2498 = vmatpush.bf16.msra.mxu1 %v3850_v57 }
 0x979   : > { %3761 = vmatmul.msk.bf16.vlgmr.msrb.gmra.mxu1 %vm1158_vm9, %v2177_v33  ;;  %v4151_v33 = vld [vmem:[%s5182_s13 + $0x6c] sm:$0xf0] }
 0x9f6   : > { %v2194_v34 = vpop.f32.mrf.mxu1 }
 0x9f7   : > { %v2198_v35 = vpack.c.bf16 %v2194_v34, %v2194_v34  ;;  %v4149_v34 = vld [vmem:[%s5182_s13 + $0x64] sm:$0xf] }
 0x9f9   : > { %3774 = vmatmul.msk.bf16.vlgmr.msra.gmra.mxu2 %vm1123_vm5, %v2198_v35  ;;  %v3826_v35 = vor.u32 %v4151_v33, %v3825_v32  ;;  %v4243_v32 = vld [vmem:[%s5181_s12] ss:$0 sm:$0xff] }
 0x9fb   : > { %2473 = vmatpush.bf16.msrb.mxu3 %v3826_v35 }
 0x9fe   : > { %v2196_v6 = vpop.f32.mrf.mxu1 }
 0x9ff   : > { %v3827_v6 = vld [vmem:[%s5182_s13 + $0x70] sm:$0xf0] }
 0xa7c   : > { %v2228_v36 = vpop.f32.mrf.mxu2 }
 0xa7d   : > { %v2232_v37 = vadd.f32 %v2228_v36, %v1894_v18  ;;  %v4158_v18 = vld [vmem:[%s5182_s13 + $0xac] sm:$0xf]  ;;  %v3833_v36 = vld [vmem:[%s5182_s13 + $0x68] sm:$0xf] }
 0xa7e   : > { %v3870_v20 = vor.u32 %v4158_v18, %v3867_v19  ;;  %v3787_v18 = vld [vmem:[%s5182_s13 + $0x18] sm:$0xf0] }
 0xa7f   : > { %v4845_v38 = vadd.f32 %v2232_v37, %v4419_v1  ;;  %v3891_v1 = vld [vmem:[%s5182_s13 + $0xf0] sm:$0xf0]  ;;  %v4152_v37 = vld [vmem:[%s5182_s13 + $0x74] sm:$0xf0] }
 0xa80   : > { %v3894_v48 = vor.u32 %v4165_v43, %v3891_v1  ;;  %2510 = vmatpush.bf16.msrb.mxu2 %v3870_v20  ;;  %v3838_v43 = vor.u32 %v4150_v41, %v3835_v42  ;;  %v4147_v1 = vld [vmem:[%s5182_s13 + $0x4c] sm:$0xf0] }
 0xa81   : > { %v2236_v39 = vsel %vm838_vm0, %v4845_v38, 0.0  ;;  %v3810_v46 = vor.u32 %v4147_v1, %v3809_v44  ;;  %v4175_v41 = vld [vmem:[%s5184_s15 + $0x30] sm:$0xff]  ;;  %v4189_v44 = vld [vmem:[%s5184_s15 + $0xa0] sm:$0xff]  ;;  %v4174_v1 = vld [vmem:[%s5184_s15 + $0x28] sm:$0xff] }
 0xa82   : > { %2237 = vadd.xlane.f32.xlu1 %v2236_v39  ;;  %2482 = vmatpush.bf16.msra.mxu0 %v3894_v48  ;;  %v3830_v39 = vor.u32 %v4149_v34, %v3827_v6  ;;  %v3811_v48 = vld [vmem:[%s5182_s13 + $0x50] sm:$0xf0] }
 0xa83   : > { %v3814_v51 = vor.u32 %v4145_v45, %v3811_v48  ;;  %2474 = vmatpush.bf16.msrb.mxu3 %v3810_v46  ;;  %v4183_v6 = vld [vmem:[%s5184_s15 + $0x70] sm:$0xff]  ;;  %v4198_v45 = vld [vmem:[%s5184_s15 + $0xe8] sm:$0xff]  ;;  %v4180_v46 = vld [vmem:[%s5184_s15 + $0x58] sm:$0xff] }
 0xa84   : > { %v2230_v40 = vpop.f32.mrf.mxu2  ;;  %2511 = vmatpush.bf16.msrb.mxu2 %v3854_v31  ;;  %v4199_v42 = vld [vmem:[%s5184_s15 + $0xf0] sm:$0xff]  ;;  %v4188_v48 = vld [vmem:[%s5184_s15 + $0x98] sm:$0xff] }
 0xa85   : > { %v3834_v40 = vor.u32 %v4152_v37, %v3833_v36  ;;  %v4191_v36 = vld [vmem:[%s5184_s15 + $0xb0] sm:$0xff]  ;;  %v4200_v37 = vld [vmem:[%s5184_s15 + $0xf8] sm:$0xff] }
 0xa86   : > { %2483 = vmatpush.bf16.msra.mxu0 %v3878_v2  ;;  %v3802_v2 = vor.u32 %v4144_v63, %v3801_v62  ;;  %v4170_v62 = vld [vmem:[%s5184_s15 + $0x8] sm:$0xff] }
 0xa87   : > { %2499 = vmatpush.bf16.msra.mxu1 %v3834_v40  ;;  %v4190_v40 = vld [vmem:[%s5184_s15 + $0xa8] sm:$0xff] }
 0xa88   : > { %2512 = vmatpush.bf16.msrb.mxu2 %v3838_v43  ;;  %v4181_v43 = vld [vmem:[%s5184_s15 + $0x60] sm:$0xff]  ;;  %v4194_v63 = vld [vmem:[%s5184_s15 + $0xc8] sm:$0xff] }
 0xa8a   : > { %2484 = vmatpush.bf16.msra.mxu0 %v3862_v15  ;;  %v4138_v15 = vld [vmem:[%s5182_s13 + $0xc] sm:$0xf] }
 0xa8b   : > { %2500 = vmatpush.bf16.msra.mxu1 %v3818_v52  ;;  %v3790_v19 = vor.u32 %v4138_v15, %v3787_v18  ;;  %v4187_v52 = vld [vmem:[%s5184_s15 + $0x90] sm:$0xff] }
 0xa8e   : > { %2485 = vmatpush.bf16.msra.mxu0 %v3846_v28 }
 0xa8f   : > { %2501 = vmatpush.bf16.msra.mxu1 %v3802_v2 }
 0xa92   : > { %2486 = vmatpush.bf16.msra.mxu0 %v3830_v39  ;;  %v4182_v39 = vld [vmem:[%s5184_s15 + $0x68] sm:$0xff] }
 0xa93   : > { %2502 = vmatpush.bf16.msra.mxu1 %v3786_v17 }
 0xa96   : > { %2487 = vmatpush.bf16.msra.mxu0 %v3814_v51  ;;  %v4179_v51 = vld [vmem:[%s5184_s15 + $0x50] sm:$0xff] }
 0xa97   : > { %2847 = vmatpush.bf16.msrb.mxu1 %v4192_v14 }
 0xa9a   : > { %2488 = vmatpush.bf16.msra.mxu0 %v3798_v0  ;;  %v2299_v0 = vld [vmem:[%s5183_s14] sm:$0xf] }
 0xa9b   : > { %2848 = vmatpush.bf16.msrb.mxu1 %v4191_v36  ;;  %v2302_v2 = vperm.slane %v2299_v0, 1  ;;  %v2303_v5 = vperm.slane %v2299_v0, 2  ;;  %v2304_v16 = vperm.slane %v2299_v0, 3 }
 0xa9e   : > { %2489 = vmatpush.bf16.msra.mxu0 %v3782_v12  ;;  %v2301_v12 = vperm.slane %v2299_v0, 0  ;;  %v4244_v0 = vld [vmem:[%s5185_s16] ss:$0 sm:$0xff] }
 0xa9f   : > { %2849 = vmatpush.bf16.msrb.mxu1 %v4190_v40 }
 0xaa2   : > { %2834 = vmatpush.bf16.msrb.mxu0 %v4184_v21 }
 0xaa3   : > { %2850 = vmatpush.bf16.msrb.mxu1 %v4189_v44 }
 0xaa6   : > { %2835 = vmatpush.bf16.msrb.mxu0 %v4183_v6 }
 0xaa7   : > { %2851 = vmatpush.bf16.msrb.mxu1 %v4188_v48 }
 0xaaa   : > { %2836 = vmatpush.bf16.msrb.mxu0 %v4182_v39 }
 0xaab   : > { %2852 = vmatpush.bf16.msrb.mxu1 %v4187_v52 }
 0xaae   : > { %2837 = vmatpush.bf16.msrb.mxu0 %v4181_v43 }
 0xab2   : > { %2838 = vmatpush.bf16.msrb.mxu0 %v4180_v46 }
 0xab6   : > { %2839 = vmatpush.bf16.msrb.mxu0 %v4179_v51 }
 0xaf5   : > { %v2238_v53 = vpop.xlane.xlu1 %2237 }
 0xaf6   : > { %v2239_v47 = vmul.f32 %v2238_v53, %v4471_v25  ;;  %v4146_v53 = vld [vmem:[%s5182_s13 + $0x4c] sm:$0xf] }
 0xaf8   : > { %v4875_v54 = vsub.f32 %v4845_v38, %v2239_v47  ;;  %v3819_v47 = vld [vmem:[%s5182_s13 + $0x58] sm:$0xf0] }
 0xafa   : > { %v2241_v55 = vmul.f32 %v4875_v54, %v4875_v54 }
 0xafc   : > { %v2242_v56 = vsel %vm838_vm0, %v2241_v55, 0.0  ;;  %v3822_v55 = vor.u32 %v4146_v53, %v3819_v47  ;;  %v4172_v53 = vld [vmem:[%s5184_s15 + $0x18] sm:$0xff] }
 0xafd   : > { %2243 = vadd.xlane.f32.xlu2 %v2242_v56  ;;  %v3793_v56 = vld [vmem:[%s5182_s13 + $0x20] sm:$0xf]  ;;  %v4196_v47 = vld [vmem:[%s5184_s15 + $0xd8] sm:$0xff] }
 0xafe   : > { %2513 = vmatpush.bf16.msrb.mxu2 %v3822_v55  ;;  %v3794_v60 = vor.u32 %v4143_v58, %v3793_v56  ;;  %v4178_v55 = vld [vmem:[%s5184_s15 + $0x48] sm:$0xff]  ;;  %v4171_v58 = vld [vmem:[%s5184_s15 + $0x10] sm:$0xff] }
 0xaff   : > { %v4186_v56 = vld [vmem:[%s5184_s15 + $0x88] sm:$0xff]  ;;  %2840 = vmatpush.bf16.msrb.mxu0 %v4178_v55 }
 0xb00   : > { %2475 = vmatpush.bf16.msrb.mxu3 %v3794_v60  ;;  %2853 = vmatpush.bf16.msrb.mxu1 %v4186_v56  ;;  %v4177_v60 = vld [vmem:[%s5184_s15 + $0x40] sm:$0xff] }
 0xb02   : > { %2514 = vmatpush.bf16.msrb.mxu2 %v3806_v7 }
 0xb03   : > { %2841 = vmatpush.bf16.msrb.mxu0 %v4177_v60 }
 0xb04   : > { %2476 = vmatpush.bf16.msrb.mxu3 %v3778_v11  ;;  %2854 = vmatpush.bf16.msrb.mxu1 %v4185_v61 }
 0xb06   : > { %2515 = vmatpush.bf16.msrb.mxu2 %v3790_v19 }
 0xb0a   : > { %2860 = vmatpush.bf16.msra.mxu2 %v4200_v37 }
 0xb0e   : > { %2861 = vmatpush.bf16.msra.mxu2 %v4199_v42 }
 0xb12   : > { %2862 = vmatpush.bf16.msra.mxu2 %v4198_v45 }
 0xb16   : > { %2863 = vmatpush.bf16.msra.mxu2 %v4197_v50 }
 0xb1a   : > { %2864 = vmatpush.bf16.msra.mxu2 %v4196_v47 }
 0xb1e   : > { %2865 = vmatpush.bf16.msra.mxu2 %v4195_v59 }
 0xb22   : > { %2866 = vmatpush.bf16.msra.mxu2 %v4194_v63 }
 0xb26   : > { %2867 = vmatpush.bf16.msra.mxu2 %v4193_v4 }
 0xb70   : > { %v2244_v20 = vpop.xlane.xlu2 %2243 }
 0xb71   : > { %v2245_v22 = vmul.f32 %v2244_v20, %v4471_v25 }
 0xb73   : > { %v2246_v23 = vadd.f32 1e-06, %v2245_v22 }
 0xb75   : > { %4265 = vrsqrt.f32 %v2246_v23  ;;  %vm2253_vm11 = vweird.f32 %v2246_v23 }
 0xb7b   : > { %v4266_v24 = vpop.eup %4265 }
 0xb7c   : > { %v2248_v26 = vmul.f32 %v4266_v24, %v2246_v23  ;;  %vm2254_vm10 = vweird.f32 %v4266_v24 }
 0xb7d   : > { %vm2255_vm12 = vmor %vm2253_vm11, %vm2254_vm10 }
 0xb7e   : > { %v2249_v27 = vmul.f32 %v4266_v24, %v2248_v26 }
 0xb80   : > { %v2250_v28 = vmul.f32 0.5, %v2249_v27 }
 0xb82   : > { %v2251_v57 = vsub.f32 1.5, %v2250_v28 }
 0xb84   : > { %v2252_v29 = vmul.f32 %v4266_v24, %v2251_v57 }
 0xb86   : > { %v2256_v31 = vsel %vm2255_vm12, %v4266_v24, %v2252_v29 }
 0xb87   : > { %v2257_v25 = vmul.f32 %v2256_v31, %v4875_v54  ;;  %v4176_v54 = vld [vmem:[%s5184_s15 + $0x38] sm:$0xff] }
 0xb88   : > { %2821 = vmatpush.bf16.msra.mxu3 %v4176_v54 }
 0xb89   : > { %v2261_v33 = vmul.f32 %v4242_v30, %v2257_v25 }
 0xb8b   : > { %v2265_v34 = vadd.f32 %v4243_v32, %v2261_v33 }
 0xb8c   : > { %2822 = vmatpush.bf16.msra.mxu3 %v4175_v41 }
 0xb8d   : > { %v2266_v35 = vpack.c.bf16 %v2265_v34, %v2265_v34 }
 0xb8f   : > { %2477 = vmatmul.bf16.vlgmr.msrb.gmra.mxu3 %v2266_v35  ;;  %2490 = vmatmul.bf16.vlgmr.msra.gmra.mxu0 %v2266_v35 }
 0xb90   : > { %2503 = vmatmul.bf16.vlgmr.msra.gmra.mxu1 %v2266_v35  ;;  %2516 = vmatmul.bf16.vlgmr.msrb.gmra.mxu2 %v2266_v35 }
 0xb91   : > { %2823 = vmatpush.bf16.msra.mxu3 %v4174_v1 }
 0xb95   : > { %2824 = vmatpush.bf16.msra.mxu3 %v4173_v49 }
 0xb99   : > { %2825 = vmatpush.bf16.msra.mxu3 %v4172_v53 }
 0xb9d   : > { %2826 = vmatpush.bf16.msra.mxu3 %v4171_v58 }
 0xba1   : > { %2827 = vmatpush.bf16.msra.mxu3 %v4170_v62 }
 0xba5   : > { %2828 = vmatpush.bf16.msra.mxu3 %v4169_v3 }
 0xc0c   : > { %v2491_v7 = vpop.f32.mrf.mxu0 }
 0xc0d   : > { %v2492_v8 = vadd.f32 %v2491_v7, %v2302_v2  ;;  %v2504_v9 = vpop.f32.mrf.mxu1 }
 0xc0e   : > { %v2505_v10 = vadd.f32 %v2504_v9, %v2303_v5 }
 0xc0f   : > { %v2522_v11 = vmul.f32 %v2492_v8, %v2492_v8 }
 0xc10   : > { %v2523_v13 = vmul.f32 %v2505_v10, %v2505_v10 }
 0xc11   : > { %v2526_v15 = vmul.f32 %v2522_v11, %v2492_v8 }
 0xc12   : > { %v2527_v17 = vmul.f32 %v2523_v13, %v2505_v10  ;;  %v2478_v18 = vpop.f32.mrf.mxu3 }
 0xc13   : > { %v2530_v19 = vmul.f32 0.044715, %v2526_v15  ;;  %v2479_v20 = vadd.f32 %v2478_v18, %v2301_v12  ;;  %v2517_v21 = vpop.f32.mrf.mxu2 }
 0xc14   : > { %v2531_v14 = vmul.f32 0.044715, %v2527_v17  ;;  %v2518_v22 = vadd.f32 %v2517_v21, %v2304_v16  ;;  %v2493_v23 = vpop.f32.mrf.mxu0 }
 0xc15   : > { %v2534_v24 = vadd.f32 %v2530_v19, %v2492_v8  ;;  %v2521_v26 = vmul.f32 %v2479_v20, %v2479_v20  ;;  %v2506_v27 = vpop.f32.mrf.mxu1 }
 0xc16   : > { %v2535_v28 = vadd.f32 %v2531_v14, %v2505_v10  ;;  %v2524_v57 = vmul.f32 %v2518_v22, %v2518_v22 }
 0xc17   : > { %v2538_v29 = vmul.f32 0.7978846, %v2534_v24  ;;  %v2525_v30 = vmul.f32 %v2521_v26, %v2479_v20 }
 0xc18   : > { %v2539_v31 = vmul.f32 0.7978846, %v2535_v28  ;;  %v2528_v25 = vmul.f32 %v2524_v57, %v2518_v22 }
 0xc19   : > { %4267 = vtanh.f32 %v2538_v29  ;;  %v2529_v32 = vmul.f32 0.044715, %v2525_v30 }
 0xc1a   : > { %4269 = vtanh.f32 %v2539_v31  ;;  %v2532_v33 = vmul.f32 0.044715, %v2528_v25  ;;  %v2480_v34 = vpop.f32.mrf.mxu3 }
 0xc1b   : > { %v2533_v35 = vadd.f32 %v2529_v32, %v2479_v20  ;;  %v2519_v6 = vpop.f32.mrf.mxu2 }
 0xc1c   : > { %v2536_v36 = vadd.f32 %v2532_v33, %v2518_v22 }
 0xc1d   : > { %v2537_v54 = vmul.f32 0.7978846, %v2533_v35 }
 0xc1e   : > { %v2540_v37 = vmul.f32 0.7978846, %v2536_v36 }
 0xc1f   : > { %v4268_v39 = vpop.eup %4267  ;;  %4271 = vtanh.f32 %v2537_v54 }
 0xc20   : > { %v4270_v40 = vpop.eup %4269  ;;  %4273 = vtanh.f32 %v2540_v37  ;;  %v2546_v41 = vadd.f32 1.0, %v4268_v39 }
 0xc21   : > { %v2547_v42 = vadd.f32 1.0, %v4270_v40 }
 0xc22   : > { %v2550_v43 = vmul.f32 0.5, %v2546_v41 }
 0xc23   : > { %v2551_v44 = vmul.f32 0.5, %v2547_v42 }
 0xc24   : > { %v2554_v1 = vmul.f32 %v2550_v43, %v2492_v8 }
 0xc25   : > { %v4272_v45 = vpop.eup %4271  ;;  %v2555_v46 = vmul.f32 %v2551_v44, %v2505_v10 }
 0xc26   : > { %v4274_v48 = vpop.eup %4273  ;;  %v2558_v49 = vpack.c.bf16 %v2554_v1, %v2554_v1  ;;  %v2545_v50 = vadd.f32 1.0, %v4272_v45 }
 0xc27   : > { %v2559_v51 = vpack.c.bf16 %v2555_v46, %v2555_v46  ;;  %v2548_v52 = vadd.f32 1.0, %v4274_v48 }
 0xc28   : > { %2842 = vmatmul.bf16.vlgmr.msrb.gmra.mxu0 %v2558_v49  ;;  %v2549_v53 = vmul.f32 0.5, %v2545_v50 }
 0xc29   : > { %2855 = vmatmul.bf16.vlgmr.msrb.gmra.mxu1 %v2559_v51  ;;  %v2552_v47 = vmul.f32 0.5, %v2548_v52 }
 0xc2a   : > { %v2553_v55 = vmul.f32 %v2549_v53, %v2479_v20 }
 0xc2b   : > { %v2556_v56 = vmul.f32 %v2552_v47, %v2518_v22 }
 0xc2c   : > { %v2557_v58 = vpack.c.bf16 %v2553_v55, %v2553_v55 }
 0xc2d   : > { %v2560_v59 = vpack.c.bf16 %v2556_v56, %v2556_v56 }
 0xc2e   : > { %2829 = vmatmul.bf16.vlgmr.msra.gmra.mxu3 %v2557_v58 }
 0xc2f   : > { %2868 = vmatmul.bf16.vlgmr.msra.gmra.mxu2 %v2560_v59 }
 0xca5   : > { %v2843_v60 = vpop.f32.mrf.mxu0 }
 0xca6   : > { %v2856_v61 = vpop.f32.mrf.mxu1 }
 0xcad   : > { %v2845_v62 = vpop.f32.mrf.mxu0 }
 0xcae   : > { %v2858_v63 = vpop.f32.mrf.mxu1 }
 0xcb1   : > { %v2830_v2 = vpop.f32.mrf.mxu3 }
 0xcb2   : > { %v2831_v3 = vadd.f32 %v4244_v0, %v2830_v2  ;;  %v2869_v4 = vpop.f32.mrf.mxu2 }
 0xcb4   : > { %v2844_v5 = vadd.f32 %v2843_v60, %v2831_v3 }
 0xcb6   : > { %v2857_v7 = vadd.f32 %v2856_v61, %v2844_v5 }
 0xcb8   : > { %v2870_v8 = vadd.f32 %v2869_v4, %v2857_v7 }
 0xcb9   : > { %v2832_v9 = vpop.f32.mrf.mxu3 }
 0xcba   : > { %v2873_v10 = vadd.f32 %v2870_v8, %v4845_v38  ;;  %v2871_v11 = vpop.f32.mrf.mxu2 }
 0xcbc   : > { %2874 = vst [vmem:[%s4415_s20] sm:$0x1f] %v2873_v10 }
 0xcbd PF: > { %s27_s26 = sadd.s32 1, %s4297_s26   ;;  %s5191_s24 = smov %s4293_s25 }
 0xcbe   : > { %p24_p5 = scmp.ge.s32.totalorder %s27_s26, 4   ;;  %s5192_s25 = smov %s5194_s27 }
 0xcc0   :  { %26 = sbr.rel (!%p24_p5) target bundleno = 3 (0x3), region = 191 }

</bundles_post_ra>
